<compile_context>
chip_gen: v6e
topology: v6e:2x2x1
jax: 0.10.0
libtpu: 0.0.40
codegen_flags: <defaults>
</compile_context>

<pallas_src>
import functools

import jax
import jax.numpy as jnp
from jax import lax
from jax.experimental import pallas as pl
from jax.experimental.pallas import tpu as pltpu

PAD = 4                      # F.pad(x, [4]*4)
KS = 5                       # conv kernel size
DIL = 2                      # dilation
SPAN = (KS - 1) * DIL + 1    # effective receptive span = 9
EPS = 1e-5                   # BatchNorm eps (PyTorch default)
W_LEFT = 8                   # sublane-aligned column where the interior starts
                             # (logical padded image begins at W_LEFT - PAD)


def _dil5_kernel(scale_ref, shift_ref, wf_ref, x_ref, o_ref, pad_scratch, *,
                 stride):
    """One batch element per grid step.

    scale_ref, shift_ref : (1, C)       folded BatchNorm affine
    wf_ref               : (5, 5, C, C) dilated-conv weight with the 1x1 conv
                                        folded in (HWI, out)
    x_ref                : (1, H, W, C)
    o_ref                : (1, Ho, Wo, C)
    pad_scratch          : (H+8, W_LEFT+W+8, C) f32 VMEM scratch
    """
    H, W, C = x_ref.shape[1], x_ref.shape[2], x_ref.shape[3]
    Ho, Wo = o_ref.shape[1], o_ref.shape[2]
    Hs, Ws = pad_scratch.shape[0], pad_scratch.shape[1]

    # ---- BatchNorm (inference affine) + ReLU, stored straight into the
    #      sublane-aligned interior of the scratch (unmasked vst).
    x = x_ref[0].astype(jnp.float32)                       # (H, W, C)
    act = jnp.maximum(x * scale_ref[...] + shift_ref[...], 0.0)
    pad_scratch[PAD:PAD + H, W_LEFT:W_LEFT + W, :] = act

    # ---- zero only the halo (top/bottom rows, left/right columns).
    #      Re-done every step: scratch is per-core, so a program_id==0 guard
    #      would leave the second core's halo uninitialized under megacore.
    pad_scratch[0:PAD, :, :] = jnp.zeros((PAD, Ws, C), jnp.float32)
    pad_scratch[PAD + H:Hs, :, :] = jnp.zeros((Hs - PAD - H, Ws, C),
                                              jnp.float32)
    pad_scratch[PAD:PAD + H, 0:W_LEFT, :] = jnp.zeros((H, W_LEFT, C),
                                                      jnp.float32)
    pad_scratch[PAD:PAD + H, W_LEFT + W:Ws, :] = jnp.zeros(
        (H, Ws - W_LEFT - W, C), jnp.float32)

    # ---- dilated 5x5 conv (1x1 already folded into wf): 25 shifted
    #      (Ho*Wo, C) @ (C, C) MXU matmuls; each tap is sliced from the
    #      scratch Ref so the full padded image never lives in vregs.
    span_h = (Ho - 1) * stride + 1
    span_w = (Wo - 1) * stride + 1
    col0 = W_LEFT - PAD                                    # padded-image origin
    acc = jnp.zeros((Ho * Wo, C), jnp.float32)
    for kh in range(KS):
        for kw in range(KS):
            r0 = kh * DIL
            c0 = col0 + kw * DIL
            win = pad_scratch[r0:r0 + span_h, c0:c0 + span_w, :]
            if stride > 1:
                # TODO(synk): stride-2 path decimates per tap; a one-time
                # phase-compaction pass would avoid 25 strided slices.
                win = win[::stride, ::stride, :]
            acc = acc + jnp.dot(win.reshape(Ho * Wo, C), wf_ref[kh, kw],
                                preferred_element_type=jnp.float32)

    o_ref[0] = acc.reshape(Ho, Wo, C).astype(o_ref.dtype)


def dil5_forward(x_nchw, params, reduction=False):
    stride = 2 if reduction else 1
    N, C, H, W = x_nchw.shape

    # fold BN running stats + affine into scale/shift
    scale = params["gamma"] / jnp.sqrt(params["running_var"] + EPS)
    shift = params["beta"] - params["running_mean"] * scale

    x_nhwc = jnp.transpose(x_nchw, (0, 2, 3, 1))            # NCHW -> NHWC
    Hp, Wp = H + 2 * PAD, W + 2 * PAD
    Ho = (Hp - SPAN) // stride + 1
    Wo = (Wp - SPAN) // stride + 1

    # PyTorch conv weights are (Cout, Cin, kh, kw) -> HWIO / (Cin, Cout);
    # fold the 1x1 conv into the 5x5 weights (exact up to fp reassociation).
    w5_hwio = jnp.transpose(params["w5"], (2, 3, 1, 0)).astype(jnp.float32)
    w1t = jnp.transpose(params["w1"][:, :, 0, 0], (1, 0)).astype(jnp.float32)
    wf = jnp.einsum("hwio,od->hwid", w5_hwio, w1t)           # (5,5,Cin,Cout)

    scale2 = scale.reshape(1, C).astype(jnp.float32)
    shift2 = shift.reshape(1, C).astype(jnp.float32)

    Hs = H + 2 * PAD
    Ws = W_LEFT + W + 8    # aligned interior + 8 cols of right halo/slack

    out_nhwc = pl.pallas_call(
        functools.partial(_dil5_kernel, stride=stride),
        out_shape=jax.ShapeDtypeStruct((N, Ho, Wo, C), x_nhwc.dtype),
        grid_spec=pltpu.PrefetchScalarGridSpec(
            num_scalar_prefetch=0,
            grid=(N,),
            in_specs=[
                pl.BlockSpec((1, C), lambda n: (0, 0)),
                pl.BlockSpec((1, C), lambda n: (0, 0)),
                pl.BlockSpec((KS, KS, C, C), lambda n: (0, 0, 0, 0)),
                pl.BlockSpec((1, H, W, C), lambda n: (n, 0, 0, 0)),
            ],
            out_specs=pl.BlockSpec((1, Ho, Wo, C), lambda n: (n, 0, 0, 0)),
            scratch_shapes=[pltpu.VMEM((Hs, Ws, C), jnp.float32)],
        ),
        compiler_params=pltpu.CompilerParams(
            dimension_semantics=("parallel",)),
    )(scale2, shift2, wf, x_nhwc)

    return jnp.transpose(out_nhwc, (0, 3, 1, 2))            # back to NCHW


def dil5_reference(x_nchw, params, reduction=False):
    """Pure-JAX reference (matches PyTorch eval-mode forward, unfused)."""
    stride = 2 if reduction else 1
    scale = params["gamma"] / jnp.sqrt(params["running_var"] + EPS)
    shift = params["beta"] - params["running_mean"] * scale
    x = jnp.transpose(x_nchw, (0, 2, 3, 1))
    act = jnp.maximum(x * scale + shift, 0.0)
    act = jnp.pad(act, ((0, 0), (PAD, PAD), (PAD, PAD), (0, 0)))
    w5_hwio = jnp.transpose(params["w5"], (2, 3, 1, 0))
    y = lax.conv_general_dilated(act, w5_hwio, (stride, stride), "VALID",
                                 rhs_dilation=(DIL, DIL),
                                 dimension_numbers=("NHWC", "HWIO", "NHWC"))
    w1t = jnp.transpose(params["w1"][:, :, 0, 0], (1, 0))
    y = jnp.einsum("nhwc,cd->nhwd", y, w1t)
    return jnp.transpose(y, (0, 3, 1, 2))


def init_params(key, in_channels):
    k1, k2, k3, k4 = jax.random.split(key, 4)
    # TODO(synk): BatchNorm is implemented in inference (running-stats) mode;
    # PyTorch's default train-mode batch statistics are not reproduced.
    return {
        "gamma": 1.0 + 0.1 * jax.random.normal(k1, (in_channels,), jnp.float32),
        "beta": 0.1 * jax.random.normal(k2, (in_channels,), jnp.float32),
        "running_mean": 0.05 * jax.random.normal(k3, (in_channels,), jnp.float32),
        "running_var": jnp.abs(1.0 + 0.1 * jax.random.normal(k4, (in_channels,),
                                                             jnp.float32)),
        "w5": 0.1 * jax.random.normal(k1, (in_channels, in_channels, KS, KS),
                                      jnp.float32),
        "w1": 0.1 * jax.random.normal(k2, (in_channels, in_channels, 1, 1),
                                      jnp.float32),
    }


if __name__ == "__main__":
    N, C, H, W = 2, 8, 16, 16
    key = jax.random.PRNGKey(0)
    kx, kp = jax.random.split(key)
    x = jax.random.normal(kx, (N, C, H, W), jnp.float32)
    params = init_params(kp, C)

    out = dil5_forward(x, params, reduction=False)
    out = jax.block_until_ready(out)

    ref = dil5_reference(x, params, reduction=False)
    assert out.shape == ref.shape == (N, C, H, W), (out.shape, ref.shape)
    assert jnp.allclose(out, ref, rtol=1e-4, atol=1e-4), \
        float(jnp.max(jnp.abs(out - ref)))

    print("KERNEL_OK")
</pallas_src>

<mosaic_0001>
module attributes {stable_mosaic.version = 11 : i64} {
  func.func @_dil5_kernel(%arg0: i32, %arg1: memref<1x8xf32, #tpu.memory_space<vmem>>, %arg2: memref<1x8xf32, #tpu.memory_space<vmem>>, %arg3: memref<5x5x8x8xf32, #tpu.memory_space<vmem>>, %arg4: memref<1x16x16x8xf32, #tpu.memory_space<vmem>>, %arg5: memref<1x16x16x8xf32, #tpu.memory_space<vmem>>, %arg6: memref<24x32x8xf32, #tpu.memory_space<vmem>>) attributes {dimension_semantics = [#tpu.dimension_semantics<parallel>], iteration_bounds = array<i64: 2>, scalar_prefetch = 0 : i64, scratch_operands = 1 : i64, tpu.core_type = #tpu.core_type<tc>, window_params = [{pipeline_mode = #tpu.pipeline_mode<synchronous>, transform_indices = @transform_0, window_bounds = array<i64: 1, 8>}, {pipeline_mode = #tpu.pipeline_mode<synchronous>, transform_indices = @transform_1, window_bounds = array<i64: 1, 8>}, {pipeline_mode = #tpu.pipeline_mode<synchronous>, transform_indices = @transform_2, window_bounds = array<i64: 5, 5, 8, 8>}, {transform_indices = @transform_3, window_bounds = array<i64: 1, 16, 16, 8>}, {transform_indices = @transform_4, window_bounds = array<i64: 1, 16, 16, 8>}]} {
    %c0 = arith.constant 0 : index
    %c0_0 = arith.constant 0 : index
    %c0_1 = arith.constant 0 : index
    %c0_2 = arith.constant 0 : index
    %0 = vector.load %arg4[%c0, %c0_0, %c0_1, %c0_2] : memref<1x16x16x8xf32, #tpu.memory_space<vmem>>, vector<1x16x16x8xf32>
    %1 = vector.shape_cast %0 : vector<1x16x16x8xf32> to vector<16x16x8xf32>
    %c0_3 = arith.constant 0 : index
    %c0_4 = arith.constant 0 : index
    %2 = vector.load %arg1[%c0_3, %c0_4] : memref<1x8xf32, #tpu.memory_space<vmem>>, vector<1x8xf32>
    %3 = vector.shape_cast %2 : vector<1x8xf32> to vector<1x1x8xf32>
    %4 = vector.broadcast %3 : vector<1x1x8xf32> to vector<16x16x8xf32>
    %5 = arith.mulf %1, %4 : vector<16x16x8xf32>
    %c0_5 = arith.constant 0 : index
    %c0_6 = arith.constant 0 : index
    %6 = vector.load %arg2[%c0_5, %c0_6] : memref<1x8xf32, #tpu.memory_space<vmem>>, vector<1x8xf32>
    %7 = vector.shape_cast %6 : vector<1x8xf32> to vector<1x1x8xf32>
    %8 = vector.broadcast %7 : vector<1x1x8xf32> to vector<16x16x8xf32>
    %9 = arith.addf %5, %8 : vector<16x16x8xf32>
    %cst = arith.constant 0.000000e+00 : f32
    %10 = vector.broadcast %cst : f32 to vector<16x16x8xf32>
    %11 = arith.maximumf %9, %10 : vector<16x16x8xf32>
    %c4 = arith.constant 4 : index
    %c8 = arith.constant 8 : index
    %c0_7 = arith.constant 0 : index
    %12 = vector.load %arg6[%c4, %c8, %c0_7] : memref<24x32x8xf32, #tpu.memory_space<vmem>>, vector<16x16x8xf32>
    tpu.vector_store %arg6[%c4, %c8, %c0_7], %11 {strides = array<i32>} : memref<24x32x8xf32, #tpu.memory_space<vmem>>, vector<16x16x8xf32>,
    %cst_8 = arith.constant 0.000000e+00 : f32
    %13 = vector.broadcast %cst_8 : f32 to vector<4x32x8xf32>
    %c0_9 = arith.constant 0 : index
    %c0_10 = arith.constant 0 : index
    %c0_11 = arith.constant 0 : index
    %14 = vector.load %arg6[%c0_9, %c0_10, %c0_11] : memref<24x32x8xf32, #tpu.memory_space<vmem>>, vector<4x32x8xf32>
    tpu.vector_store %arg6[%c0_9, %c0_10, %c0_11], %13 {strides = array<i32>} : memref<24x32x8xf32, #tpu.memory_space<vmem>>, vector<4x32x8xf32>,
    %cst_12 = arith.constant 0.000000e+00 : f32
    %15 = vector.broadcast %cst_12 : f32 to vector<4x32x8xf32>
    %c20 = arith.constant 20 : index
    %c0_13 = arith.constant 0 : index
    %c0_14 = arith.constant 0 : index
    %16 = vector.load %arg6[%c20, %c0_13, %c0_14] : memref<24x32x8xf32, #tpu.memory_space<vmem>>, vector<4x32x8xf32>
    tpu.vector_store %arg6[%c20, %c0_13, %c0_14], %15 {strides = array<i32>} : memref<24x32x8xf32, #tpu.memory_space<vmem>>, vector<4x32x8xf32>,
    %cst_15 = arith.constant 0.000000e+00 : f32
    %17 = vector.broadcast %cst_15 : f32 to vector<16x8x8xf32>
    %c4_16 = arith.constant 4 : index
    %c0_17 = arith.constant 0 : index
    %c0_18 = arith.constant 0 : index
    %18 = vector.load %arg6[%c4_16, %c0_17, %c0_18] : memref<24x32x8xf32, #tpu.memory_space<vmem>>, vector<16x8x8xf32>
    tpu.vector_store %arg6[%c4_16, %c0_17, %c0_18], %17 {strides = array<i32>} : memref<24x32x8xf32, #tpu.memory_space<vmem>>, vector<16x8x8xf32>,
    %cst_19 = arith.constant 0.000000e+00 : f32
    %19 = vector.broadcast %cst_19 : f32 to vector<16x8x8xf32>
    %c4_20 = arith.constant 4 : index
    %c24 = arith.constant 24 : index
    %c0_21 = arith.constant 0 : index
    %20 = vector.load %arg6[%c4_20, %c24, %c0_21] : memref<24x32x8xf32, #tpu.memory_space<vmem>>, vector<16x8x8xf32>
    tpu.vector_store %arg6[%c4_20, %c24, %c0_21], %19 {strides = array<i32>} : memref<24x32x8xf32, #tpu.memory_space<vmem>>, vector<16x8x8xf32>,
    %cst_22 = arith.constant 0.000000e+00 : f32
    %21 = vector.broadcast %cst_22 : f32 to vector<256x8xf32>
    %c0_23 = arith.constant 0 : index
    %c4_24 = arith.constant 4 : index
    %c0_25 = arith.constant 0 : index
    %22 = vector.load %arg6[%c0_23, %c4_24, %c0_25] : memref<24x32x8xf32, #tpu.memory_space<vmem>>, vector<16x16x8xf32>
    %23 = vector.shape_cast %22 : vector<16x16x8xf32> to vector<256x8xf32>
    %c0_26 = arith.constant 0 : index
    %c0_27 = arith.constant 0 : index
    %c0_28 = arith.constant 0 : index
    %c0_29 = arith.constant 0 : index
    %24 = vector.load %arg3[%c0_26, %c0_27, %c0_28, %c0_29] : memref<5x5x8x8xf32, #tpu.memory_space<vmem>>, vector<1x1x8x8xf32>
    %25 = vector.shape_cast %24 : vector<1x1x8x8xf32> to vector<8x8xf32>
    %cst_30 = arith.constant dense<0.000000e+00> : vector<256x8xf32>
    %26 = tpu.matmul %23, %25, %cst_30 {dimension_numbers = #tpu.dot_dimension_numbers<[1], [0], [0], [1], [0, 0, 1, 1], [], []>} : vector<256x8xf32>, vector<8x8xf32>, vector<256x8xf32> -> vector<256x8xf32>
    %27 = arith.addf %21, %26 : vector<256x8xf32>
    %c0_31 = arith.constant 0 : index
    %c6 = arith.constant 6 : index
    %c0_32 = arith.constant 0 : index
    %28 = vector.load %arg6[%c0_31, %c6, %c0_32] : memref<24x32x8xf32, #tpu.memory_space<vmem>>, vector<16x16x8xf32>
    %29 = vector.shape_cast %28 : vector<16x16x8xf32> to vector<256x8xf32>
    %c0_33 = arith.constant 0 : index
    %c1 = arith.constant 1 : index
    %c0_34 = arith.constant 0 : index
    %c0_35 = arith.constant 0 : index
    %30 = vector.load %arg3[%c0_33, %c1, %c0_34, %c0_35] : memref<5x5x8x8xf32, #tpu.memory_space<vmem>>, vector<1x1x8x8xf32>
    %31 = vector.shape_cast %30 : vector<1x1x8x8xf32> to vector<8x8xf32>
    %cst_36 = arith.constant dense<0.000000e+00> : vector<256x8xf32>
    %32 = tpu.matmul %29, %31, %cst_36 {dimension_numbers = #tpu.dot_dimension_numbers<[1], [0], [0], [1], [0, 0, 1, 1], [], []>} : vector<256x8xf32>, vector<8x8xf32>, vector<256x8xf32> -> vector<256x8xf32>
    %33 = arith.addf %27, %32 : vector<256x8xf32>
    %c0_37 = arith.constant 0 : index
    %c8_38 = arith.constant 8 : index
    %c0_39 = arith.constant 0 : index
    %34 = vector.load %arg6[%c0_37, %c8_38, %c0_39] : memref<24x32x8xf32, #tpu.memory_space<vmem>>, vector<16x16x8xf32>
    %35 = vector.shape_cast %34 : vector<16x16x8xf32> to vector<256x8xf32>
    %c0_40 = arith.constant 0 : index
    %c2 = arith.constant 2 : index
    %c0_41 = arith.constant 0 : index
    %c0_42 = arith.constant 0 : index
    %36 = vector.load %arg3[%c0_40, %c2, %c0_41, %c0_42] : memref<5x5x8x8xf32, #tpu.memory_space<vmem>>, vector<1x1x8x8xf32>
    %37 = vector.shape_cast %36 : vector<1x1x8x8xf32> to vector<8x8xf32>
    %cst_43 = arith.constant dense<0.000000e+00> : vector<256x8xf32>
    %38 = tpu.matmul %35, %37, %cst_43 {dimension_numbers = #tpu.dot_dimension_numbers<[1], [0], [0], [1], [0, 0, 1, 1], [], []>} : vector<256x8xf32>, vector<8x8xf32>, vector<256x8xf32> -> vector<256x8xf32>
    %39 = arith.addf %33, %38 : vector<256x8xf32>
    %c0_44 = arith.constant 0 : index
    %c10 = arith.constant 10 : index
    %c0_45 = arith.constant 0 : index
    %40 = vector.load %arg6[%c0_44, %c10, %c0_45] : memref<24x32x8xf32, #tpu.memory_space<vmem>>, vector<16x16x8xf32>
    %41 = vector.shape_cast %40 : vector<16x16x8xf32> to vector<256x8xf32>
    %c0_46 = arith.constant 0 : index
    %c3 = arith.constant 3 : index
    %c0_47 = arith.constant 0 : index
    %c0_48 = arith.constant 0 : index
    %42 = vector.load %arg3[%c0_46, %c3, %c0_47, %c0_48] : memref<5x5x8x8xf32, #tpu.memory_space<vmem>>, vector<1x1x8x8xf32>
    %43 = vector.shape_cast %42 : vector<1x1x8x8xf32> to vector<8x8xf32>
    %cst_49 = arith.constant dense<0.000000e+00> : vector<256x8xf32>
    %44 = tpu.matmul %41, %43, %cst_49 {dimension_numbers = #tpu.dot_dimension_numbers<[1], [0], [0], [1], [0, 0, 1, 1], [], []>} : vector<256x8xf32>, vector<8x8xf32>, vector<256x8xf32> -> vector<256x8xf32>
    %45 = arith.addf %39, %44 : vector<256x8xf32>
    %c0_50 = arith.constant 0 : index
    %c12 = arith.constant 12 : index
    %c0_51 = arith.constant 0 : index
    %46 = vector.load %arg6[%c0_50, %c12, %c0_51] : memref<24x32x8xf32, #tpu.memory_space<vmem>>, vector<16x16x8xf32>
    %47 = vector.shape_cast %46 : vector<16x16x8xf32> to vector<256x8xf32>
    %c0_52 = arith.constant 0 : index
    %c4_53 = arith.constant 4 : index
    %c0_54 = arith.constant 0 : index
    %c0_55 = arith.constant 0 : index
    %48 = vector.load %arg3[%c0_52, %c4_53, %c0_54, %c0_55] : memref<5x5x8x8xf32, #tpu.memory_space<vmem>>, vector<1x1x8x8xf32>
    %49 = vector.shape_cast %48 : vector<1x1x8x8xf32> to vector<8x8xf32>
    %cst_56 = arith.constant dense<0.000000e+00> : vector<256x8xf32>
    %50 = tpu.matmul %47, %49, %cst_56 {dimension_numbers = #tpu.dot_dimension_numbers<[1], [0], [0], [1], [0, 0, 1, 1], [], []>} : vector<256x8xf32>, vector<8x8xf32>, vector<256x8xf32> -> vector<256x8xf32>
    %51 = arith.addf %45, %50 : vector<256x8xf32>
    %c2_57 = arith.constant 2 : index
    %c4_58 = arith.constant 4 : index
    %c0_59 = arith.constant 0 : index
    %52 = vector.load %arg6[%c2_57, %c4_58, %c0_59] : memref<24x32x8xf32, #tpu.memory_space<vmem>>, vector<16x16x8xf32>
    %53 = vector.shape_cast %52 : vector<16x16x8xf32> to vector<256x8xf32>
    %c1_60 = arith.constant 1 : index
    %c0_61 = arith.constant 0 : index
    %c0_62 = arith.constant 0 : index
    %c0_63 = arith.constant 0 : index
    %54 = vector.load %arg3[%c1_60, %c0_61, %c0_62, %c0_63] : memref<5x5x8x8xf32, #tpu.memory_space<vmem>>, vector<1x1x8x8xf32>
    %55 = vector.shape_cast %54 : vector<1x1x8x8xf32> to vector<8x8xf32>
    %cst_64 = arith.constant dense<0.000000e+00> : vector<256x8xf32>
    %56 = tpu.matmul %53, %55, %cst_64 {dimension_numbers = #tpu.dot_dimension_numbers<[1], [0], [0], [1], [0, 0, 1, 1], [], []>} : vector<256x8xf32>, vector<8x8xf32>, vector<256x8xf32> -> vector<256x8xf32>
    %57 = arith.addf %51, %56 : vector<256x8xf32>
    %c2_65 = arith.constant 2 : index
    %c6_66 = arith.constant 6 : index
    %c0_67 = arith.constant 0 : index
    %58 = vector.load %arg6[%c2_65, %c6_66, %c0_67] : memref<24x32x8xf32, #tpu.memory_space<vmem>>, vector<16x16x8xf32>
    %59 = vector.shape_cast %58 : vector<16x16x8xf32> to vector<256x8xf32>
    %c1_68 = arith.constant 1 : index
    %c1_69 = arith.constant 1 : index
    %c0_70 = arith.constant 0 : index
    %c0_71 = arith.constant 0 : index
    %60 = vector.load %arg3[%c1_68, %c1_69, %c0_70, %c0_71] : memref<5x5x8x8xf32, #tpu.memory_space<vmem>>, vector<1x1x8x8xf32>
    %61 = vector.shape_cast %60 : vector<1x1x8x8xf32> to vector<8x8xf32>
    %cst_72 = arith.constant dense<0.000000e+00> : vector<256x8xf32>
    %62 = tpu.matmul %59, %61, %cst_72 {dimension_numbers = #tpu.dot_dimension_numbers<[1], [0], [0], [1], [0, 0, 1, 1], [], []>} : vector<256x8xf32>, vector<8x8xf32>, vector<256x8xf32> -> vector<256x8xf32>
    %63 = arith.addf %57, %62 : vector<256x8xf32>
    %c2_73 = arith.constant 2 : index
    %c8_74 = arith.constant 8 : index
    %c0_75 = arith.constant 0 : index
    %64 = vector.load %arg6[%c2_73, %c8_74, %c0_75] : memref<24x32x8xf32, #tpu.memory_space<vmem>>, vector<16x16x8xf32>
    %65 = vector.shape_cast %64 : vector<16x16x8xf32> to vector<256x8xf32>
    %c1_76 = arith.constant 1 : index
    %c2_77 = arith.constant 2 : index
    %c0_78 = arith.constant 0 : index
    %c0_79 = arith.constant 0 : index
    %66 = vector.load %arg3[%c1_76, %c2_77, %c0_78, %c0_79] : memref<5x5x8x8xf32, #tpu.memory_space<vmem>>, vector<1x1x8x8xf32>
    %67 = vector.shape_cast %66 : vector<1x1x8x8xf32> to vector<8x8xf32>
    %cst_80 = arith.constant dense<0.000000e+00> : vector<256x8xf32>
    %68 = tpu.matmul %65, %67, %cst_80 {dimension_numbers = #tpu.dot_dimension_numbers<[1], [0], [0], [1], [0, 0, 1, 1], [], []>} : vector<256x8xf32>, vector<8x8xf32>, vector<256x8xf32> -> vector<256x8xf32>
    %69 = arith.addf %63, %68 : vector<256x8xf32>
    %c2_81 = arith.constant 2 : index
    %c10_82 = arith.constant 10 : index
    %c0_83 = arith.constant 0 : index
    %70 = vector.load %arg6[%c2_81, %c10_82, %c0_83] : memref<24x32x8xf32, #tpu.memory_space<vmem>>, vector<16x16x8xf32>
    %71 = vector.shape_cast %70 : vector<16x16x8xf32> to vector<256x8xf32>
    %c1_84 = arith.constant 1 : index
    %c3_85 = arith.constant 3 : index
    %c0_86 = arith.constant 0 : index
    %c0_87 = arith.constant 0 : index
    %72 = vector.load %arg3[%c1_84, %c3_85, %c0_86, %c0_87] : memref<5x5x8x8xf32, #tpu.memory_space<vmem>>, vector<1x1x8x8xf32>
    %73 = vector.shape_cast %72 : vector<1x1x8x8xf32> to vector<8x8xf32>
    %cst_88 = arith.constant dense<0.000000e+00> : vector<256x8xf32>
    %74 = tpu.matmul %71, %73, %cst_88 {dimension_numbers = #tpu.dot_dimension_numbers<[1], [0], [0], [1], [0, 0, 1, 1], [], []>} : vector<256x8xf32>, vector<8x8xf32>, vector<256x8xf32> -> vector<256x8xf32>
    %75 = arith.addf %69, %74 : vector<256x8xf32>
    %c2_89 = arith.constant 2 : index
    %c12_90 = arith.constant 12 : index
    %c0_91 = arith.constant 0 : index
    %76 = vector.load %arg6[%c2_89, %c12_90, %c0_91] : memref<24x32x8xf32, #tpu.memory_space<vmem>>, vector<16x16x8xf32>
    %77 = vector.shape_cast %76 : vector<16x16x8xf32> to vector<256x8xf32>
    %c1_92 = arith.constant 1 : index
    %c4_93 = arith.constant 4 : index
    %c0_94 = arith.constant 0 : index
    %c0_95 = arith.constant 0 : index
    %78 = vector.load %arg3[%c1_92, %c4_93, %c0_94, %c0_95] : memref<5x5x8x8xf32, #tpu.memory_space<vmem>>, vector<1x1x8x8xf32>
    %79 = vector.shape_cast %78 : vector<1x1x8x8xf32> to vector<8x8xf32>
    %cst_96 = arith.constant dense<0.000000e+00> : vector<256x8xf32>
    %80 = tpu.matmul %77, %79, %cst_96 {dimension_numbers = #tpu.dot_dimension_numbers<[1], [0], [0], [1], [0, 0, 1, 1], [], []>} : vector<256x8xf32>, vector<8x8xf32>, vector<256x8xf32> -> vector<256x8xf32>
    %81 = arith.addf %75, %80 : vector<256x8xf32>
    %c4_97 = arith.constant 4 : index
    %c4_98 = arith.constant 4 : index
    %c0_99 = arith.constant 0 : index
    %82 = vector.load %arg6[%c4_97, %c4_98, %c0_99] : memref<24x32x8xf32, #tpu.memory_space<vmem>>, vector<16x16x8xf32>
    %83 = vector.shape_cast %82 : vector<16x16x8xf32> to vector<256x8xf32>
    %c2_100 = arith.constant 2 : index
    %c0_101 = arith.constant 0 : index
    %c0_102 = arith.constant 0 : index
    %c0_103 = arith.constant 0 : index
    %84 = vector.load %arg3[%c2_100, %c0_101, %c0_102, %c0_103] : memref<5x5x8x8xf32, #tpu.memory_space<vmem>>, vector<1x1x8x8xf32>
    %85 = vector.shape_cast %84 : vector<1x1x8x8xf32> to vector<8x8xf32>
    %cst_104 = arith.constant dense<0.000000e+00> : vector<256x8xf32>
    %86 = tpu.matmul %83, %85, %cst_104 {dimension_numbers = #tpu.dot_dimension_numbers<[1], [0], [0], [1], [0, 0, 1, 1], [], []>} : vector<256x8xf32>, vector<8x8xf32>, vector<256x8xf32> -> vector<256x8xf32>
    %87 = arith.addf %81, %86 : vector<256x8xf32>
    %c4_105 = arith.constant 4 : index
    %c6_106 = arith.constant 6 : index
    %c0_107 = arith.constant 0 : index
    %88 = vector.load %arg6[%c4_105, %c6_106, %c0_107] : memref<24x32x8xf32, #tpu.memory_space<vmem>>, vector<16x16x8xf32>
    %89 = vector.shape_cast %88 : vector<16x16x8xf32> to vector<256x8xf32>
    %c2_108 = arith.constant 2 : index
    %c1_109 = arith.constant 1 : index
    %c0_110 = arith.constant 0 : index
    %c0_111 = arith.constant 0 : index
    %90 = vector.load %arg3[%c2_108, %c1_109, %c0_110, %c0_111] : memref<5x5x8x8xf32, #tpu.memory_space<vmem>>, vector<1x1x8x8xf32>
    %91 = vector.shape_cast %90 : vector<1x1x8x8xf32> to vector<8x8xf32>
    %cst_112 = arith.constant dense<0.000000e+00> : vector<256x8xf32>
    %92 = tpu.matmul %89, %91, %cst_112 {dimension_numbers = #tpu.dot_dimension_numbers<[1], [0], [0], [1], [0, 0, 1, 1], [], []>} : vector<256x8xf32>, vector<8x8xf32>, vector<256x8xf32> -> vector<256x8xf32>
    %93 = arith.addf %87, %92 : vector<256x8xf32>
    %c4_113 = arith.constant 4 : index
    %c8_114 = arith.constant 8 : index
    %c0_115 = arith.constant 0 : index
    %94 = vector.load %arg6[%c4_113, %c8_114, %c0_115] : memref<24x32x8xf32, #tpu.memory_space<vmem>>, vector<16x16x8xf32>
    %95 = vector.shape_cast %94 : vector<16x16x8xf32> to vector<256x8xf32>
    %c2_116 = arith.constant 2 : index
    %c2_117 = arith.constant 2 : index
    %c0_118 = arith.constant 0 : index
    %c0_119 = arith.constant 0 : index
    %96 = vector.load %arg3[%c2_116, %c2_117, %c0_118, %c0_119] : memref<5x5x8x8xf32, #tpu.memory_space<vmem>>, vector<1x1x8x8xf32>
    %97 = vector.shape_cast %96 : vector<1x1x8x8xf32> to vector<8x8xf32>
    %cst_120 = arith.constant dense<0.000000e+00> : vector<256x8xf32>
    %98 = tpu.matmul %95, %97, %cst_120 {dimension_numbers = #tpu.dot_dimension_numbers<[1], [0], [0], [1], [0, 0, 1, 1], [], []>} : vector<256x8xf32>, vector<8x8xf32>, vector<256x8xf32> -> vector<256x8xf32>
    %99 = arith.addf %93, %98 : vector<256x8xf32>
    %c4_121 = arith.constant 4 : index
    %c10_122 = arith.constant 10 : index
    %c0_123 = arith.constant 0 : index
    %100 = vector.load %arg6[%c4_121, %c10_122, %c0_123] : memref<24x32x8xf32, #tpu.memory_space<vmem>>, vector<16x16x8xf32>
    %101 = vector.shape_cast %100 : vector<16x16x8xf32> to vector<256x8xf32>
    %c2_124 = arith.constant 2 : index
    %c3_125 = arith.constant 3 : index
    %c0_126 = arith.constant 0 : index
    %c0_127 = arith.constant 0 : index
    %102 = vector.load %arg3[%c2_124, %c3_125, %c0_126, %c0_127] : memref<5x5x8x8xf32, #tpu.memory_space<vmem>>, vector<1x1x8x8xf32>
    %103 = vector.shape_cast %102 : vector<1x1x8x8xf32> to vector<8x8xf32>
    %cst_128 = arith.constant dense<0.000000e+00> : vector<256x8xf32>
    %104 = tpu.matmul %101, %103, %cst_128 {dimension_numbers = #tpu.dot_dimension_numbers<[1], [0], [0], [1], [0, 0, 1, 1], [], []>} : vector<256x8xf32>, vector<8x8xf32>, vector<256x8xf32> -> vector<256x8xf32>
    %105 = arith.addf %99, %104 : vector<256x8xf32>
    %c4_129 = arith.constant 4 : index
    %c12_130 = arith.constant 12 : index
    %c0_131 = arith.constant 0 : index
    %106 = vector.load %arg6[%c4_129, %c12_130, %c0_131] : memref<24x32x8xf32, #tpu.memory_space<vmem>>, vector<16x16x8xf32>
    %107 = vector.shape_cast %106 : vector<16x16x8xf32> to vector<256x8xf32>
    %c2_132 = arith.constant 2 : index
    %c4_133 = arith.constant 4 : index
    %c0_134 = arith.constant 0 : index
    %c0_135 = arith.constant 0 : index
    %108 = vector.load %arg3[%c2_132, %c4_133, %c0_134, %c0_135] : memref<5x5x8x8xf32, #tpu.memory_space<vmem>>, vector<1x1x8x8xf32>
    %109 = vector.shape_cast %108 : vector<1x1x8x8xf32> to vector<8x8xf32>
    %cst_136 = arith.constant dense<0.000000e+00> : vector<256x8xf32>
    %110 = tpu.matmul %107, %109, %cst_136 {dimension_numbers = #tpu.dot_dimension_numbers<[1], [0], [0], [1], [0, 0, 1, 1], [], []>} : vector<256x8xf32>, vector<8x8xf32>, vector<256x8xf32> -> vector<256x8xf32>
    %111 = arith.addf %105, %110 : vector<256x8xf32>
    %c6_137 = arith.constant 6 : index
    %c4_138 = arith.constant 4 : index
    %c0_139 = arith.constant 0 : index
    %112 = vector.load %arg6[%c6_137, %c4_138, %c0_139] : memref<24x32x8xf32, #tpu.memory_space<vmem>>, vector<16x16x8xf32>
    %113 = vector.shape_cast %112 : vector<16x16x8xf32> to vector<256x8xf32>
    %c3_140 = arith.constant 3 : index
    %c0_141 = arith.constant 0 : index
    %c0_142 = arith.constant 0 : index
    %c0_143 = arith.constant 0 : index
    %114 = vector.load %arg3[%c3_140, %c0_141, %c0_142, %c0_143] : memref<5x5x8x8xf32, #tpu.memory_space<vmem>>, vector<1x1x8x8xf32>
    %115 = vector.shape_cast %114 : vector<1x1x8x8xf32> to vector<8x8xf32>
    %cst_144 = arith.constant dense<0.000000e+00> : vector<256x8xf32>
    %116 = tpu.matmul %113, %115, %cst_144 {dimension_numbers = #tpu.dot_dimension_numbers<[1], [0], [0], [1], [0, 0, 1, 1], [], []>} : vector<256x8xf32>, vector<8x8xf32>, vector<256x8xf32> -> vector<256x8xf32>
    %117 = arith.addf %111, %116 : vector<256x8xf32>
    %c6_145 = arith.constant 6 : index
    %c6_146 = arith.constant 6 : index
    %c0_147 = arith.constant 0 : index
    %118 = vector.load %arg6[%c6_145, %c6_146, %c0_147] : memref<24x32x8xf32, #tpu.memory_space<vmem>>, vector<16x16x8xf32>
    %119 = vector.shape_cast %118 : vector<16x16x8xf32> to vector<256x8xf32>
    %c3_148 = arith.constant 3 : index
    %c1_149 = arith.constant 1 : index
    %c0_150 = arith.constant 0 : index
    %c0_151 = arith.constant 0 : index
    %120 = vector.load %arg3[%c3_148, %c1_149, %c0_150, %c0_151] : memref<5x5x8x8xf32, #tpu.memory_space<vmem>>, vector<1x1x8x8xf32>
    %121 = vector.shape_cast %120 : vector<1x1x8x8xf32> to vector<8x8xf32>
    %cst_152 = arith.constant dense<0.000000e+00> : vector<256x8xf32>
    %122 = tpu.matmul %119, %121, %cst_152 {dimension_numbers = #tpu.dot_dimension_numbers<[1], [0], [0], [1], [0, 0, 1, 1], [], []>} : vector<256x8xf32>, vector<8x8xf32>, vector<256x8xf32> -> vector<256x8xf32>
    %123 = arith.addf %117, %122 : vector<256x8xf32>
    %c6_153 = arith.constant 6 : index
    %c8_154 = arith.constant 8 : index
    %c0_155 = arith.constant 0 : index
    %124 = vector.load %arg6[%c6_153, %c8_154, %c0_155] : memref<24x32x8xf32, #tpu.memory_space<vmem>>, vector<16x16x8xf32>
    %125 = vector.shape_cast %124 : vector<16x16x8xf32> to vector<256x8xf32>
    %c3_156 = arith.constant 3 : index
    %c2_157 = arith.constant 2 : index
    %c0_158 = arith.constant 0 : index
    %c0_159 = arith.constant 0 : index
    %126 = vector.load %arg3[%c3_156, %c2_157, %c0_158, %c0_159] : memref<5x5x8x8xf32, #tpu.memory_space<vmem>>, vector<1x1x8x8xf32>
    %127 = vector.shape_cast %126 : vector<1x1x8x8xf32> to vector<8x8xf32>
    %cst_160 = arith.constant dense<0.000000e+00> : vector<256x8xf32>
    %128 = tpu.matmul %125, %127, %cst_160 {dimension_numbers = #tpu.dot_dimension_numbers<[1], [0], [0], [1], [0, 0, 1, 1], [], []>} : vector<256x8xf32>, vector<8x8xf32>, vector<256x8xf32> -> vector<256x8xf32>
    %129 = arith.addf %123, %128 : vector<256x8xf32>
    %c6_161 = arith.constant 6 : index
    %c10_162 = arith.constant 10 : index
    %c0_163 = arith.constant 0 : index
    %130 = vector.load %arg6[%c6_161, %c10_162, %c0_163] : memref<24x32x8xf32, #tpu.memory_space<vmem>>, vector<16x16x8xf32>
    %131 = vector.shape_cast %130 : vector<16x16x8xf32> to vector<256x8xf32>
    %c3_164 = arith.constant 3 : index
    %c3_165 = arith.constant 3 : index
    %c0_166 = arith.constant 0 : index
    %c0_167 = arith.constant 0 : index
    %132 = vector.load %arg3[%c3_164, %c3_165, %c0_166, %c0_167] : memref<5x5x8x8xf32, #tpu.memory_space<vmem>>, vector<1x1x8x8xf32>
    %133 = vector.shape_cast %132 : vector<1x1x8x8xf32> to vector<8x8xf32>
    %cst_168 = arith.constant dense<0.000000e+00> : vector<256x8xf32>
    %134 = tpu.matmul %131, %133, %cst_168 {dimension_numbers = #tpu.dot_dimension_numbers<[1], [0], [0], [1], [0, 0, 1, 1], [], []>} : vector<256x8xf32>, vector<8x8xf32>, vector<256x8xf32> -> vector<256x8xf32>
    %135 = arith.addf %129, %134 : vector<256x8xf32>
    %c6_169 = arith.constant 6 : index
    %c12_170 = arith.constant 12 : index
    %c0_171 = arith.constant 0 : index
    %136 = vector.load %arg6[%c6_169, %c12_170, %c0_171] : memref<24x32x8xf32, #tpu.memory_space<vmem>>, vector<16x16x8xf32>
    %137 = vector.shape_cast %136 : vector<16x16x8xf32> to vector<256x8xf32>
    %c3_172 = arith.constant 3 : index
    %c4_173 = arith.constant 4 : index
    %c0_174 = arith.constant 0 : index
    %c0_175 = arith.constant 0 : index
    %138 = vector.load %arg3[%c3_172, %c4_173, %c0_174, %c0_175] : memref<5x5x8x8xf32, #tpu.memory_space<vmem>>, vector<1x1x8x8xf32>
    %139 = vector.shape_cast %138 : vector<1x1x8x8xf32> to vector<8x8xf32>
    %cst_176 = arith.constant dense<0.000000e+00> : vector<256x8xf32>
    %140 = tpu.matmul %137, %139, %cst_176 {dimension_numbers = #tpu.dot_dimension_numbers<[1], [0], [0], [1], [0, 0, 1, 1], [], []>} : vector<256x8xf32>, vector<8x8xf32>, vector<256x8xf32> -> vector<256x8xf32>
    %141 = arith.addf %135, %140 : vector<256x8xf32>
    %c8_177 = arith.constant 8 : index
    %c4_178 = arith.constant 4 : index
    %c0_179 = arith.constant 0 : index
    %142 = vector.load %arg6[%c8_177, %c4_178, %c0_179] : memref<24x32x8xf32, #tpu.memory_space<vmem>>, vector<16x16x8xf32>
    %143 = vector.shape_cast %142 : vector<16x16x8xf32> to vector<256x8xf32>
    %c4_180 = arith.constant 4 : index
    %c0_181 = arith.constant 0 : index
    %c0_182 = arith.constant 0 : index
    %c0_183 = arith.constant 0 : index
    %144 = vector.load %arg3[%c4_180, %c0_181, %c0_182, %c0_183] : memref<5x5x8x8xf32, #tpu.memory_space<vmem>>, vector<1x1x8x8xf32>
    %145 = vector.shape_cast %144 : vector<1x1x8x8xf32> to vector<8x8xf32>
    %cst_184 = arith.constant dense<0.000000e+00> : vector<256x8xf32>
    %146 = tpu.matmul %143, %145, %cst_184 {dimension_numbers = #tpu.dot_dimension_numbers<[1], [0], [0], [1], [0, 0, 1, 1], [], []>} : vector<256x8xf32>, vector<8x8xf32>, vector<256x8xf32> -> vector<256x8xf32>
    %147 = arith.addf %141, %146 : vector<256x8xf32>
    %c8_185 = arith.constant 8 : index
    %c6_186 = arith.constant 6 : index
    %c0_187 = arith.constant 0 : index
    %148 = vector.load %arg6[%c8_185, %c6_186, %c0_187] : memref<24x32x8xf32, #tpu.memory_space<vmem>>, vector<16x16x8xf32>
    %149 = vector.shape_cast %148 : vector<16x16x8xf32> to vector<256x8xf32>
    %c4_188 = arith.constant 4 : index
    %c1_189 = arith.constant 1 : index
    %c0_190 = arith.constant 0 : index
    %c0_191 = arith.constant 0 : index
    %150 = vector.load %arg3[%c4_188, %c1_189, %c0_190, %c0_191] : memref<5x5x8x8xf32, #tpu.memory_space<vmem>>, vector<1x1x8x8xf32>
    %151 = vector.shape_cast %150 : vector<1x1x8x8xf32> to vector<8x8xf32>
    %cst_192 = arith.constant dense<0.000000e+00> : vector<256x8xf32>
    %152 = tpu.matmul %149, %151, %cst_192 {dimension_numbers = #tpu.dot_dimension_numbers<[1], [0], [0], [1], [0, 0, 1, 1], [], []>} : vector<256x8xf32>, vector<8x8xf32>, vector<256x8xf32> -> vector<256x8xf32>
    %153 = arith.addf %147, %152 : vector<256x8xf32>
    %c8_193 = arith.constant 8 : index
    %c8_194 = arith.constant 8 : index
    %c0_195 = arith.constant 0 : index
    %154 = vector.load %arg6[%c8_193, %c8_194, %c0_195] : memref<24x32x8xf32, #tpu.memory_space<vmem>>, vector<16x16x8xf32>
    %155 = vector.shape_cast %154 : vector<16x16x8xf32> to vector<256x8xf32>
    %c4_196 = arith.constant 4 : index
    %c2_197 = arith.constant 2 : index
    %c0_198 = arith.constant 0 : index
    %c0_199 = arith.constant 0 : index
    %156 = vector.load %arg3[%c4_196, %c2_197, %c0_198, %c0_199] : memref<5x5x8x8xf32, #tpu.memory_space<vmem>>, vector<1x1x8x8xf32>
    %157 = vector.shape_cast %156 : vector<1x1x8x8xf32> to vector<8x8xf32>
    %cst_200 = arith.constant dense<0.000000e+00> : vector<256x8xf32>
    %158 = tpu.matmul %155, %157, %cst_200 {dimension_numbers = #tpu.dot_dimension_numbers<[1], [0], [0], [1], [0, 0, 1, 1], [], []>} : vector<256x8xf32>, vector<8x8xf32>, vector<256x8xf32> -> vector<256x8xf32>
    %159 = arith.addf %153, %158 : vector<256x8xf32>
    %c8_201 = arith.constant 8 : index
    %c10_202 = arith.constant 10 : index
    %c0_203 = arith.constant 0 : index
    %160 = vector.load %arg6[%c8_201, %c10_202, %c0_203] : memref<24x32x8xf32, #tpu.memory_space<vmem>>, vector<16x16x8xf32>
    %161 = vector.shape_cast %160 : vector<16x16x8xf32> to vector<256x8xf32>
    %c4_204 = arith.constant 4 : index
    %c3_205 = arith.constant 3 : index
    %c0_206 = arith.constant 0 : index
    %c0_207 = arith.constant 0 : index
    %162 = vector.load %arg3[%c4_204, %c3_205, %c0_206, %c0_207] : memref<5x5x8x8xf32, #tpu.memory_space<vmem>>, vector<1x1x8x8xf32>
    %163 = vector.shape_cast %162 : vector<1x1x8x8xf32> to vector<8x8xf32>
    %cst_208 = arith.constant dense<0.000000e+00> : vector<256x8xf32>
    %164 = tpu.matmul %161, %163, %cst_208 {dimension_numbers = #tpu.dot_dimension_numbers<[1], [0], [0], [1], [0, 0, 1, 1], [], []>} : vector<256x8xf32>, vector<8x8xf32>, vector<256x8xf32> -> vector<256x8xf32>
    %165 = arith.addf %159, %164 : vector<256x8xf32>
    %c8_209 = arith.constant 8 : index
    %c12_210 = arith.constant 12 : index
    %c0_211 = arith.constant 0 : index
    %166 = vector.load %arg6[%c8_209, %c12_210, %c0_211] : memref<24x32x8xf32, #tpu.memory_space<vmem>>, vector<16x16x8xf32>
    %167 = vector.shape_cast %166 : vector<16x16x8xf32> to vector<256x8xf32>
    %c4_212 = arith.constant 4 : index
    %c4_213 = arith.constant 4 : index
    %c0_214 = arith.constant 0 : index
    %c0_215 = arith.constant 0 : index
    %168 = vector.load %arg3[%c4_212, %c4_213, %c0_214, %c0_215] : memref<5x5x8x8xf32, #tpu.memory_space<vmem>>, vector<1x1x8x8xf32>
    %169 = vector.shape_cast %168 : vector<1x1x8x8xf32> to vector<8x8xf32>
    %cst_216 = arith.constant dense<0.000000e+00> : vector<256x8xf32>
    %170 = tpu.matmul %167, %169, %cst_216 {dimension_numbers = #tpu.dot_dimension_numbers<[1], [0], [0], [1], [0, 0, 1, 1], [], []>} : vector<256x8xf32>, vector<8x8xf32>, vector<256x8xf32> -> vector<256x8xf32>
    %171 = arith.addf %165, %170 : vector<256x8xf32>
    %172 = vector.shape_cast %171 : vector<256x8xf32> to vector<16x16x8xf32>
    %c0_217 = arith.constant 0 : index
    %c0_218 = arith.constant 0 : index
    %c0_219 = arith.constant 0 : index
    %c0_220 = arith.constant 0 : index
    %173 = vector.load %arg5[%c0_217, %c0_218, %c0_219, %c0_220] : memref<1x16x16x8xf32, #tpu.memory_space<vmem>>, vector<1x16x16x8xf32>
    %174 = vector.shape_cast %173 : vector<1x16x16x8xf32> to vector<16x16x8xf32>
    %175 = vector.shape_cast %172 : vector<16x16x8xf32> to vector<1x16x16x8xf32>
    tpu.vector_store %arg5[%c0_217, %c0_218, %c0_219, %c0_220], %175 {strides = array<i32>} : memref<1x16x16x8xf32, #tpu.memory_space<vmem>>, vector<1x16x16x8xf32>,
    return
  }
  func.func @transform_0(%arg0: i32) -> (i32, i32) {
    %c0_i32 = arith.constant 0 : i32
    %c0_i32_0 = arith.constant 0 : i32
    %c0_i32_1 = arith.constant 0 : i32
    return %c0_i32, %c0_i32_0 : i32, i32
  }
  func.func @transform_1(%arg0: i32) -> (i32, i32) {
    %c0_i32 = arith.constant 0 : i32
    %c0_i32_0 = arith.constant 0 : i32
    %c0_i32_1 = arith.constant 0 : i32
    return %c0_i32, %c0_i32_0 : i32, i32
  }
  func.func @transform_2(%arg0: i32) -> (i32, i32, i32, i32) {
    %c0_i32 = arith.constant 0 : i32
    %c0_i32_0 = arith.constant 0 : i32
    %c0_i32_1 = arith.constant 0 : i32
    %c0_i32_2 = arith.constant 0 : i32
    %c0_i32_3 = arith.constant 0 : i32
    return %c0_i32, %c0_i32_0, %c0_i32_1, %c0_i32_2 : i32, i32, i32, i32
  }
  func.func @transform_3(%arg0: i32) -> (i32, i32, i32, i32) {
    %c0_i32 = arith.constant 0 : i32
    %c0_i32_0 = arith.constant 0 : i32
    %c0_i32_1 = arith.constant 0 : i32
    %c0_i32_2 = arith.constant 0 : i32
    return %arg0, %c0_i32, %c0_i32_0, %c0_i32_1 : i32, i32, i32, i32
  }
  func.func @transform_4(%arg0: i32) -> (i32, i32, i32, i32) {
    %c0_i32 = arith.constant 0 : i32
    %c0_i32_0 = arith.constant 0 : i32
    %c0_i32_1 = arith.constant 0 : i32
    %c0_i32_2 = arith.constant 0 : i32
    return %arg0, %c0_i32, %c0_i32_0, %c0_i32_1 : i32, i32, i32, i32
  }
}

</mosaic_0001>

<bundles_post_ra>
// kernel: tpu_custom_call.1
= control target key start
LH: loop header
LB: loop body
LE: loop exit
PB: predicated region body
PF: predicated region fallthrough
CT: control target
= control target key end

     0   :  { %s13100_s15 = smov 0   ;;  %s16785_s0 = inlined_call_operand.vmem [shape: f32[1,8], index: 0, kind: input, shape index: {}]   ;;  %s16786_s1 = inlined_call_operand.vmem [shape: f32[1,8], index: 1, kind: input, shape index: {}]   ;;  %s16787_s2 = inlined_call_operand.vmem [shape: f32[5,5,8,8], index: 2, kind: input, shape index: {}]   ;;  %s16788_s3 = inlined_call_operand.vmem [shape: f32[2,16,16,8], index: 3, kind: input, shape index: {}]   ;;  %s16789_s4 = inlined_call_operand.vmem [shape: f32[2,16,16,8], index: 4, kind: output, shape index: {}]  }
   0x1 LB: > { %s10139_s16 = sadd.s32 4294967295, %s13072_s15   ;;  %p10143_p0 = scmp.ge.s32.totalorder %s13072_s15, 1  ;;  %s13072_s15 = sphi %s13100_s15, %s14_s15  }
   0x2   : > { %p162_p1 = scmp.lt.s32.totalorder %s13072_s15, 3 }
   0x4   : > { %p163_p2 = pnand %p10143_p0, %p162_p1 }
   0x6   : > { %166 = sbr.rel (%p163_p2) target bundleno = 1049 (0x419), region = 36 }
   0xb   : > { %v13111_v0 = vld [vmem:[%s16787_s2 + $0x8] sm:$0xff]  ;;  %vm341_vm0 = vcmask 64512   ;;  %p13115_p3 = scmp.lt.s32.totalorder %s10139_s16, 1  ;;  %v13074_v1 = vmov 0.0   ;;  %v13252_v2 = vld [vmem:[%s16787_s2] sm:$0xff]  ;;  %v10215_v3 = vld [vmem:[%s16787_s2 + $0x10] sm:$0xff] }
   0xc   : > { %13053 = vmatprep.subr.mxu1 %v13111_v0  ;;  %11803 = vmatprep.subr.mxu0 %v13111_v0  ;;  %374 = vst.msk [vmem:[#allocation2] sm:$0xff] %vm341_vm0, %v13074_v1  ;;  %375 = vst.msk [vmem:[#allocation2 + $0x8] sm:$0xff] %vm341_vm0, %v13074_v1  ;;  %v13270_v4 = vld [vmem:[%s16785_s0] ss:$0 sm:$0xff] }
   0xd   : > { %376 = vst.msk [vmem:[#allocation2 + $0x10] sm:$0xff] %vm341_vm0, %v13074_v1  ;;  %377 = vst.msk [vmem:[#allocation2 + $0x18] sm:$0xff] %vm341_vm0, %v13074_v1  ;;  %13054 = vmatpush3.msra.mxu1 %v13111_v0  ;;  %11804 = vmatpush3.msra.mxu0 %v13111_v0  ;;  %s17334_s16 = smov (!%p13115_p3, %s10139_s16), 1  ;;  %v13282_v5 = vld [vmem:[%s16786_s1] ss:$0 sm:$0xff] }
   0xe   : > { %378 = vst.msk [vmem:[#allocation2 + $0x20] sm:$0xff] %vm341_vm0, %v13074_v1  ;;  %379 = vst.msk [vmem:[#allocation2 + $0x28] sm:$0xff] %vm341_vm0, %v13074_v1  ;;  %11853 = vmatprep.subr.mxu1 %v13252_v2  ;;  %11903 = vmatprep.subr.mxu0 %v10215_v3  ;;  %s10976_s24 = sshll.u32 %s17334_s16, 8  ;;  %v13303_v24 = vld [vmem:[%s16787_s2 + $0x20] sm:$0xff] }
   0xf   : > { %380 = vst.msk [vmem:[#allocation2 + $0x30] sm:$0xff] %vm341_vm0, %v13074_v1  ;;  %381 = vst.msk [vmem:[#allocation2 + $0x38] sm:$0xff] %vm341_vm0, %v13074_v1  ;;  %s13277_s29 = scalar_lea.vmem %s16788_s3, %s10976_s24  ;;  %s16630_s10 = scalar_lea.vmem %s16789_s4, %s10976_s24 }
  0x10   : > { %382 = vst.msk [vmem:[#allocation2 + $0x40] sm:$0xff] %vm341_vm0, %v13074_v1  ;;  %383 = vst.msk [vmem:[#allocation2 + $0x48] sm:$0xff] %vm341_vm0, %v13074_v1  ;;  %v206_v6 = vld [vmem:[%s13277_s29 + $0x40] sm:$0xff]  ;;  %v207_v7 = vld [vmem:[%s13277_s29 + $0x48] sm:$0xff] }
  0x11   : > { %384 = vst.msk [vmem:[#allocation2 + $0x50] sm:$0xff] %vm341_vm0, %v13074_v1  ;;  %385 = vst.msk [vmem:[#allocation2 + $0x58] sm:$0xff] %vm341_vm0, %v13074_v1  ;;  %v208_v8 = vld [vmem:[%s13277_s29 + $0x50] sm:$0xff]  ;;  %v245_v9 = vmul.f32 %v13270_v4, %v206_v6  ;;  %v246_v10 = vmul.f32 %v13270_v4, %v207_v7  ;;  %v209_v12 = vld [vmem:[%s13277_s29 + $0x58] sm:$0xff] }
  0x12   : > { %386 = vst.msk [vmem:[#allocation2 + $0x60] sm:$0xff] %vm341_vm0, %v13074_v1  ;;  %387 = vst.msk [vmem:[#allocation2 + $0x68] sm:$0xff] %vm341_vm0, %v13074_v1  ;;  %v247_v11 = vmul.f32 %v13270_v4, %v208_v8  ;;  %v210_v13 = vld [vmem:[%s13277_s29 + $0x60] sm:$0xff]  ;;  %v211_v14 = vld [vmem:[%s13277_s29 + $0x68] sm:$0xff]  ;;  %v248_v18 = vmul.f32 %v13270_v4, %v209_v12 }
  0x13   : > { %388 = vst.msk [vmem:[#allocation2 + $0x70] sm:$0xff] %vm341_vm0, %v13074_v1  ;;  %389 = vst.msk [vmem:[#allocation2 + $0x78] sm:$0xff] %vm341_vm0, %v13074_v1  ;;  %v472_v15 = vld [vmem:[#allocation2 + $0x6] sm:$0xff]  ;;  %v249_v19 = vmul.f32 %v13270_v4, %v210_v13  ;;  %v250_v20 = vmul.f32 %v13270_v4, %v211_v14  ;;  %v284_v21 = vadd.f32 %v13282_v5, %v245_v9  ;;  %v212_v30 = vld [vmem:[%s13277_s29 + $0x70] sm:$0xff] }
  0x14   : > { %391 = vst.msk [vmem:[#allocation2 + $0x280] sm:$0xff] %vm341_vm0, %v13074_v1  ;;  %392 = vst.msk [vmem:[#allocation2 + $0x288] sm:$0xff] %vm341_vm0, %v13074_v1  ;;  %v473_v16 = vld [vmem:[#allocation2 + $0xe] sm:$0xff]  ;;  %11805 = vmatprep.mubr.msk.f32.mxu0 %vm341_vm0, %v472_v15  ;;  %v285_v22 = vadd.f32 %v13282_v5, %v246_v10  ;;  %v286_v23 = vadd.f32 %v13282_v5, %v247_v11  ;;  %v287_v26 = vadd.f32 %v13282_v5, %v248_v18  ;;  %v213_v35 = vld [vmem:[%s13277_s29 + $0x78] sm:$0xff] }
  0x15   : > { %393 = vst.msk [vmem:[#allocation2 + $0x290] sm:$0xff] %vm341_vm0, %v13074_v1  ;;  %394 = vst.msk [vmem:[#allocation2 + $0x298] sm:$0xff] %vm341_vm0, %v13074_v1  ;;  %v474_v17 = vld [vmem:[#allocation2 + $0x26] sm:$0xff]  ;;  %11806 = vmatmul.mubr.msk.f32.vlgmr.msra.gmra.mxu0 %vm341_vm0, %v473_v16  ;;  %v288_v28 = vadd.f32 %v13282_v5, %v249_v19  ;;  %v289_v29 = vadd.f32 %v13282_v5, %v250_v20  ;;  %v316_v31 = vmax.f32 %v284_v21, 0.0  ;;  %v200_v44 = vld [vmem:[%s13277_s29 + $0x10] sm:$0xff] }
  0x16   : > { %395 = vst.msk [vmem:[#allocation2 + $0x2a0] sm:$0xff] %vm341_vm0, %v13074_v1  ;;  %396 = vst.msk [vmem:[#allocation2 + $0x2a8] sm:$0xff] %vm341_vm0, %v13074_v1  ;;  %v475_v25 = vld [vmem:[#allocation2 + $0x2e] sm:$0xff]  ;;  %v317_v32 = vmax.f32 %v285_v22, 0.0  ;;  %11904 = vmatpush3.msra.mxu0 %v10215_v3  ;;  %11808 = vmatprep.mubr.msk.f32.mxu0 %vm341_vm0, %v474_v17  ;;  %v318_v33 = vmax.f32 %v286_v23, 0.0  ;;  %v251_v34 = vmul.f32 %v13270_v4, %v212_v30  ;;  %v198_v36 = vld [vmem:[%s13277_s29] sm:$0xff] }
  0x17   : > { %397 = vst.msk [vmem:[#allocation2 + $0x2b0] sm:$0xff] %vm341_vm0, %v13074_v1  ;;  %398 = vst.msk [vmem:[#allocation2 + $0x2b8] sm:$0xff] %vm341_vm0, %v13074_v1  ;;  %v13307_v27 = vld [vmem:[#allocation2 + $0x46] sm:$0xff]  ;;  %v319_v38 = vmax.f32 %v287_v26, 0.0  ;;  %v320_v39 = vmax.f32 %v288_v28, 0.0  ;;  %v321_v40 = vmax.f32 %v289_v29, 0.0  ;;  %v252_v41 = vmul.f32 %v13270_v4, %v213_v35  ;;  %12003 = vmatprep.subr.mxu0 %v13303_v24 }
  0x18   : > { %399 = vst.msk [vmem:[#allocation2 + $0x2c0] sm:$0xff] %vm341_vm0, %v13074_v1  ;;  %400 = vst.msk [vmem:[#allocation2 + $0x2c8] sm:$0xff] %vm341_vm0, %v13074_v1  ;;  %v214_v37 = vld [vmem:[%s13277_s29 + $0x80] sm:$0xff]  ;;  %v199_v42 = vld [vmem:[%s13277_s29 + $0x8] sm:$0xff]  ;;  %v290_v45 = vadd.f32 %v13282_v5, %v251_v34  ;;  %v237_v46 = vmul.f32 %v13270_v4, %v198_v36  ;;  %v239_v52 = vmul.f32 %v13270_v4, %v200_v44 }
  0x19   : > { %401 = vst.msk [vmem:[#allocation2 + $0x2d0] sm:$0xff] %vm341_vm0, %v13074_v1  ;;  %402 = vst.msk [vmem:[#allocation2 + $0x2d8] sm:$0xff] %vm341_vm0, %v13074_v1  ;;  %v215_v43 = vld [vmem:[%s13277_s29 + $0x88] sm:$0xff]  ;;  %v253_v47 = vmul.f32 %v13270_v4, %v214_v37  ;;  %v238_v48 = vmul.f32 %v13270_v4, %v199_v42  ;;  %v216_v49 = vld [vmem:[%s13277_s29 + $0x90] sm:$0xff]  ;;  %11809 = vmatmul.mubr.msk.f32.gmra.mxu0 %vm341_vm0, %v475_v25  ;;  %v291_v50 = vadd.f32 %v13282_v5, %v252_v41 }
  0x1a   : > { %403 = vst.msk [vmem:[#allocation2 + $0x2e0] sm:$0xff] %vm341_vm0, %v13074_v1  ;;  %404 = vst.msk [vmem:[#allocation2 + $0x2e8] sm:$0xff] %vm341_vm0, %v13074_v1  ;;  %v254_v51 = vmul.f32 %v13270_v4, %v215_v43  ;;  %v255_v53 = vmul.f32 %v13270_v4, %v216_v49  ;;  %v201_v54 = vld [vmem:[%s13277_s29 + $0x18] sm:$0xff]  ;;  %11811 = vmatprep.mubr.msk.f32.mxu0 %vm341_vm0, %v13307_v27  ;;  %v13341_v55 = vld [vmem:[#allocation2 + $0x4e] sm:$0xff]  ;;  %v322_v57 = vmax.f32 %v290_v45, 0.0 }
  0x1b   : > { %405 = vst.msk [vmem:[#allocation2 + $0x2f0] sm:$0xff] %vm341_vm0, %v13074_v1  ;;  %406 = vst.msk [vmem:[#allocation2 + $0x2f8] sm:$0xff] %vm341_vm0, %v13074_v1  ;;  %v13343_v56 = vld [vmem:[#allocation2 + $0x66] sm:$0xff]  ;;  %v276_v58 = vadd.f32 %v13282_v5, %v237_v46  ;;  %v292_v59 = vadd.f32 %v13282_v5, %v253_v47  ;;  %v277_v60 = vadd.f32 %v13282_v5, %v238_v48  ;;  %v217_v61 = vld [vmem:[%s13277_s29 + $0x98] sm:$0xff]  ;;  %v323_v62 = vmax.f32 %v291_v50, 0.0 }
  0x1c   : > { %407 = vst.msk [vmem:[#allocation2 + $0x80] sm:$0xff] %vm341_vm0, %v13074_v1  ;;  %408 = vst.msk [vmem:[#allocation2 + $0xa0] sm:$0xff] %vm341_vm0, %v13074_v1  ;;  %v293_v63 = vadd.f32 %v13282_v5, %v254_v51  ;;  %v278_v0 = vadd.f32 %v13282_v5, %v239_v52  ;;  %v202_v3 = vld [vmem:[%s13277_s29 + $0x20] sm:$0xff]  ;;  %v203_v7 = vld [vmem:[%s13277_s29 + $0x28] sm:$0xff]  ;;  %v240_v11 = vmul.f32 %v13270_v4, %v201_v54 }
  0x1d   : > { %409 = vst.msk [vmem:[#allocation2 + $0xc0] sm:$0xff] %vm341_vm0, %v13074_v1  ;;  %410 = vst.msk [vmem:[#allocation2 + $0xe0] sm:$0xff] %vm341_vm0, %v13074_v1  ;;  %v218_v6 = vld [vmem:[%s13277_s29 + $0xa0] sm:$0xff]  ;;  %v308_v8 = vmax.f32 %v276_v58, 0.0  ;;  %v324_v9 = vmax.f32 %v292_v59, 0.0  ;;  %v309_v10 = vmax.f32 %v277_v60, 0.0  ;;  %11812 = vmatmul.mubr.msk.f32.gmra.mxu0 %vm341_vm0, %v13341_v55  ;;  %v256_v18 = vmul.f32 %v13270_v4, %v217_v61 }
  0x1e   : > { %411 = vst.msk [vmem:[#allocation2 + $0x100] sm:$0xff] %vm341_vm0, %v13074_v1  ;;  %412 = vst.msk [vmem:[#allocation2 + $0x120] sm:$0xff] %vm341_vm0, %v13074_v1  ;;  %v219_v12 = vld [vmem:[%s13277_s29 + $0xa8] sm:$0xff]  ;;  %v204_v13 = vld [vmem:[%s13277_s29 + $0x30] sm:$0xff]  ;;  %v325_v15 = vmax.f32 %v293_v63, 0.0  ;;  %v310_v16 = vmax.f32 %v278_v0, 0.0  ;;  %11814 = vmatprep.mubr.msk.f32.mxu0 %vm341_vm0, %v13343_v56  ;;  %v279_v20 = vadd.f32 %v13282_v5, %v240_v11  ;;  %v241_v21 = vmul.f32 %v13270_v4, %v202_v3 }
  0x1f   : > { %413 = vst.msk [vmem:[#allocation2 + $0x140] sm:$0xff] %vm341_vm0, %v13074_v1  ;;  %414 = vst.msk [vmem:[#allocation2 + $0x160] sm:$0xff] %vm341_vm0, %v13074_v1  ;;  %v220_v14 = vld [vmem:[%s13277_s29 + $0xb0] sm:$0xff]  ;;  %v257_v22 = vmul.f32 %v13270_v4, %v218_v6  ;;  %v242_v23 = vmul.f32 %v13270_v4, %v203_v7  ;;  %v205_v25 = vld [vmem:[%s13277_s29 + $0x38] sm:$0xff]  ;;  %v295_v30 = vadd.f32 %v13282_v5, %v256_v18 }
  0x20   : > { %415 = vst.msk [vmem:[#allocation2 + $0x180] sm:$0xff] %vm341_vm0, %v13074_v1  ;;  %416 = vst.msk [vmem:[#allocation2 + $0x1a0] sm:$0xff] %vm341_vm0, %v13074_v1  ;;  %v13366_v19 = vld [vmem:[#allocation2 + $0x6e] sm:$0xff]  ;;  %v311_v34 = vmax.f32 %v279_v20, 0.0  ;;  %v280_v35 = vadd.f32 %v13282_v5, %v241_v21  ;;  %v244_v48 = vmul.f32 %v13270_v4, %v205_v25  ;;  %v439_v25 = vld [vmem:[#allocation2 + $0x4] sm:$0xff] }
  0x21   : > { %417 = vst.msk [vmem:[#allocation2 + $0x1c0] sm:$0xff] %vm341_vm0, %v13074_v1  ;;  %418 = vst.msk [vmem:[#allocation2 + $0x1e0] sm:$0xff] %vm341_vm0, %v13074_v1  ;;  %v296_v36 = vadd.f32 %v13282_v5, %v257_v22  ;;  %v281_v37 = vadd.f32 %v13282_v5, %v242_v23  ;;  %11815 = vmatmul.mubr.msk.f32.gmra.mxu0 %vm341_vm0, %v13366_v19  ;;  %v13503_v18 = vld [vmem:[%s16787_s2 + $0x30] sm:$0xff]  ;;  %v13512_v22 = vld [vmem:[#allocation2 + $0x48] sm:$0xff] }
  0x22   : > { %419 = vst.msk [vmem:[#allocation2 + $0x200] sm:$0xff] %vm341_vm0, %v13074_v1  ;;  %420 = vst.msk [vmem:[#allocation2 + $0x220] sm:$0xff] %vm341_vm0, %v13074_v1  ;;  %v312_v45 = vmax.f32 %v280_v35, 0.0  ;;  %v1151_v21 = vld [vmem:[#allocation2 + $0x30] sm:$0xff] }
  0x23   : > { %421 = vst.msk [vmem:[#allocation2 + $0x240] sm:$0xff] %vm341_vm0, %v13074_v1  ;;  %422 = vst.msk [vmem:[#allocation2 + $0x260] sm:$0xff] %vm341_vm0, %v13074_v1  ;;  %v328_v46 = vmax.f32 %v296_v36, 0.0  ;;  %v313_v47 = vmax.f32 %v281_v37, 0.0  ;;  %v13548_v36 = vld [vmem:[#allocation2 + $0x2c] sm:$0xff]  ;;  %v13550_v37 = vld [vmem:[#allocation2 + $0x44] sm:$0xff] }
  0x24   : > { %423 = vst.msk [vmem:[#allocation2 + $0x98] sm:$0xff] %vm341_vm0, %v13074_v1  ;;  %424 = vst.msk [vmem:[#allocation2 + $0xb8] sm:$0xff] %vm341_vm0, %v13074_v1 }
  0x25   : > { %425 = vst.msk [vmem:[#allocation2 + $0xd8] sm:$0xff] %vm341_vm0, %v13074_v1  ;;  %426 = vst.msk [vmem:[#allocation2 + $0xf8] sm:$0xff] %vm341_vm0, %v13074_v1 }
  0x26   : > { %427 = vst.msk [vmem:[#allocation2 + $0x118] sm:$0xff] %vm341_vm0, %v13074_v1  ;;  %428 = vst.msk [vmem:[#allocation2 + $0x138] sm:$0xff] %vm341_vm0, %v13074_v1 }
  0x27   : > { %429 = vst.msk [vmem:[#allocation2 + $0x158] sm:$0xff] %vm341_vm0, %v13074_v1  ;;  %430 = vst.msk [vmem:[#allocation2 + $0x178] sm:$0xff] %vm341_vm0, %v13074_v1 }
  0x28   : > { %431 = vst.msk [vmem:[#allocation2 + $0x198] sm:$0xff] %vm341_vm0, %v13074_v1  ;;  %432 = vst.msk [vmem:[#allocation2 + $0x1b8] sm:$0xff] %vm341_vm0, %v13074_v1 }
  0x29   : > { %433 = vst.msk [vmem:[#allocation2 + $0x1d8] sm:$0xff] %vm341_vm0, %v13074_v1  ;;  %434 = vst.msk [vmem:[#allocation2 + $0x1f8] sm:$0xff] %vm341_vm0, %v13074_v1 }
  0x2a   : > { %435 = vst.msk [vmem:[#allocation2 + $0x218] sm:$0xff] %vm341_vm0, %v13074_v1  ;;  %436 = vst.msk [vmem:[#allocation2 + $0x238] sm:$0xff] %vm341_vm0, %v13074_v1 }
  0x2b   : > { %437 = vst.msk [vmem:[#allocation2 + $0x258] sm:$0xff] %vm341_vm0, %v13074_v1  ;;  %438 = vst.msk [vmem:[#allocation2 + $0x278] sm:$0xff] %vm341_vm0, %v13074_v1  ;;  %v294_v1 = vadd.f32 %v13282_v5, %v255_v53  ;;  %v283_v53 = vadd.f32 %v13282_v5, %v244_v48 }
  0x2c   : > { %350 = vst.msk [vmem:[#allocation2 + $0x108] sm:$0xff] %vm341_vm0, %v316_v31  ;;  %351 = vst.msk [vmem:[#allocation2 + $0x110] sm:$0xff] %vm341_vm0, %v317_v32  ;;  %v258_v31 = vmul.f32 %v13270_v4, %v219_v12  ;;  %v243_v32 = vmul.f32 %v13270_v4, %v204_v13  ;;  %v1148_v12 = vld [vmem:[#allocation2 + $0x8] sm:$0xff] }
  0x2d   : > { %352 = vst.msk [vmem:[#allocation2 + $0x128] sm:$0xff] %vm341_vm0, %v318_v33  ;;  %353 = vst.msk [vmem:[#allocation2 + $0x130] sm:$0xff] %vm341_vm0, %v319_v38  ;;  %v326_v17 = vmax.f32 %v294_v1, 0.0  ;;  %v259_v33 = vmul.f32 %v13270_v4, %v220_v14  ;;  %v221_v38 = vld [vmem:[%s13277_s29 + $0xb8] sm:$0xff]  ;;  %v315_v61 = vmax.f32 %v283_v53, 0.0 }
  0x2e   : > { %354 = vst.msk [vmem:[#allocation2 + $0x148] sm:$0xff] %vm341_vm0, %v320_v39  ;;  %355 = vst.msk [vmem:[#allocation2 + $0x150] sm:$0xff] %vm341_vm0, %v321_v40  ;;  %v13398_v39 = vld [vmem:[%s16787_s2 + $0x18] sm:$0xff]  ;;  %v327_v40 = vmax.f32 %v295_v30, 0.0  ;;  %v297_v41 = vadd.f32 %v13282_v5, %v258_v31  ;;  %v282_v42 = vadd.f32 %v13282_v5, %v243_v32  ;;  %v13526_v30 = vld [vmem:[#allocation2 + $0x68] sm:$0xff] }
  0x2f   : > { %356 = vst.msk [vmem:[#allocation2 + $0x168] sm:$0xff] %vm341_vm0, %v322_v57  ;;  %357 = vst.msk [vmem:[#allocation2 + $0x170] sm:$0xff] %vm341_vm0, %v323_v62  ;;  %v298_v43 = vadd.f32 %v13282_v5, %v259_v33  ;;  %v13529_v31 = vld [vmem:[#allocation2 + $0xc] sm:$0xff]  ;;  %v441_v32 = vld [vmem:[#allocation2 + $0x24] sm:$0xff] }
  0x30   : > { %342 = vst.msk [vmem:[#allocation2 + $0x88] sm:$0xff] %vm341_vm0, %v308_v8  ;;  %358 = vst.msk [vmem:[#allocation2 + $0x188] sm:$0xff] %vm341_vm0, %v324_v9  ;;  %v329_v50 = vmax.f32 %v297_v41, 0.0  ;;  %v314_v51 = vmax.f32 %v282_v42, 0.0  ;;  %v13535_v33 = vld [vmem:[#allocation2 + $0x70] sm:$0xff]  ;;  %v13567_v41 = vld [vmem:[#allocation2 + $0x64] sm:$0xff] }
  0x31   : > { %343 = vst.msk [vmem:[#allocation2 + $0x90] sm:$0xff] %vm341_vm0, %v309_v10  ;;  %359 = vst.msk [vmem:[#allocation2 + $0x190] sm:$0xff] %vm341_vm0, %v325_v15  ;;  %v330_v52 = vmax.f32 %v298_v43, 0.0  ;;  %v1149_v15 = vld [vmem:[#allocation2 + $0x10] sm:$0xff] }
  0x32   : > { %344 = vst.msk [vmem:[#allocation2 + $0xa8] sm:$0xff] %vm341_vm0, %v310_v16  ;;  %360 = vst.msk [vmem:[#allocation2 + $0x1a8] sm:$0xff] %vm341_vm0, %v326_v17  ;;  %v1150_v16 = vld [vmem:[#allocation2 + $0x28] sm:$0xff] }
  0x33   : > { %v13376_v26 = vld [vmem:[#allocation2 + $0x106] sm:$0xff]  ;;  %v13378_v28 = vld [vmem:[#allocation2 + $0x10e] sm:$0xff]  ;;  %345 = vst.msk [vmem:[#allocation2 + $0xb0] sm:$0xff] %vm341_vm0, %v311_v34  ;;  %361 = vst.msk [vmem:[#allocation2 + $0x1b0] sm:$0xff] %vm341_vm0, %v327_v40 }
  0x34   : > { %v13380_v29 = vld [vmem:[#allocation2 + $0x126] sm:$0xff]  ;;  %11829 = vmatprep.mubr.msk.f32.mxu1 %vm341_vm0, %v13376_v26  ;;  %v13410_v44 = vld [vmem:[#allocation2 + $0x12e] sm:$0xff]  ;;  %346 = vst.msk [vmem:[#allocation2 + $0xc8] sm:$0xff] %vm341_vm0, %v312_v45  ;;  %362 = vst.msk [vmem:[#allocation2 + $0x1c8] sm:$0xff] %vm341_vm0, %v328_v46 }
  0x35   : > { %11830 = vmatmul.mubr.msk.f32.vlgmr.msra.gmra.mxu1 %vm341_vm0, %v13378_v28  ;;  %v13414_v49 = vld [vmem:[#allocation2 + $0x146] sm:$0xff]  ;;  %347 = vst.msk [vmem:[#allocation2 + $0xd0] sm:$0xff] %vm341_vm0, %v313_v47  ;;  %363 = vst.msk [vmem:[#allocation2 + $0x1d0] sm:$0xff] %vm341_vm0, %v329_v50  ;;  %v13435_v59 = vld [vmem:[#allocation2 + $0x14e] sm:$0xff] }
  0x36   : > { %11854 = vmatpush3.msra.mxu1 %v13252_v2  ;;  %11832 = vmatprep.mubr.msk.f32.mxu1 %vm341_vm0, %v13380_v29  ;;  %v260_v2 = vmul.f32 %v13270_v4, %v221_v38  ;;  %348 = vst.msk [vmem:[#allocation2 + $0xe8] sm:$0xff] %vm341_vm0, %v314_v51  ;;  %364 = vst.msk [vmem:[#allocation2 + $0x1e8] sm:$0xff] %vm341_vm0, %v330_v52  ;;  %v13441_v62 = vld [vmem:[#allocation2 + $0x166] sm:$0xff]  ;;  %v13455_v1 = vld [vmem:[#allocation2 + $0x16e] sm:$0xff] }
  0x37   : > { %11953 = vmatprep.subr.mxu1 %v13398_v39  ;;  %v13425_v54 = vld [vmem:[#allocation2 + $0x86] sm:$0xff]  ;;  %349 = vst.msk [vmem:[#allocation2 + $0xf0] sm:$0xff] %vm341_vm0, %v315_v61  ;;  %16944 = vst [vmem:[#allocation6_spill] sm:$0xff] %v13512_v22  ;;  %v13621_v61 = vld [vmem:[#allocation2 + $0x110] sm:$0xff] }
  0x38   : > { %v13427_v57 = vld [vmem:[#allocation2 + $0x8e] sm:$0xff]  ;;  %v299_v58 = vadd.f32 %v13282_v5, %v260_v2  ;;  %11817 = vmatprep.mubr.msk.f32.mxu0 %vm341_vm0, %v13425_v54  ;;  %v13457_v3 = vld [vmem:[#allocation2 + $0x186] sm:$0xff]  ;;  %16947 = vst [vmem:[#allocation9_spill] sm:$0xff] %v13526_v30  ;;  %16948 = vst [vmem:[#allocation10_spill] sm:$0xff] %v13535_v33 }
  0x39   : > { %11833 = vmatmul.mubr.msk.f32.gmra.mxu1 %vm341_vm0, %v13410_v44  ;;  %v13439_v60 = vld [vmem:[#allocation2 + $0xa6] sm:$0xff]  ;;  %11818 = vmatmul.mubr.msk.f32.gmra.mxu0 %vm341_vm0, %v13427_v57  ;;  %v13473_v9 = vld [vmem:[#allocation2 + $0x18e] sm:$0xff]  ;;  %16958 = vst [vmem:[#allocation20_spill] sm:$0xff] %v13621_v61 }
  0x3a   : > { %11835 = vmatprep.mubr.msk.f32.mxu1 %vm341_vm0, %v13414_v49  ;;  %v331_v63 = vmax.f32 %v299_v58, 0.0  ;;  %11820 = vmatprep.mubr.msk.f32.mxu0 %vm341_vm0, %v13439_v60  ;;  %v13450_v0 = vld [vmem:[#allocation2 + $0xae] sm:$0xff]  ;;  %v13475_v10 = vld [vmem:[#allocation2 + $0x1a6] sm:$0xff] }
  0x3b   : > { %v13461_v6 = vld [vmem:[#allocation2 + $0xc6] sm:$0xff]  ;;  %v13487_v13 = vld [vmem:[#allocation2 + $0x1ae] sm:$0xff] }
  0x3c   : > { %365 = vst.msk [vmem:[#allocation2 + $0x1f0] sm:$0xff] %vm341_vm0, %v331_v63  ;;  %v13465_v7 = vld [vmem:[#allocation2 + $0xce] sm:$0xff]  ;;  %v13489_v14 = vld [vmem:[#allocation2 + $0x1c6] sm:$0xff] }
  0x3d   : > { %11836 = vmatmul.mubr.msk.f32.gmra.mxu1 %vm341_vm0, %v13435_v59  ;;  %11821 = vmatmul.mubr.msk.f32.gmra.mxu0 %vm341_vm0, %v13450_v0  ;;  %v13469_v8 = vld [vmem:[#allocation2 + $0xe6] sm:$0xff]  ;;  %16941 = vst [vmem:[#allocation3_spill] sm:$0xff] %v13489_v14  ;;  %v13498_v17 = vld [vmem:[#allocation2 + $0x1ce] sm:$0xff] }
  0x3e   : > { %11838 = vmatprep.mubr.msk.f32.mxu1 %vm341_vm0, %v13441_v62  ;;  %11823 = vmatprep.mubr.msk.f32.mxu0 %vm341_vm0, %v13461_v6  ;;  %v13481_v11 = vld [vmem:[#allocation2 + $0xee] sm:$0xff]  ;;  %16942 = vst [vmem:[#allocation4_spill] sm:$0xff] %v13498_v17  ;;  %v13505_v20 = vld [vmem:[#allocation2 + $0x1e6] sm:$0xff] }
  0x3f   : > { %16943 = vst [vmem:[#allocation5_spill] sm:$0xff] %v13505_v20  ;;  %v13540_v34 = vld [vmem:[%s16787_s2 + $0x28] sm:$0xff]  ;;  %v13557_v38 = vld [vmem:[#allocation2 + $0x90] sm:$0xff] }
  0x40   : > { %v13544_v35 = vld [vmem:[#allocation2 + $0x88] sm:$0xff]  ;;  %16950 = vst [vmem:[#allocation12_spill] sm:$0xff] %v13557_v38  ;;  %v13573_v42 = vld [vmem:[#allocation2 + $0xb0] sm:$0xff] }
  0x41   : > { %11839 = vmatmul.mubr.msk.f32.gmra.mxu1 %vm341_vm0, %v13455_v1  ;;  %11824 = vmatmul.mubr.msk.f32.gmra.mxu0 %vm341_vm0, %v13465_v7  ;;  %16949 = vst [vmem:[#allocation11_spill] sm:$0xff] %v13544_v35  ;;  %v13565_v40 = vld [vmem:[#allocation2 + $0x4c] sm:$0xff]  ;;  %16952 = vst [vmem:[#allocation14_spill] sm:$0xff] %v13573_v42  ;;  %v13583_v46 = vld [vmem:[#allocation2 + $0x84] sm:$0xff] }
  0x42   : > { %11841 = vmatprep.mubr.msk.f32.mxu1 %vm341_vm0, %v13457_v3  ;;  %11826 = vmatprep.mubr.msk.f32.mxu0 %vm341_vm0, %v13469_v8  ;;  %v13577_v43 = vld [vmem:[#allocation2 + $0xc8] sm:$0xff]  ;;  %v13589_v47 = vld [vmem:[#allocation2 + $0xd0] sm:$0xff] }
  0x43   : > { %v13517_v23 = vld [vmem:[#allocation2 + $0x1ee] sm:$0xff]  ;;  %16953 = vst [vmem:[#allocation15_spill] sm:$0xff] %v13577_v43  ;;  %16954 = vst [vmem:[#allocation16_spill] sm:$0xff] %v13589_v47  ;;  %v13599_v51 = vld [vmem:[#allocation2 + $0xa4] sm:$0xff] }
  0x44   : > { %16945 = vst [vmem:[#allocation7_spill] sm:$0xff] %v13517_v23  ;;  %v13581_v45 = vld [vmem:[#allocation2 + $0x6c] sm:$0xff]  ;;  %v13615_v58 = vld [vmem:[#allocation2 + $0xc4] sm:$0xff] }
  0x45   : > { %11842 = vmatmul.mubr.msk.f32.gmra.mxu1 %vm341_vm0, %v13473_v9  ;;  %11827 = vmatmul.mubr.msk.f32.gmra.mxu0 %vm341_vm0, %v13481_v11  ;;  %v13593_v48 = vld [vmem:[#allocation2 + $0xe8] sm:$0xff]  ;;  %v13605_v52 = vld [vmem:[#allocation2 + $0xf0] sm:$0xff] }
  0x46   : > { %11844 = vmatprep.mubr.msk.f32.mxu1 %vm341_vm0, %v13475_v10  ;;  %11905 = vmatprep.mubr.msk.f32.mxu0 %vm341_vm0, %v1148_v12  ;;  %16955 = vst [vmem:[#allocation17_spill] sm:$0xff] %v13593_v48  ;;  %v13597_v50 = vld [vmem:[#allocation2 + $0x8c] sm:$0xff]  ;;  %16956 = vst [vmem:[#allocation18_spill] sm:$0xff] %v13605_v52 }
  0x47   : > { %v13609_v2 = vld [vmem:[#allocation2 + $0x108] sm:$0xff] }
  0x48   : > { %16957 = vst [vmem:[#allocation19_spill] sm:$0xff] %v13609_v2  ;;  %v13613_v53 = vld [vmem:[#allocation2 + $0xac] sm:$0xff] }
  0x49   : > { %11845 = vmatmul.mubr.msk.f32.gmra.mxu1 %vm341_vm0, %v13487_v13  ;;  %11906 = vmatmul.mubr.msk.f32.vlgmr.msra.gmra.mxu0 %vm341_vm0, %v1149_v15  ;;  %v13625_v63 = vld [vmem:[#allocation2 + $0x128] sm:$0xff] }
  0x4a   : > { %11847 = vmatprep.mubr.msk.f32.mxu1 %vm341_vm0, %v13489_v14  ;;  %12004 = vmatpush3.msra.mxu0 %v13303_v24  ;;  %v13522_v24 = vld [vmem:[#allocation2 + $0x50] sm:$0xff]  ;;  %16959 = vst [vmem:[#allocation21_spill] sm:$0xff] %v13625_v63  ;;  %v13631_v15 = vld [vmem:[#allocation2 + $0xe4] sm:$0xff] }
  0x4b   : > { %11908 = vmatprep.mubr.msk.f32.mxu0 %vm341_vm0, %v1150_v16  ;;  %12103 = vmatprep.subr.mxu0 %v13503_v18  ;;  %16946 = vst [vmem:[#allocation8_spill] sm:$0xff] %v13522_v24  ;;  %v13629_v12 = vld [vmem:[#allocation2 + $0xcc] sm:$0xff] }
  0x4c   : > { %v13637_v16 = vld [vmem:[#allocation2 + $0x130] sm:$0xff] }
  0x4d   : > { %11848 = vmatmul.mubr.msk.f32.gmra.mxu1 %vm341_vm0, %v13498_v17  ;;  %11909 = vmatmul.mubr.msk.f32.gmra.mxu0 %vm341_vm0, %v1151_v21  ;;  %16960 = vst [vmem:[#allocation22_spill] sm:$0xff] %v13637_v16  ;;  %v13641_v21 = vld [vmem:[#allocation2 + $0x148] sm:$0xff]  ;;  %v225_v17 = vld [vmem:[%s13277_s29 + $0xd8] sm:$0xff] }
  0x4e   : > { %11850 = vmatprep.mubr.msk.f32.mxu1 %vm341_vm0, %v13505_v20  ;;  %11911 = vmatprep.mubr.msk.f32.mxu0 %vm341_vm0, %v13512_v22  ;;  %16961 = vst [vmem:[#allocation23_spill] sm:$0xff] %v13641_v21  ;;  %v1178_v22 = vld [vmem:[#allocation2 + $0x1e8] sm:$0xff]  ;;  %v264_v14 = vmul.f32 %v13270_v4, %v225_v17 }
  0x4f   : > { %v13713_v20 = vld [vmem:[#allocation2 + $0x18c] sm:$0xff]  ;;  %v13732_v17 = vld [vmem:[#allocation2 + $0x1c4] sm:$0xff] }
  0x51   : > { %11851 = vmatmul.mubr.msk.f32.gmra.mxu1 %vm341_vm0, %v13517_v23  ;;  %11912 = vmatmul.mubr.msk.f32.gmra.mxu0 %vm341_vm0, %v13522_v24 }
  0x52   : > { %11855 = vmatprep.mubr.msk.f32.mxu1 %vm341_vm0, %v439_v25  ;;  %11914 = vmatprep.mubr.msk.f32.mxu0 %vm341_vm0, %v13526_v30  ;;  %v13645_v25 = vld [vmem:[#allocation2 + $0xec] sm:$0xff]  ;;  %v13701_v30 = vld [vmem:[#allocation2 + $0x184] sm:$0xff] }
  0x53   : > { %16965 = vst [vmem:[#allocation27_spill] sm:$0xff] %v13701_v30 }
  0x55   : > { %11856 = vmatmul.mubr.msk.f32.vlgmr.msra.gmra.mxu1 %vm341_vm0, %v13529_v31  ;;  %11915 = vmatmul.mubr.msk.f32.gmra.mxu0 %vm341_vm0, %v13535_v33  ;;  %v223_v33 = vld [vmem:[%s13277_s29 + $0xc8] sm:$0xff] }
  0x56   : > { %11954 = vmatpush3.msra.mxu1 %v13398_v39  ;;  %11858 = vmatprep.mubr.msk.f32.mxu1 %vm341_vm0, %v441_v32  ;;  %v13561_v39 = vld [vmem:[#allocation2 + $0xa8] sm:$0xff] }
  0x57   : > { %12053 = vmatprep.subr.mxu1 %v13540_v34  ;;  %11917 = vmatprep.mubr.msk.f32.mxu0 %vm341_vm0, %v13544_v35  ;;  %16951 = vst [vmem:[#allocation13_spill] sm:$0xff] %v13561_v39  ;;  %v13647_v32 = vld [vmem:[#allocation2 + $0x104] sm:$0xff] }
  0x59   : > { %11859 = vmatmul.mubr.msk.f32.gmra.mxu1 %vm341_vm0, %v13548_v36  ;;  %11918 = vmatmul.mubr.msk.f32.gmra.mxu0 %vm341_vm0, %v13557_v38  ;;  %v13697_v38 = vld [vmem:[#allocation2 + $0x16c] sm:$0xff] }
  0x5a   : > { %11861 = vmatprep.mubr.msk.f32.mxu1 %vm341_vm0, %v13550_v37  ;;  %11920 = vmatprep.mubr.msk.f32.mxu0 %vm341_vm0, %v13561_v39  ;;  %v222_v39 = vld [vmem:[%s13277_s29 + $0xc0] sm:$0xff] }
  0x5b   : > { %v261_v35 = vmul.f32 %v13270_v4, %v222_v39  ;;  %v224_v39 = vld [vmem:[%s13277_s29 + $0xd0] sm:$0xff] }
  0x5d   : > { %11862 = vmatmul.mubr.msk.f32.gmra.mxu1 %vm341_vm0, %v13565_v40  ;;  %11921 = vmatmul.mubr.msk.f32.gmra.mxu0 %vm341_vm0, %v13573_v42  ;;  %v13688_v42 = vld [vmem:[#allocation2 + $0x164] sm:$0xff]  ;;  %v300_v24 = vadd.f32 %v13282_v5, %v261_v35 }
  0x5e   : > { %11864 = vmatprep.mubr.msk.f32.mxu1 %vm341_vm0, %v13567_v41  ;;  %11923 = vmatprep.mubr.msk.f32.mxu0 %vm341_vm0, %v13577_v43  ;;  %v13686_v43 = vld [vmem:[#allocation2 + $0x14c] sm:$0xff] }
  0x61   : > { %11865 = vmatmul.mubr.msk.f32.gmra.mxu1 %vm341_vm0, %v13581_v45  ;;  %11924 = vmatmul.mubr.msk.f32.gmra.mxu0 %vm341_vm0, %v13589_v47  ;;  %v13677_v47 = vld [vmem:[#allocation2 + $0x144] sm:$0xff] }
  0x62   : > { %11867 = vmatprep.mubr.msk.f32.mxu1 %vm341_vm0, %v13583_v46  ;;  %11926 = vmatprep.mubr.msk.f32.mxu0 %vm341_vm0, %v13593_v48  ;;  %v13675_v48 = vld [vmem:[#allocation2 + $0x12c] sm:$0xff] }
  0x65   : > { %11868 = vmatmul.mubr.msk.f32.gmra.mxu1 %vm341_vm0, %v13597_v50  ;;  %11927 = vmatmul.mubr.msk.f32.gmra.mxu0 %vm341_vm0, %v13605_v52  ;;  %v13663_v52 = vld [vmem:[#allocation2 + $0x124] sm:$0xff] }
  0x66   : > { %11870 = vmatprep.mubr.msk.f32.mxu1 %vm341_vm0, %v13599_v51  ;;  %11929 = vmatprep.mubr.msk.f32.mxu0 %vm341_vm0, %v13609_v2  ;;  %v13661_v2 = vld [vmem:[#allocation2 + $0x10c] sm:$0xff] }
  0x69   : > { %11871 = vmatmul.mubr.msk.f32.gmra.mxu1 %vm341_vm0, %v13613_v53  ;;  %11930 = vmatmul.mubr.msk.f32.gmra.mxu0 %vm341_vm0, %v13621_v61  ;;  %v13657_v61 = vld [vmem:[#allocation2 + $0x168] sm:$0xff] }
  0x6a   : > { %11873 = vmatprep.mubr.msk.f32.mxu1 %vm341_vm0, %v13615_v58  ;;  %11932 = vmatprep.mubr.msk.f32.mxu0 %vm341_vm0, %v13625_v63  ;;  %v13653_v63 = vld [vmem:[#allocation2 + $0x150] sm:$0xff]  ;;  %16963 = vst [vmem:[#allocation25_spill] sm:$0xff] %v13657_v61 }
  0x6b   : > { %16962 = vst [vmem:[#allocation24_spill] sm:$0xff] %v13653_v63 }
  0x6d   : > { %11874 = vmatmul.mubr.msk.f32.gmra.mxu1 %vm341_vm0, %v13629_v12  ;;  %11933 = vmatmul.mubr.msk.f32.gmra.mxu0 %vm341_vm0, %v13637_v16  ;;  %v1172_v16 = vld [vmem:[#allocation2 + $0x188] sm:$0xff] }
  0x6e   : > { %11876 = vmatprep.mubr.msk.f32.mxu1 %vm341_vm0, %v13631_v15  ;;  %11935 = vmatprep.mubr.msk.f32.mxu0 %vm341_vm0, %v13641_v21  ;;  %v13669_v21 = vld [vmem:[#allocation2 + $0x170] sm:$0xff] }
  0x6f   : > { %16964 = vst [vmem:[#allocation26_spill] sm:$0xff] %v13669_v21 }
  0x71   : > { %11877 = vmatmul.mubr.msk.f32.gmra.mxu1 %vm341_vm0, %v13645_v25  ;;  %11936 = vmatmul.mubr.msk.f32.gmra.mxu0 %vm341_vm0, %v13653_v63  ;;  %v1174_v63 = vld [vmem:[#allocation2 + $0x1a8] sm:$0xff] }
  0x72   : > { %11879 = vmatprep.mubr.msk.f32.mxu1 %vm341_vm0, %v13647_v32  ;;  %11938 = vmatprep.mubr.msk.f32.mxu0 %vm341_vm0, %v13657_v61  ;;  %v1173_v61 = vld [vmem:[#allocation2 + $0x190] sm:$0xff] }
  0x75   : > { %11880 = vmatmul.mubr.msk.f32.gmra.mxu1 %vm341_vm0, %v13661_v2  ;;  %11939 = vmatmul.mubr.msk.f32.gmra.mxu0 %vm341_vm0, %v13669_v21  ;;  %v1175_v21 = vld [vmem:[#allocation2 + $0x1b0] sm:$0xff] }
  0x76   : > { %11882 = vmatprep.mubr.msk.f32.mxu1 %vm341_vm0, %v13663_v52  ;;  %11941 = vmatprep.mubr.msk.f32.mxu0 %vm341_vm0, %v1172_v16  ;;  %v1176_v16 = vld [vmem:[#allocation2 + $0x1c8] sm:$0xff] }
  0x79   : > { %11883 = vmatmul.mubr.msk.f32.gmra.mxu1 %vm341_vm0, %v13675_v48  ;;  %11942 = vmatmul.mubr.msk.f32.gmra.mxu0 %vm341_vm0, %v1173_v61  ;;  %v262_v61 = vmul.f32 %v13270_v4, %v223_v33  ;;  %v263_v33 = vmul.f32 %v13270_v4, %v224_v39  ;;  %v13761_v39 = vld [vmem:[#allocation2 + $0x1ec] sm:$0xff] }
  0x7a   : > { %11885 = vmatprep.mubr.msk.f32.mxu1 %vm341_vm0, %v13677_v47  ;;  %11944 = vmatprep.mubr.msk.f32.mxu0 %vm341_vm0, %v1174_v63  ;;  %v1177_v63 = vld [vmem:[#allocation2 + $0x1d0] sm:$0xff] }
  0x7b   : > { %v301_v23 = vadd.f32 %v13282_v5, %v262_v61  ;;  %v1179_v61 = vld [vmem:[#allocation2 + $0x1f0] sm:$0xff] }
  0x7d   : > { %11886 = vmatmul.mubr.msk.f32.gmra.mxu1 %vm341_vm0, %v13686_v43  ;;  %11945 = vmatmul.mubr.msk.f32.gmra.mxu0 %vm341_vm0, %v1175_v21  ;;  %v332_v21 = vmax.f32 %v300_v24, 0.0  ;;  %v333_v35 = vmax.f32 %v301_v23, 0.0  ;;  %v303_v24 = vadd.f32 %v13282_v5, %v264_v14  ;;  %v13730_v23 = vld [vmem:[#allocation2 + $0x1ac] sm:$0xff]  ;;  %v13748_v14 = vld [vmem:[%s16787_s2 + $0x40] sm:$0xff] }
  0x7e   : > { %11888 = vmatprep.mubr.msk.f32.mxu1 %vm341_vm0, %v13688_v42  ;;  %11947 = vmatprep.mubr.msk.f32.mxu0 %vm341_vm0, %v1176_v16  ;;  %v13717_v16 = vld [vmem:[#allocation2 + $0x1a4] sm:$0xff] }
  0x7f   : > { %366 = vst.msk [vmem:[#allocation2 + $0x208] sm:$0xff] %vm341_vm0, %v332_v21  ;;  %367 = vst.msk [vmem:[#allocation2 + $0x210] sm:$0xff] %vm341_vm0, %v333_v35  ;;  %v1535_v21 = vld [vmem:[#allocation2 + $0xa] sm:$0xff]  ;;  %v1929_v35 = vld [vmem:[#allocation2 + $0x74] sm:$0xff] }
  0x81   : > { %11889 = vmatmul.mubr.msk.f32.gmra.mxu1 %vm341_vm0, %v13697_v38  ;;  %11948 = vmatmul.mubr.msk.f32.gmra.mxu0 %vm341_vm0, %v1177_v63  ;;  %v1923_v63 = vld [vmem:[#allocation2 + $0x14] sm:$0xff] }
  0x82   : > { %11891 = vmatprep.mubr.msk.f32.mxu1 %vm341_vm0, %v13701_v30  ;;  %11950 = vmatprep.mubr.msk.f32.mxu0 %vm341_vm0, %v1178_v22  ;;  %v302_v30 = vadd.f32 %v13282_v5, %v263_v33  ;;  %v335_v22 = vmax.f32 %v303_v24, 0.0  ;;  %v13743_v5 = vld [vmem:[#allocation2 + $0x1cc] sm:$0xff] }
  0x83   : > { %v1537_v33 = vld [vmem:[#allocation2 + $0x2a] sm:$0xff]  ;;  %v1538_v24 = vld [vmem:[#allocation2 + $0x32] sm:$0xff] }
  0x84   : > { %v334_v4 = vmax.f32 %v302_v30, 0.0  ;;  %369 = vst.msk [vmem:[#allocation2 + $0x230] sm:$0xff] %vm341_vm0, %v335_v22  ;;  %v13750_v30 = vld [vmem:[#allocation2 + $0x1e4] sm:$0xff]  ;;  %v1931_v22 = vld [vmem:[#allocation2 + $0x94] sm:$0xff] }
  0x85   : > { %11892 = vmatmul.mubr.msk.f32.gmra.mxu1 %vm341_vm0, %v13713_v20  ;;  %11951 = vmatmul.mubr.msk.f32.gmra.mxu0 %vm341_vm0, %v1179_v61  ;;  %v13775_v61 = vld [vmem:[%s16787_s2 + $0x38] sm:$0xff] }
  0x86   : > { %11894 = vmatprep.mubr.msk.f32.mxu1 %vm341_vm0, %v13717_v16  ;;  %12005 = vmatprep.mubr.msk.f32.mxu0 %vm341_vm0, %v13529_v31  ;;  %368 = vst.msk [vmem:[#allocation2 + $0x228] sm:$0xff] %vm341_vm0, %v334_v4  ;;  %v1925_v31 = vld [vmem:[#allocation2 + $0x34] sm:$0xff]  ;;  %v13780_v4 = vld [vmem:[#allocation2 + $0x4a] sm:$0xff] }
  0x89   : > { %11895 = vmatmul.mubr.msk.f32.gmra.mxu1 %vm341_vm0, %v13730_v23  ;;  %12006 = vmatmul.mubr.msk.f32.vlgmr.msra.gmra.mxu0 %vm341_vm0, %v1923_v63  ;;  %v13789_v63 = vld [vmem:[#allocation2 + $0x52] sm:$0xff] }
  0x8a   : > { %11897 = vmatprep.mubr.msk.f32.mxu1 %vm341_vm0, %v13732_v17  ;;  %12104 = vmatpush3.msra.mxu0 %v13503_v18  ;;  %v1927_v18 = vld [vmem:[#allocation2 + $0x54] sm:$0xff] }
  0x8b   : > { %12008 = vmatprep.mubr.msk.f32.mxu0 %vm341_vm0, %v13548_v36  ;;  %12203 = vmatprep.subr.mxu0 %v13748_v14  ;;  %v1536_v36 = vld [vmem:[#allocation2 + $0x12] sm:$0xff] }
  0x8d   : > { %11898 = vmatmul.mubr.msk.f32.gmra.mxu1 %vm341_vm0, %v13743_v5  ;;  %12009 = vmatmul.mubr.msk.f32.gmra.mxu0 %vm341_vm0, %v1925_v31  ;;  %v1933_v31 = vld [vmem:[#allocation2 + $0xb4] sm:$0xff] }
  0x8e   : > { %11900 = vmatprep.mubr.msk.f32.mxu1 %vm341_vm0, %v13750_v30  ;;  %12011 = vmatprep.mubr.msk.f32.mxu0 %vm341_vm0, %v13565_v40 }
  0x91   : > { %11901 = vmatmul.mubr.msk.f32.gmra.mxu1 %vm341_vm0, %v13761_v39  ;;  %12012 = vmatmul.mubr.msk.f32.gmra.mxu0 %vm341_vm0, %v1927_v18  ;;  %v13802_v18 = vld [vmem:[#allocation2 + $0x8a] sm:$0xff] }
  0x92   : > { %11955 = vmatprep.mubr.msk.f32.mxu1 %vm341_vm0, %v1535_v21  ;;  %12014 = vmatprep.mubr.msk.f32.mxu0 %vm341_vm0, %v13581_v45  ;;  %v13800_v21 = vld [vmem:[#allocation2 + $0x72] sm:$0xff]  ;;  %16966 = vst [vmem:[#allocation28_spill] sm:$0xff] %v13802_v18 }
  0x95   : > { %11956 = vmatmul.mubr.msk.f32.vlgmr.msra.gmra.mxu1 %vm341_vm0, %v1536_v36  ;;  %12015 = vmatmul.mubr.msk.f32.gmra.mxu0 %vm341_vm0, %v1929_v35  ;;  %v1935_v36 = vld [vmem:[#allocation2 + $0xd4] sm:$0xff]  ;;  %v13813_v35 = vld [vmem:[#allocation2 + $0xaa] sm:$0xff] }
  0x96   : > { %12054 = vmatpush3.msra.mxu1 %v13540_v34  ;;  %11958 = vmatprep.mubr.msk.f32.mxu1 %vm341_vm0, %v1537_v33  ;;  %v13791_v34 = vld [vmem:[#allocation2 + $0x6a] sm:$0xff]  ;;  %v13811_v33 = vld [vmem:[#allocation2 + $0x92] sm:$0xff]  ;;  %16968 = vst [vmem:[#allocation30_spill] sm:$0xff] %v13813_v35 }
  0x97   : > { %12153 = vmatprep.subr.mxu1 %v13775_v61  ;;  %12017 = vmatprep.mubr.msk.f32.mxu0 %vm341_vm0, %v13597_v50  ;;  %16967 = vst [vmem:[#allocation29_spill] sm:$0xff] %v13811_v33 }
  0x99   : > { %11959 = vmatmul.mubr.msk.f32.gmra.mxu1 %vm341_vm0, %v1538_v24  ;;  %12018 = vmatmul.mubr.msk.f32.gmra.mxu0 %vm341_vm0, %v1931_v22  ;;  %v1937_v24 = vld [vmem:[#allocation2 + $0xf4] sm:$0xff] }
  0x9a   : > { %11961 = vmatprep.mubr.msk.f32.mxu1 %vm341_vm0, %v13780_v4  ;;  %12020 = vmatprep.mubr.msk.f32.mxu0 %vm341_vm0, %v13613_v53  ;;  %v13822_v22 = vld [vmem:[#allocation2 + $0xb2] sm:$0xff] }
  0x9b   : > { %16969 = vst [vmem:[#allocation31_spill] sm:$0xff] %v13822_v22 }
  0x9d   : > { %11962 = vmatmul.mubr.msk.f32.gmra.mxu1 %vm341_vm0, %v13789_v63  ;;  %12021 = vmatmul.mubr.msk.f32.gmra.mxu0 %vm341_vm0, %v1933_v31  ;;  %v13824_v31 = vld [vmem:[#allocation2 + $0xca] sm:$0xff] }
  0x9e   : > { %11964 = vmatprep.mubr.msk.f32.mxu1 %vm341_vm0, %v13791_v34  ;;  %12023 = vmatprep.mubr.msk.f32.mxu0 %vm341_vm0, %v13629_v12  ;;  %16970 = vst [vmem:[#allocation32_spill] sm:$0xff] %v13824_v31 }
  0xa1   : > { %11965 = vmatmul.mubr.msk.f32.gmra.mxu1 %vm341_vm0, %v13800_v21  ;;  %12024 = vmatmul.mubr.msk.f32.gmra.mxu0 %vm341_vm0, %v1935_v36  ;;  %v1939_v36 = vld [vmem:[#allocation2 + $0x114] sm:$0xff] }
  0xa2   : > { %11967 = vmatprep.mubr.msk.f32.mxu1 %vm341_vm0, %v13802_v18  ;;  %12026 = vmatprep.mubr.msk.f32.mxu0 %vm341_vm0, %v13645_v25  ;;  %v13835_v18 = vld [vmem:[#allocation2 + $0xea] sm:$0xff] }
  0xa3   : > { %16972 = vst [vmem:[#allocation34_spill] sm:$0xff] %v13835_v18 }
  0xa5   : > { %11968 = vmatmul.mubr.msk.f32.gmra.mxu1 %vm341_vm0, %v13811_v33  ;;  %12027 = vmatmul.mubr.msk.f32.gmra.mxu0 %vm341_vm0, %v1937_v24  ;;  %v13833_v33 = vld [vmem:[#allocation2 + $0xd2] sm:$0xff] }
  0xa6   : > { %11970 = vmatprep.mubr.msk.f32.mxu1 %vm341_vm0, %v13813_v35  ;;  %12029 = vmatprep.mubr.msk.f32.mxu0 %vm341_vm0, %v13661_v2  ;;  %16971 = vst [vmem:[#allocation33_spill] sm:$0xff] %v13833_v33  ;;  %v1941_v24 = vld [vmem:[#allocation2 + $0x134] sm:$0xff]  ;;  %v13846_v35 = vld [vmem:[#allocation2 + $0x10a] sm:$0xff] }
  0xa7   : > { %16974 = vst [vmem:[#allocation36_spill] sm:$0xff] %v13846_v35 }
  0xa9   : > { %11971 = vmatmul.mubr.msk.f32.gmra.mxu1 %vm341_vm0, %v13822_v22  ;;  %12030 = vmatmul.mubr.msk.f32.gmra.mxu0 %vm341_vm0, %v1939_v36  ;;  %v13844_v22 = vld [vmem:[#allocation2 + $0xf2] sm:$0xff] }
  0xaa   : > { %11973 = vmatprep.mubr.msk.f32.mxu1 %vm341_vm0, %v13824_v31  ;;  %12032 = vmatprep.mubr.msk.f32.mxu0 %vm341_vm0, %v13675_v48  ;;  %16973 = vst [vmem:[#allocation35_spill] sm:$0xff] %v13844_v22  ;;  %v1943_v36 = vld [vmem:[#allocation2 + $0x154] sm:$0xff]  ;;  %v13857_v31 = vld [vmem:[#allocation2 + $0x12a] sm:$0xff] }
  0xab   : > { %16976 = vst [vmem:[#allocation38_spill] sm:$0xff] %v13857_v31 }
  0xad   : > { %11974 = vmatmul.mubr.msk.f32.gmra.mxu1 %vm341_vm0, %v13833_v33  ;;  %12033 = vmatmul.mubr.msk.f32.gmra.mxu0 %vm341_vm0, %v1941_v24  ;;  %v13855_v33 = vld [vmem:[#allocation2 + $0x112] sm:$0xff] }
  0xae   : > { %11976 = vmatprep.mubr.msk.f32.mxu1 %vm341_vm0, %v13835_v18  ;;  %12035 = vmatprep.mubr.msk.f32.mxu0 %vm341_vm0, %v13686_v43  ;;  %16975 = vst [vmem:[#allocation37_spill] sm:$0xff] %v13855_v33  ;;  %v1945_v24 = vld [vmem:[#allocation2 + $0x174] sm:$0xff]  ;;  %v13868_v18 = vld [vmem:[#allocation2 + $0x14a] sm:$0xff] }
  0xaf   : > { %16978 = vst [vmem:[#allocation40_spill] sm:$0xff] %v13868_v18 }
  0xb1   : > { %11977 = vmatmul.mubr.msk.f32.gmra.mxu1 %vm341_vm0, %v13844_v22  ;;  %12036 = vmatmul.mubr.msk.f32.gmra.mxu0 %vm341_vm0, %v1943_v36  ;;  %v13866_v22 = vld [vmem:[#allocation2 + $0x132] sm:$0xff] }
  0xb2   : > { %11979 = vmatprep.mubr.msk.f32.mxu1 %vm341_vm0, %v13846_v35  ;;  %12038 = vmatprep.mubr.msk.f32.mxu0 %vm341_vm0, %v13697_v38  ;;  %16977 = vst [vmem:[#allocation39_spill] sm:$0xff] %v13866_v22  ;;  %v1947_v36 = vld [vmem:[#allocation2 + $0x194] sm:$0xff]  ;;  %v13879_v35 = vld [vmem:[#allocation2 + $0x16a] sm:$0xff] }
  0xb3   : > { %16980 = vst [vmem:[#allocation42_spill] sm:$0xff] %v13879_v35 }
  0xb5   : > { %11980 = vmatmul.mubr.msk.f32.gmra.mxu1 %vm341_vm0, %v13855_v33  ;;  %12039 = vmatmul.mubr.msk.f32.gmra.mxu0 %vm341_vm0, %v1945_v24  ;;  %v13877_v33 = vld [vmem:[#allocation2 + $0x152] sm:$0xff] }
  0xb6   : > { %11982 = vmatprep.mubr.msk.f32.mxu1 %vm341_vm0, %v13857_v31  ;;  %12041 = vmatprep.mubr.msk.f32.mxu0 %vm341_vm0, %v13713_v20  ;;  %16979 = vst [vmem:[#allocation41_spill] sm:$0xff] %v13877_v33  ;;  %v1949_v24 = vld [vmem:[#allocation2 + $0x1b4] sm:$0xff]  ;;  %v13890_v31 = vld [vmem:[#allocation2 + $0x18a] sm:$0xff] }
  0xb9   : > { %11983 = vmatmul.mubr.msk.f32.gmra.mxu1 %vm341_vm0, %v13866_v22  ;;  %12042 = vmatmul.mubr.msk.f32.gmra.mxu0 %vm341_vm0, %v1947_v36  ;;  %v13888_v22 = vld [vmem:[#allocation2 + $0x172] sm:$0xff] }
  0xba   : > { %11985 = vmatprep.mubr.msk.f32.mxu1 %vm341_vm0, %v13868_v18  ;;  %12044 = vmatprep.mubr.msk.f32.mxu0 %vm341_vm0, %v13730_v23  ;;  %16981 = vst [vmem:[#allocation43_spill] sm:$0xff] %v13888_v22  ;;  %v1951_v36 = vld [vmem:[#allocation2 + $0x1d4] sm:$0xff]  ;;  %v13901_v18 = vld [vmem:[#allocation2 + $0x1aa] sm:$0xff] }
  0xbb   : > { %16983 = vst [vmem:[#allocation45_spill] sm:$0xff] %v13901_v18 }
  0xbd   : > { %11986 = vmatmul.mubr.msk.f32.gmra.mxu1 %vm341_vm0, %v13877_v33  ;;  %12045 = vmatmul.mubr.msk.f32.gmra.mxu0 %vm341_vm0, %v1949_v24  ;;  %v13899_v33 = vld [vmem:[#allocation2 + $0x192] sm:$0xff] }
  0xbe   : > { %11988 = vmatprep.mubr.msk.f32.mxu1 %vm341_vm0, %v13879_v35  ;;  %12047 = vmatprep.mubr.msk.f32.mxu0 %vm341_vm0, %v13743_v5  ;;  %16982 = vst [vmem:[#allocation44_spill] sm:$0xff] %v13899_v33  ;;  %v1953_v24 = vld [vmem:[#allocation2 + $0x1f4] sm:$0xff]  ;;  %v13912_v35 = vld [vmem:[#allocation2 + $0x1ca] sm:$0xff] }
  0xc1   : > { %11989 = vmatmul.mubr.msk.f32.gmra.mxu1 %vm341_vm0, %v13888_v22  ;;  %12048 = vmatmul.mubr.msk.f32.gmra.mxu0 %vm341_vm0, %v1951_v36  ;;  %v13910_v22 = vld [vmem:[#allocation2 + $0x1b2] sm:$0xff] }
  0xc2   : > { %11991 = vmatprep.mubr.msk.f32.mxu1 %vm341_vm0, %v13890_v31  ;;  %12050 = vmatprep.mubr.msk.f32.mxu0 %vm341_vm0, %v13761_v39  ;;  %v13921_v36 = vld [vmem:[#allocation2 + $0x1d2] sm:$0xff] }
  0xc5   : > { %11992 = vmatmul.mubr.msk.f32.gmra.mxu1 %vm341_vm0, %v13899_v33  ;;  %12051 = vmatmul.mubr.msk.f32.gmra.mxu0 %vm341_vm0, %v1953_v24  ;;  %v13928_v33 = vld [vmem:[#allocation2 + $0x1ea] sm:$0xff] }
  0xc6   : > { %11994 = vmatprep.mubr.msk.f32.mxu1 %vm341_vm0, %v13901_v18  ;;  %12105 = vmatprep.mubr.msk.f32.mxu0 %vm341_vm0, %v13307_v27  ;;  %v13926_v18 = vld [vmem:[%s16787_s2 + $0x50] sm:$0xff] }
  0xc7   : > { %v13940_v27 = vld [vmem:[#allocation2 + $0x1f2] sm:$0xff] }
  0xc9   : > { %11995 = vmatmul.mubr.msk.f32.gmra.mxu1 %vm341_vm0, %v13910_v22  ;;  %12106 = vmatmul.mubr.msk.f32.vlgmr.msra.gmra.mxu0 %vm341_vm0, %v13341_v55  ;;  %v13957_v55 = vld [vmem:[%s16787_s2 + $0x48] sm:$0xff] }
  0xca   : > { %11997 = vmatprep.mubr.msk.f32.mxu1 %vm341_vm0, %v13912_v35  ;;  %12204 = vmatpush3.msra.mxu0 %v13748_v14 }
  0xcb   : > { %12108 = vmatprep.mubr.msk.f32.mxu0 %vm341_vm0, %v13343_v56  ;;  %12303 = vmatprep.subr.mxu0 %v13926_v18 }
  0xcd   : > { %11998 = vmatmul.mubr.msk.f32.gmra.mxu1 %vm341_vm0, %v13921_v36  ;;  %12109 = vmatmul.mubr.msk.f32.gmra.mxu0 %vm341_vm0, %v13366_v19 }
  0xce   : > { %12000 = vmatprep.mubr.msk.f32.mxu1 %vm341_vm0, %v13928_v33  ;;  %12111 = vmatprep.mubr.msk.f32.mxu0 %vm341_vm0, %v13425_v54 }
  0xd1   : > { %12001 = vmatmul.mubr.msk.f32.gmra.mxu1 %vm341_vm0, %v13940_v27  ;;  %12112 = vmatmul.mubr.msk.f32.gmra.mxu0 %vm341_vm0, %v13427_v57 }
  0xd2   : > { %12055 = vmatprep.mubr.msk.f32.mxu1 %vm341_vm0, %v13550_v37  ;;  %12114 = vmatprep.mubr.msk.f32.mxu0 %vm341_vm0, %v13439_v60  ;;  %v16984_v60 = vld [vmem:[#allocation3_spill] sm:$0xff] }
  0xd5   : > { %12056 = vmatmul.mubr.msk.f32.vlgmr.msra.gmra.mxu1 %vm341_vm0, %v13565_v40  ;;  %12115 = vmatmul.mubr.msk.f32.gmra.mxu0 %vm341_vm0, %v13450_v0  ;;  %v14003_v56 = vpop.f32.mrf.mxu0  ;;  %v16985_v0 = vld [vmem:[#allocation27_spill] sm:$0xff] }
  0xd6   : > { %12154 = vmatpush3.msra.mxu1 %v13775_v61  ;;  %12058 = vmatprep.mubr.msk.f32.mxu1 %vm341_vm0, %v13567_v41 }
  0xd7   : > { %12253 = vmatprep.subr.mxu1 %v13957_v55  ;;  %12117 = vmatprep.mubr.msk.f32.mxu0 %vm341_vm0, %v13461_v6  ;;  %v14009_v19 = vpop.f32.mrf.mxu0  ;;  %v16986_v6 = vld [vmem:[#allocation4_spill] sm:$0xff] }
  0xd9   : > { %12059 = vmatmul.mubr.msk.f32.gmra.mxu1 %vm341_vm0, %v13581_v45  ;;  %12118 = vmatmul.mubr.msk.f32.gmra.mxu0 %vm341_vm0, %v13465_v7  ;;  %v16987_v7 = vld [vmem:[#allocation5_spill] sm:$0xff]  ;;  %v13065_v45 = vld [vmem:[%s16786_s1] ss:$0 sm:$0xff] }
  0xda   : > { %12061 = vmatprep.mubr.msk.f32.mxu1 %vm341_vm0, %v13583_v46  ;;  %12120 = vmatprep.mubr.msk.f32.mxu0 %vm341_vm0, %v13469_v8 }
  0xdd   : > { %12062 = vmatmul.mubr.msk.f32.gmra.mxu1 %vm341_vm0, %v13597_v50  ;;  %12121 = vmatmul.mubr.msk.f32.gmra.mxu0 %vm341_vm0, %v13481_v11  ;;  %v226_v11 = vld [vmem:[%s13277_s29 + $0xe0] sm:$0xff] }
  0xde   : > { %12064 = vmatprep.mubr.msk.f32.mxu1 %vm341_vm0, %v13599_v51  ;;  %12123 = vmatprep.mubr.msk.f32.mxu0 %vm341_vm0, %v13376_v26  ;;  %v14015_v26 = vpop.f32.mrf.mxu0  ;;  %v2727_v50 = vld [vmem:[#allocation2 + $0x226] sm:$0xff] }
  0xe1   : > { %12065 = vmatmul.mubr.msk.f32.gmra.mxu1 %vm341_vm0, %v13613_v53  ;;  %12124 = vmatmul.mubr.msk.f32.gmra.mxu0 %vm341_vm0, %v13378_v28  ;;  %v14021_v28 = vpop.f32.mrf.mxu0 }
  0xe2   : > { %12067 = vmatprep.mubr.msk.f32.mxu1 %vm341_vm0, %v13615_v58  ;;  %12126 = vmatprep.mubr.msk.f32.mxu0 %vm341_vm0, %v13380_v29  ;;  %v229_v58 = vld [vmem:[%s13277_s29 + $0xf8] sm:$0xff] }
  0xe3   : > { %v14027_v29 = vpop.f32.mrf.mxu0 }
  0xe5   : > { %12068 = vmatmul.mubr.msk.f32.gmra.mxu1 %vm341_vm0, %v13629_v12  ;;  %12127 = vmatmul.mubr.msk.f32.gmra.mxu0 %vm341_vm0, %v13410_v44  ;;  %v14033_v44 = vpop.f32.mrf.mxu0 }
  0xe6   : > { %12070 = vmatprep.mubr.msk.f32.mxu1 %vm341_vm0, %v13631_v15  ;;  %12129 = vmatprep.mubr.msk.f32.mxu0 %vm341_vm0, %v13414_v49 }
  0xe7   : > { %v14041_v54 = vpop.f32.mrf.mxu0 }
  0xe9   : > { %12071 = vmatmul.mubr.msk.f32.gmra.mxu1 %vm341_vm0, %v13645_v25  ;;  %12130 = vmatmul.mubr.msk.f32.gmra.mxu0 %vm341_vm0, %v13435_v59  ;;  %v14049_v59 = vpop.f32.mrf.mxu0 }
  0xea   : > { %12073 = vmatprep.mubr.msk.f32.mxu1 %vm341_vm0, %v13647_v32  ;;  %12132 = vmatprep.mubr.msk.f32.mxu0 %vm341_vm0, %v13441_v62 }
  0xed   : > { %12074 = vmatmul.mubr.msk.f32.gmra.mxu1 %vm341_vm0, %v13661_v2  ;;  %12133 = vmatmul.mubr.msk.f32.gmra.mxu0 %vm341_vm0, %v13455_v1 }
  0xee   : > { %12076 = vmatprep.mubr.msk.f32.mxu1 %vm341_vm0, %v13663_v52  ;;  %12135 = vmatprep.mubr.msk.f32.mxu0 %vm341_vm0, %v13457_v3  ;;  %v228_v52 = vld [vmem:[%s13277_s29 + $0xf0] sm:$0xff] }
  0xf1   : > { %12077 = vmatmul.mubr.msk.f32.gmra.mxu1 %vm341_vm0, %v13675_v48  ;;  %12136 = vmatmul.mubr.msk.f32.gmra.mxu0 %vm341_vm0, %v13473_v9 }
  0xf2   : > { %12079 = vmatprep.mubr.msk.f32.mxu1 %vm341_vm0, %v13677_v47  ;;  %12138 = vmatprep.mubr.msk.f32.mxu0 %vm341_vm0, %v13475_v10  ;;  %v2725_v10 = vld [vmem:[#allocation2 + $0x206] sm:$0xff] }
  0xf5   : > { %v14037_v49 = vpop.f32.mrf.mxu1  ;;  %12080 = vmatmul.mubr.msk.f32.gmra.mxu1 %vm341_vm0, %v13686_v43  ;;  %12139 = vmatmul.mubr.msk.f32.gmra.mxu0 %vm341_vm0, %v13487_v13  ;;  %v13064_v13 = vld [vmem:[%s16785_s0] ss:$0 sm:$0xff]  ;;  %v2726_v43 = vld [vmem:[#allocation2 + $0x20e] sm:$0xff] }
  0xf6   : > { %12082 = vmatprep.mubr.msk.f32.mxu1 %vm341_vm0, %v13688_v42  ;;  %12141 = vmatprep.mubr.msk.f32.mxu0 %vm341_vm0, %v16984_v60  ;;  %v265_v37 = vmul.f32 %v13064_v13, %v226_v11  ;;  %v16988_v42 = vld [vmem:[#allocation7_spill] sm:$0xff]  ;;  %v267_v53 = vmul.f32 %v13064_v13, %v228_v52  ;;  %v268_v32 = vmul.f32 %v13064_v13, %v229_v58  ;;  %v16992_v52 = vld [vmem:[#allocation30_spill] sm:$0xff] }
  0xf7   : > { %v14045_v57 = vpop.f32.mrf.mxu1 }
  0xf8   : > { %v304_v46 = vadd.f32 %v13065_v45, %v265_v37  ;;  %v307_v61 = vadd.f32 %v13065_v45, %v268_v32  ;;  %v16994_v32 = vld [vmem:[#allocation9_spill] sm:$0xff] }
  0xf9   : > { %v14053_v62 = vpop.f32.mrf.mxu1  ;;  %12083 = vmatmul.mubr.msk.f32.gmra.mxu1 %vm341_vm0, %v13697_v38  ;;  %v14061_v3 = vpop.f32.mrf.mxu0  ;;  %12142 = vmatmul.mubr.msk.f32.gmra.mxu0 %vm341_vm0, %v16986_v6  ;;  %v227_v38 = vld [vmem:[%s13277_s29 + $0xe8] sm:$0xff] }
  0xfa   : > { %12085 = vmatprep.mubr.msk.f32.mxu1 %vm341_vm0, %v16985_v0  ;;  %12144 = vmatprep.mubr.msk.f32.mxu0 %vm341_vm0, %v16987_v7  ;;  %v336_v2 = vmax.f32 %v304_v46, 0.0  ;;  %v14118_v0 = vld [vmem:[#allocation2 + $0x204] sm:$0xff]  ;;  %v339_v7 = vmax.f32 %v307_v61, 0.0 }
  0xfb   : > { %v14059_v1 = vpop.f32.mrf.mxu1  ;;  %v14071_v9 = vpop.f32.mrf.mxu0  ;;  %v16995_v61 = vld [vmem:[#allocation31_spill] sm:$0xff] }
  0xfc   : > { %370 = vst.msk [vmem:[#allocation2 + $0x248] sm:$0xff] %vm341_vm0, %v336_v2  ;;  %373 = vst.msk [vmem:[#allocation2 + $0x270] sm:$0xff] %vm341_vm0, %v339_v7 }
  0xfd   : > { %v14067_v8 = vpop.f32.mrf.mxu1  ;;  %12086 = vmatmul.mubr.msk.f32.gmra.mxu1 %vm341_vm0, %v13713_v20  ;;  %v14082_v41 = vpop.f32.mrf.mxu0  ;;  %12145 = vmatmul.mubr.msk.f32.gmra.mxu0 %vm341_vm0, %v16988_v42  ;;  %v266_v20 = vmul.f32 %v13064_v13, %v227_v38  ;;  %v14144_v13 = vld [vmem:[#allocation2 + $0x224] sm:$0xff]  ;;  %v14158_v42 = vld [vmem:[#allocation2 + $0x22c] sm:$0xff] }
  0xfe   : > { %12088 = vmatprep.mubr.msk.f32.mxu1 %vm341_vm0, %v13717_v16  ;;  %12147 = vmatprep.mubr.msk.f32.mxu0 %vm341_vm0, %v2725_v10  ;;  %v2728_v16 = vld [vmem:[#allocation2 + $0x22e] sm:$0xff] }
  0xff   : > { %v14080_v40 = vpop.f32.mrf.mxu1  ;;  %v14094_v48 = vpop.f32.mrf.mxu0  ;;  %v305_v51 = vadd.f32 %v13065_v45, %v266_v20  ;;  %v14135_v10 = vld [vmem:[#allocation2 + $0x20c] sm:$0xff] }
 0x101   : > { %v14090_v47 = vpop.f32.mrf.mxu1  ;;  %12089 = vmatmul.mubr.msk.f32.gmra.mxu1 %vm341_vm0, %v13730_v23  ;;  %v14102_v15 = vpop.f32.mrf.mxu0  ;;  %12148 = vmatmul.mubr.msk.f32.gmra.mxu0 %vm341_vm0, %v2726_v43  ;;  %v337_v25 = vmax.f32 %v305_v51, 0.0  ;;  %v306_v23 = vadd.f32 %v13065_v45, %v267_v53  ;;  %v16990_v45 = vld [vmem:[#allocation6_spill] sm:$0xff]  ;;  %v16991_v51 = vld [vmem:[#allocation29_spill] sm:$0xff]  ;;  %v16993_v53 = vld [vmem:[#allocation8_spill] sm:$0xff] }
 0x102   : > { %12091 = vmatprep.mubr.msk.f32.mxu1 %vm341_vm0, %v13732_v17  ;;  %12150 = vmatprep.mubr.msk.f32.mxu0 %vm341_vm0, %v2727_v50 }
 0x103   : > { %v14100_v12 = vpop.f32.mrf.mxu1  ;;  %v14111_v17 = vpop.f32.mrf.mxu0  ;;  %371 = vst.msk [vmem:[#allocation2 + $0x250] sm:$0xff] %vm341_vm0, %v337_v25  ;;  %v338_v24 = vmax.f32 %v306_v23, 0.0 }
 0x105   : > { %v14107_v14 = vpop.f32.mrf.mxu1  ;;  %12092 = vmatmul.mubr.msk.f32.gmra.mxu1 %vm341_vm0, %v13743_v5  ;;  %v14120_v6 = vpop.f32.mrf.mxu0  ;;  %12151 = vmatmul.mubr.msk.f32.gmra.mxu0 %vm341_vm0, %v2728_v16  ;;  %372 = vst.msk [vmem:[#allocation2 + $0x268] sm:$0xff] %vm341_vm0, %v338_v24 }
 0x106   : > { %12094 = vmatprep.mubr.msk.f32.mxu1 %vm341_vm0, %v13750_v30  ;;  %12205 = vmatprep.mubr.msk.f32.mxu0 %vm341_vm0, %v13780_v4  ;;  %v14140_v4 = vld [vmem:[%s16787_s2 + $0x60] sm:$0xff] }
 0x107   : > { %v14116_v60 = vpop.f32.mrf.mxu1  ;;  %v14130_v30 = vpop.f32.mrf.mxu0 }
 0x109   : > { %v14126_v5 = vpop.f32.mrf.mxu1  ;;  %12095 = vmatmul.mubr.msk.f32.gmra.mxu1 %vm341_vm0, %v13761_v39  ;;  %v11907_v37 = vpop.f32.mrf.mxu0  ;;  %12206 = vmatmul.mubr.msk.f32.vlgmr.msra.gmra.mxu0 %vm341_vm0, %v13789_v63 }
 0x10a   : > { %12097 = vmatprep.mubr.msk.f32.mxu1 %vm341_vm0, %v14118_v0  ;;  %12304 = vmatpush3.msra.mxu0 %v13926_v18 }
 0x10b   : > { %v14142_v11 = vpop.f32.mrf.mxu1  ;;  %12208 = vmatprep.mubr.msk.f32.mxu0 %vm341_vm0, %v13791_v34  ;;  %v1344_v38 = vpop.f32.mrf.mxu0  ;;  %12403 = vmatprep.subr.mxu0 %v14140_v4  ;;  %v16989_v34 = vld [vmem:[#allocation28_spill] sm:$0xff] }
 0x10d   : > { %v14151_v39 = vpop.f32.mrf.mxu1  ;;  %12098 = vmatmul.mubr.msk.f32.gmra.mxu1 %vm341_vm0, %v14135_v10  ;;  %v11910_v63 = vpop.f32.mrf.mxu0  ;;  %12209 = vmatmul.mubr.msk.f32.gmra.mxu0 %vm341_vm0, %v13800_v21  ;;  %v14181_v21 = vld [vmem:[%s16787_s2 + $0x58] sm:$0xff] }
 0x10e   : > { %12100 = vmatprep.mubr.msk.f32.mxu1 %vm341_vm0, %v14144_v13  ;;  %12211 = vmatprep.mubr.msk.f32.mxu0 %vm341_vm0, %v16989_v34  ;;  %v16996_v34 = vld [vmem:[#allocation32_spill] sm:$0xff] }
 0x10f   : > { %v14160_v20 = vpop.f32.mrf.mxu1  ;;  %v1354_v43 = vpop.f32.mrf.mxu0 }
 0x111   : > { %v14166_v18 = vpop.f32.mrf.mxu1  ;;  %12101 = vmatmul.mubr.msk.f32.gmra.mxu1 %vm341_vm0, %v14158_v42  ;;  %v11913_v50 = vpop.f32.mrf.mxu0  ;;  %12212 = vmatmul.mubr.msk.f32.gmra.mxu0 %vm341_vm0, %v16991_v51 }
 0x112   : > { %12155 = vmatprep.mubr.msk.f32.mxu1 %vm341_vm0, %v16990_v45  ;;  %12214 = vmatprep.mubr.msk.f32.mxu0 %vm341_vm0, %v16992_v52  ;;  %v16997_v45 = vld [vmem:[#allocation10_spill] sm:$0xff] }
 0x113   : > { %v14172_v46 = vpop.f32.mrf.mxu1  ;;  %v1364_v58 = vpop.f32.mrf.mxu0 }
 0x115   : > { %v11857_v2 = vpop.f32.mrf.mxu1  ;;  %12156 = vmatmul.mubr.msk.f32.vlgmr.msra.gmra.mxu1 %vm341_vm0, %v16993_v53  ;;  %v11916_v23 = vpop.f32.mrf.mxu0  ;;  %12215 = vmatmul.mubr.msk.f32.gmra.mxu0 %vm341_vm0, %v16995_v61 }
 0x116   : > { %v995_v25 = vadd.f32 %v11857_v2, %v14003_v56  ;;  %12254 = vmatpush3.msra.mxu1 %v13957_v55  ;;  %12158 = vmatprep.mubr.msk.f32.mxu1 %vm341_vm0, %v16994_v32  ;;  %v16998_v2 = vld [vmem:[#allocation11_spill] sm:$0xff] }
 0x117   : > { %v989_v16 = vpop.f32.mrf.mxu1  ;;  %12353 = vmatprep.subr.mxu1 %v14181_v21  ;;  %12217 = vmatprep.mubr.msk.f32.mxu0 %vm341_vm0, %v16996_v34  ;;  %v1374_v55 = vpop.f32.mrf.mxu0 }
 0x118   : > { %v14192_v24 = vadd.f32 %v11907_v37, %v995_v25  ;;  %v990_v7 = vadd.f32 %v989_v16, %v14009_v19  ;;  %v16999_v25 = vld [vmem:[#allocation33_spill] sm:$0xff]  ;;  %v17000_v16 = vld [vmem:[#allocation34_spill] sm:$0xff] }
 0x119   : > { %v11860_v56 = vpop.f32.mrf.mxu1  ;;  %12159 = vmatmul.mubr.msk.f32.gmra.mxu1 %vm341_vm0, %v16997_v45  ;;  %v11919_v37 = vpop.f32.mrf.mxu0  ;;  %12218 = vmatmul.mubr.msk.f32.gmra.mxu0 %vm341_vm0, %v16999_v25 }
 0x11a   : > { %v14199_v51 = vadd.f32 %v1344_v38, %v990_v7  ;;  %v1005_v52 = vadd.f32 %v11860_v56, %v14015_v26  ;;  %12161 = vmatprep.mubr.msk.f32.mxu1 %vm341_vm0, %v16998_v2  ;;  %12220 = vmatprep.mubr.msk.f32.mxu0 %vm341_vm0, %v17000_v16  ;;  %v17001_v38 = vld [vmem:[#allocation12_spill] sm:$0xff]  ;;  %v17002_v56 = vld [vmem:[#allocation13_spill] sm:$0xff] }
 0x11b   : > { %v999_v53 = vpop.f32.mrf.mxu1  ;;  %v1384_v26 = vpop.f32.mrf.mxu0 }
 0x11c   : > { %v14206_v19 = vadd.f32 %v11910_v63, %v1005_v52  ;;  %v1000_v32 = vadd.f32 %v999_v53, %v14021_v28  ;;  %v17003_v52 = vld [vmem:[#allocation35_spill] sm:$0xff]  ;;  %v17004_v53 = vld [vmem:[#allocation36_spill] sm:$0xff] }
 0x11d   : > { %v11863_v61 = vpop.f32.mrf.mxu1  ;;  %12162 = vmatmul.mubr.msk.f32.gmra.mxu1 %vm341_vm0, %v17001_v38  ;;  %v11922_v63 = vpop.f32.mrf.mxu0  ;;  %12221 = vmatmul.mubr.msk.f32.gmra.mxu0 %vm341_vm0, %v17003_v52 }
 0x11e   : > { %v14213_v7 = vadd.f32 %v1354_v43, %v1000_v32  ;;  %v1015_v34 = vadd.f32 %v11863_v61, %v14027_v29  ;;  %12164 = vmatprep.mubr.msk.f32.mxu1 %vm341_vm0, %v17002_v56  ;;  %12223 = vmatprep.mubr.msk.f32.mxu0 %vm341_vm0, %v17004_v53  ;;  %v17005_v43 = vld [vmem:[#allocation14_spill] sm:$0xff]  ;;  %v17006_v61 = vld [vmem:[#allocation15_spill] sm:$0xff] }
 0x11f   : > { %v1009_v45 = vpop.f32.mrf.mxu1  ;;  %v1394_v29 = vpop.f32.mrf.mxu0 }
 0x120   : > { %v14220_v28 = vadd.f32 %v11913_v50, %v1015_v34  ;;  %v1010_v2 = vadd.f32 %v1009_v45, %v14033_v44  ;;  %v17007_v34 = vld [vmem:[#allocation37_spill] sm:$0xff]  ;;  %v17008_v45 = vld [vmem:[#allocation38_spill] sm:$0xff] }
 0x121   : > { %v11866_v25 = vpop.f32.mrf.mxu1  ;;  %12165 = vmatmul.mubr.msk.f32.gmra.mxu1 %vm341_vm0, %v17005_v43  ;;  %v11925_v50 = vpop.f32.mrf.mxu0  ;;  %12224 = vmatmul.mubr.msk.f32.gmra.mxu0 %vm341_vm0, %v17007_v34 }
 0x122   : > { %v14227_v32 = vadd.f32 %v1364_v58, %v1010_v2  ;;  %v1025_v16 = vadd.f32 %v11866_v25, %v14041_v54  ;;  %12167 = vmatprep.mubr.msk.f32.mxu1 %vm341_vm0, %v17006_v61  ;;  %12226 = vmatprep.mubr.msk.f32.mxu0 %vm341_vm0, %v17008_v45  ;;  %v17009_v58 = vld [vmem:[#allocation16_spill] sm:$0xff]  ;;  %v17010_v25 = vld [vmem:[#allocation17_spill] sm:$0xff] }
 0x123   : > { %v1019_v38 = vpop.f32.mrf.mxu1  ;;  %v1404_v54 = vpop.f32.mrf.mxu0 }
 0x124   : > { %v14234_v44 = vadd.f32 %v11916_v23, %v1025_v16  ;;  %v1020_v56 = vadd.f32 %v1019_v38, %v14049_v59  ;;  %v17011_v16 = vld [vmem:[#allocation39_spill] sm:$0xff]  ;;  %v17012_v38 = vld [vmem:[#allocation40_spill] sm:$0xff] }
 0x125   : > { %v11869_v52 = vpop.f32.mrf.mxu1  ;;  %12168 = vmatmul.mubr.msk.f32.gmra.mxu1 %vm341_vm0, %v17009_v58  ;;  %v11928_v23 = vpop.f32.mrf.mxu0  ;;  %12227 = vmatmul.mubr.msk.f32.gmra.mxu0 %vm341_vm0, %v17011_v16 }
 0x126   : > { %v14241_v2 = vadd.f32 %v1374_v55, %v1020_v56  ;;  %v1035_v53 = vadd.f32 %v11869_v52, %v14061_v3  ;;  %12170 = vmatprep.mubr.msk.f32.mxu1 %vm341_vm0, %v17010_v25  ;;  %12229 = vmatprep.mubr.msk.f32.mxu0 %vm341_vm0, %v17012_v38  ;;  %v17013_v55 = vld [vmem:[#allocation18_spill] sm:$0xff]  ;;  %v17014_v52 = vld [vmem:[#allocation19_spill] sm:$0xff] }
 0x127   : > { %v1029_v43 = vpop.f32.mrf.mxu1  ;;  %v1414_v3 = vpop.f32.mrf.mxu0 }
 0x128   : > { %v14248_v59 = vadd.f32 %v11919_v37, %v1035_v53  ;;  %v1030_v61 = vadd.f32 %v1029_v43, %v14071_v9  ;;  %v17015_v53 = vld [vmem:[#allocation41_spill] sm:$0xff]  ;;  %v17016_v43 = vld [vmem:[#allocation42_spill] sm:$0xff] }
 0x129   : > { %v11872_v34 = vpop.f32.mrf.mxu1  ;;  %12171 = vmatmul.mubr.msk.f32.gmra.mxu1 %vm341_vm0, %v17013_v55  ;;  %v11931_v37 = vpop.f32.mrf.mxu0  ;;  %12230 = vmatmul.mubr.msk.f32.gmra.mxu0 %vm341_vm0, %v17015_v53 }
 0x12a   : > { %v14255_v56 = vadd.f32 %v1384_v26, %v1030_v61  ;;  %v1045_v45 = vadd.f32 %v11872_v34, %v14082_v41  ;;  %12173 = vmatprep.mubr.msk.f32.mxu1 %vm341_vm0, %v17014_v52  ;;  %12232 = vmatprep.mubr.msk.f32.mxu0 %vm341_vm0, %v17016_v43  ;;  %v17017_v26 = vld [vmem:[#allocation20_spill] sm:$0xff]  ;;  %v17018_v34 = vld [vmem:[#allocation21_spill] sm:$0xff]  ;;  %v17021_v43 = vld [vmem:[#allocation23_spill] sm:$0xff] }
 0x12b   : > { %v1039_v58 = vpop.f32.mrf.mxu1  ;;  %v1424_v41 = vpop.f32.mrf.mxu0 }
 0x12c   : > { %v14262_v9 = vadd.f32 %v11922_v63, %v1045_v45  ;;  %v1040_v25 = vadd.f32 %v1039_v58, %v14094_v48  ;;  %v17019_v45 = vld [vmem:[#allocation43_spill] sm:$0xff] }
 0x12d   : > { %v11875_v16 = vpop.f32.mrf.mxu1  ;;  %12174 = vmatmul.mubr.msk.f32.gmra.mxu1 %vm341_vm0, %v17017_v26  ;;  %v11934_v63 = vpop.f32.mrf.mxu0  ;;  %12233 = vmatmul.mubr.msk.f32.gmra.mxu0 %vm341_vm0, %v17019_v45  ;;  %v17022_v26 = vld [vmem:[#allocation44_spill] sm:$0xff] }
 0x12e   : > { %v14269_v61 = vadd.f32 %v1394_v29, %v1040_v25  ;;  %v1055_v38 = vadd.f32 %v11875_v16, %v14102_v15  ;;  %12176 = vmatprep.mubr.msk.f32.mxu1 %vm341_vm0, %v17018_v34  ;;  %12235 = vmatprep.mubr.msk.f32.mxu0 %vm341_vm0, %v13890_v31  ;;  %v17020_v29 = vld [vmem:[#allocation22_spill] sm:$0xff] }
 0x12f   : > { %v1049_v55 = vpop.f32.mrf.mxu1  ;;  %v1434_v15 = vpop.f32.mrf.mxu0 }
 0x130   : > { %v14276_v48 = vadd.f32 %v11925_v50, %v1055_v38  ;;  %v1050_v52 = vadd.f32 %v1049_v55, %v14111_v17  ;;  %v17023_v38 = vld [vmem:[#allocation45_spill] sm:$0xff] }
 0x131   : > { %v11878_v58 = vpop.f32.mrf.mxu1  ;;  %12177 = vmatmul.mubr.msk.f32.gmra.mxu1 %vm341_vm0, %v17020_v29  ;;  %v11937_v50 = vpop.f32.mrf.mxu0  ;;  %12236 = vmatmul.mubr.msk.f32.gmra.mxu0 %vm341_vm0, %v17022_v26 }
 0x132   : > { %v14283_v53 = vadd.f32 %v1404_v54, %v1050_v52  ;;  %v1065_v25 = vadd.f32 %v11878_v58, %v14120_v6  ;;  %12179 = vmatprep.mubr.msk.f32.mxu1 %vm341_vm0, %v17021_v43  ;;  %12238 = vmatprep.mubr.msk.f32.mxu0 %vm341_vm0, %v17023_v38  ;;  %v17024_v54 = vld [vmem:[#allocation24_spill] sm:$0xff]  ;;  %v17025_v52 = vld [vmem:[#allocation25_spill] sm:$0xff]  ;;  %v17026_v43 = vld [vmem:[#allocation26_spill] sm:$0xff] }
 0x133   : > { %v1059_v16 = vpop.f32.mrf.mxu1  ;;  %v1444_v6 = vpop.f32.mrf.mxu0 }
 0x134   : > { %v14290_v17 = vadd.f32 %v11928_v23, %v1065_v25  ;;  %v1060_v31 = vadd.f32 %v1059_v16, %v14130_v30  ;;  %v3104_v23 = vld [vmem:[#allocation2 + $0x188] sm:$0xff] }
 0x135   : > { %v11881_v34 = vpop.f32.mrf.mxu1  ;;  %12180 = vmatmul.mubr.msk.f32.gmra.mxu1 %vm341_vm0, %v17024_v54  ;;  %v11940_v29 = vpop.f32.mrf.mxu0  ;;  %12239 = vmatmul.mubr.msk.f32.gmra.mxu0 %vm341_vm0, %v13910_v22 }
 0x136   : > { %v14297_v55 = vadd.f32 %v1414_v3, %v1060_v31  ;;  %v1075_v45 = vadd.f32 %v11881_v34, %v14037_v49  ;;  %12182 = vmatprep.mubr.msk.f32.mxu1 %vm341_vm0, %v17025_v52  ;;  %12241 = vmatprep.mubr.msk.f32.mxu0 %vm341_vm0, %v13912_v35  ;;  %v3105_v31 = vld [vmem:[#allocation2 + $0x190] sm:$0xff] }
 0x137   : > { %v1069_v58 = vpop.f32.mrf.mxu1  ;;  %v1454_v49 = vpop.f32.mrf.mxu0  ;;  %v3499_v34 = vld [vmem:[#allocation2 + $0x20a] sm:$0xff] }
 0x138   : > { %v14304_v30 = vadd.f32 %v11931_v37, %v1075_v45  ;;  %v1070_v25 = vadd.f32 %v1069_v58, %v14045_v57  ;;  %v3106_v37 = vld [vmem:[#allocation2 + $0x1a8] sm:$0xff]  ;;  %v3107_v52 = vld [vmem:[#allocation2 + $0x1b0] sm:$0xff] }
 0x139   : > { %v11884_v3 = vpop.f32.mrf.mxu1  ;;  %12183 = vmatmul.mubr.msk.f32.gmra.mxu1 %vm341_vm0, %v17026_v43  ;;  %v11943_v38 = vpop.f32.mrf.mxu0  ;;  %12242 = vmatmul.mubr.msk.f32.gmra.mxu0 %vm341_vm0, %v13921_v36 }
 0x13a   : > { %v14311_v16 = vadd.f32 %v1424_v41, %v1070_v25  ;;  %v1085_v26 = vadd.f32 %v11884_v3, %v14053_v62  ;;  %12185 = vmatprep.mubr.msk.f32.mxu1 %vm341_vm0, %v3104_v23  ;;  %12244 = vmatprep.mubr.msk.f32.mxu0 %vm341_vm0, %v13928_v33  ;;  %v3500_v23 = vld [vmem:[#allocation2 + $0x212] sm:$0xff]  ;;  %v3501_v25 = vld [vmem:[#allocation2 + $0x22a] sm:$0xff] }
 0x13b   : > { %v1079_v22 = vpop.f32.mrf.mxu1  ;;  %v1464_v62 = vpop.f32.mrf.mxu0 }
 0x13c   : > { %v14317_v57 = vadd.f32 %v11934_v63, %v1085_v26  ;;  %v1080_v35 = vadd.f32 %v1079_v22, %v14059_v1  ;;  %v3108_v63 = vld [vmem:[#allocation2 + $0x1c8] sm:$0xff]  ;;  %v3109_v26 = vld [vmem:[#allocation2 + $0x1d0] sm:$0xff] }
 0x13d   : > { %v11887_v41 = vpop.f32.mrf.mxu1  ;;  %12186 = vmatmul.mubr.msk.f32.gmra.mxu1 %vm341_vm0, %v3105_v31  ;;  %v11946_v58 = vpop.f32.mrf.mxu0  ;;  %12245 = vmatmul.mubr.msk.f32.gmra.mxu0 %vm341_vm0, %v13940_v27 }
 0x13e   : > { %v14323_v54 = vadd.f32 %v1434_v15, %v1080_v35  ;;  %v1095_v45 = vadd.f32 %v11887_v41, %v14067_v8  ;;  %12188 = vmatprep.mubr.msk.f32.mxu1 %vm341_vm0, %v3106_v37  ;;  %12247 = vmatprep.mubr.msk.f32.mxu0 %vm341_vm0, %v3499_v34  ;;  %v3502_v37 = vld [vmem:[#allocation2 + $0x232] sm:$0xff] }
 0x13f   : > { %v1089_v36 = vpop.f32.mrf.mxu1  ;;  %v1474_v8 = vpop.f32.mrf.mxu0 }
 0x140   : > { %v14329_v1 = vadd.f32 %v11937_v50, %v1095_v45  ;;  %v1090_v33 = vadd.f32 %v1089_v36, %v14080_v40  ;;  %v3110_v50 = vld [vmem:[#allocation2 + $0x1e8] sm:$0xff]  ;;  %v3111_v45 = vld [vmem:[#allocation2 + $0x1f0] sm:$0xff] }
 0x141   : > { %v11890_v15 = vpop.f32.mrf.mxu1  ;;  %12189 = vmatmul.mubr.msk.f32.gmra.mxu1 %vm341_vm0, %v3107_v52  ;;  %v11949_v31 = vpop.f32.mrf.mxu0  ;;  %12248 = vmatmul.mubr.msk.f32.gmra.mxu0 %vm341_vm0, %v3500_v23  ;;  %v4247_v23 = vld [vmem:[#allocation2 + $0xa4] sm:$0xff] }
 0x142   : > { %v14334_v3 = vadd.f32 %v1444_v6, %v1090_v33  ;;  %v1105_v43 = vadd.f32 %v11890_v15, %v14090_v47  ;;  %12191 = vmatprep.mubr.msk.f32.mxu1 %vm341_vm0, %v3108_v63  ;;  %12250 = vmatprep.mubr.msk.f32.mxu0 %vm341_vm0, %v3501_v25  ;;  %v4245_v47 = vld [vmem:[#allocation2 + $0x84] sm:$0xff]  ;;  %v14353_v33 = vld [vmem:[#allocation2 + $0x8c] sm:$0xff] }
 0x143   : > { %v1099_v27 = vpop.f32.mrf.mxu1  ;;  %v1484_v6 = vpop.f32.mrf.mxu0 }
 0x144   : > { %v14339_v40 = vadd.f32 %v11940_v29, %v1105_v43  ;;  %v1100_v22 = vadd.f32 %v1099_v27, %v14100_v12  ;;  %v3112_v29 = vld [vmem:[#allocation2 + $0x208] sm:$0xff]  ;;  %v3113_v43 = vld [vmem:[#allocation2 + $0x210] sm:$0xff] }
 0x145   : > { %v11893_v35 = vpop.f32.mrf.mxu1  ;;  %12192 = vmatmul.mubr.msk.f32.gmra.mxu1 %vm341_vm0, %v3109_v26  ;;  %v11952_v36 = vpop.f32.mrf.mxu0  ;;  %12251 = vmatmul.mubr.msk.f32.gmra.mxu0 %vm341_vm0, %v3502_v37  ;;  %v3114_v26 = vld [vmem:[#allocation2 + $0x228] sm:$0xff] }
 0x146   : > { %v14344_v41 = vadd.f32 %v1454_v49, %v1100_v22  ;;  %v1115_v34 = vadd.f32 %v11893_v35, %v14107_v14  ;;  %12194 = vmatprep.mubr.msk.f32.mxu1 %vm341_vm0, %v3110_v50  ;;  %12305 = vmatprep.mubr.msk.f32.mxu0 %vm341_vm0, %v4245_v47  ;;  %v4249_v35 = vld [vmem:[#allocation2 + $0xc4] sm:$0xff] }
 0x147   : > { %v1109_v52 = vpop.f32.mrf.mxu1  ;;  %v1494_v14 = vpop.f32.mrf.mxu0 }
 0x148   : > { %v14349_v12 = vadd.f32 %v11943_v38, %v1115_v34  ;;  %v1110_v63 = vadd.f32 %v1109_v52, %v14116_v60  ;;  %v14363_v60 = vld [vmem:[%s16787_s2 + $0x70] sm:$0xff] }
 0x149   : > { %v11896_v49 = vpop.f32.mrf.mxu1  ;;  %12195 = vmatmul.mubr.msk.f32.gmra.mxu1 %vm341_vm0, %v3111_v45  ;;  %v12007_v27 = vpop.f32.mrf.mxu0  ;;  %12306 = vmatmul.mubr.msk.f32.vlgmr.msra.gmra.mxu0 %vm341_vm0, %v14353_v33 }
 0x14a   : > { %v14356_v15 = vadd.f32 %v1464_v62, %v1110_v63  ;;  %v1125_v25 = vadd.f32 %v11896_v49, %v14126_v5  ;;  %12197 = vmatprep.mubr.msk.f32.mxu1 %vm341_vm0, %v3112_v29  ;;  %12404 = vmatpush3.msra.mxu0 %v14140_v4  ;;  %v14372_v5 = vld [vmem:[#allocation2 + $0xac] sm:$0xff]  ;;  %v4251_v49 = vld [vmem:[#allocation2 + $0xe4] sm:$0xff] }
 0x14b   : > { %v1119_v38 = vpop.f32.mrf.mxu1  ;;  %12308 = vmatprep.mubr.msk.f32.mxu0 %vm341_vm0, %v4247_v23  ;;  %v2118_v37 = vpop.f32.mrf.mxu0  ;;  %12503 = vmatprep.subr.mxu0 %v14363_v60  ;;  %v3858_v4 = vld [vmem:[#allocation2 + $0x4c] sm:$0xff] }
 0x14c   : > { %v14367_v50 = vadd.f32 %v11946_v58, %v1125_v25  ;;  %v1120_v62 = vadd.f32 %v1119_v38, %v14142_v11  ;;  %v3115_v11 = vld [vmem:[#allocation2 + $0x230] sm:$0xff] }
 0x14d   : > { %v11899_v22 = vpop.f32.mrf.mxu1  ;;  %12198 = vmatmul.mubr.msk.f32.gmra.mxu1 %vm341_vm0, %v3113_v43  ;;  %v12010_v45 = vpop.f32.mrf.mxu0  ;;  %12309 = vmatmul.mubr.msk.f32.gmra.mxu0 %vm341_vm0, %v14372_v5  ;;  %v14386_v63 = vld [vmem:[#allocation2 + $0xcc] sm:$0xff]  ;;  %v3859_v43 = vld [vmem:[#allocation2 + $0x54] sm:$0xff] }
 0x14e   : > { %v14376_v47 = vadd.f32 %v1474_v8, %v1120_v62  ;;  %v1135_v58 = vadd.f32 %v11899_v22, %v14151_v39  ;;  %12200 = vmatprep.mubr.msk.f32.mxu1 %vm341_vm0, %v3114_v26  ;;  %12311 = vmatprep.mubr.msk.f32.mxu0 %vm341_vm0, %v4249_v35  ;;  %v3860_v38 = vld [vmem:[#allocation2 + $0x6c] sm:$0xff] }
 0x14f   : > { %v1129_v34 = vpop.f32.mrf.mxu1  ;;  %v2128_v39 = vpop.f32.mrf.mxu0  ;;  %v14399_v22 = vld [vmem:[#allocation2 + $0xec] sm:$0xff] }
 0x150   : > { %v14382_v52 = vadd.f32 %v11949_v31, %v1135_v58  ;;  %v1130_v29 = vadd.f32 %v1129_v34, %v14160_v20  ;;  %v4253_v58 = vld [vmem:[#allocation2 + $0x104] sm:$0xff] }
 0x151   : > { %v11902_v8 = vpop.f32.mrf.mxu1  ;;  %12201 = vmatmul.mubr.msk.f32.gmra.mxu1 %vm341_vm0, %v3115_v11  ;;  %v12013_v26 = vpop.f32.mrf.mxu0  ;;  %12312 = vmatmul.mubr.msk.f32.gmra.mxu0 %vm341_vm0, %v14386_v63 }
 0x152   : > { %v14389_v23 = vadd.f32 %v1484_v6, %v1130_v29  ;;  %v1145_v25 = vadd.f32 %v11902_v8, %v14166_v18  ;;  %12255 = vmatprep.mubr.msk.f32.mxu1 %vm341_vm0, %v3858_v4  ;;  %12314 = vmatprep.mubr.msk.f32.mxu0 %vm341_vm0, %v4251_v49  ;;  %v14404_v18 = vld [vmem:[%s16787_s2 + $0x68] sm:$0xff] }
 0x153   : > { %v1139_v31 = vpop.f32.mrf.mxu1  ;;  %v2138_v35 = vpop.f32.mrf.mxu0  ;;  %v4255_v49 = vld [vmem:[#allocation2 + $0x124] sm:$0xff] }
 0x154   : > { %v14395_v20 = vadd.f32 %v11952_v36, %v1145_v25  ;;  %v1140_v62 = vadd.f32 %v1139_v31, %v14172_v46  ;;  %v3861_v46 = vld [vmem:[#allocation2 + $0x74] sm:$0xff] }
 0x155   : > { %v11957_v6 = vpop.f32.mrf.mxu1  ;;  %12256 = vmatmul.mubr.msk.f32.vlgmr.msra.gmra.mxu1 %vm341_vm0, %v3859_v43  ;;  %v12016_v4 = vpop.f32.mrf.mxu0  ;;  %12315 = vmatmul.mubr.msk.f32.gmra.mxu0 %vm341_vm0, %v14399_v22 }
 0x156   : > { %v14407_v11 = vadd.f32 %v1494_v14, %v1140_v62  ;;  %v1891_v36 = vadd.f32 %v11957_v6, %v14192_v24  ;;  %12354 = vmatpush3.msra.mxu1 %v14181_v21  ;;  %12258 = vmatprep.mubr.msk.f32.mxu1 %vm341_vm0, %v3860_v38  ;;  %v14419_v14 = vld [vmem:[#allocation2 + $0x10c] sm:$0xff] }
 0x157   : > { %v1731_v34 = vpop.f32.mrf.mxu1  ;;  %12453 = vmatprep.subr.mxu1 %v14404_v18  ;;  %12317 = vmatprep.mubr.msk.f32.mxu0 %vm341_vm0, %v4253_v58  ;;  %v2148_v21 = vpop.f32.mrf.mxu0 }
 0x158   : > { %v14415_v29 = vadd.f32 %v12007_v27, %v1891_v36  ;;  %v1890_v8 = vadd.f32 %v1731_v34, %v14199_v51  ;;  %v14427_v27 = vld [vmem:[#allocation2 + $0x94] sm:$0xff] }
 0x159   : > { %v11960_v24 = vpop.f32.mrf.mxu1  ;;  %12259 = vmatmul.mubr.msk.f32.gmra.mxu1 %vm341_vm0, %v3861_v46  ;;  %v12019_v51 = vpop.f32.mrf.mxu0  ;;  %12318 = vmatmul.mubr.msk.f32.gmra.mxu0 %vm341_vm0, %v14419_v14 }
 0x15a   : > { %v14422_v25 = vadd.f32 %v2118_v37, %v1890_v8  ;;  %v1893_v43 = vadd.f32 %v11960_v24, %v14206_v19  ;;  %12261 = vmatprep.mubr.msk.f32.mxu1 %vm341_vm0, %v14353_v33  ;;  %12320 = vmatprep.mubr.msk.f32.mxu0 %vm341_vm0, %v4255_v49  ;;  %v14435_v37 = vld [vmem:[#allocation2 + $0x12c] sm:$0xff]  ;;  %v4257_v33 = vld [vmem:[#allocation2 + $0x144] sm:$0xff] }
 0x15b   : > { %v1741_v31 = vpop.f32.mrf.mxu1  ;;  %v2158_v19 = vpop.f32.mrf.mxu0  ;;  %v14450_v24 = vld [vmem:[#allocation2 + $0x14c] sm:$0xff]  ;;  %v4259_v49 = vld [vmem:[#allocation2 + $0x164] sm:$0xff] }
 0x15c   : > { %v14431_v38 = vadd.f32 %v12010_v45, %v1893_v43  ;;  %v1892_v62 = vadd.f32 %v1741_v31, %v14213_v7  ;;  %v3865_v45 = vld [vmem:[#allocation2 + $0xb4] sm:$0xff] }
 0x15d   : > { %v11963_v6 = vpop.f32.mrf.mxu1  ;;  %12262 = vmatmul.mubr.msk.f32.gmra.mxu1 %vm341_vm0, %v14427_v27  ;;  %v12022_v7 = vpop.f32.mrf.mxu0  ;;  %12321 = vmatmul.mubr.msk.f32.gmra.mxu0 %vm341_vm0, %v14435_v37 }
 0x15e   : > { %v14439_v58 = vadd.f32 %v2128_v39, %v1892_v62  ;;  %v1895_v36 = vadd.f32 %v11963_v6, %v14220_v28  ;;  %12264 = vmatprep.mubr.msk.f32.mxu1 %vm341_vm0, %v14372_v5  ;;  %12323 = vmatprep.mubr.msk.f32.mxu0 %vm341_vm0, %v4257_v33  ;;  %v14464_v33 = vld [vmem:[#allocation2 + $0x16c] sm:$0xff] }
 0x15f   : > { %v1751_v46 = vpop.f32.mrf.mxu1  ;;  %v2168_v28 = vpop.f32.mrf.mxu0 }
 0x160   : > { %v14446_v34 = vadd.f32 %v12013_v26, %v1895_v36  ;;  %v1894_v8 = vadd.f32 %v1751_v46, %v14227_v32  ;;  %v3867_v26 = vld [vmem:[#allocation2 + $0xd4] sm:$0xff]  ;;  %v4261_v36 = vld [vmem:[#allocation2 + $0x184] sm:$0xff] }
 0x161   : > { %v11966_v39 = vpop.f32.mrf.mxu1  ;;  %12265 = vmatmul.mubr.msk.f32.gmra.mxu1 %vm341_vm0, %v3865_v45  ;;  %v12025_v62 = vpop.f32.mrf.mxu0  ;;  %12324 = vmatmul.mubr.msk.f32.gmra.mxu0 %vm341_vm0, %v14450_v24 }
 0x162   : > { %v14453_v5 = vadd.f32 %v2138_v35, %v1894_v8  ;;  %v1897_v43 = vadd.f32 %v11966_v39, %v14234_v44  ;;  %12267 = vmatprep.mubr.msk.f32.mxu1 %vm341_vm0, %v14386_v63  ;;  %12326 = vmatprep.mubr.msk.f32.mxu0 %vm341_vm0, %v4259_v49  ;;  %v14478_v49 = vld [vmem:[#allocation2 + $0x18c] sm:$0xff] }
 0x163   : > { %v1761_v31 = vpop.f32.mrf.mxu1  ;;  %v2178_v44 = vpop.f32.mrf.mxu0 }
 0x164   : > { %v14460_v32 = vadd.f32 %v12016_v4, %v1897_v43  ;;  %v1896_v6 = vadd.f32 %v1761_v31, %v14241_v2  ;;  %v3869_v4 = vld [vmem:[#allocation2 + $0xf4] sm:$0xff]  ;;  %v4263_v43 = vld [vmem:[#allocation2 + $0x1a4] sm:$0xff] }
 0x165   : > { %v11969_v35 = vpop.f32.mrf.mxu1  ;;  %12268 = vmatmul.mubr.msk.f32.gmra.mxu1 %vm341_vm0, %v3867_v26  ;;  %v12028_v8 = vpop.f32.mrf.mxu0  ;;  %12327 = vmatmul.mubr.msk.f32.gmra.mxu0 %vm341_vm0, %v14464_v33 }
 0x166   : > { %v14467_v63 = vadd.f32 %v2148_v21, %v1896_v6  ;;  %v1899_v45 = vadd.f32 %v11969_v35, %v14248_v59  ;;  %12270 = vmatprep.mubr.msk.f32.mxu1 %vm341_vm0, %v14399_v22  ;;  %12329 = vmatprep.mubr.msk.f32.mxu0 %vm341_vm0, %v4261_v36  ;;  %v14492_v36 = vld [vmem:[#allocation2 + $0x1ac] sm:$0xff] }
 0x167   : > { %v1771_v46 = vpop.f32.mrf.mxu1  ;;  %v2188_v59 = vpop.f32.mrf.mxu0 }
 0x168   : > { %v14474_v2 = vadd.f32 %v12019_v51, %v1899_v45  ;;  %v1898_v39 = vadd.f32 %v1771_v46, %v14255_v56  ;;  %v3871_v51 = vld [vmem:[#allocation2 + $0x114] sm:$0xff]  ;;  %v4265_v45 = vld [vmem:[#allocation2 + $0x1c4] sm:$0xff] }
 0x169   : > { %v11972_v21 = vpop.f32.mrf.mxu1  ;;  %12271 = vmatmul.mubr.msk.f32.gmra.mxu1 %vm341_vm0, %v3869_v4  ;;  %v12031_v6 = vpop.f32.mrf.mxu0  ;;  %12330 = vmatmul.mubr.msk.f32.gmra.mxu0 %vm341_vm0, %v14478_v49 }
 0x16a   : > { %v14481_v22 = vadd.f32 %v2158_v19, %v1898_v39  ;;  %v1901_v26 = vadd.f32 %v11972_v21, %v14262_v9  ;;  %12273 = vmatprep.mubr.msk.f32.mxu1 %vm341_vm0, %v14419_v14  ;;  %12332 = vmatprep.mubr.msk.f32.mxu0 %vm341_vm0, %v4263_v43  ;;  %v14506_v43 = vld [vmem:[#allocation2 + $0x1cc] sm:$0xff] }
 0x16b   : > { %v1781_v31 = vpop.f32.mrf.mxu1  ;;  %v2198_v9 = vpop.f32.mrf.mxu0 }
 0x16c   : > { %v14488_v56 = vadd.f32 %v12022_v7, %v1901_v26  ;;  %v1900_v35 = vadd.f32 %v1781_v31, %v14269_v61  ;;  %v3873_v7 = vld [vmem:[#allocation2 + $0x134] sm:$0xff]  ;;  %v4267_v26 = vld [vmem:[#allocation2 + $0x1e4] sm:$0xff] }
 0x16d   : > { %v11975_v19 = vpop.f32.mrf.mxu1  ;;  %12274 = vmatmul.mubr.msk.f32.gmra.mxu1 %vm341_vm0, %v3871_v51  ;;  %v12034_v39 = vpop.f32.mrf.mxu0  ;;  %12333 = vmatmul.mubr.msk.f32.gmra.mxu0 %vm341_vm0, %v14492_v36 }
 0x16e   : > { %v14495_v14 = vadd.f32 %v2168_v28, %v1900_v35  ;;  %v1903_v4 = vadd.f32 %v11975_v19, %v14276_v48  ;;  %12276 = vmatprep.mubr.msk.f32.mxu1 %vm341_vm0, %v14435_v37  ;;  %12335 = vmatprep.mubr.msk.f32.mxu0 %vm341_vm0, %v4265_v45  ;;  %v14520_v45 = vld [vmem:[#allocation2 + $0x1ec] sm:$0xff] }
 0x16f   : > { %v1791_v46 = vpop.f32.mrf.mxu1  ;;  %v2208_v48 = vpop.f32.mrf.mxu0 }
 0x170   : > { %v14502_v61 = vadd.f32 %v12025_v62, %v1903_v4  ;;  %v1902_v21 = vadd.f32 %v1791_v46, %v14283_v53  ;;  %v3875_v62 = vld [vmem:[#allocation2 + $0x154] sm:$0xff] }
 0x171   : > { %v11978_v28 = vpop.f32.mrf.mxu1  ;;  %12277 = vmatmul.mubr.msk.f32.gmra.mxu1 %vm341_vm0, %v3873_v7  ;;  %v12037_v35 = vpop.f32.mrf.mxu0  ;;  %12336 = vmatmul.mubr.msk.f32.gmra.mxu0 %vm341_vm0, %v14506_v43  ;;  %v3877_v7 = vld [vmem:[#allocation2 + $0x174] sm:$0xff] }
 0x172   : > { %v14509_v37 = vadd.f32 %v2178_v44, %v1902_v21  ;;  %v1905_v51 = vadd.f32 %v11978_v28, %v14290_v17  ;;  %12279 = vmatprep.mubr.msk.f32.mxu1 %vm341_vm0, %v14450_v24  ;;  %12338 = vmatprep.mubr.msk.f32.mxu0 %vm341_vm0, %v4267_v26  ;;  %v3879_v26 = vld [vmem:[#allocation2 + $0x194] sm:$0xff] }
 0x173   : > { %v1801_v31 = vpop.f32.mrf.mxu1  ;;  %v2218_v17 = vpop.f32.mrf.mxu0 }
 0x174   : > { %v14516_v53 = vadd.f32 %v12028_v8, %v1905_v51  ;;  %v1904_v19 = vadd.f32 %v1801_v31, %v14297_v55 }
 0x175   : > { %v11981_v44 = vpop.f32.mrf.mxu1  ;;  %12280 = vmatmul.mubr.msk.f32.gmra.mxu1 %vm341_vm0, %v3875_v62  ;;  %v12040_v46 = vpop.f32.mrf.mxu0  ;;  %12339 = vmatmul.mubr.msk.f32.gmra.mxu0 %vm341_vm0, %v14520_v45  ;;  %v4273_v62 = vld [vmem:[#allocation2 + $0x244] sm:$0xff] }
 0x176   : > { %v14523_v4 = vadd.f32 %v2188_v59, %v1904_v19  ;;  %v1907_v24 = vadd.f32 %v11981_v44, %v14304_v30  ;;  %12282 = vmatprep.mubr.msk.f32.mxu1 %vm341_vm0, %v14464_v33  ;;  %12341 = vmatprep.mubr.msk.f32.mxu0 %vm341_vm0, %v14118_v0  ;;  %v4274_v44 = vld [vmem:[#allocation2 + $0x24c] sm:$0xff] }
 0x177   : > { %v1811_v8 = vpop.f32.mrf.mxu1  ;;  %v2228_v30 = vpop.f32.mrf.mxu0 }
 0x178   : > { %v14530_v55 = vadd.f32 %v12031_v6, %v1907_v24  ;;  %v1906_v21 = vadd.f32 %v1811_v8, %v14311_v16  ;;  %v4275_v24 = vld [vmem:[#allocation2 + $0x264] sm:$0xff] }
 0x179   : > { %v11984_v59 = vpop.f32.mrf.mxu1  ;;  %12283 = vmatmul.mubr.msk.f32.gmra.mxu1 %vm341_vm0, %v3877_v7  ;;  %v12043_v6 = vpop.f32.mrf.mxu0  ;;  %12342 = vmatmul.mubr.msk.f32.gmra.mxu0 %vm341_vm0, %v14135_v10  ;;  %v3881_v10 = vld [vmem:[#allocation2 + $0x1b4] sm:$0xff] }
 0x17a   : > { %v14536_v28 = vadd.f32 %v2198_v9, %v1906_v21  ;;  %v1909_v33 = vadd.f32 %v11984_v59, %v14317_v57  ;;  %12285 = vmatprep.mubr.msk.f32.mxu1 %vm341_vm0, %v14478_v49  ;;  %12344 = vmatprep.mubr.msk.f32.mxu0 %vm341_vm0, %v14144_v13  ;;  %v4276_v59 = vld [vmem:[#allocation2 + $0x26c] sm:$0xff] }
 0x17b   : > { %v1821_v51 = vpop.f32.mrf.mxu1  ;;  %v2238_v57 = vpop.f32.mrf.mxu0 }
 0x17c   : > { %v14543_v16 = vadd.f32 %v12034_v39, %v1909_v33  ;;  %v1908_v0 = vadd.f32 %v1821_v51, %v14323_v54  ;;  %v3885_v51 = vld [vmem:[#allocation2 + $0x1f4] sm:$0xff] }
 0x17d   : > { %v11987_v9 = vpop.f32.mrf.mxu1  ;;  %12286 = vmatmul.mubr.msk.f32.gmra.mxu1 %vm341_vm0, %v3879_v26  ;;  %v12046_v19 = vpop.f32.mrf.mxu0  ;;  %12345 = vmatmul.mubr.msk.f32.gmra.mxu0 %vm341_vm0, %v14158_v42  ;;  %v3883_v42 = vld [vmem:[#allocation2 + $0x1d4] sm:$0xff] }
 0x17e   : > { %v14549_v31 = vadd.f32 %v2208_v48, %v1908_v0  ;;  %v1911_v49 = vadd.f32 %v11987_v9, %v14329_v1  ;;  %12288 = vmatprep.mubr.msk.f32.mxu1 %vm341_vm0, %v14492_v36  ;;  %12347 = vmatprep.mubr.msk.f32.mxu0 %vm341_vm0, %v4273_v62  ;;  %v3886_v0 = vld [vmem:[#allocation2 + $0x20c] sm:$0xff] }
 0x17f   : > { %v1831_v39 = vpop.f32.mrf.mxu1  ;;  %v2248_v1 = vpop.f32.mrf.mxu0 }
 0x180   : > { %v14556_v54 = vadd.f32 %v12037_v35, %v1911_v49  ;;  %v1910_v13 = vadd.f32 %v1831_v39, %v14334_v3  ;;  %v5020_v49 = vld [vmem:[#allocation2 + $0x90] sm:$0xff] }
 0x181   : > { %v11990_v48 = vpop.f32.mrf.mxu1  ;;  %12289 = vmatmul.mubr.msk.f32.gmra.mxu1 %vm341_vm0, %v3881_v10  ;;  %v12049_v8 = vpop.f32.mrf.mxu0  ;;  %12348 = vmatmul.mubr.msk.f32.gmra.mxu0 %vm341_vm0, %v4274_v44  ;;  %v5021_v10 = vld [vmem:[#allocation2 + $0xa8] sm:$0xff] }
 0x182   : > { %v14561_v7 = vadd.f32 %v2218_v17, %v1910_v13  ;;  %v1913_v36 = vadd.f32 %v11990_v48, %v14339_v40  ;;  %12291 = vmatprep.mubr.msk.f32.mxu1 %vm341_vm0, %v14506_v43  ;;  %12350 = vmatprep.mubr.msk.f32.mxu0 %vm341_vm0, %v4275_v24  ;;  %v5019_v40 = vld [vmem:[#allocation2 + $0x88] sm:$0xff]  ;;  %v14587_v13 = vld [vmem:[#allocation2 + $0x214] sm:$0xff] }
 0x183   : > { %v1841_v35 = vpop.f32.mrf.mxu1  ;;  %v2258_v17 = vpop.f32.mrf.mxu0  ;;  %v14594_v44 = vld [vmem:[#allocation2 + $0x22c] sm:$0xff] }
 0x184   : > { %v14567_v3 = vadd.f32 %v12040_v46, %v1913_v36  ;;  %v1912_v21 = vadd.f32 %v1841_v35, %v14344_v41  ;;  %v5023_v35 = vld [vmem:[#allocation2 + $0xc8] sm:$0xff] }
 0x185   : > { %v11993_v33 = vpop.f32.mrf.mxu1  ;;  %12292 = vmatmul.mubr.msk.f32.gmra.mxu1 %vm341_vm0, %v3883_v42  ;;  %v12052_v9 = vpop.f32.mrf.mxu0  ;;  %12351 = vmatmul.mubr.msk.f32.gmra.mxu0 %vm341_vm0, %v4276_v59  ;;  %v4632_v59 = vld [vmem:[#allocation2 + $0x86] sm:$0xff] }
 0x186   : > { %v14572_v26 = vadd.f32 %v2228_v30, %v1912_v21  ;;  %v1915_v43 = vadd.f32 %v11993_v33, %v14349_v12  ;;  %12294 = vmatprep.mubr.msk.f32.mxu1 %vm341_vm0, %v14520_v45  ;;  %12405 = vmatprep.mubr.msk.f32.mxu0 %vm341_vm0, %v5019_v40 }
 0x187   : > { %v1851_v46 = vpop.f32.mrf.mxu1  ;;  %v2268_v12 = vpop.f32.mrf.mxu0 }
 0x188   : > { %v14578_v41 = vadd.f32 %v12043_v6, %v1915_v43  ;;  %v1914_v62 = vadd.f32 %v1851_v46, %v14356_v15  ;;  %v14592_v15 = vld [vmem:[%s16787_s2 + $0x80] sm:$0xff]  ;;  %v5025_v46 = vld [vmem:[#allocation2 + $0xe8] sm:$0xff] }
 0x189   : > { %v11996_v30 = vpop.f32.mrf.mxu1  ;;  %12295 = vmatmul.mubr.msk.f32.gmra.mxu1 %vm341_vm0, %v3885_v51  ;;  %v12107_v48 = vpop.f32.mrf.mxu0  ;;  %12406 = vmatmul.mubr.msk.f32.vlgmr.msra.gmra.mxu0 %vm341_vm0, %v5020_v49  ;;  %v4633_v49 = vld [vmem:[#allocation2 + $0x8e] sm:$0xff] }
 0x18a   : > { %v14583_v39 = vadd.f32 %v2238_v57, %v1914_v62  ;;  %v1917_v45 = vadd.f32 %v11996_v30, %v14367_v50  ;;  %12297 = vmatprep.mubr.msk.f32.mxu1 %vm341_vm0, %v3886_v0  ;;  %12504 = vmatpush3.msra.mxu0 %v14363_v60  ;;  %v5022_v50 = vld [vmem:[#allocation2 + $0xb0] sm:$0xff]  ;;  %v4634_v30 = vld [vmem:[#allocation2 + $0xa6] sm:$0xff] }
 0x18b   : > { %v1861_v6 = vpop.f32.mrf.mxu1  ;;  %12408 = vmatprep.mubr.msk.f32.mxu0 %vm341_vm0, %v5021_v10  ;;  %v2893_v42 = vpop.f32.mrf.mxu0  ;;  %12603 = vmatprep.subr.mxu0 %v14592_v15 }
 0x18c   : > { %v14597_v24 = vadd.f32 %v12046_v19, %v1917_v45  ;;  %v1916_v57 = vadd.f32 %v1861_v6, %v14376_v47  ;;  %v14610_v47 = vld [vmem:[#allocation2 + $0x234] sm:$0xff] }
 0x18d   : > { %v11999_v36 = vpop.f32.mrf.mxu1  ;;  %12298 = vmatmul.mubr.msk.f32.gmra.mxu1 %vm341_vm0, %v14587_v13  ;;  %v12110_v33 = vpop.f32.mrf.mxu0  ;;  %12409 = vmatmul.mubr.msk.f32.gmra.mxu0 %vm341_vm0, %v5022_v50  ;;  %v5026_v6 = vld [vmem:[#allocation2 + $0xf0] sm:$0xff]  ;;  %v5027_v50 = vld [vmem:[#allocation2 + $0x108] sm:$0xff] }
 0x18e   : > { %v14605_v21 = vadd.f32 %v2248_v1, %v1916_v57  ;;  %v1919_v19 = vadd.f32 %v11999_v36, %v14382_v52  ;;  %12300 = vmatprep.mubr.msk.f32.mxu1 %vm341_vm0, %v14594_v44  ;;  %12411 = vmatprep.mubr.msk.f32.mxu0 %vm341_vm0, %v5023_v35  ;;  %v5024_v1 = vld [vmem:[#allocation2 + $0xd0] sm:$0xff] }
 0x18f   : > { %v1871_v60 = vpop.f32.mrf.mxu1  ;;  %v2903_v52 = vpop.f32.mrf.mxu0 }
 0x190   : > { %v14613_v40 = vadd.f32 %v12049_v8, %v1919_v19  ;;  %v1918_v43 = vadd.f32 %v1871_v60, %v14389_v23  ;;  %v14639_v19 = vld [vmem:[#allocation2 + $0xc6] sm:$0xff] }
 0x191   : > { %v12002_v51 = vpop.f32.mrf.mxu1  ;;  %12301 = vmatmul.mubr.msk.f32.gmra.mxu1 %vm341_vm0, %v14610_v47  ;;  %v12113_v10 = vpop.f32.mrf.mxu0  ;;  %12412 = vmatmul.mubr.msk.f32.gmra.mxu0 %vm341_vm0, %v5024_v1  ;;  %v5029_v1 = vld [vmem:[#allocation2 + $0x128] sm:$0xff] }
 0x192   : > { %v14619_v0 = vadd.f32 %v2258_v17, %v1918_v43  ;;  %v1921_v62 = vadd.f32 %v12002_v51, %v14395_v20  ;;  %12355 = vmatprep.mubr.msk.f32.mxu1 %vm341_vm0, %v4632_v59  ;;  %12414 = vmatprep.mubr.msk.f32.mxu0 %vm341_vm0, %v5025_v46  ;;  %v14631_v17 = vld [vmem:[%s16787_s2 + $0x78] sm:$0xff] }
 0x193   : > { %v1881_v8 = vpop.f32.mrf.mxu1  ;;  %v2913_v57 = vpop.f32.mrf.mxu0 }
 0x194   : > { %v14624_v23 = vadd.f32 %v12052_v9, %v1921_v62  ;;  %v1920_v45 = vadd.f32 %v1881_v8, %v14407_v11  ;;  %v4635_v11 = vld [vmem:[#allocation2 + $0xae] sm:$0xff] }
 0x195   : > { %v12057_v20 = vpop.f32.mrf.mxu1  ;;  %12356 = vmatmul.mubr.msk.f32.vlgmr.msra.gmra.mxu1 %vm341_vm0, %v4633_v49  ;;  %v12116_v60 = vpop.f32.mrf.mxu0  ;;  %12415 = vmatmul.mubr.msk.f32.gmra.mxu0 %vm341_vm0, %v5026_v6  ;;  %v14653_v62 = vld [vmem:[#allocation2 + $0xce] sm:$0xff]  ;;  %v14655_v49 = vld [vmem:[#allocation2 + $0xe6] sm:$0xff] }
 0x196   : > { %v14634_v36 = vadd.f32 %v2268_v12, %v1920_v45  ;;  %v2666_v9 = vadd.f32 %v12057_v20, %v14415_v29  ;;  %12454 = vmatpush3.msra.mxu1 %v14404_v18  ;;  %12358 = vmatprep.mubr.msk.f32.mxu1 %vm341_vm0, %v4634_v30  ;;  %v5028_v29 = vld [vmem:[#allocation2 + $0x110] sm:$0xff]  ;;  %v5031_v6 = vld [vmem:[#allocation2 + $0x148] sm:$0xff] }
 0x197   : > { %v2506_v35 = vpop.f32.mrf.mxu1  ;;  %12553 = vmatprep.subr.mxu1 %v14631_v17  ;;  %12417 = vmatprep.mubr.msk.f32.mxu0 %vm341_vm0, %v5027_v50  ;;  %v2923_v18 = vpop.f32.mrf.mxu0 }
 0x198   : > { %v14643_v59 = vadd.f32 %v12107_v48, %v2666_v9  ;;  %v2665_v12 = vadd.f32 %v2506_v35, %v14422_v25 }
 0x199   : > { %v12060_v43 = vpop.f32.mrf.mxu1  ;;  %12359 = vmatmul.mubr.msk.f32.gmra.mxu1 %vm341_vm0, %v4635_v11  ;;  %v12119_v25 = vpop.f32.mrf.mxu0  ;;  %12418 = vmatmul.mubr.msk.f32.gmra.mxu0 %vm341_vm0, %v5028_v29 }
 0x19a   : > { %v14648_v51 = vadd.f32 %v2893_v42, %v2665_v12  ;;  %v2668_v46 = vadd.f32 %v12060_v43, %v14431_v38  ;;  %12361 = vmatprep.mubr.msk.f32.mxu1 %vm341_vm0, %v14639_v19  ;;  %12420 = vmatprep.mubr.msk.f32.mxu0 %vm341_vm0, %v5029_v1  ;;  %v5030_v42 = vld [vmem:[#allocation2 + $0x130] sm:$0xff]  ;;  %v5033_v43 = vld [vmem:[#allocation2 + $0x168] sm:$0xff] }
 0x19b   : > { %v2516_v48 = vpop.f32.mrf.mxu1  ;;  %v2933_v38 = vpop.f32.mrf.mxu0 }
 0x19c   : > { %v14658_v8 = vadd.f32 %v12110_v33, %v2668_v46  ;;  %v2667_v30 = vadd.f32 %v2516_v48, %v14439_v58  ;;  %v14669_v33 = vld [vmem:[#allocation2 + $0xee] sm:$0xff]  ;;  %v14671_v58 = vld [vmem:[#allocation2 + $0x106] sm:$0xff] }
 0x19d   : > { %v12063_v45 = vpop.f32.mrf.mxu1  ;;  %12362 = vmatmul.mubr.msk.f32.gmra.mxu1 %vm341_vm0, %v14653_v62  ;;  %v12122_v11 = vpop.f32.mrf.mxu0  ;;  %12421 = vmatmul.mubr.msk.f32.gmra.mxu0 %vm341_vm0, %v5030_v42 }
 0x19e   : > { %v14664_v20 = vadd.f32 %v2903_v52, %v2667_v30  ;;  %v2670_v50 = vadd.f32 %v12063_v45, %v14446_v34  ;;  %12364 = vmatprep.mubr.msk.f32.mxu1 %vm341_vm0, %v14655_v49  ;;  %12423 = vmatprep.mubr.msk.f32.mxu0 %vm341_vm0, %v5031_v6  ;;  %v5032_v52 = vld [vmem:[#allocation2 + $0x150] sm:$0xff] }
 0x19f   : > { %v2526_v9 = vpop.f32.mrf.mxu1  ;;  %v2943_v34 = vpop.f32.mrf.mxu0 }
 0x1a0   : > { %v14674_v35 = vadd.f32 %v12113_v10, %v2670_v50  ;;  %v2669_v12 = vadd.f32 %v2526_v9, %v14453_v5  ;;  %v14685_v10 = vld [vmem:[#allocation2 + $0x10e] sm:$0xff]  ;;  %v14687_v5 = vld [vmem:[#allocation2 + $0x126] sm:$0xff] }
 0x1a1   : > { %v12066_v29 = vpop.f32.mrf.mxu1  ;;  %12365 = vmatmul.mubr.msk.f32.gmra.mxu1 %vm341_vm0, %v14669_v33  ;;  %17027 = vst [vmem:[#allocation3_spill] sm:$0xff] %v14687_v5  ;;  %v12125_v30 = vpop.f32.mrf.mxu0  ;;  %12424 = vmatmul.mubr.msk.f32.gmra.mxu0 %vm341_vm0, %v5032_v52  ;;  %v5035_v50 = vld [vmem:[#allocation2 + $0x188] sm:$0xff] }
 0x1a2   : > { %v14680_v1 = vadd.f32 %v2913_v57, %v2669_v12  ;;  %v2672_v46 = vadd.f32 %v12066_v29, %v14460_v32  ;;  %12367 = vmatprep.mubr.msk.f32.mxu1 %vm341_vm0, %v14671_v58  ;;  %12426 = vmatprep.mubr.msk.f32.mxu0 %vm341_vm0, %v5033_v43  ;;  %v5034_v57 = vld [vmem:[#allocation2 + $0x170] sm:$0xff] }
 0x1a3   : > { %v2536_v48 = vpop.f32.mrf.mxu1  ;;  %v2953_v32 = vpop.f32.mrf.mxu0 }
 0x1a4   : > { %v14690_v42 = vadd.f32 %v12116_v60, %v2672_v46  ;;  %v2671_v45 = vadd.f32 %v2536_v48, %v14467_v63  ;;  %v14701_v60 = vld [vmem:[#allocation2 + $0x12e] sm:$0xff]  ;;  %v14703_v63 = vld [vmem:[#allocation2 + $0x146] sm:$0xff] }
 0x1a5   : > { %v12069_v6 = vpop.f32.mrf.mxu1  ;;  %12368 = vmatmul.mubr.msk.f32.gmra.mxu1 %vm341_vm0, %v14685_v10  ;;  %17028 = vst [vmem:[#allocation27_spill] sm:$0xff] %v14701_v60  ;;  %17029 = vst [vmem:[#allocation4_spill] sm:$0xff] %v14703_v63  ;;  %v12128_v29 = vpop.f32.mrf.mxu0  ;;  %12427 = vmatmul.mubr.msk.f32.gmra.mxu0 %vm341_vm0, %v5034_v57 }
 0x1a6   : > { %v14696_v9 = vadd.f32 %v2923_v18, %v2671_v45  ;;  %v2674_v12 = vadd.f32 %v12069_v6, %v14474_v2  ;;  %12370 = vmatprep.mubr.msk.f32.mxu1 %vm341_vm0, %v14687_v5  ;;  %12429 = vmatprep.mubr.msk.f32.mxu0 %vm341_vm0, %v5035_v50  ;;  %v5036_v18 = vld [vmem:[#allocation2 + $0x190] sm:$0xff]  ;;  %v5037_v45 = vld [vmem:[#allocation2 + $0x1a8] sm:$0xff] }
 0x1a7   : > { %v2546_v52 = vpop.f32.mrf.mxu1  ;;  %v2963_v2 = vpop.f32.mrf.mxu0 }
 0x1a8   : > { %v14706_v43 = vadd.f32 %v12119_v25, %v2674_v12  ;;  %v2673_v46 = vadd.f32 %v2546_v52, %v14481_v22  ;;  %v14717_v25 = vld [vmem:[#allocation2 + $0x14e] sm:$0xff]  ;;  %v14719_v22 = vld [vmem:[#allocation2 + $0x166] sm:$0xff] }
 0x1a9   : > { %v12072_v48 = vpop.f32.mrf.mxu1  ;;  %12371 = vmatmul.mubr.msk.f32.gmra.mxu1 %vm341_vm0, %v14701_v60  ;;  %17030 = vst [vmem:[#allocation5_spill] sm:$0xff] %v14717_v25  ;;  %17031 = vst [vmem:[#allocation7_spill] sm:$0xff] %v14719_v22  ;;  %v12131_v50 = vpop.f32.mrf.mxu0  ;;  %12430 = vmatmul.mubr.msk.f32.gmra.mxu0 %vm341_vm0, %v5036_v18 }
 0x1aa   : > { %v14712_v6 = vadd.f32 %v2933_v38, %v2673_v46  ;;  %v2676_v5 = vadd.f32 %v12072_v48, %v14488_v56  ;;  %12373 = vmatprep.mubr.msk.f32.mxu1 %vm341_vm0, %v14703_v63  ;;  %12432 = vmatprep.mubr.msk.f32.mxu0 %vm341_vm0, %v5037_v45  ;;  %v5038_v38 = vld [vmem:[#allocation2 + $0x1b0] sm:$0xff]  ;;  %v5039_v48 = vld [vmem:[#allocation2 + $0x1c8] sm:$0xff] }
 0x1ab   : > { %v2556_v57 = vpop.f32.mrf.mxu1  ;;  %v2973_v56 = vpop.f32.mrf.mxu0 }
 0x1ac   : > { %v14722_v12 = vadd.f32 %v12122_v11, %v2676_v5  ;;  %v2675_v52 = vadd.f32 %v2556_v57, %v14495_v14  ;;  %v14733_v11 = vld [vmem:[#allocation2 + $0x16e] sm:$0xff]  ;;  %v14735_v14 = vld [vmem:[#allocation2 + $0x186] sm:$0xff] }
 0x1ad   : > { %v12075_v46 = vpop.f32.mrf.mxu1  ;;  %12374 = vmatmul.mubr.msk.f32.gmra.mxu1 %vm341_vm0, %v14717_v25  ;;  %17032 = vst [vmem:[#allocation28_spill] sm:$0xff] %v14733_v11  ;;  %17033 = vst [vmem:[#allocation6_spill] sm:$0xff] %v14735_v14  ;;  %v12134_v18 = vpop.f32.mrf.mxu0  ;;  %12433 = vmatmul.mubr.msk.f32.gmra.mxu0 %vm341_vm0, %v5038_v38 }
 0x1ae   : > { %v14728_v63 = vadd.f32 %v2943_v34, %v2675_v52  ;;  %v2678_v60 = vadd.f32 %v12075_v46, %v14502_v61  ;;  %12376 = vmatprep.mubr.msk.f32.mxu1 %vm341_vm0, %v14719_v22  ;;  %12435 = vmatprep.mubr.msk.f32.mxu0 %vm341_vm0, %v5039_v48  ;;  %v5040_v34 = vld [vmem:[#allocation2 + $0x1d0] sm:$0xff]  ;;  %v5041_v46 = vld [vmem:[#allocation2 + $0x1e8] sm:$0xff] }
 0x1af   : > { %v2566_v5 = vpop.f32.mrf.mxu1  ;;  %v2983_v61 = vpop.f32.mrf.mxu0 }
 0x1b0   : > { %v14738_v45 = vadd.f32 %v12125_v30, %v2678_v60  ;;  %v2677_v57 = vadd.f32 %v2566_v5, %v14509_v37  ;;  %v14749_v30 = vld [vmem:[#allocation2 + $0x18e] sm:$0xff]  ;;  %v14751_v37 = vld [vmem:[#allocation2 + $0x1a6] sm:$0xff] }
 0x1b1   : > { %v12078_v52 = vpop.f32.mrf.mxu1  ;;  %12377 = vmatmul.mubr.msk.f32.gmra.mxu1 %vm341_vm0, %v14733_v11  ;;  %17034 = vst [vmem:[#allocation29_spill] sm:$0xff] %v14749_v30  ;;  %17035 = vst [vmem:[#allocation30_spill] sm:$0xff] %v14751_v37  ;;  %v12137_v38 = vpop.f32.mrf.mxu0  ;;  %12436 = vmatmul.mubr.msk.f32.gmra.mxu0 %vm341_vm0, %v5040_v34 }
 0x1b2   : > { %v14744_v22 = vadd.f32 %v2953_v32, %v2677_v57  ;;  %v2680_v25 = vadd.f32 %v12078_v52, %v14516_v53  ;;  %12379 = vmatprep.mubr.msk.f32.mxu1 %vm341_vm0, %v14735_v14  ;;  %12438 = vmatprep.mubr.msk.f32.mxu0 %vm341_vm0, %v5041_v46  ;;  %v5042_v32 = vld [vmem:[#allocation2 + $0x1f0] sm:$0xff]  ;;  %v5043_v52 = vld [vmem:[#allocation2 + $0x208] sm:$0xff] }
 0x1b3   : > { %v2576_v60 = vpop.f32.mrf.mxu1  ;;  %v2993_v53 = vpop.f32.mrf.mxu0 }
 0x1b4   : > { %v14754_v48 = vadd.f32 %v12128_v29, %v2680_v25  ;;  %v2679_v5 = vadd.f32 %v2576_v60, %v14523_v4  ;;  %v14765_v29 = vld [vmem:[#allocation2 + $0x1ae] sm:$0xff]  ;;  %v14767_v4 = vld [vmem:[#allocation2 + $0x1c6] sm:$0xff] }
 0x1b5   : > { %v12081_v57 = vpop.f32.mrf.mxu1  ;;  %12380 = vmatmul.mubr.msk.f32.gmra.mxu1 %vm341_vm0, %v14749_v30  ;;  %17036 = vst [vmem:[#allocation8_spill] sm:$0xff] %v14765_v29  ;;  %17037 = vst [vmem:[#allocation9_spill] sm:$0xff] %v14767_v4  ;;  %v12140_v34 = vpop.f32.mrf.mxu0  ;;  %12439 = vmatmul.mubr.msk.f32.gmra.mxu0 %vm341_vm0, %v5042_v32 }
 0x1b6   : > { %v14760_v14 = vadd.f32 %v2963_v2, %v2679_v5  ;;  %v2682_v11 = vadd.f32 %v12081_v57, %v14530_v55  ;;  %12382 = vmatprep.mubr.msk.f32.mxu1 %vm341_vm0, %v14751_v37  ;;  %12441 = vmatprep.mubr.msk.f32.mxu0 %vm341_vm0, %v5043_v52  ;;  %v5044_v2 = vld [vmem:[#allocation2 + $0x210] sm:$0xff]  ;;  %v5045_v57 = vld [vmem:[#allocation2 + $0x228] sm:$0xff] }
 0x1b7   : > { %v2586_v25 = vpop.f32.mrf.mxu1  ;;  %v3003_v55 = vpop.f32.mrf.mxu0 }
 0x1b8   : > { %v14770_v46 = vadd.f32 %v12131_v50, %v2682_v11  ;;  %v2681_v60 = vadd.f32 %v2586_v25, %v14536_v28  ;;  %v14781_v50 = vld [vmem:[#allocation2 + $0x1ce] sm:$0xff]  ;;  %v14783_v28 = vld [vmem:[#allocation2 + $0x1e6] sm:$0xff] }
 0x1b9   : > { %v12084_v5 = vpop.f32.mrf.mxu1  ;;  %12383 = vmatmul.mubr.msk.f32.gmra.mxu1 %vm341_vm0, %v14765_v29  ;;  %17038 = vst [vmem:[#allocation31_spill] sm:$0xff] %v14781_v50  ;;  %17039 = vst [vmem:[#allocation32_spill] sm:$0xff] %v14783_v28  ;;  %v12143_v32 = vpop.f32.mrf.mxu0  ;;  %12442 = vmatmul.mubr.msk.f32.gmra.mxu0 %vm341_vm0, %v5044_v2 }
 0x1ba   : > { %v14776_v37 = vadd.f32 %v2973_v56, %v2681_v60  ;;  %v2684_v30 = vadd.f32 %v12084_v5, %v14543_v16  ;;  %12385 = vmatprep.mubr.msk.f32.mxu1 %vm341_vm0, %v14767_v4  ;;  %12444 = vmatprep.mubr.msk.f32.mxu0 %vm341_vm0, %v5045_v57  ;;  %v5046_v56 = vld [vmem:[#allocation2 + $0x230] sm:$0xff]  ;;  %v5047_v5 = vld [vmem:[#allocation2 + $0x248] sm:$0xff] }
 0x1bb   : > { %v2596_v11 = vpop.f32.mrf.mxu1  ;;  %v3013_v16 = vpop.f32.mrf.mxu0 }
 0x1bc   : > { %v14786_v52 = vadd.f32 %v12134_v18, %v2684_v30  ;;  %v2683_v25 = vadd.f32 %v2596_v11, %v14549_v31  ;;  %v14797_v18 = vld [vmem:[#allocation2 + $0x1ee] sm:$0xff]  ;;  %v14799_v31 = vld [vmem:[#allocation2 + $0x206] sm:$0xff] }
 0x1bd   : > { %v12087_v60 = vpop.f32.mrf.mxu1  ;;  %12386 = vmatmul.mubr.msk.f32.gmra.mxu1 %vm341_vm0, %v14781_v50  ;;  %17040 = vst [vmem:[#allocation10_spill] sm:$0xff] %v14797_v18  ;;  %17041 = vst [vmem:[#allocation11_spill] sm:$0xff] %v14799_v31  ;;  %v12146_v2 = vpop.f32.mrf.mxu0  ;;  %12445 = vmatmul.mubr.msk.f32.gmra.mxu0 %vm341_vm0, %v5046_v56 }
 0x1be   : > { %v14792_v4 = vadd.f32 %v2983_v61, %v2683_v25  ;;  %v2686_v29 = vadd.f32 %v12087_v60, %v14556_v54  ;;  %12388 = vmatprep.mubr.msk.f32.mxu1 %vm341_vm0, %v14783_v28  ;;  %12447 = vmatprep.mubr.msk.f32.mxu0 %vm341_vm0, %v5047_v5  ;;  %v5048_v61 = vld [vmem:[#allocation2 + $0x250] sm:$0xff]  ;;  %v5049_v60 = vld [vmem:[#allocation2 + $0x268] sm:$0xff] }
 0x1bf   : > { %v2606_v30 = vpop.f32.mrf.mxu1  ;;  %v3023_v54 = vpop.f32.mrf.mxu0 }
 0x1c0   : > { %v14802_v57 = vadd.f32 %v12137_v38, %v2686_v29  ;;  %v2685_v11 = vadd.f32 %v2606_v30, %v14561_v7  ;;  %v14813_v38 = vld [vmem:[#allocation2 + $0x20e] sm:$0xff]  ;;  %v14815_v7 = vld [vmem:[#allocation2 + $0x226] sm:$0xff] }
 0x1c1   : > { %v12090_v25 = vpop.f32.mrf.mxu1  ;;  %12389 = vmatmul.mubr.msk.f32.gmra.mxu1 %vm341_vm0, %v14797_v18  ;;  %17042 = vst [vmem:[#allocation33_spill] sm:$0xff] %v14813_v38  ;;  %17043 = vst [vmem:[#allocation34_spill] sm:$0xff] %v14815_v7  ;;  %v12149_v56 = vpop.f32.mrf.mxu0  ;;  %12448 = vmatmul.mubr.msk.f32.gmra.mxu0 %vm341_vm0, %v5048_v61 }
 0x1c2   : > { %v14808_v28 = vadd.f32 %v2993_v53, %v2685_v11  ;;  %v2688_v50 = vadd.f32 %v12090_v25, %v14567_v3  ;;  %12391 = vmatprep.mubr.msk.f32.mxu1 %vm341_vm0, %v14799_v31  ;;  %12450 = vmatprep.mubr.msk.f32.mxu0 %vm341_vm0, %v5049_v60  ;;  %v5050_v53 = vld [vmem:[#allocation2 + $0x270] sm:$0xff] }
 0x1c3   : > { %v2616_v29 = vpop.f32.mrf.mxu1  ;;  %v3033_v3 = vpop.f32.mrf.mxu0  ;;  %v5793_v25 = vld [vmem:[#allocation2 + $0x8c] sm:$0xff] }
 0x1c4   : > { %v14818_v5 = vadd.f32 %v12140_v34, %v2688_v50  ;;  %v2687_v30 = vadd.f32 %v2616_v29, %v14572_v26  ;;  %v14829_v34 = vld [vmem:[#allocation2 + $0x22e] sm:$0xff]  ;;  %v14831_v26 = vld [vmem:[#allocation2 + $0x246] sm:$0xff] }
 0x1c5   : > { %v12093_v11 = vpop.f32.mrf.mxu1  ;;  %12392 = vmatmul.mubr.msk.f32.gmra.mxu1 %vm341_vm0, %v14813_v38  ;;  %17044 = vst [vmem:[#allocation12_spill] sm:$0xff] %v14829_v34  ;;  %17045 = vst [vmem:[#allocation13_spill] sm:$0xff] %v14831_v26  ;;  %v12152_v61 = vpop.f32.mrf.mxu0  ;;  %12451 = vmatmul.mubr.msk.f32.gmra.mxu0 %vm341_vm0, %v5050_v53  ;;  %v14845_v53 = vld [vmem:[#allocation2 + $0x24e] sm:$0xff] }
 0x1c6   : > { %v14824_v31 = vadd.f32 %v3003_v55, %v2687_v30  ;;  %v2690_v18 = vadd.f32 %v12093_v11, %v14578_v41  ;;  %12394 = vmatprep.mubr.msk.f32.mxu1 %vm341_vm0, %v14815_v7  ;;  %12505 = vmatprep.mubr.msk.f32.mxu0 %vm341_vm0, %v5793_v25  ;;  %v5795_v30 = vld [vmem:[#allocation2 + $0xac] sm:$0xff]  ;;  %17046 = vst [vmem:[#allocation35_spill] sm:$0xff] %v14845_v53 }
 0x1c7   : > { %v2626_v50 = vpop.f32.mrf.mxu1  ;;  %v3043_v41 = vpop.f32.mrf.mxu0 }
 0x1c8   : > { %v14834_v60 = vadd.f32 %v12143_v32, %v2690_v18  ;;  %v2689_v29 = vadd.f32 %v2626_v50, %v14583_v39  ;;  %v14850_v39 = vld [vmem:[%s16787_s2 + $0x90] sm:$0xff]  ;;  %v14852_v18 = vld [vmem:[#allocation2 + $0x266] sm:$0xff] }
 0x1c9   : > { %v12096_v55 = vpop.f32.mrf.mxu1  ;;  %12395 = vmatmul.mubr.msk.f32.gmra.mxu1 %vm341_vm0, %v14829_v34  ;;  %17047 = vst [vmem:[#allocation36_spill] sm:$0xff] %v14852_v18  ;;  %v12207_v25 = vpop.f32.mrf.mxu0  ;;  %12506 = vmatmul.mubr.msk.f32.vlgmr.msra.gmra.mxu0 %vm341_vm0, %v14427_v27  ;;  %v5796_v50 = vld [vmem:[#allocation2 + $0xb4] sm:$0xff] }
 0x1ca   : > { %v14840_v11 = vadd.f32 %v3013_v16, %v2689_v29  ;;  %v2692_v7 = vadd.f32 %v12096_v55, %v14597_v24  ;;  %12397 = vmatprep.mubr.msk.f32.mxu1 %vm341_vm0, %v14831_v26  ;;  %12604 = vmatpush3.msra.mxu0 %v14592_v15  ;;  %v14863_v26 = vld [vmem:[#allocation2 + $0xcc] sm:$0xff] }
 0x1cb   : > { %v2636_v32 = vpop.f32.mrf.mxu1  ;;  %12508 = vmatprep.mubr.msk.f32.mxu0 %vm341_vm0, %v5795_v30  ;;  %v3667_v55 = vpop.f32.mrf.mxu0  ;;  %12703 = vmatprep.subr.mxu0 %v14850_v39  ;;  %v14871_v15 = vld [vmem:[#allocation2 + $0x26e] sm:$0xff] }
 0x1cc   : > { %v14856_v16 = vadd.f32 %v12146_v2, %v2692_v7  ;;  %v2691_v24 = vadd.f32 %v2636_v32, %v14605_v21  ;;  %17048 = vst [vmem:[#allocation14_spill] sm:$0xff] %v14871_v15  ;;  %v5406_v2 = vld [vmem:[#allocation2 + $0x8a] sm:$0xff] }
 0x1cd   : > { %v12099_v29 = vpop.f32.mrf.mxu1  ;;  %12398 = vmatmul.mubr.msk.f32.gmra.mxu1 %vm341_vm0, %v14845_v53  ;;  %v12210_v7 = vpop.f32.mrf.mxu0  ;;  %12509 = vmatmul.mubr.msk.f32.gmra.mxu0 %vm341_vm0, %v5796_v50 }
 0x1ce   : > { %v14866_v34 = vadd.f32 %v3023_v54, %v2691_v24  ;;  %v2694_v27 = vadd.f32 %v12099_v29, %v14613_v40  ;;  %12400 = vmatprep.mubr.msk.f32.mxu1 %vm341_vm0, %v14852_v18  ;;  %12511 = vmatprep.mubr.msk.f32.mxu0 %vm341_vm0, %v14863_v26  ;;  %v5798_v54 = vld [vmem:[#allocation2 + $0xd4] sm:$0xff]  ;;  %v14881_v29 = vld [vmem:[#allocation2 + $0xec] sm:$0xff] }
 0x1cf   : > { %v2646_v21 = vpop.f32.mrf.mxu1  ;;  %v3677_v40 = vpop.f32.mrf.mxu0  ;;  %17049 = vst [vmem:[#allocation15_spill] sm:$0xff] %v14881_v29 }
 0x1d0   : > { %v14874_v30 = vadd.f32 %v12149_v56, %v2694_v27  ;;  %v2693_v32 = vadd.f32 %v2646_v21, %v14619_v0  ;;  %v5407_v56 = vld [vmem:[#allocation2 + $0x92] sm:$0xff]  ;;  %v5408_v0 = vld [vmem:[#allocation2 + $0xaa] sm:$0xff] }
 0x1d1   : > { %v12102_v24 = vpop.f32.mrf.mxu1  ;;  %12401 = vmatmul.mubr.msk.f32.gmra.mxu1 %vm341_vm0, %v14871_v15  ;;  %v12213_v27 = vpop.f32.mrf.mxu0  ;;  %12512 = vmatmul.mubr.msk.f32.gmra.mxu0 %vm341_vm0, %v5798_v54  ;;  %v5800_v15 = vld [vmem:[#allocation2 + $0xf4] sm:$0xff] }
 0x1d2   : > { %v14883_v18 = vadd.f32 %v3033_v3, %v2693_v32  ;;  %v2696_v53 = vadd.f32 %v12102_v24, %v14624_v23  ;;  %12455 = vmatprep.mubr.msk.f32.mxu1 %vm341_vm0, %v5406_v2  ;;  %12514 = vmatprep.mubr.msk.f32.mxu0 %vm341_vm0, %v14881_v29  ;;  %v14896_v23 = vld [vmem:[%s16787_s2 + $0x88] sm:$0xff] }
 0x1d3   : > { %v2656_v50 = vpop.f32.mrf.mxu1  ;;  %v3687_v2 = vpop.f32.mrf.mxu0  ;;  %v14899_v32 = vld [vmem:[#allocation2 + $0x10c] sm:$0xff] }
 0x1d4   : > { %v14888_v21 = vadd.f32 %v12152_v61, %v2696_v53  ;;  %v2695_v38 = vadd.f32 %v2656_v50, %v14634_v36  ;;  %17050 = vst [vmem:[#allocation37_spill] sm:$0xff] %v14899_v32  ;;  %v5409_v36 = vld [vmem:[#allocation2 + $0xb2] sm:$0xff]  ;;  %v14906_v24 = vld [vmem:[#allocation2 + $0xca] sm:$0xff] }
 0x1d5   : > { %v12157_v3 = vpop.f32.mrf.mxu1  ;;  %12456 = vmatmul.mubr.msk.f32.vlgmr.msra.gmra.mxu1 %vm341_vm0, %v5407_v56  ;;  %17051 = vst [vmem:[#allocation38_spill] sm:$0xff] %v14906_v24  ;;  %v12216_v50 = vpop.f32.mrf.mxu0  ;;  %12515 = vmatmul.mubr.msk.f32.gmra.mxu0 %vm341_vm0, %v5800_v15 }
 0x1d6   : > { %v14901_v54 = vadd.f32 %v3043_v41, %v2695_v38  ;;  %v3440_v61 = vadd.f32 %v12157_v3, %v14643_v59  ;;  %12554 = vmatpush3.msra.mxu1 %v14631_v17  ;;  %12458 = vmatprep.mubr.msk.f32.mxu1 %vm341_vm0, %v5408_v0  ;;  %v5802_v59 = vld [vmem:[#allocation2 + $0x114] sm:$0xff]  ;;  %v14916_v0 = vld [vmem:[#allocation2 + $0x12c] sm:$0xff] }
 0x1d7   : > { %v3280_v53 = vpop.f32.mrf.mxu1  ;;  %12653 = vmatprep.subr.mxu1 %v14896_v23  ;;  %12517 = vmatprep.mubr.msk.f32.mxu0 %vm341_vm0, %v14899_v32  ;;  %v3697_v41 = vpop.f32.mrf.mxu0  ;;  %17052 = vst [vmem:[#allocation16_spill] sm:$0xff] %v14916_v0 }
 0x1d8   : > { %v14910_v56 = vadd.f32 %v12207_v25, %v3440_v61  ;;  %v3439_v38 = vadd.f32 %v3280_v53, %v14648_v51  ;;  %v14923_v25 = vld [vmem:[#allocation2 + $0xd2] sm:$0xff]  ;;  %v14925_v61 = vld [vmem:[#allocation2 + $0xea] sm:$0xff] }
 0x1d9   : > { %v12160_v17 = vpop.f32.mrf.mxu1  ;;  %12459 = vmatmul.mubr.msk.f32.gmra.mxu1 %vm341_vm0, %v5409_v36  ;;  %17053 = vst [vmem:[#allocation17_spill] sm:$0xff] %v14923_v25  ;;  %17054 = vst [vmem:[#allocation39_spill] sm:$0xff] %v14925_v61  ;;  %v12219_v53 = vpop.f32.mrf.mxu0  ;;  %12518 = vmatmul.mubr.msk.f32.gmra.mxu0 %vm341_vm0, %v5802_v59  ;;  %v14944_v59 = vld [vmem:[#allocation2 + $0x10a] sm:$0xff] }
 0x1da   : > { %v14918_v3 = vadd.f32 %v3667_v55, %v3439_v38  ;;  %v3442_v15 = vadd.f32 %v12160_v17, %v14658_v8  ;;  %12461 = vmatprep.mubr.msk.f32.mxu1 %vm341_vm0, %v14906_v24  ;;  %12520 = vmatprep.mubr.msk.f32.mxu0 %vm341_vm0, %v14916_v0  ;;  %v5804_v55 = vld [vmem:[#allocation2 + $0x134] sm:$0xff]  ;;  %v14935_v17 = vld [vmem:[#allocation2 + $0x14c] sm:$0xff]  ;;  %17057 = vst [vmem:[#allocation19_spill] sm:$0xff] %v14944_v59 }
 0x1db   : > { %v3290_v51 = vpop.f32.mrf.mxu1  ;;  %v3707_v38 = vpop.f32.mrf.mxu0  ;;  %17055 = vst [vmem:[#allocation40_spill] sm:$0xff] %v14935_v17 }
 0x1dc   : > { %v14928_v32 = vadd.f32 %v12210_v7, %v3442_v15  ;;  %v3441_v36 = vadd.f32 %v3290_v51, %v14664_v20  ;;  %v14942_v7 = vld [vmem:[#allocation2 + $0xf2] sm:$0xff] }
 0x1dd   : > { %v12163_v8 = vpop.f32.mrf.mxu1  ;;  %12462 = vmatmul.mubr.msk.f32.gmra.mxu1 %vm341_vm0, %v14923_v25  ;;  %17056 = vst [vmem:[#allocation18_spill] sm:$0xff] %v14942_v7  ;;  %v12222_v15 = vpop.f32.mrf.mxu0  ;;  %12521 = vmatmul.mubr.msk.f32.gmra.mxu0 %vm341_vm0, %v5804_v55 }
 0x1de   : > { %v14937_v24 = vadd.f32 %v3677_v40, %v3441_v36  ;;  %v3444_v29 = vadd.f32 %v12163_v8, %v14674_v35  ;;  %12464 = vmatprep.mubr.msk.f32.mxu1 %vm341_vm0, %v14925_v61  ;;  %12523 = vmatprep.mubr.msk.f32.mxu0 %vm341_vm0, %v14935_v17  ;;  %v5806_v40 = vld [vmem:[#allocation2 + $0x154] sm:$0xff]  ;;  %v14954_v8 = vld [vmem:[#allocation2 + $0x16c] sm:$0xff] }
 0x1df   : > { %v3300_v20 = vpop.f32.mrf.mxu1  ;;  %v3717_v36 = vpop.f32.mrf.mxu0  ;;  %17058 = vst [vmem:[#allocation41_spill] sm:$0xff] %v14954_v8 }
 0x1e0   : > { %v14947_v51 = vadd.f32 %v12213_v27, %v3444_v29  ;;  %v3443_v25 = vadd.f32 %v3300_v20, %v14680_v1  ;;  %v14961_v29 = vld [vmem:[#allocation2 + $0x112] sm:$0xff]  ;;  %v14963_v27 = vld [vmem:[#allocation2 + $0x12a] sm:$0xff] }
 0x1e1   : > { %v12166_v35 = vpop.f32.mrf.mxu1  ;;  %12465 = vmatmul.mubr.msk.f32.gmra.mxu1 %vm341_vm0, %v14942_v7  ;;  %17059 = vst [vmem:[#allocation42_spill] sm:$0xff] %v14961_v29  ;;  %17060 = vst [vmem:[#allocation20_spill] sm:$0xff] %v14963_v27  ;;  %v12225_v55 = vpop.f32.mrf.mxu0  ;;  %12524 = vmatmul.mubr.msk.f32.gmra.mxu0 %vm341_vm0, %v5806_v40 }
 0x1e2   : > { %v14956_v61 = vadd.f32 %v3687_v2, %v3443_v25  ;;  %v3446_v0 = vadd.f32 %v12166_v35, %v14690_v42  ;;  %12467 = vmatprep.mubr.msk.f32.mxu1 %vm341_vm0, %v14944_v59  ;;  %12526 = vmatprep.mubr.msk.f32.mxu0 %vm341_vm0, %v14954_v8  ;;  %v5808_v2 = vld [vmem:[#allocation2 + $0x174] sm:$0xff]  ;;  %v14973_v35 = vld [vmem:[#allocation2 + $0x18c] sm:$0xff] }
 0x1e3   : > { %v3310_v1 = vpop.f32.mrf.mxu1  ;;  %v3727_v25 = vpop.f32.mrf.mxu0  ;;  %17061 = vst [vmem:[#allocation21_spill] sm:$0xff] %v14973_v35 }
 0x1e4   : > { %v14966_v20 = vadd.f32 %v12216_v50, %v3446_v0  ;;  %v3445_v7 = vadd.f32 %v3310_v1, %v14696_v9  ;;  %v14980_v50 = vld [vmem:[#allocation2 + $0x132] sm:$0xff]  ;;  %v14982_v0 = vld [vmem:[#allocation2 + $0x14a] sm:$0xff] }
 0x1e5   : > { %v12169_v42 = vpop.f32.mrf.mxu1  ;;  %12468 = vmatmul.mubr.msk.f32.gmra.mxu1 %vm341_vm0, %v14961_v29  ;;  %17062 = vst [vmem:[#allocation43_spill] sm:$0xff] %v14980_v50  ;;  %17063 = vst [vmem:[#allocation22_spill] sm:$0xff] %v14982_v0  ;;  %v12228_v40 = vpop.f32.mrf.mxu0  ;;  %12527 = vmatmul.mubr.msk.f32.gmra.mxu0 %vm341_vm0, %v5808_v2 }
 0x1e6   : > { %v14975_v59 = vadd.f32 %v3697_v41, %v3445_v7  ;;  %v3448_v17 = vadd.f32 %v12169_v42, %v14706_v43  ;;  %12470 = vmatprep.mubr.msk.f32.mxu1 %vm341_vm0, %v14963_v27  ;;  %12529 = vmatprep.mubr.msk.f32.mxu0 %vm341_vm0, %v14973_v35  ;;  %v5810_v41 = vld [vmem:[#allocation2 + $0x194] sm:$0xff]  ;;  %v14992_v42 = vld [vmem:[#allocation2 + $0x1ac] sm:$0xff] }
 0x1e7   : > { %v3320_v9 = vpop.f32.mrf.mxu1  ;;  %v3737_v7 = vpop.f32.mrf.mxu0  ;;  %17064 = vst [vmem:[#allocation23_spill] sm:$0xff] %v14992_v42 }
 0x1e8   : > { %v14985_v1 = vadd.f32 %v12219_v53, %v3448_v17  ;;  %v3447_v29 = vadd.f32 %v3320_v9, %v14712_v6  ;;  %v14999_v53 = vld [vmem:[#allocation2 + $0x152] sm:$0xff]  ;;  %v15001_v17 = vld [vmem:[#allocation2 + $0x16a] sm:$0xff] }
 0x1e9   : > { %v12172_v43 = vpop.f32.mrf.mxu1  ;;  %12471 = vmatmul.mubr.msk.f32.gmra.mxu1 %vm341_vm0, %v14980_v50  ;;  %17065 = vst [vmem:[#allocation44_spill] sm:$0xff] %v14999_v53  ;;  %17066 = vst [vmem:[#allocation45_spill] sm:$0xff] %v15001_v17  ;;  %v12231_v2 = vpop.f32.mrf.mxu0  ;;  %12530 = vmatmul.mubr.msk.f32.gmra.mxu0 %vm341_vm0, %v5810_v41 }
 0x1ea   : > { %v14994_v27 = vadd.f32 %v3707_v38, %v3447_v29  ;;  %v3450_v8 = vadd.f32 %v12172_v43, %v14722_v12  ;;  %12473 = vmatprep.mubr.msk.f32.mxu1 %vm341_vm0, %v14982_v0  ;;  %12532 = vmatprep.mubr.msk.f32.mxu0 %vm341_vm0, %v14992_v42  ;;  %v5812_v38 = vld [vmem:[#allocation2 + $0x1b4] sm:$0xff]  ;;  %v15011_v43 = vld [vmem:[#allocation2 + $0x1cc] sm:$0xff] }
 0x1eb   : > { %v3330_v6 = vpop.f32.mrf.mxu1  ;;  %v3747_v29 = vpop.f32.mrf.mxu0  ;;  %17067 = vst [vmem:[#allocation24_spill] sm:$0xff] %v15011_v43 }
 0x1ec   : > { %v15004_v9 = vadd.f32 %v12222_v15, %v3450_v8  ;;  %v3449_v50 = vadd.f32 %v3330_v6, %v14728_v63  ;;  %v15018_v15 = vld [vmem:[#allocation2 + $0x172] sm:$0xff]  ;;  %v15020_v8 = vld [vmem:[#allocation2 + $0x18a] sm:$0xff] }
 0x1ed   : > { %v12175_v12 = vpop.f32.mrf.mxu1  ;;  %12474 = vmatmul.mubr.msk.f32.gmra.mxu1 %vm341_vm0, %v14999_v53  ;;  %17068 = vst [vmem:[#allocation25_spill] sm:$0xff] %v15018_v15  ;;  %17069 = vst [vmem:[#allocation26_spill] sm:$0xff] %v15020_v8  ;;  %v12234_v41 = vpop.f32.mrf.mxu0  ;;  %12533 = vmatmul.mubr.msk.f32.gmra.mxu0 %vm341_vm0, %v5812_v38 }
 0x1ee   : > { %v15013_v0 = vadd.f32 %v3717_v36, %v3449_v50  ;;  %v3452_v35 = vadd.f32 %v12175_v12, %v14738_v45  ;;  %12476 = vmatprep.mubr.msk.f32.mxu1 %vm341_vm0, %v15001_v17  ;;  %12535 = vmatprep.mubr.msk.f32.mxu0 %vm341_vm0, %v15011_v43  ;;  %v5814_v36 = vld [vmem:[#allocation2 + $0x1d4] sm:$0xff]  ;;  %v15030_v12 = vld [vmem:[#allocation2 + $0x1ec] sm:$0xff] }
 0x1ef   : > { %v3340_v63 = vpop.f32.mrf.mxu1  ;;  %v3757_v50 = vpop.f32.mrf.mxu0 }
 0x1f0   : > { %v15023_v6 = vadd.f32 %v12225_v55, %v3452_v35  ;;  %v3451_v53 = vadd.f32 %v3340_v63, %v14744_v22  ;;  %v15037_v55 = vld [vmem:[#allocation2 + $0x192] sm:$0xff]  ;;  %v15039_v35 = vld [vmem:[#allocation2 + $0x1aa] sm:$0xff] }
 0x1f1   : > { %v12178_v45 = vpop.f32.mrf.mxu1  ;;  %12477 = vmatmul.mubr.msk.f32.gmra.mxu1 %vm341_vm0, %v15018_v15  ;;  %17070 = vst [vmem:[#allocation46_spill] sm:$0xff] %v15037_v55  ;;  %v12237_v38 = vpop.f32.mrf.mxu0  ;;  %12536 = vmatmul.mubr.msk.f32.gmra.mxu0 %vm341_vm0, %v5814_v36 }
 0x1f2   : > { %v15032_v17 = vadd.f32 %v3727_v25, %v3451_v53  ;;  %v3454_v42 = vadd.f32 %v12178_v45, %v14754_v48  ;;  %12479 = vmatprep.mubr.msk.f32.mxu1 %vm341_vm0, %v15020_v8  ;;  %12538 = vmatprep.mubr.msk.f32.mxu0 %vm341_vm0, %v15030_v12  ;;  %v5816_v25 = vld [vmem:[#allocation2 + $0x1f4] sm:$0xff]  ;;  %v15049_v45 = vld [vmem:[#allocation2 + $0x20c] sm:$0xff] }
 0x1f3   : > { %v3350_v22 = vpop.f32.mrf.mxu1  ;;  %v3767_v53 = vpop.f32.mrf.mxu0 }
 0x1f4   : > { %v15042_v63 = vadd.f32 %v12228_v40, %v3454_v42  ;;  %v3453_v15 = vadd.f32 %v3350_v22, %v14760_v14  ;;  %v15056_v40 = vld [vmem:[#allocation2 + $0x1b2] sm:$0xff]  ;;  %v15058_v42 = vld [vmem:[#allocation2 + $0x1ca] sm:$0xff] }
 0x1f5   : > { %v12181_v48 = vpop.f32.mrf.mxu1  ;;  %12480 = vmatmul.mubr.msk.f32.gmra.mxu1 %vm341_vm0, %v15037_v55  ;;  %17071 = vst [vmem:[#allocation47_spill] sm:$0xff] %v15056_v40  ;;  %17072 = vst [vmem:[#allocation48_spill] sm:$0xff] %v15058_v42  ;;  %v12240_v36 = vpop.f32.mrf.mxu0  ;;  %12539 = vmatmul.mubr.msk.f32.gmra.mxu0 %vm341_vm0, %v5816_v25  ;;  %v15073_v25 = vld [vmem:[#allocation2 + $0x1d2] sm:$0xff] }
 0x1f6   : > { %v15051_v8 = vadd.f32 %v3737_v7, %v3453_v15  ;;  %v3456_v43 = vadd.f32 %v12181_v48, %v14770_v46  ;;  %12482 = vmatprep.mubr.msk.f32.mxu1 %vm341_vm0, %v15039_v35  ;;  %12541 = vmatprep.mubr.msk.f32.mxu0 %vm341_vm0, %v15049_v45  ;;  %17073 = vst [vmem:[#allocation49_spill] sm:$0xff] %v15073_v25 }
 0x1f7   : > { %v3360_v14 = vpop.f32.mrf.mxu1  ;;  %v3777_v46 = vpop.f32.mrf.mxu0 }
 0x1f8   : > { %v15061_v22 = vadd.f32 %v12231_v2, %v3456_v43  ;;  %v3455_v55 = vadd.f32 %v3360_v14, %v14776_v37  ;;  %v15075_v43 = vld [vmem:[#allocation2 + $0x1ea] sm:$0xff] }
 0x1f9   : > { %v12184_v7 = vpop.f32.mrf.mxu1  ;;  %12483 = vmatmul.mubr.msk.f32.gmra.mxu1 %vm341_vm0, %v15056_v40  ;;  %17074 = vst [vmem:[#allocation50_spill] sm:$0xff] %v15075_v43  ;;  %v12243_v37 = vpop.f32.mrf.mxu0  ;;  %12542 = vmatmul.mubr.msk.f32.gmra.mxu0 %vm341_vm0, %v14587_v13  ;;  %v15093_v13 = vld [vmem:[#allocation2 + $0x1f2] sm:$0xff] }
 0x1fa   : > { %v15068_v15 = vadd.f32 %v3747_v29, %v3455_v55  ;;  %v3458_v48 = vadd.f32 %v12184_v7, %v14786_v52  ;;  %12485 = vmatprep.mubr.msk.f32.mxu1 %vm341_vm0, %v15058_v42  ;;  %12544 = vmatprep.mubr.msk.f32.mxu0 %vm341_vm0, %v14594_v44  ;;  %v15086_v55 = vld [vmem:[#allocation2 + $0x24c] sm:$0xff]  ;;  %17075 = vst [vmem:[#allocation51_spill] sm:$0xff] %v15093_v13 }
 0x1fb   : > { %v3370_v2 = vpop.f32.mrf.mxu1  ;;  %v3787_v29 = vpop.f32.mrf.mxu0 }
 0x1fc   : > { %v15079_v14 = vadd.f32 %v12234_v41, %v3458_v48  ;;  %v3457_v40 = vadd.f32 %v3370_v2, %v14792_v4  ;;  %v15095_v41 = vld [vmem:[#allocation2 + $0x20a] sm:$0xff] }
 0x1fd   : > { %v12187_v52 = vpop.f32.mrf.mxu1  ;;  %12486 = vmatmul.mubr.msk.f32.gmra.mxu1 %vm341_vm0, %v15073_v25  ;;  %17076 = vst [vmem:[#allocation52_spill] sm:$0xff] %v15095_v41  ;;  %v12246_v44 = vpop.f32.mrf.mxu0  ;;  %12545 = vmatmul.mubr.msk.f32.gmra.mxu0 %vm341_vm0, %v14610_v47  ;;  %v15113_v47 = vld [vmem:[#allocation2 + $0x212] sm:$0xff] }
 0x1fe   : > { %v15088_v7 = vadd.f32 %v3757_v50, %v3457_v40  ;;  %v3460_v42 = vadd.f32 %v12187_v52, %v14802_v57  ;;  %12488 = vmatprep.mubr.msk.f32.mxu1 %vm341_vm0, %v15075_v43  ;;  %12547 = vmatprep.mubr.msk.f32.mxu0 %vm341_vm0, %v15086_v55  ;;  %v5822_v57 = vld [vmem:[#allocation2 + $0x254] sm:$0xff]  ;;  %v15106_v52 = vld [vmem:[#allocation2 + $0x26c] sm:$0xff]  ;;  %17077 = vst [vmem:[#allocation53_spill] sm:$0xff] %v15113_v47 }
 0x1ff   : > { %v3380_v4 = vpop.f32.mrf.mxu1  ;;  %v3797_v40 = vpop.f32.mrf.mxu0 }
 0x200   : > { %v15099_v48 = vadd.f32 %v12237_v38, %v3460_v42  ;;  %v3459_v2 = vadd.f32 %v3380_v4, %v14808_v28  ;;  %v15115_v38 = vld [vmem:[#allocation2 + $0x22a] sm:$0xff] }
 0x201   : > { %v12190_v50 = vpop.f32.mrf.mxu1  ;;  %12489 = vmatmul.mubr.msk.f32.gmra.mxu1 %vm341_vm0, %v15093_v13  ;;  %v12249_v42 = vpop.f32.mrf.mxu0  ;;  %12548 = vmatmul.mubr.msk.f32.gmra.mxu0 %vm341_vm0, %v5822_v57 }
 0x202   : > { %v15108_v43 = vadd.f32 %v3767_v53, %v3459_v2  ;;  %v3462_v25 = vadd.f32 %v12190_v50, %v14818_v5  ;;  %12491 = vmatprep.mubr.msk.f32.mxu1 %vm341_vm0, %v15095_v41  ;;  %12550 = vmatprep.mubr.msk.f32.mxu0 %vm341_vm0, %v15106_v52  ;;  %v5824_v53 = vld [vmem:[#allocation2 + $0x274] sm:$0xff] }
 0x203   : > { %v3390_v28 = vpop.f32.mrf.mxu1  ;;  %v3807_v2 = vpop.f32.mrf.mxu0 }
 0x204   : > { %v15118_v4 = vadd.f32 %v12240_v36, %v3462_v25  ;;  %v3461_v13 = vadd.f32 %v3390_v28, %v14824_v31  ;;  %v15130_v36 = vld [vmem:[#allocation2 + $0x232] sm:$0xff]  ;;  %v15132_v31 = vld [vmem:[#allocation2 + $0x24a] sm:$0xff] }
 0x205   : > { %v12193_v5 = vpop.f32.mrf.mxu1  ;;  %12492 = vmatmul.mubr.msk.f32.gmra.mxu1 %vm341_vm0, %v15113_v47  ;;  %v12252_v57 = vpop.f32.mrf.mxu0  ;;  %12551 = vmatmul.mubr.msk.f32.gmra.mxu0 %vm341_vm0, %v5824_v53  ;;  %v15147_v53 = vld [vmem:[#allocation2 + $0x252] sm:$0xff] }
 0x206   : > { %v15125_v50 = vadd.f32 %v3777_v46, %v3461_v13  ;;  %v3464_v41 = vadd.f32 %v12193_v5, %v14834_v60  ;;  %12494 = vmatprep.mubr.msk.f32.mxu1 %vm341_vm0, %v15115_v38  ;;  %12605 = vmatprep.mubr.msk.f32.mxu0 %vm341_vm0, %v14639_v19 }
 0x207   : > { %v3400_v25 = vpop.f32.mrf.mxu1  ;;  %v3817_v60 = vpop.f32.mrf.mxu0 }
 0x208   : > { %v15135_v28 = vadd.f32 %v12243_v37, %v3464_v41  ;;  %v3463_v47 = vadd.f32 %v3400_v25, %v14840_v11  ;;  %v15152_v11 = vld [vmem:[%s16787_s2 + $0xa0] sm:$0xff]  ;;  %v15154_v37 = vld [vmem:[#allocation2 + $0x26a] sm:$0xff] }
 0x209   : > { %v12196_v46 = vpop.f32.mrf.mxu1  ;;  %12495 = vmatmul.mubr.msk.f32.gmra.mxu1 %vm341_vm0, %v15130_v36  ;;  %17078 = vst [vmem:[#allocation54_spill] sm:$0xff] %v15154_v37  ;;  %v12307_v41 = vpop.f32.mrf.mxu0  ;;  %12606 = vmatmul.mubr.msk.f32.vlgmr.msra.gmra.mxu0 %vm341_vm0, %v14653_v62 }
 0x20a   : > { %v15142_v13 = vadd.f32 %v3787_v29, %v3463_v47  ;;  %v3466_v5 = vadd.f32 %v12196_v46, %v14856_v16  ;;  %12497 = vmatprep.mubr.msk.f32.mxu1 %vm341_vm0, %v15132_v31  ;;  %12704 = vmatpush3.msra.mxu0 %v14850_v39 }
 0x20b   : > { %v3410_v19 = vpop.f32.mrf.mxu1  ;;  %12608 = vmatprep.mubr.msk.f32.mxu0 %vm341_vm0, %v14655_v49  ;;  %v4441_v25 = vpop.f32.mrf.mxu0  ;;  %12803 = vmatprep.subr.mxu0 %v15152_v11 }
 0x20c   : > { %v15158_v29 = vadd.f32 %v12246_v44, %v3466_v5  ;;  %v3465_v16 = vadd.f32 %v3410_v19, %v14866_v34  ;;  %v15172_v34 = vld [vmem:[#allocation2 + $0x272] sm:$0xff]  ;;  %v6181_v44 = vld [vmem:[#allocation2 + $0xc4] sm:$0xff] }
 0x20d   : > { %v12199_v47 = vpop.f32.mrf.mxu1  ;;  %12498 = vmatmul.mubr.msk.f32.gmra.mxu1 %vm341_vm0, %v15147_v53  ;;  %v12310_v5 = vpop.f32.mrf.mxu0  ;;  %12609 = vmatmul.mubr.msk.f32.gmra.mxu0 %vm341_vm0, %v14669_v33  ;;  %v6183_v33 = vld [vmem:[#allocation2 + $0xe4] sm:$0xff] }
 0x20e   : > { %v15167_v46 = vadd.f32 %v3797_v40, %v3465_v16  ;;  %v3468_v62 = vadd.f32 %v12199_v47, %v14874_v30  ;;  %12500 = vmatprep.mubr.msk.f32.mxu1 %vm341_vm0, %v15154_v37  ;;  %12611 = vmatprep.mubr.msk.f32.mxu0 %vm341_vm0, %v14671_v58 }
 0x20f   : > { %v3420_v39 = vpop.f32.mrf.mxu1  ;;  %v4451_v30 = vpop.f32.mrf.mxu0 }
 0x210   : > { %v15176_v49 = vadd.f32 %v12249_v42, %v3468_v62  ;;  %v3467_v19 = vadd.f32 %v3420_v39, %v14883_v18  ;;  %v17079_v62 = vld [vmem:[#allocation3_spill] sm:$0xff] }
 0x211   : > { %v12202_v40 = vpop.f32.mrf.mxu1  ;;  %12501 = vmatmul.mubr.msk.f32.gmra.mxu1 %vm341_vm0, %v15172_v34  ;;  %v12313_v42 = vpop.f32.mrf.mxu0  ;;  %12612 = vmatmul.mubr.msk.f32.gmra.mxu0 %vm341_vm0, %v14685_v10 }
 0x212   : > { %v15183_v16 = vadd.f32 %v3807_v2, %v3467_v19  ;;  %v3470_v47 = vadd.f32 %v12202_v40, %v14888_v21  ;;  %12555 = vmatprep.mubr.msk.f32.mxu1 %vm341_vm0, %v6181_v44  ;;  %12614 = vmatprep.mubr.msk.f32.mxu0 %vm341_vm0, %v17079_v62  ;;  %v15197_v2 = vld [vmem:[%s16787_s2 + $0x98] sm:$0xff]  ;;  %v17080_v19 = vld [vmem:[#allocation27_spill] sm:$0xff] }
 0x213   : > { %v3430_v37 = vpop.f32.mrf.mxu1  ;;  %v4461_v39 = vpop.f32.mrf.mxu0 }
 0x214   : > { %v15189_v18 = vadd.f32 %v12252_v57, %v3470_v47  ;;  %v3469_v58 = vadd.f32 %v3430_v37, %v14901_v54  ;;  %v15206_v57 = vld [vmem:[#allocation2 + $0x104] sm:$0xff] }
 0x215   : > { %v12257_v21 = vpop.f32.mrf.mxu1  ;;  %12556 = vmatmul.mubr.msk.f32.vlgmr.msra.gmra.mxu1 %vm341_vm0, %v14863_v26  ;;  %v12316_v37 = vpop.f32.mrf.mxu0  ;;  %12615 = vmatmul.mubr.msk.f32.gmra.mxu0 %vm341_vm0, %v17080_v19  ;;  %v17084_v19 = vld [vmem:[#allocation7_spill] sm:$0xff] }
 0x216   : > { %v15201_v44 = vadd.f32 %v3817_v60, %v3469_v58  ;;  %v4214_v10 = vadd.f32 %v12257_v21, %v14910_v56  ;;  %12654 = vmatpush3.msra.mxu1 %v14896_v23  ;;  %12558 = vmatprep.mubr.msk.f32.mxu1 %vm341_vm0, %v6183_v33  ;;  %v17081_v60 = vld [vmem:[#allocation4_spill] sm:$0xff]  ;;  %v17082_v23 = vld [vmem:[#allocation15_spill] sm:$0xff] }
 0x217   : > { %v4054_v54 = vpop.f32.mrf.mxu1  ;;  %12753 = vmatprep.subr.mxu1 %v15197_v2  ;;  %12617 = vmatprep.mubr.msk.f32.mxu0 %vm341_vm0, %v17081_v60  ;;  %v4471_v47 = vpop.f32.mrf.mxu0 }
 0x218   : > { %v15211_v40 = vadd.f32 %v12307_v41, %v4214_v10  ;;  %v4213_v26 = vadd.f32 %v4054_v54, %v14918_v3  ;;  %v15223_v41 = vld [vmem:[#allocation2 + $0x124] sm:$0xff]  ;;  %v17083_v3 = vld [vmem:[#allocation5_spill] sm:$0xff] }
 0x219   : > { %v12260_v56 = vpop.f32.mrf.mxu1  ;;  %12559 = vmatmul.mubr.msk.f32.gmra.mxu1 %vm341_vm0, %v17082_v23  ;;  %v12319_v21 = vpop.f32.mrf.mxu0  ;;  %12618 = vmatmul.mubr.msk.f32.gmra.mxu0 %vm341_vm0, %v17083_v3 }
 0x21a   : > { %v15218_v33 = vadd.f32 %v4441_v25, %v4213_v26  ;;  %v4216_v58 = vadd.f32 %v12260_v56, %v14928_v32  ;;  %12561 = vmatprep.mubr.msk.f32.mxu1 %vm341_vm0, %v15206_v57  ;;  %12620 = vmatprep.mubr.msk.f32.mxu0 %vm341_vm0, %v17084_v19  ;;  %v17085_v26 = vld [vmem:[#allocation37_spill] sm:$0xff]  ;;  %v17088_v19 = vld [vmem:[#allocation6_spill] sm:$0xff] }
 0x21b   : > { %v4064_v62 = vpop.f32.mrf.mxu1  ;;  %v4481_v32 = vpop.f32.mrf.mxu0 }
 0x21c   : > { %v15227_v10 = vadd.f32 %v12310_v5, %v4216_v58  ;;  %v4215_v54 = vadd.f32 %v4064_v62, %v14937_v24  ;;  %v15239_v5 = vld [vmem:[#allocation2 + $0x144] sm:$0xff] }
 0x21d   : > { %v12263_v25 = vpop.f32.mrf.mxu1  ;;  %12562 = vmatmul.mubr.msk.f32.gmra.mxu1 %vm341_vm0, %v17085_v26  ;;  %17086 = vst [vmem:[#allocation3_spill] sm:$0xff] %v15239_v5  ;;  %v12322_v58 = vpop.f32.mrf.mxu0  ;;  %v17087_v24 = vld [vmem:[#allocation28_spill] sm:$0xff] }
 0x21e   : > { %v15234_v60 = vadd.f32 %v4451_v30, %v4215_v54  ;;  %v4218_v56 = vadd.f32 %v12263_v25, %v14947_v51  ;;  %12564 = vmatprep.mubr.msk.f32.mxu1 %vm341_vm0, %v15223_v41  ;;  %12621 = vmatmul.mubr.msk.f32.gmra.mxu0 %vm341_vm0, %v17087_v24  ;;  %v17089_v54 = vld [vmem:[#allocation16_spill] sm:$0xff] }
 0x21f   : > { %v4074_v23 = vpop.f32.mrf.mxu1  ;;  %12623 = vmatprep.mubr.msk.f32.mxu0 %vm341_vm0, %v17088_v19  ;;  %v4491_v51 = vpop.f32.mrf.mxu0 }
 0x220   : > { %v15243_v62 = vadd.f32 %v12313_v42, %v4218_v56  ;;  %v4217_v3 = vadd.f32 %v4074_v23, %v14956_v61  ;;  %v15255_v42 = vld [vmem:[#allocation2 + $0x164] sm:$0xff]  ;;  %v17091_v61 = vld [vmem:[#allocation29_spill] sm:$0xff] }
 0x221   : > { %v12266_v30 = vpop.f32.mrf.mxu1  ;;  %12565 = vmatmul.mubr.msk.f32.gmra.mxu1 %vm341_vm0, %v17089_v54  ;;  %17090 = vst [vmem:[#allocation27_spill] sm:$0xff] %v15255_v42  ;;  %v12325_v56 = vpop.f32.mrf.mxu0  ;;  %v17092_v54 = vld [vmem:[#allocation30_spill] sm:$0xff] }
 0x222   : > { %v15250_v25 = vadd.f32 %v4461_v39, %v4217_v3  ;;  %v4220_v26 = vadd.f32 %v12266_v30, %v14966_v20  ;;  %12567 = vmatprep.mubr.msk.f32.mxu1 %vm341_vm0, %v15239_v5  ;;  %12624 = vmatmul.mubr.msk.f32.gmra.mxu0 %vm341_vm0, %v17091_v61  ;;  %v17093_v3 = vld [vmem:[#allocation40_spill] sm:$0xff] }
 0x223   : > { %v4084_v24 = vpop.f32.mrf.mxu1  ;;  %12626 = vmatprep.mubr.msk.f32.mxu0 %vm341_vm0, %v17092_v54  ;;  %v4501_v20 = vpop.f32.mrf.mxu0 }
 0x224   : > { %v15259_v23 = vadd.f32 %v12316_v37, %v4220_v26  ;;  %v4219_v19 = vadd.f32 %v4084_v24, %v14975_v59  ;;  %v15271_v37 = vld [vmem:[#allocation2 + $0x184] sm:$0xff] }
 0x225   : > { %v12269_v39 = vpop.f32.mrf.mxu1  ;;  %12568 = vmatmul.mubr.msk.f32.gmra.mxu1 %vm341_vm0, %v17093_v3  ;;  %17094 = vst [vmem:[#allocation4_spill] sm:$0xff] %v15271_v37  ;;  %v12328_v26 = vpop.f32.mrf.mxu0  ;;  %v17095_v59 = vld [vmem:[#allocation8_spill] sm:$0xff]  ;;  %v17096_v3 = vld [vmem:[#allocation9_spill] sm:$0xff] }
 0x226   : > { %v15266_v30 = vadd.f32 %v4471_v47, %v4219_v19  ;;  %v4222_v5 = vadd.f32 %v12269_v39, %v14985_v1  ;;  %12570 = vmatprep.mubr.msk.f32.mxu1 %vm341_vm0, %v15255_v42  ;;  %12627 = vmatmul.mubr.msk.f32.gmra.mxu0 %vm341_vm0, %v17095_v59  ;;  %v17097_v19 = vld [vmem:[#allocation41_spill] sm:$0xff] }
 0x227   : > { %v4094_v61 = vpop.f32.mrf.mxu1  ;;  %12629 = vmatprep.mubr.msk.f32.mxu0 %vm341_vm0, %v17096_v3  ;;  %v4511_v1 = vpop.f32.mrf.mxu0 }
 0x228   : > { %v15275_v24 = vadd.f32 %v12319_v21, %v4222_v5  ;;  %v4221_v54 = vadd.f32 %v4094_v61, %v14994_v27  ;;  %v15287_v21 = vld [vmem:[#allocation2 + $0x1a4] sm:$0xff] }
 0x229   : > { %v12272_v47 = vpop.f32.mrf.mxu1  ;;  %12571 = vmatmul.mubr.msk.f32.gmra.mxu1 %vm341_vm0, %v17097_v19  ;;  %17098 = vst [vmem:[#allocation15_spill] sm:$0xff] %v15287_v21  ;;  %v12331_v5 = vpop.f32.mrf.mxu0  ;;  %v17099_v27 = vld [vmem:[#allocation31_spill] sm:$0xff]  ;;  %v17100_v19 = vld [vmem:[#allocation32_spill] sm:$0xff] }
 0x22a   : > { %v15282_v39 = vadd.f32 %v4481_v32, %v4221_v54  ;;  %v4224_v42 = vadd.f32 %v12272_v47, %v15004_v9  ;;  %12573 = vmatprep.mubr.msk.f32.mxu1 %vm341_vm0, %v15271_v37  ;;  %12630 = vmatmul.mubr.msk.f32.gmra.mxu0 %vm341_vm0, %v17099_v27  ;;  %v17101_v54 = vld [vmem:[#allocation21_spill] sm:$0xff] }
 0x22b   : > { %v4104_v59 = vpop.f32.mrf.mxu1  ;;  %12632 = vmatprep.mubr.msk.f32.mxu0 %vm341_vm0, %v17100_v19  ;;  %v4521_v9 = vpop.f32.mrf.mxu0 }
 0x22c   : > { %v15291_v61 = vadd.f32 %v12322_v58, %v4224_v42  ;;  %v4223_v3 = vadd.f32 %v4104_v59, %v15013_v0  ;;  %v15303_v58 = vld [vmem:[#allocation2 + $0x1c4] sm:$0xff]  ;;  %v17103_v0 = vld [vmem:[#allocation10_spill] sm:$0xff] }
 0x22d   : > { %v12275_v32 = vpop.f32.mrf.mxu1  ;;  %12574 = vmatmul.mubr.msk.f32.gmra.mxu1 %vm341_vm0, %v17101_v54  ;;  %17102 = vst [vmem:[#allocation5_spill] sm:$0xff] %v15303_v58  ;;  %v12334_v42 = vpop.f32.mrf.mxu0  ;;  %v17104_v54 = vld [vmem:[#allocation11_spill] sm:$0xff] }
 0x22e   : > { %v15298_v47 = vadd.f32 %v4491_v51, %v4223_v3  ;;  %v4226_v37 = vadd.f32 %v12275_v32, %v15023_v6  ;;  %12576 = vmatprep.mubr.msk.f32.mxu1 %vm341_vm0, %v15287_v21  ;;  %12633 = vmatmul.mubr.msk.f32.gmra.mxu0 %vm341_vm0, %v17103_v0  ;;  %v17105_v3 = vld [vmem:[#allocation23_spill] sm:$0xff] }
 0x22f   : > { %v4114_v27 = vpop.f32.mrf.mxu1  ;;  %12635 = vmatprep.mubr.msk.f32.mxu0 %vm341_vm0, %v17104_v54  ;;  %v4531_v6 = vpop.f32.mrf.mxu0 }
 0x230   : > { %v15307_v59 = vadd.f32 %v12325_v56, %v4226_v37  ;;  %v4225_v19 = vadd.f32 %v4114_v27, %v15032_v17  ;;  %v15319_v56 = vld [vmem:[#allocation2 + $0x1e4] sm:$0xff]  ;;  %v17107_v17 = vld [vmem:[#allocation33_spill] sm:$0xff] }
 0x231   : > { %v12278_v51 = vpop.f32.mrf.mxu1  ;;  %12577 = vmatmul.mubr.msk.f32.gmra.mxu1 %vm341_vm0, %v17105_v3  ;;  %17106 = vst [vmem:[#allocation7_spill] sm:$0xff] %v15319_v56  ;;  %v12337_v37 = vpop.f32.mrf.mxu0  ;;  %v17108_v3 = vld [vmem:[#allocation34_spill] sm:$0xff] }
 0x232   : > { %v15314_v32 = vadd.f32 %v4501_v20, %v4225_v19  ;;  %v4228_v21 = vadd.f32 %v12278_v51, %v15042_v63  ;;  %12579 = vmatprep.mubr.msk.f32.mxu1 %vm341_vm0, %v15303_v58  ;;  %12636 = vmatmul.mubr.msk.f32.gmra.mxu0 %vm341_vm0, %v17107_v17  ;;  %v17109_v19 = vld [vmem:[#allocation24_spill] sm:$0xff] }
 0x233   : > { %v4124_v0 = vpop.f32.mrf.mxu1  ;;  %12638 = vmatprep.mubr.msk.f32.mxu0 %vm341_vm0, %v17108_v3  ;;  %v4541_v63 = vpop.f32.mrf.mxu0 }
 0x234   : > { %v15323_v27 = vadd.f32 %v12328_v26, %v4228_v21  ;;  %v4227_v54 = vadd.f32 %v4124_v0, %v15051_v8  ;;  %v15335_v26 = vld [vmem:[#allocation2 + $0x204] sm:$0xff] }
 0x235   : > { %v12281_v20 = vpop.f32.mrf.mxu1  ;;  %12580 = vmatmul.mubr.msk.f32.gmra.mxu1 %vm341_vm0, %v17109_v19  ;;  %17110 = vst [vmem:[#allocation37_spill] sm:$0xff] %v15335_v26  ;;  %v12340_v21 = vpop.f32.mrf.mxu0  ;;  %v17111_v8 = vld [vmem:[#allocation12_spill] sm:$0xff]  ;;  %v17112_v19 = vld [vmem:[#allocation13_spill] sm:$0xff] }
 0x236   : > { %v15330_v51 = vadd.f32 %v4511_v1, %v4227_v54  ;;  %v4230_v58 = vadd.f32 %v12281_v20, %v15061_v22  ;;  %12582 = vmatprep.mubr.msk.f32.mxu1 %vm341_vm0, %v15319_v56  ;;  %12639 = vmatmul.mubr.msk.f32.gmra.mxu0 %vm341_vm0, %v17111_v8 }
 0x237   : > { %v4134_v17 = vpop.f32.mrf.mxu1  ;;  %12641 = vmatprep.mubr.msk.f32.mxu0 %vm341_vm0, %v17112_v19  ;;  %v4551_v22 = vpop.f32.mrf.mxu0 }
 0x238   : > { %v15339_v0 = vadd.f32 %v12331_v5, %v4230_v58  ;;  %v4229_v3 = vadd.f32 %v4134_v17, %v15068_v15  ;;  %v15351_v5 = vld [vmem:[#allocation2 + $0x224] sm:$0xff] }
 0x239   : > { %v12284_v1 = vpop.f32.mrf.mxu1  ;;  %12583 = vmatmul.mubr.msk.f32.gmra.mxu1 %vm341_vm0, %v15030_v12  ;;  %17113 = vst [vmem:[#allocation28_spill] sm:$0xff] %v15351_v5  ;;  %v12343_v58 = vpop.f32.mrf.mxu0  ;;  %v17114_v15 = vld [vmem:[#allocation35_spill] sm:$0xff]  ;;  %v17115_v12 = vld [vmem:[#allocation36_spill] sm:$0xff] }
 0x23a   : > { %v15346_v54 = vadd.f32 %v4521_v9, %v4229_v3  ;;  %v4232_v20 = vadd.f32 %v12284_v1, %v15079_v14  ;;  %12585 = vmatprep.mubr.msk.f32.mxu1 %vm341_vm0, %v15335_v26  ;;  %12642 = vmatmul.mubr.msk.f32.gmra.mxu0 %vm341_vm0, %v17114_v15  ;;  %v6596_v3 = vld [vmem:[#allocation2 + $0x286] sm:$0xff]  ;;  %v17116_v15 = vld [vmem:[#allocation14_spill] sm:$0xff] }
 0x23b   : > { %v4144_v8 = vpop.f32.mrf.mxu1  ;;  %12644 = vmatprep.mubr.msk.f32.mxu0 %vm341_vm0, %v17115_v12  ;;  %v4561_v14 = vpop.f32.mrf.mxu0 }
 0x23c   : > { %v15355_v17 = vadd.f32 %v12334_v42, %v4232_v20  ;;  %v4231_v19 = vadd.f32 %v4144_v8, %v15088_v7  ;;  %v15367_v42 = vld [vmem:[#allocation2 + $0x22c] sm:$0xff]  ;;  %v15369_v7 = vld [vmem:[#allocation2 + $0x244] sm:$0xff] }
 0x23d   : > { %v12287_v9 = vpop.f32.mrf.mxu1  ;;  %12586 = vmatmul.mubr.msk.f32.gmra.mxu1 %vm341_vm0, %v15049_v45  ;;  %v12346_v8 = vpop.f32.mrf.mxu0 }
 0x23e   : > { %v15362_v1 = vadd.f32 %v4531_v6, %v4231_v19  ;;  %v4234_v26 = vadd.f32 %v12287_v9, %v15099_v48  ;;  %12588 = vmatprep.mubr.msk.f32.mxu1 %vm341_vm0, %v15351_v5  ;;  %12645 = vmatmul.mubr.msk.f32.gmra.mxu0 %vm341_vm0, %v17116_v15  ;;  %v6597_v6 = vld [vmem:[#allocation2 + $0x28e] sm:$0xff]  ;;  %v6598_v9 = vld [vmem:[#allocation2 + $0x2a6] sm:$0xff] }
 0x23f   : > { %v4154_v20 = vpop.f32.mrf.mxu1  ;;  %12647 = vmatprep.mubr.msk.f32.mxu0 %vm341_vm0, %v6596_v3  ;;  %v4571_v19 = vpop.f32.mrf.mxu0  ;;  %v6599_v15 = vld [vmem:[#allocation2 + $0x2ae] sm:$0xff] }
 0x240   : > { %v15373_v12 = vadd.f32 %v12337_v37, %v4234_v26  ;;  %v4233_v45 = vadd.f32 %v4154_v20, %v15108_v43  ;;  %v15384_v26 = vld [vmem:[#allocation2 + $0x264] sm:$0xff] }
 0x241   : > { %v12290_v48 = vpop.f32.mrf.mxu1  ;;  %12589 = vmatmul.mubr.msk.f32.gmra.mxu1 %vm341_vm0, %v15367_v42  ;;  %17117 = vst [vmem:[#allocation6_spill] sm:$0xff] %v15384_v26  ;;  %v12349_v43 = vpop.f32.mrf.mxu0 }
 0x242   : > { %v15379_v5 = vadd.f32 %v4541_v63, %v4233_v45  ;;  %v4236_v56 = vadd.f32 %v12290_v48, %v15118_v4  ;;  %12591 = vmatprep.mubr.msk.f32.mxu1 %vm341_vm0, %v15369_v7  ;;  %12648 = vmatmul.mubr.msk.f32.gmra.mxu0 %vm341_vm0, %v6597_v6 }
 0x243   : > { %v4164_v37 = vpop.f32.mrf.mxu1  ;;  %12650 = vmatprep.mubr.msk.f32.mxu0 %vm341_vm0, %v6598_v9  ;;  %v4581_v4 = vpop.f32.mrf.mxu0 }
 0x244   : > { %v15387_v3 = vadd.f32 %v12340_v21, %v4236_v56  ;;  %v4235_v20 = vadd.f32 %v4164_v37, %v15125_v50  ;;  %v15398_v56 = vld [vmem:[#allocation2 + $0x284] sm:$0xff]  ;;  %v17119_v37 = vld [vmem:[#allocation38_spill] sm:$0xff] }
 0x245   : > { %v12293_v63 = vpop.f32.mrf.mxu1  ;;  %12592 = vmatmul.mubr.msk.f32.gmra.mxu1 %vm341_vm0, %v15086_v55  ;;  %17118 = vst [vmem:[#allocation16_spill] sm:$0xff] %v15398_v56  ;;  %v12352_v21 = vpop.f32.mrf.mxu0 }
 0x246   : > { %v15393_v45 = vadd.f32 %v4551_v22, %v4235_v20  ;;  %v4238_v48 = vadd.f32 %v12293_v63, %v15135_v28  ;;  %12594 = vmatprep.mubr.msk.f32.mxu1 %vm341_vm0, %v15384_v26  ;;  %12651 = vmatmul.mubr.msk.f32.gmra.mxu0 %vm341_vm0, %v6599_v15  ;;  %v15413_v15 = vld [vmem:[#allocation2 + $0x28c] sm:$0xff]  ;;  %v15420_v63 = vld [vmem:[#allocation2 + $0x2a4] sm:$0xff]  ;;  %v17126_v26 = vld [vmem:[#allocation42_spill] sm:$0xff] }
 0x247   : > { %v4174_v6 = vpop.f32.mrf.mxu1  ;;  %12705 = vmatprep.mubr.msk.f32.mxu0 %vm341_vm0, %v17119_v37  ;;  %v4591_v28 = vpop.f32.mrf.mxu0  ;;  %17120 = vst [vmem:[#allocation29_spill] sm:$0xff] %v15413_v15  ;;  %17121 = vst [vmem:[#allocation30_spill] sm:$0xff] %v15420_v63 }
 0x248   : > { %v15401_v50 = vadd.f32 %v12343_v58, %v4238_v48  ;;  %v4237_v9 = vadd.f32 %v4174_v6, %v15142_v13  ;;  %v15418_v13 = vld [vmem:[%s16787_s2 + $0xb0] sm:$0xff]  ;;  %v17123_v6 = vld [vmem:[#allocation39_spill] sm:$0xff] }
 0x249   : > { %v12296_v55 = vpop.f32.mrf.mxu1  ;;  %12595 = vmatmul.mubr.msk.f32.gmra.mxu1 %vm341_vm0, %v15106_v52  ;;  %v12407_v48 = vpop.f32.mrf.mxu0  ;;  %v17122_v52 = vld [vmem:[#allocation17_spill] sm:$0xff] }
 0x24a   : > { %v15408_v22 = vadd.f32 %v4561_v14, %v4237_v9  ;;  %v4240_v20 = vadd.f32 %v12296_v55, %v15158_v29  ;;  %12597 = vmatprep.mubr.msk.f32.mxu1 %vm341_vm0, %v15398_v56  ;;  %12706 = vmatmul.mubr.msk.f32.vlgmr.msra.gmra.mxu0 %vm341_vm0, %v17122_v52  ;;  %v17125_v56 = vld [vmem:[#allocation19_spill] sm:$0xff] }
 0x24b   : > { %v4184_v58 = vpop.f32.mrf.mxu1  ;;  %12804 = vmatpush3.msra.mxu0 %v15152_v11  ;;  %12708 = vmatprep.mubr.msk.f32.mxu0 %vm341_vm0, %v17123_v6  ;;  %v5215_v37 = vpop.f32.mrf.mxu0 }
 0x24c   : > { %v15424_v14 = vadd.f32 %v12346_v8, %v4240_v20  ;;  %v4239_v29 = vadd.f32 %v4184_v58, %v15167_v46  ;;  %12903 = vmatprep.subr.mxu0 %v15418_v13  ;;  %v15438_v46 = vld [vmem:[#allocation2 + $0x2ac] sm:$0xff]  ;;  %v17124_v58 = vld [vmem:[#allocation18_spill] sm:$0xff] }
 0x24d   : > { %v12299_v9 = vpop.f32.mrf.mxu1  ;;  %12598 = vmatmul.mubr.msk.f32.gmra.mxu1 %vm341_vm0, %v15413_v15  ;;  %v6955_v8 = vld [vmem:[#allocation2 + $0xc8] sm:$0xff]  ;;  %v12410_v20 = vpop.f32.mrf.mxu0 }
 0x24e   : > { %v15433_v55 = vadd.f32 %v4571_v19, %v4239_v29  ;;  %v4242_v52 = vadd.f32 %v12299_v9, %v15176_v49  ;;  %12600 = vmatprep.mubr.msk.f32.mxu1 %vm341_vm0, %v15420_v63  ;;  %12709 = vmatmul.mubr.msk.f32.gmra.mxu0 %vm341_vm0, %v17124_v58  ;;  %v6956_v63 = vld [vmem:[#allocation2 + $0xd0] sm:$0xff] }
 0x24f   : > { %v4194_v11 = vpop.f32.mrf.mxu1  ;;  %12711 = vmatprep.mubr.msk.f32.mxu0 %vm341_vm0, %v17125_v56  ;;  %v5225_v49 = vpop.f32.mrf.mxu0 }
 0x250   : > { %v15442_v6 = vadd.f32 %v12349_v43, %v4242_v52  ;;  %v4241_v15 = vadd.f32 %v4194_v11, %v15183_v16  ;;  %v6957_v43 = vld [vmem:[#allocation2 + $0xe8] sm:$0xff] }
 0x251   : > { %v12302_v19 = vpop.f32.mrf.mxu1  ;;  %12601 = vmatmul.mubr.msk.f32.gmra.mxu1 %vm341_vm0, %v15438_v46  ;;  %v12413_v52 = vpop.f32.mrf.mxu0  ;;  %v17127_v11 = vld [vmem:[#allocation20_spill] sm:$0xff] }
 0x252   : > { %v15449_v29 = vadd.f32 %v4581_v4, %v4241_v15  ;;  %v4244_v9 = vadd.f32 %v12302_v19, %v15189_v18  ;;  %12655 = vmatprep.mubr.msk.f32.mxu1 %vm341_vm0, %v6955_v8  ;;  %12712 = vmatmul.mubr.msk.f32.gmra.mxu0 %vm341_vm0, %v17126_v26  ;;  %v15463_v18 = vld [vmem:[%s16787_s2 + $0xa8] sm:$0xff] }
 0x253   : > { %v4204_v58 = vpop.f32.mrf.mxu1  ;;  %12714 = vmatprep.mubr.msk.f32.mxu0 %vm341_vm0, %v17127_v11  ;;  %v5235_v15 = vpop.f32.mrf.mxu0  ;;  %v15471_v19 = vld [vmem:[#allocation2 + $0x108] sm:$0xff] }
 0x254   : > { %v15455_v16 = vadd.f32 %v12352_v21, %v4244_v9  ;;  %v4243_v56 = vadd.f32 %v4204_v58, %v15201_v44  ;;  %v6958_v44 = vld [vmem:[#allocation2 + $0xf0] sm:$0xff]  ;;  %v17128_v58 = vld [vmem:[#allocation43_spill] sm:$0xff] }
 0x255   : > { %v12357_v4 = vpop.f32.mrf.mxu1  ;;  %12656 = vmatmul.mubr.msk.f32.vlgmr.msra.gmra.mxu1 %vm341_vm0, %v6956_v63  ;;  %v12416_v9 = vpop.f32.mrf.mxu0 }
 0x256   : > { %v15466_v8 = vadd.f32 %v4591_v28, %v4243_v56  ;;  %v4988_v26 = vadd.f32 %v12357_v4, %v15211_v40  ;;  %12754 = vmatpush3.msra.mxu1 %v15197_v2  ;;  %12658 = vmatprep.mubr.msk.f32.mxu1 %vm341_vm0, %v6957_v43  ;;  %v17129_v56 = vld [vmem:[#allocation22_spill] sm:$0xff]  ;;  %v15487_v4 = vld [vmem:[#allocation2 + $0x110] sm:$0xff] }
 0x257   : > { %v4828_v21 = vpop.f32.mrf.mxu1  ;;  %12715 = vmatmul.mubr.msk.f32.gmra.mxu0 %vm341_vm0, %v17128_v58  ;;  %12853 = vmatprep.subr.mxu1 %v15463_v18  ;;  %v5245_v40 = vpop.f32.mrf.mxu0  ;;  %17130 = vst [vmem:[#allocation40_spill] sm:$0xff] %v15487_v4 }
 0x258   : > { %v15476_v63 = vadd.f32 %v12407_v48, %v4988_v26  ;;  %v4987_v28 = vadd.f32 %v4828_v21, %v15218_v33  ;;  %12717 = vmatprep.mubr.msk.f32.mxu0 %vm341_vm0, %v17129_v56  ;;  %v15489_v26 = vld [vmem:[#allocation2 + $0x128] sm:$0xff] }
 0x259   : > { %v12360_v2 = vpop.f32.mrf.mxu1  ;;  %12659 = vmatmul.mubr.msk.f32.gmra.mxu1 %vm341_vm0, %v6958_v44  ;;  %17131 = vst [vmem:[#allocation8_spill] sm:$0xff] %v15489_v26  ;;  %v12419_v33 = vpop.f32.mrf.mxu0  ;;  %v17132_v21 = vld [vmem:[#allocation44_spill] sm:$0xff] }
 0x25a   : > { %v15482_v43 = vadd.f32 %v5215_v37, %v4987_v28  ;;  %v4990_v11 = vadd.f32 %v12360_v2, %v15227_v10  ;;  %12661 = vmatprep.mubr.msk.f32.mxu1 %vm341_vm0, %v15471_v19  ;;  %v17133_v37 = vld [vmem:[#allocation45_spill] sm:$0xff] }
 0x25b   : > { %v4838_v48 = vpop.f32.mrf.mxu1  ;;  %12718 = vmatmul.mubr.msk.f32.gmra.mxu0 %vm341_vm0, %v17132_v21  ;;  %v5255_v28 = vpop.f32.mrf.mxu0  ;;  %v15505_v21 = vld [vmem:[#allocation2 + $0x130] sm:$0xff] }
 0x25c   : > { %v15493_v58 = vadd.f32 %v12410_v20, %v4990_v11  ;;  %v4989_v44 = vadd.f32 %v4838_v48, %v15234_v60  ;;  %12720 = vmatprep.mubr.msk.f32.mxu0 %vm341_vm0, %v17133_v37  ;;  %17134 = vst [vmem:[#allocation9_spill] sm:$0xff] %v15505_v21  ;;  %v15507_v11 = vld [vmem:[#allocation2 + $0x148] sm:$0xff]  ;;  %v17135_v48 = vld [vmem:[#allocation25_spill] sm:$0xff] }
 0x25d   : > { %v12363_v10 = vpop.f32.mrf.mxu1  ;;  %12662 = vmatmul.mubr.msk.f32.gmra.mxu1 %vm341_vm0, %v15487_v4  ;;  %v12422_v60 = vpop.f32.mrf.mxu0 }
 0x25e   : > { %v15500_v56 = vadd.f32 %v5225_v49, %v4989_v44  ;;  %v4992_v2 = vadd.f32 %v12363_v10, %v15243_v62  ;;  %12664 = vmatprep.mubr.msk.f32.mxu1 %vm341_vm0, %v15489_v26  ;;  %v17136_v49 = vld [vmem:[#allocation26_spill] sm:$0xff] }
 0x25f   : > { %v4848_v20 = vpop.f32.mrf.mxu1  ;;  %12721 = vmatmul.mubr.msk.f32.gmra.mxu0 %vm341_vm0, %v17135_v48  ;;  %v5265_v44 = vpop.f32.mrf.mxu0  ;;  %v15523_v48 = vld [vmem:[#allocation2 + $0x150] sm:$0xff] }
 0x260   : > { %v15511_v37 = vadd.f32 %v12413_v52, %v4992_v2  ;;  %v4991_v4 = vadd.f32 %v4848_v20, %v15250_v25  ;;  %12723 = vmatprep.mubr.msk.f32.mxu0 %vm341_vm0, %v17136_v49  ;;  %17137 = vst [vmem:[#allocation41_spill] sm:$0xff] %v15523_v48  ;;  %v15525_v2 = vld [vmem:[#allocation2 + $0x168] sm:$0xff]  ;;  %v17139_v20 = vld [vmem:[#allocation46_spill] sm:$0xff] }
 0x261   : > { %v12366_v62 = vpop.f32.mrf.mxu1  ;;  %12665 = vmatmul.mubr.msk.f32.gmra.mxu1 %vm341_vm0, %v15505_v21  ;;  %17138 = vst [vmem:[#allocation31_spill] sm:$0xff] %v15525_v2  ;;  %v12425_v25 = vpop.f32.mrf.mxu0 }
 0x262   : > { %v15518_v10 = vadd.f32 %v5235_v15, %v4991_v4  ;;  %v4994_v26 = vadd.f32 %v12366_v62, %v15259_v23  ;;  %12667 = vmatprep.mubr.msk.f32.mxu1 %vm341_vm0, %v15507_v11 }
 0x263   : > { %v4858_v52 = vpop.f32.mrf.mxu1  ;;  %12724 = vmatmul.mubr.msk.f32.gmra.mxu0 %vm341_vm0, %v17139_v20  ;;  %v5275_v15 = vpop.f32.mrf.mxu0  ;;  %v15541_v20 = vld [vmem:[#allocation2 + $0x170] sm:$0xff] }
 0x264   : > { %v15529_v49 = vadd.f32 %v12416_v9, %v4994_v26  ;;  %v4993_v21 = vadd.f32 %v4858_v52, %v15266_v30  ;;  %12726 = vmatprep.mubr.msk.f32.mxu0 %vm341_vm0, %v15039_v35  ;;  %17140 = vst [vmem:[#allocation32_spill] sm:$0xff] %v15541_v20  ;;  %v15543_v26 = vld [vmem:[#allocation2 + $0x188] sm:$0xff]  ;;  %v17142_v52 = vld [vmem:[#allocation47_spill] sm:$0xff] }
 0x265   : > { %v12369_v23 = vpop.f32.mrf.mxu1  ;;  %12668 = vmatmul.mubr.msk.f32.gmra.mxu1 %vm341_vm0, %v15523_v48  ;;  %17141 = vst [vmem:[#allocation21_spill] sm:$0xff] %v15543_v26  ;;  %v12428_v30 = vpop.f32.mrf.mxu0 }
 0x266   : > { %v15536_v4 = vadd.f32 %v5245_v40, %v4993_v21  ;;  %v4996_v62 = vadd.f32 %v12369_v23, %v15275_v24  ;;  %12670 = vmatprep.mubr.msk.f32.mxu1 %vm341_vm0, %v15525_v2  ;;  %v17143_v40 = vld [vmem:[#allocation48_spill] sm:$0xff] }
 0x267   : > { %v4868_v9 = vpop.f32.mrf.mxu1  ;;  %12727 = vmatmul.mubr.msk.f32.gmra.mxu0 %vm341_vm0, %v17142_v52  ;;  %v5285_v21 = vpop.f32.mrf.mxu0  ;;  %v15559_v52 = vld [vmem:[#allocation2 + $0x190] sm:$0xff] }
 0x268   : > { %v15547_v35 = vadd.f32 %v12419_v33, %v4996_v62  ;;  %v4995_v48 = vadd.f32 %v4868_v9, %v15282_v39  ;;  %12729 = vmatprep.mubr.msk.f32.mxu0 %vm341_vm0, %v17143_v40  ;;  %17144 = vst [vmem:[#allocation10_spill] sm:$0xff] %v15559_v52  ;;  %v15561_v62 = vld [vmem:[#allocation2 + $0x1a8] sm:$0xff]  ;;  %v17146_v9 = vld [vmem:[#allocation49_spill] sm:$0xff] }
 0x269   : > { %v12372_v24 = vpop.f32.mrf.mxu1  ;;  %12671 = vmatmul.mubr.msk.f32.gmra.mxu1 %vm341_vm0, %v15541_v20  ;;  %17145 = vst [vmem:[#allocation11_spill] sm:$0xff] %v15561_v62  ;;  %v12431_v39 = vpop.f32.mrf.mxu0 }
 0x26a   : > { %v15554_v23 = vadd.f32 %v5255_v28, %v4995_v48  ;;  %v4998_v2 = vadd.f32 %v12372_v24, %v15291_v61  ;;  %12673 = vmatprep.mubr.msk.f32.mxu1 %vm341_vm0, %v15543_v26  ;;  %v17147_v28 = vld [vmem:[#allocation50_spill] sm:$0xff] }
 0x26b   : > { %v4878_v33 = vpop.f32.mrf.mxu1  ;;  %12730 = vmatmul.mubr.msk.f32.gmra.mxu0 %vm341_vm0, %v17146_v9  ;;  %v5295_v48 = vpop.f32.mrf.mxu0  ;;  %v15577_v9 = vld [vmem:[#allocation2 + $0x1b0] sm:$0xff] }
 0x26c   : > { %v15565_v40 = vadd.f32 %v12422_v60, %v4998_v2  ;;  %v4997_v20 = vadd.f32 %v4878_v33, %v15298_v47  ;;  %12732 = vmatprep.mubr.msk.f32.mxu0 %vm341_vm0, %v17147_v28  ;;  %17148 = vst [vmem:[#allocation23_spill] sm:$0xff] %v15577_v9  ;;  %v15579_v2 = vld [vmem:[#allocation2 + $0x1c8] sm:$0xff]  ;;  %v17149_v33 = vld [vmem:[#allocation51_spill] sm:$0xff] }
 0x26d   : > { %v12375_v61 = vpop.f32.mrf.mxu1  ;;  %12674 = vmatmul.mubr.msk.f32.gmra.mxu1 %vm341_vm0, %v15559_v52  ;;  %v12434_v47 = vpop.f32.mrf.mxu0 }
 0x26e   : > { %v15572_v24 = vadd.f32 %v5265_v44, %v4997_v20  ;;  %v5000_v26 = vadd.f32 %v12375_v61, %v15307_v59  ;;  %12676 = vmatprep.mubr.msk.f32.mxu1 %vm341_vm0, %v15561_v62  ;;  %v17150_v44 = vld [vmem:[#allocation52_spill] sm:$0xff] }
 0x26f   : > { %v4888_v60 = vpop.f32.mrf.mxu1  ;;  %12733 = vmatmul.mubr.msk.f32.gmra.mxu0 %vm341_vm0, %v17149_v33  ;;  %v5305_v20 = vpop.f32.mrf.mxu0  ;;  %v15595_v33 = vld [vmem:[#allocation2 + $0x1d0] sm:$0xff] }
 0x270   : > { %v15583_v28 = vadd.f32 %v12425_v25, %v5000_v26  ;;  %v4999_v52 = vadd.f32 %v4888_v60, %v15314_v32  ;;  %12735 = vmatprep.mubr.msk.f32.mxu0 %vm341_vm0, %v17150_v44  ;;  %v15597_v26 = vld [vmem:[#allocation2 + $0x1e8] sm:$0xff]  ;;  %v17151_v60 = vld [vmem:[#allocation53_spill] sm:$0xff] }
 0x271   : > { %v12378_v59 = vpop.f32.mrf.mxu1  ;;  %12677 = vmatmul.mubr.msk.f32.gmra.mxu1 %vm341_vm0, %v15577_v9  ;;  %v12437_v32 = vpop.f32.mrf.mxu0 }
 0x272   : > { %v15590_v61 = vadd.f32 %v5275_v15, %v4999_v52  ;;  %v5002_v62 = vadd.f32 %v12378_v59, %v15323_v27  ;;  %12679 = vmatprep.mubr.msk.f32.mxu1 %vm341_vm0, %v15579_v2 }
 0x273   : > { %v4898_v25 = vpop.f32.mrf.mxu1  ;;  %12736 = vmatmul.mubr.msk.f32.gmra.mxu0 %vm341_vm0, %v17151_v60  ;;  %v5315_v15 = vpop.f32.mrf.mxu0  ;;  %v15613_v60 = vld [vmem:[#allocation2 + $0x1f0] sm:$0xff] }
 0x274   : > { %v15601_v44 = vadd.f32 %v12428_v30, %v5002_v62  ;;  %v5001_v9 = vadd.f32 %v4898_v25, %v15330_v51  ;;  %12738 = vmatprep.mubr.msk.f32.mxu0 %vm341_vm0, %v15115_v38  ;;  %17152 = vst [vmem:[#allocation33_spill] sm:$0xff] %v15613_v60  ;;  %v15615_v62 = vld [vmem:[#allocation2 + $0x208] sm:$0xff] }
 0x275   : > { %v12381_v27 = vpop.f32.mrf.mxu1  ;;  %12680 = vmatmul.mubr.msk.f32.gmra.mxu1 %vm341_vm0, %v15595_v33  ;;  %17153 = vst [vmem:[#allocation34_spill] sm:$0xff] %v15615_v62  ;;  %v12440_v51 = vpop.f32.mrf.mxu0 }
 0x276   : > { %v15608_v52 = vadd.f32 %v5285_v21, %v5001_v9  ;;  %v5004_v59 = vadd.f32 %v12381_v27, %v15339_v0  ;;  %12682 = vmatprep.mubr.msk.f32.mxu1 %vm341_vm0, %v15597_v26 }
 0x277   : > { %v4908_v30 = vpop.f32.mrf.mxu1  ;;  %12739 = vmatmul.mubr.msk.f32.gmra.mxu0 %vm341_vm0, %v15130_v36  ;;  %v5325_v21 = vpop.f32.mrf.mxu0  ;;  %v15631_v36 = vld [vmem:[#allocation2 + $0x210] sm:$0xff] }
 0x278   : > { %v15619_v38 = vadd.f32 %v12431_v39, %v5004_v59  ;;  %v5003_v25 = vadd.f32 %v4908_v30, %v15346_v54  ;;  %12741 = vmatprep.mubr.msk.f32.mxu0 %vm341_vm0, %v15132_v31  ;;  %17154 = vst [vmem:[#allocation24_spill] sm:$0xff] %v15631_v36  ;;  %v15633_v59 = vld [vmem:[#allocation2 + $0x228] sm:$0xff] }
 0x279   : > { %v12384_v0 = vpop.f32.mrf.mxu1  ;;  %12683 = vmatmul.mubr.msk.f32.gmra.mxu1 %vm341_vm0, %v15613_v60  ;;  %17155 = vst [vmem:[#allocation12_spill] sm:$0xff] %v15633_v59  ;;  %v12443_v54 = vpop.f32.mrf.mxu0 }
 0x27a   : > { %v15626_v9 = vadd.f32 %v5295_v48, %v5003_v25  ;;  %v5006_v27 = vadd.f32 %v12384_v0, %v15355_v17  ;;  %12685 = vmatprep.mubr.msk.f32.mxu1 %vm341_vm0, %v15615_v62  ;;  %v17156_v48 = vld [vmem:[#allocation54_spill] sm:$0xff]  ;;  %v7370_v0 = vld [vmem:[#allocation2 + $0x28a] sm:$0xff] }
 0x27b   : > { %v4918_v39 = vpop.f32.mrf.mxu1  ;;  %12742 = vmatmul.mubr.msk.f32.gmra.mxu0 %vm341_vm0, %v15147_v53  ;;  %v5335_v25 = vpop.f32.mrf.mxu0  ;;  %v15649_v53 = vld [vmem:[#allocation2 + $0x230] sm:$0xff] }
 0x27c   : > { %v15637_v31 = vadd.f32 %v12434_v47, %v5006_v27  ;;  %v5005_v30 = vadd.f32 %v4918_v39, %v15362_v1  ;;  %12744 = vmatprep.mubr.msk.f32.mxu0 %vm341_vm0, %v17156_v48  ;;  %17157 = vst [vmem:[#allocation13_spill] sm:$0xff] %v15649_v53  ;;  %v15651_v1 = vld [vmem:[#allocation2 + $0x248] sm:$0xff] }
 0x27d   : > { %v12387_v17 = vpop.f32.mrf.mxu1  ;;  %12686 = vmatmul.mubr.msk.f32.gmra.mxu1 %vm341_vm0, %v15631_v36  ;;  %17158 = vst [vmem:[#allocation35_spill] sm:$0xff] %v15651_v1  ;;  %v12446_v27 = vpop.f32.mrf.mxu0 }
 0x27e   : > { %v15644_v62 = vadd.f32 %v5305_v20, %v5005_v30  ;;  %v5008_v60 = vadd.f32 %v12387_v17, %v15373_v12  ;;  %12688 = vmatprep.mubr.msk.f32.mxu1 %vm341_vm0, %v15633_v59  ;;  %v7371_v20 = vld [vmem:[#allocation2 + $0x292] sm:$0xff]  ;;  %v7372_v17 = vld [vmem:[#allocation2 + $0x2aa] sm:$0xff] }
 0x27f   : > { %v4928_v47 = vpop.f32.mrf.mxu1  ;;  %12745 = vmatmul.mubr.msk.f32.gmra.mxu0 %vm341_vm0, %v15172_v34  ;;  %v5345_v30 = vpop.f32.mrf.mxu0  ;;  %v15666_v34 = vld [vmem:[#allocation2 + $0x250] sm:$0xff] }
 0x280   : > { %v15655_v39 = vadd.f32 %v12437_v32, %v5008_v60  ;;  %v5007_v48 = vadd.f32 %v4928_v47, %v15379_v5  ;;  %12747 = vmatprep.mubr.msk.f32.mxu0 %vm341_vm0, %v7370_v0  ;;  %17159 = vst [vmem:[#allocation36_spill] sm:$0xff] %v15666_v34  ;;  %v15668_v5 = vld [vmem:[#allocation2 + $0x268] sm:$0xff] }
 0x281   : > { %v12390_v12 = vpop.f32.mrf.mxu1  ;;  %12689 = vmatmul.mubr.msk.f32.gmra.mxu1 %vm341_vm0, %v15649_v53  ;;  %17160 = vst [vmem:[#allocation14_spill] sm:$0xff] %v15668_v5  ;;  %v12449_v60 = vpop.f32.mrf.mxu0  ;;  %v17168_v53 = vld [vmem:[#allocation27_spill] sm:$0xff] }
 0x282   : > { %v15661_v59 = vadd.f32 %v5315_v15, %v5007_v48  ;;  %v5010_v36 = vadd.f32 %v12390_v12, %v15387_v3  ;;  %12691 = vmatprep.mubr.msk.f32.mxu1 %vm341_vm0, %v15651_v1  ;;  %v7373_v15 = vld [vmem:[#allocation2 + $0x2b2] sm:$0xff] }
 0x283   : > { %v4938_v32 = vpop.f32.mrf.mxu1  ;;  %12748 = vmatmul.mubr.msk.f32.gmra.mxu0 %vm341_vm0, %v7371_v20  ;;  %v5355_v3 = vpop.f32.mrf.mxu0  ;;  %v15682_v20 = vld [vmem:[#allocation2 + $0x270] sm:$0xff] }
 0x284   : > { %v15671_v0 = vadd.f32 %v12440_v51, %v5010_v36  ;;  %v5009_v47 = vadd.f32 %v4938_v32, %v15393_v45  ;;  %12750 = vmatprep.mubr.msk.f32.mxu0 %vm341_vm0, %v7372_v17  ;;  %17161 = vst [vmem:[#allocation38_spill] sm:$0xff] %v15682_v20  ;;  %v15684_v36 = vld [vmem:[#allocation2 + $0x288] sm:$0xff] }
 0x285   : > { %v12393_v48 = vpop.f32.mrf.mxu1  ;;  %12692 = vmatmul.mubr.msk.f32.gmra.mxu1 %vm341_vm0, %v15666_v34  ;;  %17162 = vst [vmem:[#allocation17_spill] sm:$0xff] %v15684_v36  ;;  %v12452_v45 = vpop.f32.mrf.mxu0  ;;  %v7731_v34 = vld [vmem:[#allocation2 + $0xec] sm:$0xff] }
 0x286   : > { %v15677_v12 = vadd.f32 %v5325_v21, %v5009_v47  ;;  %v5012_v1 = vadd.f32 %v12393_v48, %v15401_v50  ;;  %12694 = vmatprep.mubr.msk.f32.mxu1 %vm341_vm0, %v15668_v5  ;;  %v15692_v21 = vld [vmem:[#allocation2 + $0x10c] sm:$0xff] }
 0x287   : > { %v4948_v51 = vpop.f32.mrf.mxu1  ;;  %12751 = vmatmul.mubr.msk.f32.gmra.mxu0 %vm341_vm0, %v7373_v15  ;;  %v5365_v47 = vpop.f32.mrf.mxu0 }
 0x288   : > { %v15687_v17 = vadd.f32 %v12443_v54, %v5012_v1  ;;  %v5011_v32 = vadd.f32 %v4948_v51, %v15408_v22  ;;  %12805 = vmatprep.mubr.msk.f32.mxu0 %vm341_vm0, %v15206_v57  ;;  %v15701_v54 = vld [vmem:[#allocation2 + $0x290] sm:$0xff]  ;;  %v15706_v57 = vld [vmem:[%s16787_s2 + $0xc0] sm:$0xff]  ;;  %v15708_v1 = vld [vmem:[#allocation2 + $0x2a8] sm:$0xff] }
 0x289   : > { %v12396_v50 = vpop.f32.mrf.mxu1  ;;  %12695 = vmatmul.mubr.msk.f32.gmra.mxu1 %vm341_vm0, %v15682_v20  ;;  %17163 = vst [vmem:[#allocation39_spill] sm:$0xff] %v15701_v54  ;;  %17164 = vst [vmem:[#allocation18_spill] sm:$0xff] %v15708_v1  ;;  %v12507_v15 = vpop.f32.mrf.mxu0  ;;  %v15718_v51 = vld [vmem:[#allocation2 + $0x12c] sm:$0xff]  ;;  %v17166_v20 = vld [vmem:[#allocation3_spill] sm:$0xff] }
 0x28a   : > { %v15696_v48 = vadd.f32 %v5335_v25, %v5011_v32  ;;  %v5014_v5 = vadd.f32 %v12396_v50, %v15424_v14  ;;  %12697 = vmatprep.mubr.msk.f32.mxu1 %vm341_vm0, %v15684_v36  ;;  %17165 = vst [vmem:[#allocation19_spill] sm:$0xff] %v15718_v51 }
 0x28b   : > { %v4958_v22 = vpop.f32.mrf.mxu1  ;;  %12806 = vmatmul.mubr.msk.f32.vlgmr.msra.gmra.mxu0 %vm341_vm0, %v15692_v21  ;;  %v5989_v50 = vpop.f32.mrf.mxu0 }
 0x28c   : > { %v15712_v25 = vadd.f32 %v12446_v27, %v5014_v5  ;;  %v5013_v14 = vadd.f32 %v4958_v22, %v15433_v55  ;;  %12904 = vmatpush3.msra.mxu0 %v15418_v13  ;;  %12808 = vmatprep.mubr.msk.f32.mxu0 %vm341_vm0, %v15223_v41  ;;  %v15728_v13 = vld [vmem:[#allocation2 + $0x2b0] sm:$0xff] }
 0x28d   : > { %v12399_v32 = vpop.f32.mrf.mxu1  ;;  %12698 = vmatmul.mubr.msk.f32.gmra.mxu1 %vm341_vm0, %v15701_v54  ;;  %13003 = vmatprep.subr.mxu0 %v15706_v57  ;;  %v7729_v41 = vld [vmem:[#allocation2 + $0xcc] sm:$0xff]  ;;  %v12510_v5 = vpop.f32.mrf.mxu0 }
 0x28e   : > { %v15723_v36 = vadd.f32 %v5345_v30, %v5013_v14  ;;  %v5016_v27 = vadd.f32 %v12399_v32, %v15442_v6  ;;  %12700 = vmatprep.mubr.msk.f32.mxu1 %vm341_vm0, %v15708_v1  ;;  %v15737_v30 = vld [vmem:[#allocation2 + $0x14c] sm:$0xff] }
 0x28f   : > { %v4968_v55 = vpop.f32.mrf.mxu1  ;;  %12809 = vmatmul.mubr.msk.f32.gmra.mxu0 %vm341_vm0, %v15718_v51  ;;  %17167 = vst [vmem:[#allocation42_spill] sm:$0xff] %v15737_v30  ;;  %v5999_v14 = vpop.f32.mrf.mxu0 }
 0x290   : > { %v15732_v22 = vadd.f32 %v12449_v60, %v5016_v27  ;;  %v5015_v54 = vadd.f32 %v4968_v55, %v15449_v29  ;;  %12811 = vmatprep.mubr.msk.f32.mxu0 %vm341_vm0, %v17166_v20  ;;  %v7730_v60 = vld [vmem:[#allocation2 + $0xd4] sm:$0xff] }
 0x291   : > { %v12402_v6 = vpop.f32.mrf.mxu1  ;;  %12701 = vmatmul.mubr.msk.f32.gmra.mxu1 %vm341_vm0, %v15728_v13  ;;  %v12513_v29 = vpop.f32.mrf.mxu0 }
 0x292   : > { %v15741_v32 = vadd.f32 %v5355_v3, %v5015_v54  ;;  %v5018_v1 = vadd.f32 %v12402_v6, %v15455_v16  ;;  %12755 = vmatprep.mubr.msk.f32.mxu1 %vm341_vm0, %v7729_v41  ;;  %v15752_v3 = vld [vmem:[#allocation2 + $0x16c] sm:$0xff]  ;;  %v15757_v16 = vld [vmem:[%s16787_s2 + $0xb8] sm:$0xff] }
 0x293   : > { %v4978_v27 = vpop.f32.mrf.mxu1  ;;  %12812 = vmatmul.mubr.msk.f32.gmra.mxu0 %vm341_vm0, %v15737_v30  ;;  %17169 = vst [vmem:[#allocation20_spill] sm:$0xff] %v15752_v3  ;;  %v6009_v41 = vpop.f32.mrf.mxu0 }
 0x294   : > { %v15747_v20 = vadd.f32 %v12452_v45, %v5018_v1  ;;  %v5017_v55 = vadd.f32 %v4978_v27, %v15466_v8  ;;  %12814 = vmatprep.mubr.msk.f32.mxu0 %vm341_vm0, %v17168_v53  ;;  %v7732_v8 = vld [vmem:[#allocation2 + $0xf4] sm:$0xff] }
 0x295   : > { %v12457_v54 = vpop.f32.mrf.mxu1  ;;  %12756 = vmatmul.mubr.msk.f32.vlgmr.msra.gmra.mxu1 %vm341_vm0, %v7730_v60  ;;  %v12516_v1 = vpop.f32.mrf.mxu0 }
 0x296   : > { %v15760_v6 = vadd.f32 %v5365_v47, %v5017_v55  ;;  %v5762_v45 = vadd.f32 %v12457_v54, %v15476_v63  ;;  %12854 = vmatpush3.msra.mxu1 %v15463_v18  ;;  %12758 = vmatprep.mubr.msk.f32.mxu1 %vm341_vm0, %v7731_v34  ;;  %v17170_v47 = vld [vmem:[#allocation4_spill] sm:$0xff] }
 0x297   : > { %v5602_v53 = vpop.f32.mrf.mxu1  ;;  %12815 = vmatmul.mubr.msk.f32.gmra.mxu0 %vm341_vm0, %v15752_v3  ;;  %12953 = vmatprep.subr.mxu1 %v15757_v16  ;;  %v15773_v63 = vld [vmem:[#allocation2 + $0x18c] sm:$0xff]  ;;  %v6019_v34 = vpop.f32.mrf.mxu0 }
 0x298   : > { %v15768_v27 = vadd.f32 %v12507_v15, %v5762_v45  ;;  %v5761_v60 = vadd.f32 %v5602_v53, %v15482_v43  ;;  %12817 = vmatprep.mubr.msk.f32.mxu0 %vm341_vm0, %v17170_v47  ;;  %17171 = vst [vmem:[#allocation43_spill] sm:$0xff] %v15773_v63  ;;  %v15781_v15 = vld [vmem:[#allocation2 + $0x114] sm:$0xff] }
 0x299   : > { %v12460_v18 = vpop.f32.mrf.mxu1  ;;  %12759 = vmatmul.mubr.msk.f32.gmra.mxu1 %vm341_vm0, %v7732_v8  ;;  %17172 = vst [vmem:[#allocation22_spill] sm:$0xff] %v15781_v15  ;;  %v12519_v43 = vpop.f32.mrf.mxu0  ;;  %v17173_v8 = vld [vmem:[#allocation15_spill] sm:$0xff] }
 0x29a   : > { %v15776_v55 = vadd.f32 %v5989_v50, %v5761_v60  ;;  %v5764_v54 = vadd.f32 %v12460_v18, %v15493_v58  ;;  %12761 = vmatprep.mubr.msk.f32.mxu1 %vm341_vm0, %v15692_v21  ;;  %v15790_v50 = vld [vmem:[#allocation2 + $0x1ac] sm:$0xff] }
 0x29b   : > { %v5612_v45 = vpop.f32.mrf.mxu1  ;;  %12818 = vmatmul.mubr.msk.f32.gmra.mxu0 %vm341_vm0, %v15773_v63  ;;  %v6029_v21 = vpop.f32.mrf.mxu0 }
 0x29c   : > { %v15785_v53 = vadd.f32 %v12510_v5, %v5764_v54  ;;  %v5763_v47 = vadd.f32 %v5612_v45, %v15500_v56  ;;  %12820 = vmatprep.mubr.msk.f32.mxu0 %vm341_vm0, %v17173_v8  ;;  %v15799_v5 = vld [vmem:[#allocation2 + $0x134] sm:$0xff] }
 0x29d   : > { %v12463_v58 = vpop.f32.mrf.mxu1  ;;  %12762 = vmatmul.mubr.msk.f32.gmra.mxu1 %vm341_vm0, %v15781_v15  ;;  %17174 = vst [vmem:[#allocation44_spill] sm:$0xff] %v15799_v5  ;;  %v12522_v54 = vpop.f32.mrf.mxu0  ;;  %v17175_v15 = vld [vmem:[#allocation5_spill] sm:$0xff] }
 0x29e   : > { %v15794_v60 = vadd.f32 %v5999_v14, %v5763_v47  ;;  %v5766_v18 = vadd.f32 %v12463_v58, %v15511_v37  ;;  %12764 = vmatprep.mubr.msk.f32.mxu1 %vm341_vm0, %v15718_v51  ;;  %v15808_v14 = vld [vmem:[#allocation2 + $0x1cc] sm:$0xff] }
 0x29f   : > { %v5622_v56 = vpop.f32.mrf.mxu1  ;;  %12821 = vmatmul.mubr.msk.f32.gmra.mxu0 %vm341_vm0, %v15790_v50  ;;  %17176 = vst [vmem:[#allocation45_spill] sm:$0xff] %v15808_v14  ;;  %v6039_v47 = vpop.f32.mrf.mxu0 }
 0x2a0   : > { %v15803_v45 = vadd.f32 %v12513_v29, %v5766_v18  ;;  %v5765_v8 = vadd.f32 %v5622_v56, %v15518_v10  ;;  %12823 = vmatprep.mubr.msk.f32.mxu0 %vm341_vm0, %v17175_v15  ;;  %v15817_v29 = vld [vmem:[#allocation2 + $0x154] sm:$0xff] }
 0x2a1   : > { %v12466_v37 = vpop.f32.mrf.mxu1  ;;  %12765 = vmatmul.mubr.msk.f32.gmra.mxu1 %vm341_vm0, %v15799_v5  ;;  %17177 = vst [vmem:[#allocation25_spill] sm:$0xff] %v15817_v29  ;;  %v12525_v18 = vpop.f32.mrf.mxu0  ;;  %v17178_v5 = vld [vmem:[#allocation7_spill] sm:$0xff] }
 0x2a2   : > { %v15812_v58 = vadd.f32 %v6009_v41, %v5765_v8  ;;  %v5768_v51 = vadd.f32 %v12466_v37, %v15529_v49  ;;  %12767 = vmatprep.mubr.msk.f32.mxu1 %vm341_vm0, %v15737_v30  ;;  %v15826_v41 = vld [vmem:[#allocation2 + $0x1ec] sm:$0xff] }
 0x2a3   : > { %v5632_v10 = vpop.f32.mrf.mxu1  ;;  %12824 = vmatmul.mubr.msk.f32.gmra.mxu0 %vm341_vm0, %v15808_v14  ;;  %17179 = vst [vmem:[#allocation26_spill] sm:$0xff] %v15826_v41  ;;  %v6049_v8 = vpop.f32.mrf.mxu0 }
 0x2a4   : > { %v15821_v15 = vadd.f32 %v12516_v1, %v5768_v51  ;;  %v5767_v56 = vadd.f32 %v5632_v10, %v15536_v4  ;;  %12826 = vmatprep.mubr.msk.f32.mxu0 %vm341_vm0, %v17178_v5  ;;  %v15835_v51 = vld [vmem:[#allocation2 + $0x174] sm:$0xff] }
 0x2a5   : > { %v12469_v49 = vpop.f32.mrf.mxu1  ;;  %12768 = vmatmul.mubr.msk.f32.gmra.mxu1 %vm341_vm0, %v15817_v29  ;;  %17180 = vst [vmem:[#allocation46_spill] sm:$0xff] %v15835_v51  ;;  %v12528_v1 = vpop.f32.mrf.mxu0  ;;  %v17181_v29 = vld [vmem:[#allocation37_spill] sm:$0xff] }
 0x2a6   : > { %v15830_v37 = vadd.f32 %v6019_v34, %v5767_v56  ;;  %v5770_v30 = vadd.f32 %v12469_v49, %v15547_v35  ;;  %12770 = vmatprep.mubr.msk.f32.mxu1 %vm341_vm0, %v15752_v3  ;;  %v15844_v34 = vld [vmem:[#allocation2 + $0x20c] sm:$0xff] }
 0x2a7   : > { %v5642_v4 = vpop.f32.mrf.mxu1  ;;  %12827 = vmatmul.mubr.msk.f32.gmra.mxu0 %vm341_vm0, %v15826_v41  ;;  %17182 = vst [vmem:[#allocation47_spill] sm:$0xff] %v15844_v34  ;;  %v6059_v56 = vpop.f32.mrf.mxu0 }
 0x2a8   : > { %v15839_v5 = vadd.f32 %v12519_v43, %v5770_v30  ;;  %v5769_v10 = vadd.f32 %v5642_v4, %v15554_v23  ;;  %12829 = vmatprep.mubr.msk.f32.mxu0 %vm341_vm0, %v17181_v29  ;;  %v15853_v30 = vld [vmem:[#allocation2 + $0x194] sm:$0xff] }
 0x2a9   : > { %v12472_v35 = vpop.f32.mrf.mxu1  ;;  %12771 = vmatmul.mubr.msk.f32.gmra.mxu1 %vm341_vm0, %v15835_v51  ;;  %v12531_v43 = vpop.f32.mrf.mxu0  ;;  %v17183_v51 = vld [vmem:[#allocation28_spill] sm:$0xff] }
 0x2aa   : > { %v15848_v49 = vadd.f32 %v6029_v21, %v5769_v10  ;;  %v5772_v3 = vadd.f32 %v12472_v35, %v15565_v40  ;;  %12773 = vmatprep.mubr.msk.f32.mxu1 %vm341_vm0, %v15773_v63  ;;  %v15869_v63 = vld [vmem:[#allocation2 + $0x1b4] sm:$0xff] }
 0x2ab   : > { %v5652_v23 = vpop.f32.mrf.mxu1  ;;  %12830 = vmatmul.mubr.msk.f32.gmra.mxu0 %vm341_vm0, %v15844_v34  ;;  %v6069_v40 = vpop.f32.mrf.mxu0  ;;  %17184 = vst [vmem:[#allocation48_spill] sm:$0xff] %v15869_v63 }
 0x2ac   : > { %v15857_v29 = vadd.f32 %v12522_v54, %v5772_v3  ;;  %v5771_v4 = vadd.f32 %v5652_v23, %v15572_v24  ;;  %12832 = vmatprep.mubr.msk.f32.mxu0 %vm341_vm0, %v17183_v51 }
 0x2ad   : > { %v12475_v21 = vpop.f32.mrf.mxu1  ;;  %12774 = vmatmul.mubr.msk.f32.gmra.mxu1 %vm341_vm0, %v15853_v30  ;;  %v12534_v54 = vpop.f32.mrf.mxu0 }
 0x2ae   : > { %v15864_v10 = vadd.f32 %v6039_v47, %v5771_v4  ;;  %v5774_v35 = vadd.f32 %v12475_v21, %v15583_v28  ;;  %12776 = vmatprep.mubr.msk.f32.mxu1 %vm341_vm0, %v15790_v50  ;;  %v15878_v47 = vld [vmem:[#allocation2 + $0x24c] sm:$0xff] }
 0x2af   : > { %v5662_v3 = vpop.f32.mrf.mxu1  ;;  %12833 = vmatmul.mubr.msk.f32.gmra.mxu0 %vm341_vm0, %v15367_v42  ;;  %v6079_v23 = vpop.f32.mrf.mxu0  ;;  %v15887_v42 = vld [vmem:[#allocation2 + $0x1d4] sm:$0xff] }
 0x2b0   : > { %v15873_v24 = vadd.f32 %v12525_v18, %v5774_v35  ;;  %v5773_v51 = vadd.f32 %v5662_v3, %v15590_v61  ;;  %12835 = vmatprep.mubr.msk.f32.mxu0 %vm341_vm0, %v15369_v7  ;;  %17185 = vst [vmem:[#allocation49_spill] sm:$0xff] %v15887_v42  ;;  %v17186_v3 = vld [vmem:[#allocation6_spill] sm:$0xff] }
 0x2b1   : > { %v12478_v28 = vpop.f32.mrf.mxu1  ;;  %12777 = vmatmul.mubr.msk.f32.gmra.mxu1 %vm341_vm0, %v15869_v63  ;;  %v12537_v18 = vpop.f32.mrf.mxu0 }
 0x2b2   : > { %v15882_v4 = vadd.f32 %v6049_v8, %v5773_v51  ;;  %v5776_v21 = vadd.f32 %v12478_v28, %v15601_v44  ;;  %12779 = vmatprep.mubr.msk.f32.mxu1 %vm341_vm0, %v15808_v14  ;;  %v15896_v8 = vld [vmem:[#allocation2 + $0x26c] sm:$0xff] }
 0x2b3   : > { %v5672_v61 = vpop.f32.mrf.mxu1  ;;  %12836 = vmatmul.mubr.msk.f32.gmra.mxu0 %vm341_vm0, %v15878_v47  ;;  %v6089_v51 = vpop.f32.mrf.mxu0 }
 0x2b4   : > { %v15891_v7 = vadd.f32 %v12528_v1, %v5776_v21  ;;  %v5775_v35 = vadd.f32 %v5672_v61, %v15608_v52  ;;  %12838 = vmatprep.mubr.msk.f32.mxu0 %vm341_vm0, %v17186_v3  ;;  %v15905_v1 = vld [vmem:[#allocation2 + $0x1f4] sm:$0xff] }
 0x2b5   : > { %v12481_v44 = vpop.f32.mrf.mxu1  ;;  %12780 = vmatmul.mubr.msk.f32.gmra.mxu1 %vm341_vm0, %v15887_v42  ;;  %17187 = vst [vmem:[#allocation50_spill] sm:$0xff] %v15905_v1  ;;  %v12540_v21 = vpop.f32.mrf.mxu0  ;;  %v17188_v42 = vld [vmem:[#allocation16_spill] sm:$0xff] }
 0x2b6   : > { %v15900_v28 = vadd.f32 %v6059_v56, %v5775_v35  ;;  %v5778_v14 = vadd.f32 %v12481_v44, %v15619_v38  ;;  %12782 = vmatprep.mubr.msk.f32.mxu1 %vm341_vm0, %v15826_v41  ;;  %v15921_v41 = vld [vmem:[#allocation2 + $0x214] sm:$0xff] }
 0x2b7   : > { %v5682_v52 = vpop.f32.mrf.mxu1  ;;  %12839 = vmatmul.mubr.msk.f32.gmra.mxu0 %vm341_vm0, %v15896_v8  ;;  %v6099_v38 = vpop.f32.mrf.mxu0 }
 0x2b8   : > { %v15909_v61 = vadd.f32 %v12531_v43, %v5778_v14  ;;  %v5777_v3 = vadd.f32 %v5682_v52, %v15626_v9  ;;  %12841 = vmatprep.mubr.msk.f32.mxu0 %vm341_vm0, %v17188_v42  ;;  %v15923_v43 = vld [vmem:[#allocation2 + $0x22c] sm:$0xff] }
 0x2b9   : > { %v12484_v56 = vpop.f32.mrf.mxu1  ;;  %12783 = vmatmul.mubr.msk.f32.gmra.mxu1 %vm341_vm0, %v15905_v1  ;;  %17189 = vst [vmem:[#allocation51_spill] sm:$0xff] %v15923_v43  ;;  %v12543_v9 = vpop.f32.mrf.mxu0  ;;  %v17190_v52 = vld [vmem:[#allocation29_spill] sm:$0xff] }
 0x2ba   : > { %v15916_v35 = vadd.f32 %v6069_v40, %v5777_v3  ;;  %v5780_v44 = vadd.f32 %v12484_v56, %v15637_v31  ;;  %12785 = vmatprep.mubr.msk.f32.mxu1 %vm341_vm0, %v15844_v34  ;;  %v17191_v40 = vld [vmem:[#allocation30_spill] sm:$0xff]  ;;  %v8145_v56 = vld [vmem:[#allocation2 + $0x2c4] sm:$0xff] }
 0x2bb   : > { %v5692_v14 = vpop.f32.mrf.mxu1  ;;  %12842 = vmatmul.mubr.msk.f32.gmra.mxu0 %vm341_vm0, %v17190_v52  ;;  %v6109_v3 = vpop.f32.mrf.mxu0 }
 0x2bc   : > { %v15927_v42 = vadd.f32 %v12534_v54, %v5780_v44  ;;  %v5779_v1 = vadd.f32 %v5692_v14, %v15644_v62  ;;  %12844 = vmatprep.mubr.msk.f32.mxu0 %vm341_vm0, %v17191_v40  ;;  %v15939_v54 = vld [vmem:[#allocation2 + $0x234] sm:$0xff]  ;;  %v8147_v40 = vld [vmem:[#allocation2 + $0x2e4] sm:$0xff] }
 0x2bd   : > { %v12487_v31 = vpop.f32.mrf.mxu1  ;;  %12786 = vmatmul.mubr.msk.f32.gmra.mxu1 %vm341_vm0, %v15921_v41  ;;  %v12546_v62 = vpop.f32.mrf.mxu0 }
 0x2be   : > { %v15934_v34 = vadd.f32 %v6079_v23, %v5779_v1  ;;  %v5782_v63 = vadd.f32 %v12487_v31, %v15655_v39  ;;  %12788 = vmatprep.mubr.msk.f32.mxu1 %vm341_vm0, %v15923_v43  ;;  %v15947_v23 = vld [vmem:[#allocation2 + $0x2cc] sm:$0xff] }
 0x2bf   : > { %v5702_v44 = vpop.f32.mrf.mxu1  ;;  %12845 = vmatmul.mubr.msk.f32.gmra.mxu0 %vm341_vm0, %v15438_v46  ;;  %17192 = vst [vmem:[#allocation52_spill] sm:$0xff] %v15947_v23  ;;  %v6119_v39 = vpop.f32.mrf.mxu0  ;;  %v15956_v46 = vld [vmem:[#allocation2 + $0x254] sm:$0xff] }
 0x2c0   : > { %v15943_v14 = vadd.f32 %v12537_v18, %v5782_v63  ;;  %v5781_v52 = vadd.f32 %v5702_v44, %v15661_v59  ;;  %12847 = vmatprep.mubr.msk.f32.mxu0 %vm341_vm0, %v8145_v56 }
 0x2c1   : > { %v12490_v1 = vpop.f32.mrf.mxu1  ;;  %12789 = vmatmul.mubr.msk.f32.gmra.mxu1 %vm341_vm0, %v15939_v54  ;;  %v12549_v63 = vpop.f32.mrf.mxu0 }
 0x2c2   : > { %v15951_v31 = vadd.f32 %v6089_v51, %v5781_v52  ;;  %v5784_v43 = vadd.f32 %v12490_v1, %v15671_v0  ;;  %12791 = vmatprep.mubr.msk.f32.mxu1 %vm341_vm0, %v15878_v47  ;;  %v15964_v51 = vld [vmem:[#allocation2 + $0x2ec] sm:$0xff] }
 0x2c3   : > { %v5712_v59 = vpop.f32.mrf.mxu1  ;;  %12848 = vmatmul.mubr.msk.f32.gmra.mxu0 %vm341_vm0, %v15947_v23  ;;  %17193 = vst [vmem:[#allocation53_spill] sm:$0xff] %v15964_v51  ;;  %v6129_v0 = vpop.f32.mrf.mxu0 }
 0x2c4   : > { %v15960_v18 = vadd.f32 %v12540_v21, %v5784_v43  ;;  %v5783_v56 = vadd.f32 %v5712_v59, %v15677_v12  ;;  %12850 = vmatprep.mubr.msk.f32.mxu0 %vm341_vm0, %v8147_v40  ;;  %v15973_v21 = vld [vmem:[#allocation2 + $0x274] sm:$0xff]  ;;  %v15975_v12 = vld [vmem:[#allocation2 + $0x28c] sm:$0xff] }
 0x2c5   : > { %v12493_v44 = vpop.f32.mrf.mxu1  ;;  %12792 = vmatmul.mubr.msk.f32.gmra.mxu1 %vm341_vm0, %v15956_v46  ;;  %17194 = vst [vmem:[#allocation54_spill] sm:$0xff] %v15973_v21  ;;  %17195 = vst [vmem:[#allocation3_spill] sm:$0xff] %v15975_v12  ;;  %v12552_v40 = vpop.f32.mrf.mxu0 }
 0x2c6   : > { %v15968_v52 = vadd.f32 %v6099_v38, %v5783_v56  ;;  %v5786_v1 = vadd.f32 %v12493_v44, %v15687_v17  ;;  %12794 = vmatprep.mubr.msk.f32.mxu1 %vm341_vm0, %v15896_v8 }
 0x2c7   : > { %v5722_v43 = vpop.f32.mrf.mxu1  ;;  %12851 = vmatmul.mubr.msk.f32.gmra.mxu0 %vm341_vm0, %v15964_v51  ;;  %v6139_v38 = vpop.f32.mrf.mxu0  ;;  %v15991_v51 = vld [vmem:[#allocation2 + $0x294] sm:$0xff] }
 0x2c8   : > { %v15979_v59 = vadd.f32 %v12543_v9, %v5786_v1  ;;  %v5785_v23 = vadd.f32 %v5722_v43, %v15696_v48  ;;  %12905 = vmatprep.mubr.msk.f32.mxu0 %vm341_vm0, %v15471_v19  ;;  %17196 = vst [vmem:[#allocation27_spill] sm:$0xff] %v15991_v51  ;;  %v15993_v1 = vld [vmem:[#allocation2 + $0x2ac] sm:$0xff] }
 0x2c9   : > { %v12496_v17 = vpop.f32.mrf.mxu1  ;;  %12795 = vmatmul.mubr.msk.f32.gmra.mxu1 %vm341_vm0, %v15973_v21  ;;  %17197 = vst [vmem:[#allocation4_spill] sm:$0xff] %v15993_v1  ;;  %v12607_v48 = vpop.f32.mrf.mxu0  ;;  %v17198_v43 = vld [vmem:[#allocation40_spill] sm:$0xff] }
 0x2ca   : > { %v15986_v56 = vadd.f32 %v6109_v3, %v5785_v23  ;;  %v5788_v44 = vadd.f32 %v12496_v17, %v15712_v25  ;;  %12797 = vmatprep.mubr.msk.f32.mxu1 %vm341_vm0, %v15975_v12  ;;  %v17199_v3 = vld [vmem:[#allocation8_spill] sm:$0xff] }
 0x2cb   : > { %v5732_v9 = vpop.f32.mrf.mxu1  ;;  %12906 = vmatmul.mubr.msk.f32.vlgmr.msra.gmra.mxu0 %vm341_vm0, %v17198_v43  ;;  %v6764_v23 = vpop.f32.mrf.mxu0 }
 0x2cc   : > { %v15997_v19 = vadd.f32 %v12546_v62, %v5788_v44  ;;  %v5787_v21 = vadd.f32 %v5732_v9, %v15723_v36  ;;  %13004 = vmatpush3.msra.mxu0 %v15706_v57  ;;  %12908 = vmatprep.mubr.msk.f32.mxu0 %vm341_vm0, %v17199_v3  ;;  %v16010_v62 = vld [vmem:[#allocation2 + $0x2b4] sm:$0xff]  ;;  %v8504_v44 = vld [vmem:[#allocation2 + $0x106] sm:$0xff] }
 0x2cd   : > { %v12499_v25 = vpop.f32.mrf.mxu1  ;;  %12798 = vmatmul.mubr.msk.f32.gmra.mxu1 %vm341_vm0, %v15991_v51  ;;  %v12610_v57 = vpop.f32.mrf.mxu0  ;;  %v17200_v9 = vld [vmem:[#allocation9_spill] sm:$0xff] }
 0x2ce   : > { %v16005_v17 = vadd.f32 %v6119_v39, %v5787_v21  ;;  %v5790_v12 = vadd.f32 %v12499_v25, %v15732_v22  ;;  %12800 = vmatprep.mubr.msk.f32.mxu1 %vm341_vm0, %v15993_v1  ;;  %v8505_v1 = vld [vmem:[#allocation2 + $0x10e] sm:$0xff] }
 0x2cf   : > { %v5742_v36 = vpop.f32.mrf.mxu1  ;;  %12909 = vmatmul.mubr.msk.f32.gmra.mxu0 %vm341_vm0, %v17200_v9  ;;  %v6774_v22 = vpop.f32.mrf.mxu0  ;;  %v17201_v51 = vld [vmem:[#allocation41_spill] sm:$0xff] }
 0x2d0   : > { %v16014_v43 = vadd.f32 %v12549_v63, %v5790_v12  ;;  %v5789_v3 = vadd.f32 %v5742_v36, %v15741_v32  ;;  %12911 = vmatprep.mubr.msk.f32.mxu0 %vm341_vm0, %v15507_v11  ;;  %v8506_v63 = vld [vmem:[#allocation2 + $0x126] sm:$0xff] }
 0x2d1   : > { %v12502_v39 = vpop.f32.mrf.mxu1  ;;  %12801 = vmatmul.mubr.msk.f32.gmra.mxu1 %vm341_vm0, %v16010_v62  ;;  %v12613_v12 = vpop.f32.mrf.mxu0  ;;  %v17202_v36 = vld [vmem:[#allocation31_spill] sm:$0xff] }
 0x2d2   : > { %v16021_v21 = vadd.f32 %v6129_v0, %v5789_v3  ;;  %v5792_v25 = vadd.f32 %v12502_v39, %v15747_v20  ;;  %12855 = vmatprep.mubr.msk.f32.mxu1 %vm341_vm0, %v8504_v44  ;;  %v8508_v39 = vld [vmem:[#allocation2 + $0x146] sm:$0xff] }
 0x2d3   : > { %v5752_v9 = vpop.f32.mrf.mxu1  ;;  %12912 = vmatmul.mubr.msk.f32.gmra.mxu0 %vm341_vm0, %v17201_v51  ;;  %v6784_v20 = vpop.f32.mrf.mxu0  ;;  %v8507_v51 = vld [vmem:[#allocation2 + $0x12e] sm:$0xff] }
 0x2d4   : > { %v16027_v32 = vadd.f32 %v12552_v40, %v5792_v25  ;;  %v5791_v11 = vadd.f32 %v5752_v9, %v15760_v6  ;;  %12914 = vmatprep.mubr.msk.f32.mxu0 %vm341_vm0, %v17202_v36  ;;  %v17203_v6 = vld [vmem:[#allocation32_spill] sm:$0xff]  ;;  %v17204_v36 = vld [vmem:[#allocation21_spill] sm:$0xff] }
 0x2d5   : > { %v12557_v0 = vpop.f32.mrf.mxu1  ;;  %12856 = vmatmul.mubr.msk.f32.vlgmr.msra.gmra.mxu1 %vm341_vm0, %v8505_v1  ;;  %v12616_v25 = vpop.f32.mrf.mxu0 }
 0x2d6   : > { %v16033_v3 = vadd.f32 %v6139_v38, %v5791_v11  ;;  %v6537_v44 = vadd.f32 %v12557_v0, %v15768_v27  ;;  %12954 = vmatpush3.msra.mxu1 %v15757_v16  ;;  %12858 = vmatprep.mubr.msk.f32.mxu1 %vm341_vm0, %v8506_v63  ;;  %v8509_v11 = vld [vmem:[#allocation2 + $0x14e] sm:$0xff] }
 0x2d7   : > { %v6377_v40 = vpop.f32.mrf.mxu1  ;;  %12915 = vmatmul.mubr.msk.f32.gmra.mxu0 %vm341_vm0, %v17203_v6  ;;  %v6794_v16 = vpop.f32.mrf.mxu0  ;;  %v8510_v6 = vld [vmem:[#allocation2 + $0x166] sm:$0xff] }
 0x2d8   : > { %v16040_v9 = vadd.f32 %v12607_v48, %v6537_v44  ;;  %v6536_v1 = vadd.f32 %v6377_v40, %v15776_v55  ;;  %12917 = vmatprep.mubr.msk.f32.mxu0 %vm341_vm0, %v17204_v36  ;;  %v17205_v44 = vld [vmem:[#allocation10_spill] sm:$0xff]  ;;  %v17206_v36 = vld [vmem:[#allocation11_spill] sm:$0xff] }
 0x2d9   : > { %v12560_v38 = vpop.f32.mrf.mxu1  ;;  %12859 = vmatmul.mubr.msk.f32.gmra.mxu1 %vm341_vm0, %v8507_v51  ;;  %v12619_v48 = vpop.f32.mrf.mxu0 }
 0x2da   : > { %v16046_v27 = vadd.f32 %v6764_v23, %v6536_v1  ;;  %v6539_v63 = vadd.f32 %v12560_v38, %v15785_v53  ;;  %12861 = vmatprep.mubr.msk.f32.mxu1 %vm341_vm0, %v8508_v39  ;;  %v8511_v1 = vld [vmem:[#allocation2 + $0x16e] sm:$0xff] }
 0x2db   : > { %v6387_v0 = vpop.f32.mrf.mxu1  ;;  %12918 = vmatmul.mubr.msk.f32.gmra.mxu0 %vm341_vm0, %v17205_v44  ;;  %v6804_v53 = vpop.f32.mrf.mxu0  ;;  %v8512_v44 = vld [vmem:[#allocation2 + $0x186] sm:$0xff] }
 0x2dc   : > { %v16052_v55 = vadd.f32 %v12610_v57, %v6539_v63  ;;  %v6538_v40 = vadd.f32 %v6387_v0, %v15794_v60  ;;  %12920 = vmatprep.mubr.msk.f32.mxu0 %vm341_vm0, %v17206_v36  ;;  %v17207_v63 = vld [vmem:[#allocation23_spill] sm:$0xff] }
 0x2dd   : > { %v12563_v23 = vpop.f32.mrf.mxu1  ;;  %12862 = vmatmul.mubr.msk.f32.gmra.mxu1 %vm341_vm0, %v8509_v11 }
 0x2de   : > { %v16058_v51 = vadd.f32 %v6774_v22, %v6538_v40  ;;  %v6541_v39 = vadd.f32 %v12563_v23, %v15803_v45  ;;  %12864 = vmatprep.mubr.msk.f32.mxu1 %vm341_vm0, %v8510_v6  ;;  %v12622_v57 = vpop.f32.mrf.mxu0  ;;  %v8513_v40 = vld [vmem:[#allocation2 + $0x18e] sm:$0xff]  ;;  %v8514_v23 = vld [vmem:[#allocation2 + $0x1a6] sm:$0xff] }
 0x2df   : > { %v6397_v38 = vpop.f32.mrf.mxu1  ;;  %12921 = vmatmul.mubr.msk.f32.gmra.mxu0 %vm341_vm0, %v17207_v63  ;;  %v17208_v63 = vld [vmem:[#allocation33_spill] sm:$0xff] }
 0x2e0   : > { %v16064_v60 = vadd.f32 %v12613_v12, %v6541_v39  ;;  %v6540_v0 = vadd.f32 %v6397_v38, %v15812_v58  ;;  %12923 = vmatprep.mubr.msk.f32.mxu0 %vm341_vm0, %v15579_v2  ;;  %v6814_v45 = vpop.f32.mrf.mxu0  ;;  %v8515_v38 = vld [vmem:[#allocation2 + $0x1ae] sm:$0xff] }
 0x2e1   : > { %v12566_v22 = vpop.f32.mrf.mxu1  ;;  %12865 = vmatmul.mubr.msk.f32.gmra.mxu1 %vm341_vm0, %v8511_v1 }
 0x2e2   : > { %v16070_v11 = vadd.f32 %v6784_v20, %v6540_v0  ;;  %v6543_v6 = vadd.f32 %v12566_v22, %v15821_v15  ;;  %12867 = vmatprep.mubr.msk.f32.mxu1 %vm341_vm0, %v8512_v44  ;;  %v12625_v12 = vpop.f32.mrf.mxu0  ;;  %v17209_v0 = vld [vmem:[#allocation34_spill] sm:$0xff] }
 0x2e3   : > { %v6407_v36 = vpop.f32.mrf.mxu1  ;;  %12924 = vmatmul.mubr.msk.f32.gmra.mxu0 %vm341_vm0, %v15595_v33  ;;  %v8516_v33 = vld [vmem:[#allocation2 + $0x1c6] sm:$0xff] }
 0x2e4   : > { %v16076_v58 = vadd.f32 %v12616_v25, %v6543_v6  ;;  %v6542_v2 = vadd.f32 %v6407_v36, %v15830_v37  ;;  %12926 = vmatprep.mubr.msk.f32.mxu0 %vm341_vm0, %v15597_v26  ;;  %v6824_v15 = vpop.f32.mrf.mxu0 }
 0x2e5   : > { %v12569_v20 = vpop.f32.mrf.mxu1  ;;  %12868 = vmatmul.mubr.msk.f32.gmra.mxu1 %vm341_vm0, %v8513_v40  ;;  %v8517_v40 = vld [vmem:[#allocation2 + $0x1ce] sm:$0xff] }
 0x2e6   : > { %v16082_v39 = vadd.f32 %v6794_v16, %v6542_v2  ;;  %v6545_v1 = vadd.f32 %v12569_v20, %v15839_v5  ;;  %12870 = vmatprep.mubr.msk.f32.mxu1 %vm341_vm0, %v8514_v23  ;;  %v12628_v25 = vpop.f32.mrf.mxu0  ;;  %v8518_v23 = vld [vmem:[#allocation2 + $0x1e6] sm:$0xff] }
 0x2e7   : > { %v6417_v44 = vpop.f32.mrf.mxu1  ;;  %12927 = vmatmul.mubr.msk.f32.gmra.mxu0 %vm341_vm0, %v17208_v63  ;;  %v17210_v2 = vld [vmem:[#allocation24_spill] sm:$0xff] }
 0x2e8   : > { %v16088_v37 = vadd.f32 %v12619_v48, %v6545_v1  ;;  %v6544_v26 = vadd.f32 %v6417_v44, %v15848_v49  ;;  %12929 = vmatprep.mubr.msk.f32.mxu0 %vm341_vm0, %v17209_v0  ;;  %v6834_v5 = vpop.f32.mrf.mxu0  ;;  %v17211_v1 = vld [vmem:[#allocation12_spill] sm:$0xff]  ;;  %v17212_v0 = vld [vmem:[#allocation13_spill] sm:$0xff] }
 0x2e9   : > { %v12572_v16 = vpop.f32.mrf.mxu1  ;;  %12871 = vmatmul.mubr.msk.f32.gmra.mxu1 %vm341_vm0, %v8515_v38 }
 0x2ea   : > { %v16094_v22 = vadd.f32 %v6804_v53, %v6544_v26  ;;  %v6547_v6 = vadd.f32 %v12572_v16, %v15857_v29  ;;  %12873 = vmatprep.mubr.msk.f32.mxu1 %vm341_vm0, %v8516_v33  ;;  %v12631_v48 = vpop.f32.mrf.mxu0  ;;  %v8519_v33 = vld [vmem:[#allocation2 + $0x1ee] sm:$0xff]  ;;  %v8520_v26 = vld [vmem:[#allocation2 + $0x206] sm:$0xff] }
 0x2eb   : > { %v6427_v36 = vpop.f32.mrf.mxu1  ;;  %12930 = vmatmul.mubr.msk.f32.gmra.mxu0 %vm341_vm0, %v17210_v2 }
 0x2ec   : > { %v16100_v49 = vadd.f32 %v12622_v57, %v6547_v6  ;;  %v6546_v20 = vadd.f32 %v6427_v36, %v15864_v10  ;;  %12932 = vmatprep.mubr.msk.f32.mxu0 %vm341_vm0, %v17211_v1  ;;  %v6844_v29 = vpop.f32.mrf.mxu0  ;;  %v17213_v6 = vld [vmem:[#allocation35_spill] sm:$0xff]  ;;  %v17214_v1 = vld [vmem:[#allocation36_spill] sm:$0xff] }
 0x2ed   : > { %v12575_v53 = vpop.f32.mrf.mxu1  ;;  %12874 = vmatmul.mubr.msk.f32.gmra.mxu1 %vm341_vm0, %v8517_v40 }
 0x2ee   : > { %v16106_v38 = vadd.f32 %v6814_v45, %v6546_v20  ;;  %v6549_v44 = vadd.f32 %v12575_v53, %v15873_v24  ;;  %12876 = vmatprep.mubr.msk.f32.mxu1 %vm341_vm0, %v8518_v23  ;;  %v12634_v57 = vpop.f32.mrf.mxu0  ;;  %v8521_v23 = vld [vmem:[#allocation2 + $0x20e] sm:$0xff]  ;;  %v8522_v20 = vld [vmem:[#allocation2 + $0x226] sm:$0xff] }
 0x2ef   : > { %v6437_v63 = vpop.f32.mrf.mxu1  ;;  %12933 = vmatmul.mubr.msk.f32.gmra.mxu0 %vm341_vm0, %v17212_v0 }
 0x2f0   : > { %v16112_v10 = vadd.f32 %v12625_v12, %v6549_v44  ;;  %v6548_v16 = vadd.f32 %v6437_v63, %v15882_v4  ;;  %12935 = vmatprep.mubr.msk.f32.mxu0 %vm341_vm0, %v17213_v6  ;;  %v6854_v24 = vpop.f32.mrf.mxu0  ;;  %v17215_v44 = vld [vmem:[#allocation14_spill] sm:$0xff] }
 0x2f1   : > { %v12578_v45 = vpop.f32.mrf.mxu1  ;;  %12877 = vmatmul.mubr.msk.f32.gmra.mxu1 %vm341_vm0, %v8519_v33  ;;  %v17216_v6 = vld [vmem:[#allocation38_spill] sm:$0xff] }
 0x2f2   : > { %v16118_v40 = vadd.f32 %v6824_v15, %v6548_v16  ;;  %v6551_v36 = vadd.f32 %v12578_v45, %v15891_v7  ;;  %12879 = vmatprep.mubr.msk.f32.mxu1 %vm341_vm0, %v8520_v26  ;;  %v12637_v12 = vpop.f32.mrf.mxu0  ;;  %v8523_v26 = vld [vmem:[#allocation2 + $0x22e] sm:$0xff]  ;;  %v8524_v16 = vld [vmem:[#allocation2 + $0x246] sm:$0xff] }
 0x2f3   : > { %v6447_v2 = vpop.f32.mrf.mxu1  ;;  %12936 = vmatmul.mubr.msk.f32.gmra.mxu0 %vm341_vm0, %v17214_v1 }
 0x2f4   : > { %v16124_v4 = vadd.f32 %v12628_v25, %v6551_v36  ;;  %v6550_v53 = vadd.f32 %v6447_v2, %v15900_v28  ;;  %12938 = vmatprep.mubr.msk.f32.mxu0 %vm341_vm0, %v17215_v44  ;;  %v6864_v7 = vpop.f32.mrf.mxu0  ;;  %v17217_v36 = vld [vmem:[#allocation17_spill] sm:$0xff]  ;;  %v17218_v44 = vld [vmem:[#allocation39_spill] sm:$0xff] }
 0x2f5   : > { %v12581_v15 = vpop.f32.mrf.mxu1  ;;  %12880 = vmatmul.mubr.msk.f32.gmra.mxu1 %vm341_vm0, %v8521_v23 }
 0x2f6   : > { %v16130_v33 = vadd.f32 %v6834_v5, %v6550_v53  ;;  %v6553_v63 = vadd.f32 %v12581_v15, %v15909_v61  ;;  %12882 = vmatprep.mubr.msk.f32.mxu1 %vm341_vm0, %v8522_v20  ;;  %v12640_v25 = vpop.f32.mrf.mxu0  ;;  %v8525_v20 = vld [vmem:[#allocation2 + $0x24e] sm:$0xff]  ;;  %v8526_v53 = vld [vmem:[#allocation2 + $0x266] sm:$0xff] }
 0x2f7   : > { %v6457_v0 = vpop.f32.mrf.mxu1  ;;  %12939 = vmatmul.mubr.msk.f32.gmra.mxu0 %vm341_vm0, %v17216_v6  ;;  %v8527_v6 = vld [vmem:[#allocation2 + $0x26e] sm:$0xff] }
 0x2f8   : > { %v16136_v28 = vadd.f32 %v12631_v48, %v6553_v63  ;;  %v6552_v45 = vadd.f32 %v6457_v0, %v15916_v35  ;;  %12941 = vmatprep.mubr.msk.f32.mxu0 %vm341_vm0, %v17217_v36  ;;  %v6874_v61 = vpop.f32.mrf.mxu0  ;;  %v17219_v63 = vld [vmem:[#allocation18_spill] sm:$0xff] }
 0x2f9   : > { %v12584_v5 = vpop.f32.mrf.mxu1  ;;  %12883 = vmatmul.mubr.msk.f32.gmra.mxu1 %vm341_vm0, %v8523_v26  ;;  %v8919_v26 = vld [vmem:[#allocation2 + $0x2c8] sm:$0xff] }
 0x2fa   : > { %v16142_v23 = vadd.f32 %v6844_v29, %v6552_v45  ;;  %v6555_v2 = vadd.f32 %v12584_v5, %v15927_v42  ;;  %12885 = vmatprep.mubr.msk.f32.mxu1 %vm341_vm0, %v8524_v16  ;;  %v12643_v48 = vpop.f32.mrf.mxu0 }
 0x2fb   : > { %v6467_v1 = vpop.f32.mrf.mxu1  ;;  %12942 = vmatmul.mubr.msk.f32.gmra.mxu0 %vm341_vm0, %v17218_v44  ;;  %v8529_v44 = vld [vmem:[#allocation2 + $0x28e] sm:$0xff] }
 0x2fc   : > { %v16148_v35 = vadd.f32 %v12634_v57, %v6555_v2  ;;  %v6554_v15 = vadd.f32 %v6467_v1, %v15934_v34  ;;  %12944 = vmatprep.mubr.msk.f32.mxu0 %vm341_vm0, %v17219_v63  ;;  %v6884_v42 = vpop.f32.mrf.mxu0  ;;  %v8528_v57 = vld [vmem:[#allocation2 + $0x286] sm:$0xff]  ;;  %v8920_v2 = vld [vmem:[#allocation2 + $0x2d0] sm:$0xff] }
 0x2fd   : > { %v12587_v29 = vpop.f32.mrf.mxu1  ;;  %12886 = vmatmul.mubr.msk.f32.gmra.mxu1 %vm341_vm0, %v8525_v20  ;;  %v8921_v20 = vld [vmem:[#allocation2 + $0x2e8] sm:$0xff] }
 0x2fe   : > { %v16154_v0 = vadd.f32 %v6854_v24, %v6554_v15  ;;  %v6557_v16 = vadd.f32 %v12587_v29, %v15943_v14  ;;  %12888 = vmatprep.mubr.msk.f32.mxu1 %vm341_vm0, %v8526_v53  ;;  %v12646_v36 = vpop.f32.mrf.mxu0  ;;  %v8922_v29 = vld [vmem:[#allocation2 + $0x2f0] sm:$0xff] }
 0x2ff   : > { %v6477_v45 = vpop.f32.mrf.mxu1  ;;  %12945 = vmatmul.mubr.msk.f32.gmra.mxu0 %vm341_vm0, %v15728_v13 }
 0x300   : > { %v16160_v34 = vadd.f32 %v12637_v12, %v6557_v16  ;;  %v6556_v5 = vadd.f32 %v6477_v45, %v15951_v31  ;;  %12947 = vmatprep.mubr.msk.f32.mxu0 %vm341_vm0, %v8919_v26  ;;  %v6894_v14 = vpop.f32.mrf.mxu0  ;;  %v8530_v12 = vld [vmem:[#allocation2 + $0x2a6] sm:$0xff]  ;;  %v8531_v45 = vld [vmem:[#allocation2 + $0x2ae] sm:$0xff] }
 0x301   : > { %v12590_v24 = vpop.f32.mrf.mxu1  ;;  %12889 = vmatmul.mubr.msk.f32.gmra.mxu1 %vm341_vm0, %v8527_v6 }
 0x302   : > { %v16165_v1 = vadd.f32 %v6864_v7, %v6556_v5  ;;  %v6559_v53 = vadd.f32 %v12590_v24, %v15960_v18  ;;  %12891 = vmatprep.mubr.msk.f32.mxu1 %vm341_vm0, %v8528_v57  ;;  %v12649_v15 = vpop.f32.mrf.mxu0  ;;  %v9665_v18 = vld [vmem:[#allocation2 + $0x10c] sm:$0xff] }
 0x303   : > { %v6487_v13 = vpop.f32.mrf.mxu1  ;;  %12948 = vmatmul.mubr.msk.f32.gmra.mxu0 %vm341_vm0, %v8920_v2 }
 0x304   : > { %v16170_v31 = vadd.f32 %v12640_v25, %v6559_v53  ;;  %v6558_v63 = vadd.f32 %v6487_v13, %v15968_v52  ;;  %12950 = vmatprep.mubr.msk.f32.mxu0 %vm341_vm0, %v8921_v20  ;;  %v6904_v7 = vpop.f32.mrf.mxu0  ;;  %v8532_v25 = vld [vmem:[#allocation2 + $0x2c6] sm:$0xff]  ;;  %v8533_v53 = vld [vmem:[#allocation2 + $0x2ce] sm:$0xff] }
 0x305   : > { %v12593_v26 = vpop.f32.mrf.mxu1  ;;  %12892 = vmatmul.mubr.msk.f32.gmra.mxu1 %vm341_vm0, %v8529_v44  ;;  %v8534_v13 = vld [vmem:[#allocation2 + $0x2e6] sm:$0xff] }
 0x306   : > { %v16175_v16 = vadd.f32 %v6874_v61, %v6558_v63  ;;  %v6561_v6 = vadd.f32 %v12593_v26, %v15979_v59  ;;  %12894 = vmatprep.mubr.msk.f32.mxu1 %vm341_vm0, %v8530_v12  ;;  %v12652_v5 = vpop.f32.mrf.mxu0 }
 0x307   : > { %v6497_v57 = vpop.f32.mrf.mxu1  ;;  %12951 = vmatmul.mubr.msk.f32.gmra.mxu0 %vm341_vm0, %v8922_v29  ;;  %v17221_v29 = vld [vmem:[#allocation19_spill] sm:$0xff] }
 0x308   : > { %v16180_v52 = vadd.f32 %v12643_v48, %v6561_v6  ;;  %v6560_v2 = vadd.f32 %v6497_v57, %v15986_v56  ;;  %13005 = vmatprep.mubr.msk.f32.mxu0 %vm341_vm0, %v9665_v18  ;;  %v6914_v61 = vpop.f32.mrf.mxu0  ;;  %v17220_v48 = vld [vmem:[#allocation22_spill] sm:$0xff]  ;;  %v8535_v6 = vld [vmem:[#allocation2 + $0x2ee] sm:$0xff] }
 0x309   : > { %v12596_v24 = vpop.f32.mrf.mxu1  ;;  %12895 = vmatmul.mubr.msk.f32.gmra.mxu1 %vm341_vm0, %v8531_v45  ;;  %v9278_v57 = vld [vmem:[#allocation2 + $0x10a] sm:$0xff] }
 0x30a   : > { %v16185_v20 = vadd.f32 %v6884_v42, %v6560_v2  ;;  %v6563_v59 = vadd.f32 %v12596_v24, %v15997_v19  ;;  %12897 = vmatprep.mubr.msk.f32.mxu1 %vm341_vm0, %v8532_v25  ;;  %v12707_v12 = vpop.f32.mrf.mxu0  ;;  %v17222_v25 = vld [vmem:[#allocation44_spill] sm:$0xff]  ;;  %v17223_v24 = vld [vmem:[#allocation42_spill] sm:$0xff] }
 0x30b   : > { %v6507_v44 = vpop.f32.mrf.mxu1  ;;  %13006 = vmatmul.mubr.msk.f32.vlgmr.msra.gmra.mxu0 %vm341_vm0, %v17220_v48  ;;  %v9280_v48 = vld [vmem:[#allocation2 + $0x12a] sm:$0xff] }
 0x30c   : > { %v16191_v56 = vadd.f32 %v12646_v36, %v6563_v59  ;;  %v6562_v63 = vadd.f32 %v6507_v44, %v16005_v17  ;;  %13008 = vmatprep.mubr.msk.f32.mxu0 %vm341_vm0, %v17221_v29  ;;  %v7538_v19 = vpop.f32.mrf.mxu0  ;;  %v9279_v44 = vld [vmem:[#allocation2 + $0x112] sm:$0xff] }
 0x30d   : > { %v12599_v42 = vpop.f32.mrf.mxu1  ;;  %12898 = vmatmul.mubr.msk.f32.gmra.mxu1 %vm341_vm0, %v8533_v53 }
 0x30e   : > { %v16197_v26 = vadd.f32 %v6894_v14, %v6562_v63  ;;  %v6565_v18 = vadd.f32 %v12599_v42, %v16014_v43  ;;  %12900 = vmatprep.mubr.msk.f32.mxu1 %vm341_vm0, %v8534_v13  ;;  %v12710_v36 = vpop.f32.mrf.mxu0  ;;  %v17224_v63 = vld [vmem:[#allocation25_spill] sm:$0xff]  ;;  %v17225_v42 = vld [vmem:[#allocation20_spill] sm:$0xff] }
 0x30f   : > { %v6517_v45 = vpop.f32.mrf.mxu1  ;;  %13009 = vmatmul.mubr.msk.f32.gmra.mxu0 %vm341_vm0, %v17222_v25  ;;  %v9282_v25 = vld [vmem:[#allocation2 + $0x14a] sm:$0xff] }
 0x310   : > { %v16203_v17 = vadd.f32 %v12649_v15, %v6565_v18  ;;  %v6564_v2 = vadd.f32 %v6517_v45, %v16021_v21  ;;  %13011 = vmatprep.mubr.msk.f32.mxu0 %vm341_vm0, %v17223_v24  ;;  %v7548_v43 = vpop.f32.mrf.mxu0  ;;  %v9281_v45 = vld [vmem:[#allocation2 + $0x132] sm:$0xff] }
 0x311   : > { %v12602_v14 = vpop.f32.mrf.mxu1  ;;  %12901 = vmatmul.mubr.msk.f32.gmra.mxu1 %vm341_vm0, %v8535_v6 }
 0x312   : > { %v16209_v59 = vadd.f32 %v6904_v7, %v6564_v2  ;;  %v6567_v53 = vadd.f32 %v12602_v14, %v16027_v32  ;;  %12955 = vmatprep.mubr.msk.f32.mxu1 %vm341_vm0, %v9278_v57  ;;  %v12713_v15 = vpop.f32.mrf.mxu0  ;;  %v17226_v2 = vld [vmem:[#allocation46_spill] sm:$0xff]  ;;  %v17227_v14 = vld [vmem:[#allocation43_spill] sm:$0xff] }
 0x313   : > { %v6527_v13 = vpop.f32.mrf.mxu1  ;;  %13012 = vmatmul.mubr.msk.f32.gmra.mxu0 %vm341_vm0, %v17224_v63  ;;  %v9284_v63 = vld [vmem:[#allocation2 + $0x16a] sm:$0xff] }
 0x314   : > { %v16215_v21 = vadd.f32 %v12652_v5, %v6567_v53  ;;  %v6566_v29 = vadd.f32 %v6527_v13, %v16033_v3  ;;  %13014 = vmatprep.mubr.msk.f32.mxu0 %vm341_vm0, %v17225_v42  ;;  %v7558_v32 = vpop.f32.mrf.mxu0  ;;  %v9283_v13 = vld [vmem:[#allocation2 + $0x152] sm:$0xff] }
 0x315   : > { %v12657_v7 = vpop.f32.mrf.mxu1  ;;  %12956 = vmatmul.mubr.msk.f32.vlgmr.msra.gmra.mxu1 %vm341_vm0, %v9279_v44 }
 0x316   : > { %v16221_v18 = vadd.f32 %v6914_v61, %v6566_v29  ;;  %v7311_v6 = vadd.f32 %v12657_v7, %v16040_v9  ;;  %12958 = vmatprep.mubr.msk.f32.mxu1 %vm341_vm0, %v9280_v48 }
 0x317   : > { %v7151_v57 = vpop.f32.mrf.mxu1  ;;  %v12716_v5 = vpop.f32.mrf.mxu0  ;;  %13015 = vmatmul.mubr.msk.f32.gmra.mxu0 %vm341_vm0, %v17226_v2 }
 0x318   : > { %v16227_v3 = vadd.f32 %v12707_v12, %v7311_v6  ;;  %v7310_v24 = vadd.f32 %v7151_v57, %v16046_v27  ;;  %13017 = vmatprep.mubr.msk.f32.mxu0 %vm341_vm0, %v17227_v14  ;;  %v9285_v6 = vld [vmem:[#allocation2 + $0x172] sm:$0xff]  ;;  %v17228_v57 = vld [vmem:[#allocation48_spill] sm:$0xff] }
 0x319   : > { %v12660_v61 = vpop.f32.mrf.mxu1  ;;  %12959 = vmatmul.mubr.msk.f32.gmra.mxu1 %vm341_vm0, %v9281_v45  ;;  %v7568_v9 = vpop.f32.mrf.mxu0  ;;  %v9287_v14 = vld [vmem:[#allocation2 + $0x192] sm:$0xff] }
 0x31a   : > { %v16233_v53 = vadd.f32 %v7538_v19, %v7310_v24  ;;  %v7313_v44 = vadd.f32 %v12660_v61, %v16052_v55  ;;  %12961 = vmatprep.mubr.msk.f32.mxu1 %vm341_vm0, %v9282_v25  ;;  %v17229_v25 = vld [vmem:[#allocation45_spill] sm:$0xff] }
 0x31b   : > { %v7161_v48 = vpop.f32.mrf.mxu1  ;;  %v12719_v12 = vpop.f32.mrf.mxu0  ;;  %13018 = vmatmul.mubr.msk.f32.gmra.mxu0 %vm341_vm0, %v15853_v30  ;;  %v9286_v30 = vld [vmem:[#allocation2 + $0x18a] sm:$0xff] }
 0x31c   : > { %v16239_v27 = vadd.f32 %v12710_v36, %v7313_v44  ;;  %v7312_v29 = vadd.f32 %v7161_v48, %v16058_v51  ;;  %13020 = vmatprep.mubr.msk.f32.mxu0 %vm341_vm0, %v15790_v50  ;;  %v9288_v44 = vld [vmem:[#allocation2 + $0x1aa] sm:$0xff] }
 0x31d   : > { %v12663_v19 = vpop.f32.mrf.mxu1  ;;  %12962 = vmatmul.mubr.msk.f32.gmra.mxu1 %vm341_vm0, %v9283_v13  ;;  %v7578_v55 = vpop.f32.mrf.mxu0  ;;  %v17230_v13 = vld [vmem:[#allocation49_spill] sm:$0xff] }
 0x31e   : > { %v16245_v42 = vadd.f32 %v7548_v43, %v7312_v29  ;;  %v7315_v7 = vadd.f32 %v12663_v19, %v16064_v60  ;;  %12964 = vmatprep.mubr.msk.f32.mxu1 %vm341_vm0, %v9284_v63  ;;  %v17231_v63 = vld [vmem:[#allocation26_spill] sm:$0xff] }
 0x31f   : > { %v7171_v45 = vpop.f32.mrf.mxu1  ;;  %v12722_v36 = vpop.f32.mrf.mxu0  ;;  %13021 = vmatmul.mubr.msk.f32.gmra.mxu0 %vm341_vm0, %v17228_v57 }
 0x320   : > { %v16251_v51 = vadd.f32 %v12713_v15, %v7315_v7  ;;  %v7314_v50 = vadd.f32 %v7171_v45, %v16070_v11  ;;  %13023 = vmatprep.mubr.msk.f32.mxu0 %vm341_vm0, %v17229_v25  ;;  %v9289_v7 = vld [vmem:[#allocation2 + $0x1b2] sm:$0xff]  ;;  %v9290_v45 = vld [vmem:[#allocation2 + $0x1ca] sm:$0xff] }
 0x321   : > { %v12666_v43 = vpop.f32.mrf.mxu1  ;;  %12965 = vmatmul.mubr.msk.f32.gmra.mxu1 %vm341_vm0, %v9285_v6  ;;  %v7588_v60 = vpop.f32.mrf.mxu0 }
 0x322   : > { %v16257_v2 = vadd.f32 %v7558_v32, %v7314_v50  ;;  %v7317_v24 = vadd.f32 %v12666_v43, %v16076_v58  ;;  %12967 = vmatprep.mubr.msk.f32.mxu1 %vm341_vm0, %v9286_v30  ;;  %v17232_v30 = vld [vmem:[#allocation50_spill] sm:$0xff]  ;;  %v17233_v50 = vld [vmem:[#allocation47_spill] sm:$0xff] }
 0x323   : > { %v7181_v61 = vpop.f32.mrf.mxu1  ;;  %v12725_v15 = vpop.f32.mrf.mxu0  ;;  %13024 = vmatmul.mubr.msk.f32.gmra.mxu0 %vm341_vm0, %v17230_v13  ;;  %v17234_v13 = vld [vmem:[#allocation51_spill] sm:$0xff] }
 0x324   : > { %v16263_v11 = vadd.f32 %v12716_v5, %v7317_v24  ;;  %v7316_v48 = vadd.f32 %v7181_v61, %v16082_v39  ;;  %13026 = vmatprep.mubr.msk.f32.mxu0 %vm341_vm0, %v17231_v63  ;;  %v9291_v24 = vld [vmem:[#allocation2 + $0x1d2] sm:$0xff]  ;;  %v9292_v61 = vld [vmem:[#allocation2 + $0x1ea] sm:$0xff] }
 0x325   : > { %v12669_v32 = vpop.f32.mrf.mxu1  ;;  %12968 = vmatmul.mubr.msk.f32.gmra.mxu1 %vm341_vm0, %v9287_v14  ;;  %v7598_v58 = vpop.f32.mrf.mxu0 }
 0x326   : > { %v16269_v29 = vadd.f32 %v7568_v9, %v7316_v48  ;;  %v7319_v19 = vadd.f32 %v12669_v32, %v16088_v37  ;;  %12970 = vmatprep.mubr.msk.f32.mxu1 %vm341_vm0, %v9288_v44  ;;  %v9293_v32 = vld [vmem:[#allocation2 + $0x1f2] sm:$0xff] }
 0x327   : > { %v7191_v6 = vpop.f32.mrf.mxu1  ;;  %v12728_v5 = vpop.f32.mrf.mxu0  ;;  %13027 = vmatmul.mubr.msk.f32.gmra.mxu0 %vm341_vm0, %v17232_v30  ;;  %v9295_v30 = vld [vmem:[#allocation2 + $0x212] sm:$0xff] }
 0x328   : > { %v16275_v39 = vadd.f32 %v12719_v12, %v7319_v19  ;;  %v7318_v57 = vadd.f32 %v7191_v6, %v16094_v22  ;;  %13029 = vmatprep.mubr.msk.f32.mxu0 %vm341_vm0, %v17233_v50 }
 0x329   : > { %v12672_v9 = vpop.f32.mrf.mxu1  ;;  %12971 = vmatmul.mubr.msk.f32.gmra.mxu1 %vm341_vm0, %v9289_v7  ;;  %v7608_v37 = vpop.f32.mrf.mxu0 }
 0x32a   : > { %v16281_v25 = vadd.f32 %v7578_v55, %v7318_v57  ;;  %v7321_v43 = vadd.f32 %v12672_v9, %v16100_v49  ;;  %12973 = vmatprep.mubr.msk.f32.mxu1 %vm341_vm0, %v9290_v45 }
 0x32b   : > { %v7201_v14 = vpop.f32.mrf.mxu1  ;;  %v12731_v12 = vpop.f32.mrf.mxu0  ;;  %13030 = vmatmul.mubr.msk.f32.gmra.mxu0 %vm341_vm0, %v15921_v41  ;;  %v9294_v41 = vld [vmem:[#allocation2 + $0x20a] sm:$0xff] }
 0x32c   : > { %v16287_v22 = vadd.f32 %v12722_v36, %v7321_v43  ;;  %v7320_v44 = vadd.f32 %v7201_v14, %v16106_v38  ;;  %13032 = vmatprep.mubr.msk.f32.mxu0 %vm341_vm0, %v17234_v13  ;;  %v9297_v43 = vld [vmem:[#allocation2 + $0x232] sm:$0xff] }
 0x32d   : > { %v12675_v55 = vpop.f32.mrf.mxu1  ;;  %12974 = vmatmul.mubr.msk.f32.gmra.mxu1 %vm341_vm0, %v9291_v24  ;;  %v7618_v49 = vpop.f32.mrf.mxu0  ;;  %v17235_v14 = vld [vmem:[#allocation54_spill] sm:$0xff] }
 0x32e   : > { %v16293_v48 = vadd.f32 %v7588_v60, %v7320_v44  ;;  %v7323_v63 = vadd.f32 %v12675_v55, %v16112_v10  ;;  %12976 = vmatprep.mubr.msk.f32.mxu1 %vm341_vm0, %v9292_v61  ;;  %v17236_v61 = vld [vmem:[#allocation3_spill] sm:$0xff]  ;;  %v9299_v55 = vld [vmem:[#allocation2 + $0x252] sm:$0xff] }
 0x32f   : > { %v7211_v19 = vpop.f32.mrf.mxu1  ;;  %v12734_v36 = vpop.f32.mrf.mxu0  ;;  %13033 = vmatmul.mubr.msk.f32.gmra.mxu0 %vm341_vm0, %v15939_v54  ;;  %v9296_v54 = vld [vmem:[#allocation2 + $0x22a] sm:$0xff] }
 0x330   : > { %v16299_v38 = vadd.f32 %v12725_v15, %v7323_v63  ;;  %v7322_v7 = vadd.f32 %v7211_v19, %v16118_v40  ;;  %13035 = vmatprep.mubr.msk.f32.mxu0 %vm341_vm0, %v15878_v47  ;;  %v17237_v19 = vld [vmem:[#allocation27_spill] sm:$0xff] }
 0x331   : > { %v12678_v60 = vpop.f32.mrf.mxu1  ;;  %12977 = vmatmul.mubr.msk.f32.gmra.mxu1 %vm341_vm0, %v9293_v32  ;;  %v7628_v10 = vpop.f32.mrf.mxu0  ;;  %v9300_v32 = vld [vmem:[#allocation2 + $0x26a] sm:$0xff] }
 0x332   : > { %v16305_v6 = vadd.f32 %v7598_v58, %v7322_v7  ;;  %v7325_v45 = vadd.f32 %v12678_v60, %v16124_v4  ;;  %12979 = vmatprep.mubr.msk.f32.mxu1 %vm341_vm0, %v9294_v41  ;;  %v17238_v7 = vld [vmem:[#allocation4_spill] sm:$0xff] }
 0x333   : > { %v7221_v57 = vpop.f32.mrf.mxu1  ;;  %v12737_v15 = vpop.f32.mrf.mxu0  ;;  %13036 = vmatmul.mubr.msk.f32.gmra.mxu0 %vm341_vm0, %v15956_v46  ;;  %v9298_v46 = vld [vmem:[#allocation2 + $0x24a] sm:$0xff] }
 0x334   : > { %v16311_v40 = vadd.f32 %v12728_v5, %v7325_v45  ;;  %v7324_v47 = vadd.f32 %v7221_v57, %v16130_v33  ;;  %13038 = vmatprep.mubr.msk.f32.mxu0 %vm341_vm0, %v15896_v8 }
 0x335   : > { %v12681_v58 = vpop.f32.mrf.mxu1  ;;  %12980 = vmatmul.mubr.msk.f32.gmra.mxu1 %vm341_vm0, %v9295_v30  ;;  %v7638_v4 = vpop.f32.mrf.mxu0  ;;  %v9301_v30 = vld [vmem:[#allocation2 + $0x272] sm:$0xff] }
 0x336   : > { %v16317_v50 = vadd.f32 %v7608_v37, %v7324_v47  ;;  %v7327_v9 = vadd.f32 %v12681_v58, %v16136_v28  ;;  %12982 = vmatprep.mubr.msk.f32.mxu1 %vm341_vm0, %v9296_v54  ;;  %v9302_v54 = vld [vmem:[#allocation2 + $0x28a] sm:$0xff] }
 0x337   : > { %v7231_v24 = vpop.f32.mrf.mxu1  ;;  %v12740_v5 = vpop.f32.mrf.mxu0  ;;  %13039 = vmatmul.mubr.msk.f32.gmra.mxu0 %vm341_vm0, %v17235_v14  ;;  %v17239_v58 = vld [vmem:[#allocation52_spill] sm:$0xff] }
 0x338   : > { %v16323_v33 = vadd.f32 %v12731_v12, %v7327_v9  ;;  %v7326_v8 = vadd.f32 %v7231_v24, %v16142_v23  ;;  %13041 = vmatprep.mubr.msk.f32.mxu0 %vm341_vm0, %v17236_v61  ;;  %v17240_v61 = vld [vmem:[#allocation53_spill] sm:$0xff] }
 0x339   : > { %v12684_v37 = vpop.f32.mrf.mxu1  ;;  %12983 = vmatmul.mubr.msk.f32.gmra.mxu1 %vm341_vm0, %v9297_v43  ;;  %v7648_v28 = vpop.f32.mrf.mxu0 }
 0x33a   : > { %v16329_v44 = vadd.f32 %v7618_v49, %v7326_v8  ;;  %v7329_v13 = vadd.f32 %v12684_v37, %v16148_v35  ;;  %12985 = vmatprep.mubr.msk.f32.mxu1 %vm341_vm0, %v9298_v46  ;;  %v9303_v46 = vld [vmem:[#allocation2 + $0x292] sm:$0xff] }
 0x33b   : > { %v7241_v63 = vpop.f32.mrf.mxu1  ;;  %v12743_v12 = vpop.f32.mrf.mxu0  ;;  %13042 = vmatmul.mubr.msk.f32.gmra.mxu0 %vm341_vm0, %v17237_v19  ;;  %v9696_v37 = vld [vmem:[#allocation2 + $0x2f4] sm:$0xff] }
 0x33c   : > { %v16335_v23 = vadd.f32 %v12734_v36, %v7329_v13  ;;  %v7328_v41 = vadd.f32 %v7241_v63, %v16154_v0  ;;  %13044 = vmatprep.mubr.msk.f32.mxu0 %vm341_vm0, %v17238_v7  ;;  %v9305_v63 = vld [vmem:[#allocation2 + $0x2b2] sm:$0xff] }
 0x33d   : > { %v12687_v49 = vpop.f32.mrf.mxu1  ;;  %12986 = vmatmul.mubr.msk.f32.gmra.mxu1 %vm341_vm0, %v9299_v55  ;;  %v7658_v35 = vpop.f32.mrf.mxu0 }
 0x33e   : > { %v16341_v60 = vadd.f32 %v7628_v10, %v7328_v41  ;;  %v7331_v45 = vadd.f32 %v12687_v49, %v16160_v34  ;;  %12988 = vmatprep.mubr.msk.f32.mxu1 %vm341_vm0, %v9300_v32  ;;  %v9694_v10 = vld [vmem:[#allocation2 + $0x2d4] sm:$0xff] }
 0x33f   : > { %v7251_v57 = vpop.f32.mrf.mxu1  ;;  %v12746_v36 = vpop.f32.mrf.mxu0  ;;  %13045 = vmatmul.mubr.msk.f32.gmra.mxu0 %vm341_vm0, %v16010_v62 }
 0x340   : > { %v16347_v0 = vadd.f32 %v12737_v15, %v7331_v45  ;;  %v7330_v47 = vadd.f32 %v7251_v57, %v16165_v1  ;;  %13047 = vmatprep.mubr.msk.f32.mxu0 %vm341_vm0, %v17239_v58  ;;  %v9304_v15 = vld [vmem:[#allocation2 + $0x2aa] sm:$0xff]  ;;  %v9307_v45 = vld [vmem:[#allocation2 + $0x2d2] sm:$0xff] }
 0x341   : > { %v12690_v9 = vpop.f32.mrf.mxu1  ;;  %12989 = vmatmul.mubr.msk.f32.gmra.mxu1 %vm341_vm0, %v9301_v30  ;;  %v7668_v34 = vpop.f32.mrf.mxu0  ;;  %v9308_v57 = vld [vmem:[#allocation2 + $0x2ea] sm:$0xff] }
 0x342   : > { %v16353_v43 = vadd.f32 %v7638_v4, %v7330_v47  ;;  %v7333_v24 = vadd.f32 %v12690_v9, %v16170_v31  ;;  %12991 = vmatprep.mubr.msk.f32.mxu1 %vm341_vm0, %v9302_v54 }
 0x343   : > { %v7261_v62 = vpop.f32.mrf.mxu1  ;;  %v12749_v14 = vpop.f32.mrf.mxu0  ;;  %13048 = vmatmul.mubr.msk.f32.gmra.mxu0 %vm341_vm0, %v9694_v10 }
 0x344   : > { %v16358_v1 = vadd.f32 %v12740_v5, %v7333_v24  ;;  %v7332_v8 = vadd.f32 %v7261_v62, %v16175_v16  ;;  %13050 = vmatprep.mubr.msk.f32.mxu0 %vm341_vm0, %v17240_v61  ;;  %v9306_v5 = vld [vmem:[#allocation2 + $0x2ca] sm:$0xff] }
 0x345   : > { %v12693_v4 = vpop.f32.mrf.mxu1  ;;  %12992 = vmatmul.mubr.msk.f32.gmra.mxu1 %vm341_vm0, %v9303_v46  ;;  %v7678_v31 = vpop.f32.mrf.mxu0 }
 0x346   : > { %v16364_v13 = vadd.f32 %v7648_v28, %v7332_v8  ;;  %v7335_v55 = vadd.f32 %v12693_v4, %v16180_v52  ;;  %12994 = vmatprep.mubr.msk.f32.mxu1 %vm341_vm0, %v9304_v15 }
 0x347   : > { %v7271_v32 = vpop.f32.mrf.mxu1  ;;  %v12752_v19 = vpop.f32.mrf.mxu0  ;;  %13051 = vmatmul.mubr.msk.f32.gmra.mxu0 %vm341_vm0, %v9696_v37 }
 0x348   : > { %v16369_v16 = vadd.f32 %v12743_v12, %v7335_v55  ;;  %v7334_v41 = vadd.f32 %v7271_v32, %v16185_v20 }
 0x349   : > { %v12696_v7 = vpop.f32.mrf.mxu1  ;;  %12995 = vmatmul.mubr.msk.f32.gmra.mxu1 %vm341_vm0, %v9305_v63  ;;  %v7688_v49 = vpop.f32.mrf.mxu0 }
 0x34a   : > { %v16373_v28 = vadd.f32 %v7658_v35, %v7334_v41  ;;  %v7337_v52 = vadd.f32 %v12696_v7, %v16191_v56  ;;  %12997 = vmatprep.mubr.msk.f32.mxu1 %vm341_vm0, %v9306_v5  ;;  %v9309_v56 = vld [vmem:[#allocation2 + $0x2f2] sm:$0xff] }
 0x34b   : > { %v7281_v30 = vpop.f32.mrf.mxu1  ;;  %v12807_v54 = vpop.f32.mrf.mxu0 }
 0x34c   : > { %v16377_v47 = vadd.f32 %v12746_v36, %v7337_v52  ;;  %v7336_v12 = vadd.f32 %v7281_v30, %v16197_v26 }
 0x34d   : > { %v12699_v58 = vpop.f32.mrf.mxu1  ;;  %12998 = vmatmul.mubr.msk.f32.gmra.mxu1 %vm341_vm0, %v9307_v45  ;;  %v8313_v20 = vpop.f32.mrf.mxu0 }
 0x34e   : > { %v16381_v10 = vadd.f32 %v7668_v34, %v7336_v12  ;;  %v7339_v35 = vadd.f32 %v12699_v58, %v16203_v17  ;;  %13000 = vmatprep.mubr.msk.f32.mxu1 %vm341_vm0, %v9308_v57 }
 0x34f   : > { %v7291_v9 = vpop.f32.mrf.mxu1  ;;  %v12810_v24 = vpop.f32.mrf.mxu0 }
 0x350   : > { %v16385_v46 = vadd.f32 %v12749_v14, %v7339_v35  ;;  %v7338_v36 = vadd.f32 %v7291_v9, %v16209_v59 }
 0x351   : > { %v12702_v62 = vpop.f32.mrf.mxu1  ;;  %13001 = vmatmul.mubr.msk.f32.gmra.mxu1 %vm341_vm0, %v9309_v56  ;;  %v8323_v26 = vpop.f32.mrf.mxu0 }
 0x352   : > { %v16389_v15 = vadd.f32 %v7678_v31, %v7338_v36  ;;  %v7341_v34 = vadd.f32 %v12702_v62, %v16215_v21 }
 0x353   : > { %v7301_v8 = vpop.f32.mrf.mxu1  ;;  %v12813_v61 = vpop.f32.mrf.mxu0 }
 0x354   : > { %v16392_v17 = vadd.f32 %v12752_v19, %v7341_v34  ;;  %v7340_v37 = vadd.f32 %v7301_v8, %v16221_v18 }
 0x355   : > { %v12757_v4 = vpop.f32.mrf.mxu1  ;;  %v8333_v55 = vpop.f32.mrf.mxu0 }
 0x356   : > { %v16395_v14 = vadd.f32 %v7688_v49, %v7340_v37  ;;  %v8085_v59 = vadd.f32 %v12757_v4, %v16227_v3 }
 0x357   : > { %v7925_v63 = vpop.f32.mrf.mxu1  ;;  %v12816_v32 = vpop.f32.mrf.mxu0 }
 0x358   : > { %v16398_v5 = vadd.f32 %v12807_v54, %v8085_v59  ;;  %v8084_v31 = vadd.f32 %v7925_v63, %v16233_v53 }
 0x359   : > { %v12760_v41 = vpop.f32.mrf.mxu1  ;;  %v8343_v21 = vpop.f32.mrf.mxu0 }
 0x35a   : > { %v16401_v7 = vadd.f32 %v8313_v20, %v8084_v31  ;;  %v8087_v19 = vadd.f32 %v12760_v41, %v16239_v27 }
 0x35b   : > { %v7935_v52 = vpop.f32.mrf.mxu1  ;;  %v12819_v18 = vpop.f32.mrf.mxu0 }
 0x35c   : > { %v16404_v45 = vadd.f32 %v12810_v24, %v8087_v19  ;;  %v8086_v49 = vadd.f32 %v7935_v52, %v16245_v42 }
 0x35d   : > { %v12763_v30 = vpop.f32.mrf.mxu1  ;;  %v8353_v3 = vpop.f32.mrf.mxu0 }
 0x35e   : > { %v16407_v57 = vadd.f32 %v8323_v26, %v8086_v49  ;;  %v8089_v54 = vadd.f32 %v12763_v30, %v16251_v51 }
 0x35f   : > { %v7945_v12 = vpop.f32.mrf.mxu1  ;;  %v12822_v53 = vpop.f32.mrf.mxu0 }
 0x360   : > { %v16410_v58 = vadd.f32 %v12813_v61, %v8089_v54  ;;  %v8088_v20 = vadd.f32 %v7945_v12, %v16257_v2 }
 0x361   : > { %v12766_v35 = vpop.f32.mrf.mxu1  ;;  %v8363_v27 = vpop.f32.mrf.mxu0 }
 0x362   : > { %v16413_v56 = vadd.f32 %v8333_v55, %v8088_v20  ;;  %v8091_v9 = vadd.f32 %v12766_v35, %v16263_v11 }
 0x363   : > { %v7955_v24 = vpop.f32.mrf.mxu1  ;;  %v12825_v42 = vpop.f32.mrf.mxu0 }
 0x364   : > { %v16416_v36 = vadd.f32 %v12816_v32, %v8091_v9  ;;  %v8090_v62 = vadd.f32 %v7955_v24, %v16269_v29 }
 0x365   : > { %v12769_v26 = vpop.f32.mrf.mxu1  ;;  %v8373_v51 = vpop.f32.mrf.mxu0 }
 0x366   : > { %v16419_v34 = vadd.f32 %v8343_v21, %v8090_v62  ;;  %v8093_v8 = vadd.f32 %v12769_v26, %v16275_v39 }
 0x367   : > { %v7965_v61 = vpop.f32.mrf.mxu1  ;;  %v12828_v2 = vpop.f32.mrf.mxu0 }
 0x368   : > { %v16422_v37 = vadd.f32 %v12819_v18, %v8093_v8  ;;  %v8092_v4 = vadd.f32 %v7965_v61, %v16281_v25 }
 0x369   : > { %v12772_v55 = vpop.f32.mrf.mxu1  ;;  %v8383_v11 = vpop.f32.mrf.mxu0 }
 0x36a   : > { %v16425_v59 = vadd.f32 %v8353_v3, %v8092_v4  ;;  %v8095_v63 = vadd.f32 %v12772_v55, %v16287_v22 }
 0x36b   : > { %v7975_v32 = vpop.f32.mrf.mxu1  ;;  %v12831_v29 = vpop.f32.mrf.mxu0 }
 0x36c   : > { %v16428_v31 = vadd.f32 %v12822_v53, %v8095_v63  ;;  %v8094_v41 = vadd.f32 %v7975_v32, %v16293_v48 }
 0x36d   : > { %v12775_v21 = vpop.f32.mrf.mxu1  ;;  %v8393_v39 = vpop.f32.mrf.mxu0 }
 0x36e   : > { %v16431_v19 = vadd.f32 %v8363_v27, %v8094_v41  ;;  %v8097_v52 = vadd.f32 %v12775_v21, %v16299_v38 }
 0x36f   : > { %v7985_v18 = vpop.f32.mrf.mxu1  ;;  %v12834_v25 = vpop.f32.mrf.mxu0 }
 0x370   : > { %v16434_v49 = vadd.f32 %v12825_v42, %v8097_v52  ;;  %v8096_v30 = vadd.f32 %v7985_v18, %v16305_v6 }
 0x371   : > { %v12778_v3 = vpop.f32.mrf.mxu1  ;;  %v8403_v22 = vpop.f32.mrf.mxu0 }
 0x372   : > { %v16437_v54 = vadd.f32 %v8373_v51, %v8096_v30  ;;  %v8099_v12 = vadd.f32 %v12778_v3, %v16311_v40 }
 0x373   : > { %v7995_v53 = vpop.f32.mrf.mxu1  ;;  %v12837_v48 = vpop.f32.mrf.mxu0 }
 0x374   : > { %v16440_v20 = vadd.f32 %v12828_v2, %v8099_v12  ;;  %v8098_v35 = vadd.f32 %v7995_v53, %v16317_v50 }
 0x375   : > { %v12781_v27 = vpop.f32.mrf.mxu1  ;;  %v8413_v38 = vpop.f32.mrf.mxu0 }
 0x376   : > { %v16443_v9 = vadd.f32 %v8383_v11, %v8098_v35  ;;  %v8101_v24 = vadd.f32 %v12781_v27, %v16323_v33 }
 0x377   : > { %v8005_v42 = vpop.f32.mrf.mxu1  ;;  %v12840_v6 = vpop.f32.mrf.mxu0 }
 0x378   : > { %v16446_v62 = vadd.f32 %v12831_v29, %v8101_v24  ;;  %v8100_v26 = vadd.f32 %v8005_v42, %v16329_v44 }
 0x379   : > { %v12784_v51 = vpop.f32.mrf.mxu1  ;;  %v8423_v40 = vpop.f32.mrf.mxu0 }
 0x37a   : > { %v16449_v8 = vadd.f32 %v8393_v39, %v8100_v26  ;;  %v8103_v61 = vadd.f32 %v12784_v51, %v16335_v23 }
 0x37b   : > { %v8015_v2 = vpop.f32.mrf.mxu1  ;;  %v12843_v50 = vpop.f32.mrf.mxu0 }
 0x37c   : > { %17241 = vst [vmem:[#allocation15_spill] sm:$0xff] %v16449_v8  ;;  %v16452_v4 = vadd.f32 %v12834_v25, %v8103_v61  ;;  %v8102_v55 = vadd.f32 %v8015_v2, %v16341_v60 }
 0x37d   : > { %v12787_v11 = vpop.f32.mrf.mxu1  ;;  %v8433_v33 = vpop.f32.mrf.mxu0 }
 0x37e   : > { %17242 = vst [vmem:[#allocation5_spill] sm:$0xff] %v16452_v4  ;;  %v16455_v63 = vadd.f32 %v8403_v22, %v8102_v55  ;;  %v8105_v32 = vadd.f32 %v12787_v11, %v16347_v0 }
 0x37f   : > { %v8025_v29 = vpop.f32.mrf.mxu1  ;;  %v12846_v44 = vpop.f32.mrf.mxu0 }
 0x380   : > { %17243 = vst [vmem:[#allocation7_spill] sm:$0xff] %v16455_v63  ;;  %v16458_v41 = vadd.f32 %v12837_v48, %v8105_v32  ;;  %v8104_v21 = vadd.f32 %v8025_v29, %v16353_v43 }
 0x381   : > { %v12790_v39 = vpop.f32.mrf.mxu1  ;;  %v8443_v23 = vpop.f32.mrf.mxu0 }
 0x382   : > { %17244 = vst [vmem:[#allocation37_spill] sm:$0xff] %v16458_v41  ;;  %v16461_v52 = vadd.f32 %v8413_v38, %v8104_v21  ;;  %v8107_v18 = vadd.f32 %v12790_v39, %v16358_v1 }
 0x383   : > { %v8035_v25 = vpop.f32.mrf.mxu1  ;;  %v12849_v60 = vpop.f32.mrf.mxu0 }
 0x384   : > { %17245 = vst [vmem:[#allocation28_spill] sm:$0xff] %v16461_v52  ;;  %v16464_v30 = vadd.f32 %v12840_v6, %v8107_v18  ;;  %v8106_v3 = vadd.f32 %v8035_v25, %v16364_v13 }
 0x385   : > { %v12793_v22 = vpop.f32.mrf.mxu1  ;;  %v8453_v0 = vpop.f32.mrf.mxu0 }
 0x386   : > { %17246 = vst [vmem:[#allocation6_spill] sm:$0xff] %v16464_v30  ;;  %v16467_v12 = vadd.f32 %v8423_v40, %v8106_v3  ;;  %v8109_v53 = vadd.f32 %v12793_v22, %v16369_v16 }
 0x387   : > { %v8045_v48 = vpop.f32.mrf.mxu1  ;;  %v12852_v43 = vpop.f32.mrf.mxu0 }
 0x388   : > { %17247 = vst [vmem:[#allocation16_spill] sm:$0xff] %v16467_v12  ;;  %v16470_v35 = vadd.f32 %v12843_v50, %v8109_v53  ;;  %v8108_v27 = vadd.f32 %v8045_v48, %v16373_v28 }
 0x389   : > { %v12796_v38 = vpop.f32.mrf.mxu1  ;;  %v8463_v1 = vpop.f32.mrf.mxu0 }
 0x38a   : > { %17248 = vst [vmem:[#allocation29_spill] sm:$0xff] %v16470_v35  ;;  %v16473_v24 = vadd.f32 %v8433_v33, %v8108_v27  ;;  %v8111_v42 = vadd.f32 %v12796_v38, %v16377_v47 }
 0x38b   : > { %v8055_v6 = vpop.f32.mrf.mxu1  ;;  %v16476_v13 = vpop.f32.mrf.mxu0 }
 0x38c   : > { %17249 = vst [vmem:[#allocation30_spill] sm:$0xff] %v16473_v24  ;;  %v16478_v26 = vadd.f32 %v12846_v44, %v8111_v42  ;;  %v8110_v51 = vadd.f32 %v8055_v6, %v16381_v10 }
 0x38d   : > { %v12799_v16 = vpop.f32.mrf.mxu1  ;;  %v16481_v40 = vpop.f32.mrf.mxu0 }
 0x38e   : > { %17250 = vst [vmem:[#allocation40_spill] sm:$0xff] %v16478_v26  ;;  %v16483_v61 = vadd.f32 %v8443_v23, %v8110_v51  ;;  %v8113_v28 = vadd.f32 %v12799_v16, %v16385_v46 }
 0x38f   : > { %v8065_v2 = vpop.f32.mrf.mxu1  ;;  %v16486_v50 = vpop.f32.mrf.mxu0 }
 0x390   : > { %17251 = vst [vmem:[#allocation8_spill] sm:$0xff] %v16483_v61  ;;  %v16488_v55 = vadd.f32 %v12849_v60, %v8113_v28  ;;  %v8112_v47 = vadd.f32 %v8065_v2, %v16389_v15 }
 0x391   : > { %v12802_v11 = vpop.f32.mrf.mxu1  ;;  %v16491_v33 = vpop.f32.mrf.mxu0 }
 0x392   : > { %17252 = vst [vmem:[#allocation9_spill] sm:$0xff] %v16488_v55  ;;  %v16493_v32 = vadd.f32 %v8453_v0, %v8112_v47  ;;  %v8115_v10 = vadd.f32 %v12802_v11, %v16392_v17 }
 0x393   : > { %v8075_v29 = vpop.f32.mrf.mxu1  ;;  %v16496_v44 = vpop.f32.mrf.mxu0 }
 0x394   : > { %17253 = vst [vmem:[#allocation41_spill] sm:$0xff] %v16493_v32  ;;  %v16498_v21 = vadd.f32 %v12852_v43, %v8115_v10  ;;  %v8114_v46 = vadd.f32 %v8075_v29, %v16395_v14 }
 0x395   : > { %v12857_v39 = vpop.f32.mrf.mxu1  ;;  %v16501_v23 = vpop.f32.mrf.mxu0 }
 0x396   : > { %17254 = vst [vmem:[#allocation31_spill] sm:$0xff] %v16498_v21  ;;  %v16503_v18 = vadd.f32 %v8463_v1, %v8114_v46 }
 0x397   : > { %v8700_v15 = vpop.f32.mrf.mxu1  ;;  %v16505_v25 = vpop.f32.mrf.mxu0 }
 0x398   : > { %17255 = vst [vmem:[#allocation32_spill] sm:$0xff] %v16503_v18 }
 0x399   : > { %v16507_v60 = vpop.f32.mrf.mxu1  ;;  %v16509_v3 = vpop.f32.mrf.mxu0 }
 0x39b   : > { %v16511_v17 = vpop.f32.mrf.mxu1  ;;  %v16513_v22 = vpop.f32.mrf.mxu0 }
 0x39d   : > { %v16515_v0 = vpop.f32.mrf.mxu1  ;;  %v16517_v53 = vpop.f32.mrf.mxu0 }
 0x39f   : > { %v16519_v14 = vpop.f32.mrf.mxu1  ;;  %v16521_v48 = vpop.f32.mrf.mxu0 }
 0x3a1   : > { %v16523_v43 = vpop.f32.mrf.mxu1  ;;  %v16525_v27 = vpop.f32.mrf.mxu0 }
 0x3a3   : > { %v16527_v38 = vpop.f32.mrf.mxu1  ;;  %v16529_v1 = vpop.f32.mrf.mxu0 }
 0x3a5   : > { %v16531_v42 = vpop.f32.mrf.mxu1  ;;  %v16533_v6 = vpop.f32.mrf.mxu0 }
 0x3a7   : > { %v16535_v51 = vpop.f32.mrf.mxu1  ;;  %v16537_v16 = vpop.f32.mrf.mxu0 }
 0x3a9   : > { %v16539_v28 = vpop.f32.mrf.mxu1  ;;  %v16541_v2 = vpop.f32.mrf.mxu0 }
 0x3ab   : > { %v16543_v47 = vpop.f32.mrf.mxu1  ;;  %v16545_v11 = vpop.f32.mrf.mxu0 }
 0x3ac   : > { %17256 = vst [vmem:[#allocation21_spill] sm:$0xff] %v16545_v11 }
 0x3ad   : > { %v16547_v10 = vpop.f32.mrf.mxu1  ;;  %v16549_v29 = vpop.f32.mrf.mxu0 }
 0x3ae   : > { %17257 = vst [vmem:[#allocation10_spill] sm:$0xff] %v16549_v29 }
 0x3af   : > { %v16551_v46 = vpop.f32.mrf.mxu1  ;;  %v16553_v18 = vpop.f32.mrf.mxu0 }
 0x3b0   : > { %17258 = vst [vmem:[#allocation11_spill] sm:$0xff] %v16553_v18 }
 0x3b1   : > { %v16555_v21 = vpop.f32.mrf.mxu1  ;;  %v16557_v32 = vpop.f32.mrf.mxu0 }
 0x3b2   : > { %17259 = vst [vmem:[#allocation23_spill] sm:$0xff] %v16557_v32 }
 0x3b3   : > { %v16559_v55 = vpop.f32.mrf.mxu1  ;;  %v16561_v61 = vpop.f32.mrf.mxu0 }
 0x3b4   : > { %17260 = vst [vmem:[#allocation33_spill] sm:$0xff] %v16561_v61 }
 0x3b5   : > { %v16563_v26 = vpop.f32.mrf.mxu1  ;;  %v16565_v24 = vpop.f32.mrf.mxu0 }
 0x3b6   : > { %17261 = vst [vmem:[#allocation34_spill] sm:$0xff] %v16565_v24 }
 0x3b7   : > { %v16567_v35 = vpop.f32.mrf.mxu1  ;;  %v16569_v12 = vpop.f32.mrf.mxu0 }
 0x3b8   : > { %17262 = vst [vmem:[#allocation24_spill] sm:$0xff] %v16567_v35  ;;  %17263 = vst [vmem:[#allocation12_spill] sm:$0xff] %v16569_v12 }
 0x3b9   : > { %v16571_v30 = vpop.f32.mrf.mxu1  ;;  %v16573_v52 = vpop.f32.mrf.mxu0 }
 0x3ba   : > { %17264 = vst [vmem:[#allocation13_spill] sm:$0xff] %v16571_v30  ;;  %17265 = vst [vmem:[#allocation35_spill] sm:$0xff] %v16573_v52 }
 0x3bb   : > { %v16575_v41 = vpop.f32.mrf.mxu1  ;;  %v16577_v18 = vpop.f32.mrf.mxu0 }
 0x3bc   : > { %17266 = vst [vmem:[#allocation36_spill] sm:$0xff] %v16575_v41  ;;  %17267 = vst [vmem:[#allocation14_spill] sm:$0xff] %v16577_v18 }
 0x3bd   : > { %v16579_v32 = vpop.f32.mrf.mxu1  ;;  %v16581_v63 = vpop.f32.mrf.mxu0 }
 0x3be   : > { %17268 = vst [vmem:[#allocation38_spill] sm:$0xff] %v16579_v32  ;;  %17269 = vst [vmem:[#allocation17_spill] sm:$0xff] %v16581_v63 }
 0x3bf   : > { %v16583_v61 = vpop.f32.mrf.mxu1  ;;  %v16585_v29 = vpop.f32.mrf.mxu0 }
 0x3c0   : > { %17270 = vst [vmem:[#allocation39_spill] sm:$0xff] %v16583_v61  ;;  %17271 = vst [vmem:[#allocation18_spill] sm:$0xff] %v16585_v29 }
 0x3c1   : > { %v16587_v24 = vpop.f32.mrf.mxu1  ;;  %v16589_v4 = vpop.f32.mrf.mxu0 }
 0x3c2   : > { %17272 = vst [vmem:[#allocation22_spill] sm:$0xff] %v16587_v24  ;;  %17273 = vst [vmem:[#allocation19_spill] sm:$0xff] %v16589_v4 }
 0x3c3   : > { %v16591_v12 = vpop.f32.mrf.mxu1  ;;  %v16593_v30 = vpop.f32.mrf.mxu0 }
 0x3c4   : > { %17274 = vst [vmem:[#allocation44_spill] sm:$0xff] %v16591_v12  ;;  %17275 = vst [vmem:[#allocation42_spill] sm:$0xff] %v16593_v30 }
 0x3c5   : > { %v16595_v52 = vpop.f32.mrf.mxu1  ;;  %v16597_v41 = vpop.f32.mrf.mxu0 }
 0x3c6   : > { %17276 = vst [vmem:[#allocation25_spill] sm:$0xff] %v16595_v52  ;;  %17277 = vst [vmem:[#allocation20_spill] sm:$0xff] %v16597_v41  ;;  %v8860_v41 = vadd.f32 %v12857_v39, %v16398_v5  ;;  %v8861_v5 = vadd.f32 %v16511_v17, %v16407_v57 }
 0x3c7   : > { %v16599_v18 = vpop.f32.mrf.mxu1  ;;  %v16601_v32 = vpop.f32.mrf.mxu0 }
 0x3c8   : > { %17278 = vst [vmem:[#allocation46_spill] sm:$0xff] %v16599_v18  ;;  %17279 = vst [vmem:[#allocation43_spill] sm:$0xff] %v16601_v32  ;;  %v8859_v32 = vadd.f32 %v8700_v15, %v16401_v7 }
 0x3c9   : > { %v16603_v63 = vpop.f32.mrf.mxu1  ;;  %v16605_v61 = vpop.f32.mrf.mxu0 }
 0x3ca   : > { %17280 = vst [vmem:[#allocation48_spill] sm:$0xff] %v16603_v63  ;;  %17281 = vst [vmem:[#allocation45_spill] sm:$0xff] %v16605_v61 }
 0x3cb   : > { %v16607_v29 = vpop.f32.mrf.mxu1  ;;  %v13007_v24 = vpop.f32.mrf.mxu0 }
 0x3cc   : > { %17282 = vst [vmem:[#allocation49_spill] sm:$0xff] %v16607_v29  ;;  %v9247_v29 = vadd.f32 %v16476_v13, %v8860_v41  ;;  %v8864_v13 = vadd.f32 %v16515_v0, %v16410_v58  ;;  %v8866_v58 = vadd.f32 %v16523_v43, %v16416_v36 }
 0x3cd   : > { %v16609_v4 = vpop.f32.mrf.mxu1  ;;  %v9861_v12 = vpop.f32.mrf.mxu0 }
 0x3ce   : > { %17283 = vst [vmem:[#allocation26_spill] sm:$0xff] %v16609_v4  ;;  %v8862_v4 = vadd.f32 %v16507_v60, %v16404_v45  ;;  %v8863_v60 = vadd.f32 %v16519_v14, %v16413_v56  ;;  %v9253_v36 = vadd.f32 %v16505_v25, %v8866_v58 }
 0x3cf   : > { %v16611_v30 = vpop.f32.mrf.mxu1  ;;  %v13010_v52 = vpop.f32.mrf.mxu0 }
 0x3d0   : > { %17284 = vst [vmem:[#allocation50_spill] sm:$0xff] %v16611_v30  ;;  %v9246_v30 = vadd.f32 %v16481_v40, %v8859_v32  ;;  %v9249_v45 = vadd.f32 %v16486_v50, %v8862_v4  ;;  %v9251_v4 = vadd.f32 %v16496_v44, %v8864_v13  ;;  %v9250_v56 = vadd.f32 %v16501_v23, %v8863_v60 }
 0x3d1   : > { %v16614_v11 = vpop.f32.mrf.mxu1  ;;  %v9871_v18 = vpop.f32.mrf.mxu0 }
 0x3d2   : > { %17285 = vst [vmem:[#allocation47_spill] sm:$0xff] %v16614_v11 }
 0x3d3   : > { %v16617_v63 = vpop.f32.mrf.mxu1  ;;  %v13013_v61 = vpop.f32.mrf.mxu0 }
 0x3d4   : > { %17286 = vst [vmem:[#allocation51_spill] sm:$0xff] %v16617_v63 }
 0x3d5   : > { %v12957_v35 = vpop.f32.mrf.mxu1  ;;  %v9881_v8 = vpop.f32.mrf.mxu0 }
 0x3d6   : > { %v9634_v39 = vadd.f32 %v12957_v35, %v9247_v29  ;;  %v9248_v35 = vadd.f32 %v16491_v33, %v8861_v5 }
 0x3d7   : > { %v9474_v7 = vpop.f32.mrf.mxu1  ;;  %v13016_v41 = vpop.f32.mrf.mxu0 }
 0x3d8   : > { %v10021_v40 = vadd.f32 %v13007_v24, %v9634_v39  ;;  %v9633_v32 = vadd.f32 %v9474_v7, %v9246_v30 }
 0x3d9   : > { %v12960_v15 = vpop.f32.mrf.mxu1  ;;  %v9891_v57 = vpop.f32.mrf.mxu0 }
 0x3da   : > { %10053 = vst.msk [vmem:[%s16630_s10 + $0x8] sm:$0xff] %vm341_vm0, %v10021_v40  ;;  %v10020_v17 = vadd.f32 %v9861_v12, %v9633_v32  ;;  %v9636_v29 = vadd.f32 %v12960_v15, %v9249_v45  ;;  %v8865_v12 = vadd.f32 %v16527_v38, %v16419_v34 }
 0x3db   : > { %v9484_v63 = vpop.f32.mrf.mxu1  ;;  %v13019_v11 = vpop.f32.mrf.mxu0 }
 0x3dc   : > { %10052 = vst.msk [vmem:[%s16630_s10] sm:$0xff] %vm341_vm0, %v10020_v17  ;;  %v10023_v30 = vadd.f32 %v13010_v52, %v9636_v29  ;;  %v9635_v24 = vadd.f32 %v9484_v63, %v9248_v35  ;;  %v8868_v63 = vadd.f32 %v16531_v42, %v16422_v37  ;;  %v9252_v34 = vadd.f32 %v16509_v3, %v8865_v12 }
 0x3dd   : > { %v12963_v50 = vpop.f32.mrf.mxu1  ;;  %v9901_v33 = vpop.f32.mrf.mxu0 }
 0x3de   : > { %10055 = vst.msk [vmem:[%s16630_s10 + $0x18] sm:$0xff] %vm341_vm0, %v10023_v30  ;;  %v10022_v0 = vadd.f32 %v9871_v18, %v9635_v24  ;;  %v9638_v44 = vadd.f32 %v12963_v50, %v9251_v4  ;;  %v8867_v18 = vadd.f32 %v16535_v51, %v16425_v59  ;;  %v9255_v37 = vadd.f32 %v16513_v22, %v8868_v63  ;;  %v17289_v63 = vld [vmem:[#allocation21_spill] sm:$0xff] }
 0x3df   : > { %v9494_v14 = vpop.f32.mrf.mxu1  ;;  %v13022_v5 = vpop.f32.mrf.mxu0 }
 0x3e0   : > { %10054 = vst.msk [vmem:[%s16630_s10 + $0x10] sm:$0xff] %vm341_vm0, %v10022_v0  ;;  %v10025_v52 = vadd.f32 %v13013_v61, %v9638_v44  ;;  %v9637_v23 = vadd.f32 %v9494_v14, %v9250_v56  ;;  %v8870_v61 = vadd.f32 %v16539_v28, %v16428_v31  ;;  %v9254_v59 = vadd.f32 %v16517_v53, %v8867_v18  ;;  %v17288_v0 = vld [vmem:[#allocation24_spill] sm:$0xff]  ;;  %v17292_v18 = vld [vmem:[#allocation10_spill] sm:$0xff] }
 0x3e1   : > { %v12966_v43 = vpop.f32.mrf.mxu1  ;;  %v9911_v39 = vpop.f32.mrf.mxu0  ;;  %v8872_v28 = vadd.f32 %v16547_v10, %v16434_v49 }
 0x3e2   : > { %10057 = vst.msk [vmem:[%s16630_s10 + $0x28] sm:$0xff] %vm341_vm0, %v10025_v52  ;;  %v10024_v38 = vadd.f32 %v9881_v8, %v9637_v23  ;;  %v9640_v25 = vadd.f32 %v12966_v43, %v9253_v36  ;;  %v8869_v8 = vadd.f32 %v16543_v47, %v16431_v19  ;;  %v9257_v31 = vadd.f32 %v16521_v48, %v8870_v61  ;;  %v17291_v52 = vld [vmem:[#allocation13_spill] sm:$0xff] }
 0x3e3   : > { %v9504_v7 = vpop.f32.mrf.mxu1  ;;  %v13025_v45 = vpop.f32.mrf.mxu0  ;;  %v8871_v47 = vadd.f32 %v16551_v46, %v16437_v54  ;;  %v9259_v49 = vadd.f32 %v16529_v1, %v8872_v28  ;;  %v8873_v46 = vadd.f32 %v16559_v55, %v16443_v9  ;;  %v17287_v55 = vld [vmem:[#allocation15_spill] sm:$0xff] }
 0x3e4   : > { %10056 = vst.msk [vmem:[%s16630_s10 + $0x20] sm:$0xff] %vm341_vm0, %v10024_v38  ;;  %v10027_v42 = vadd.f32 %v13016_v41, %v9640_v25  ;;  %v9639_v3 = vadd.f32 %v9504_v7, %v9252_v34  ;;  %v9256_v19 = vadd.f32 %v16525_v27, %v8869_v8  ;;  %v8875_v44 = vadd.f32 %v17288_v0, %v17287_v55  ;;  %v17293_v25 = vld [vmem:[#allocation7_spill] sm:$0xff]  ;;  %v17294_v7 = vld [vmem:[#allocation36_spill] sm:$0xff]  ;;  %v17297_v8 = vld [vmem:[#allocation38_spill] sm:$0xff] }
 0x3e5   : > { %v12969_v13 = vpop.f32.mrf.mxu1  ;;  %v9921_v40 = vpop.f32.mrf.mxu0  ;;  %v9258_v54 = vadd.f32 %v16533_v6, %v8871_v47  ;;  %v9260_v9 = vadd.f32 %v16541_v2, %v8873_v46  ;;  %v17298_v28 = vld [vmem:[#allocation23_spill] sm:$0xff]  ;;  %v17308_v55 = vld [vmem:[#allocation29_spill] sm:$0xff] }
 0x3e6   : > { %10059 = vst.msk [vmem:[%s16630_s10 + $0x38] sm:$0xff] %vm341_vm0, %v10027_v42  ;;  %v10026_v51 = vadd.f32 %v9891_v57, %v9639_v3  ;;  %v9642_v22 = vadd.f32 %v12969_v13, %v9255_v37  ;;  %v9262_v38 = vadd.f32 %v17292_v18, %v8875_v44  ;;  %v17295_v13 = vld [vmem:[#allocation11_spill] sm:$0xff]  ;;  %v17309_v0 = vld [vmem:[#allocation25_spill] sm:$0xff] }
 0x3e7   : > { %v9514_v32 = vpop.f32.mrf.mxu1  ;;  %v13028_v15 = vpop.f32.mrf.mxu0 }
 0x3e8   : > { %10058 = vst.msk [vmem:[%s16630_s10 + $0x30] sm:$0xff] %vm341_vm0, %v10026_v51  ;;  %v10029_v41 = vadd.f32 %v13019_v11, %v9642_v22  ;;  %v9641_v53 = vadd.f32 %v9514_v32, %v9254_v59  ;;  %v8874_v11 = vadd.f32 %v16555_v21, %v16440_v20  ;;  %v8876_v21 = vadd.f32 %v16563_v26, %v16446_v62  ;;  %v17290_v26 = vld [vmem:[#allocation5_spill] sm:$0xff] }
 0x3e9   : > { %v12972_v35 = vpop.f32.mrf.mxu1  ;;  %v9931_v60 = vpop.f32.mrf.mxu0  ;;  %v8878_v23 = vadd.f32 %v17291_v52, %v17290_v26  ;;  %v17296_v59 = vld [vmem:[#allocation37_spill] sm:$0xff]  ;;  %v17311_v26 = vld [vmem:[#allocation30_spill] sm:$0xff] }
 0x3ea   : > { %10061 = vst.msk [vmem:[%s16630_s10 + $0x48] sm:$0xff] %vm341_vm0, %v10029_v41  ;;  %v10028_v57 = vadd.f32 %v9901_v33, %v9641_v53  ;;  %v9644_v48 = vadd.f32 %v12972_v35, %v9257_v31  ;;  %v9261_v20 = vadd.f32 %v16537_v16, %v8874_v11  ;;  %v9263_v62 = vadd.f32 %v17289_v63, %v8876_v21  ;;  %v17299_v53 = vld [vmem:[#allocation28_spill] sm:$0xff]  ;;  %v17300_v35 = vld [vmem:[#allocation39_spill] sm:$0xff]  ;;  %v17302_v11 = vld [vmem:[#allocation6_spill] sm:$0xff] }
 0x3eb   : > { %v9524_v17 = vpop.f32.mrf.mxu1  ;;  %v13031_v29 = vpop.f32.mrf.mxu0  ;;  %v8880_v51 = vadd.f32 %v17297_v8, %v17296_v59  ;;  %v17310_v63 = vld [vmem:[#allocation35_spill] sm:$0xff]  ;;  %v17312_v52 = vld [vmem:[#allocation46_spill] sm:$0xff]  ;;  %v17318_v59 = vld [vmem:[#allocation49_spill] sm:$0xff] }
 0x3ec   : > { %10060 = vst.msk [vmem:[%s16630_s10 + $0x40] sm:$0xff] %vm341_vm0, %v10028_v57  ;;  %v10031_v10 = vadd.f32 %v13022_v5, %v9644_v48  ;;  %v9643_v27 = vadd.f32 %v9524_v17, %v9256_v19  ;;  %v17301_v17 = vld [vmem:[#allocation33_spill] sm:$0xff] }
 0x3ed   : > { %v12975_v4 = vpop.f32.mrf.mxu1  ;;  %v9941_v58 = vpop.f32.mrf.mxu0 }
 0x3ee   : > { %10063 = vst.msk [vmem:[%s16630_s10 + $0x58] sm:$0xff] %vm341_vm0, %v10031_v10  ;;  %v10030_v30 = vadd.f32 %v9911_v39, %v9643_v27  ;;  %v9646_v1 = vadd.f32 %v12975_v4, %v9259_v49  ;;  %v9267_v49 = vadd.f32 %v17301_v17, %v8880_v51  ;;  %v17323_v17 = vld [vmem:[#allocation41_spill] sm:$0xff] }
 0x3ef   : > { %v9534_v24 = vpop.f32.mrf.mxu1  ;;  %v13034_v50 = vpop.f32.mrf.mxu0 }
 0x3f0   : > { %10062 = vst.msk [vmem:[%s16630_s10 + $0x50] sm:$0xff] %vm341_vm0, %v10030_v30  ;;  %v10033_v33 = vadd.f32 %v13025_v45, %v9646_v1  ;;  %v9645_v6 = vadd.f32 %v9534_v24, %v9258_v54  ;;  %v8877_v45 = vadd.f32 %v17294_v7, %v17293_v25  ;;  %v17304_v30 = vld [vmem:[#allocation34_spill] sm:$0xff]  ;;  %v17305_v24 = vld [vmem:[#allocation16_spill] sm:$0xff] }
 0x3f1   : > { %v12978_v56 = vpop.f32.mrf.mxu1  ;;  %v9951_v12 = vpop.f32.mrf.mxu0  ;;  %v17315_v25 = vld [vmem:[#allocation48_spill] sm:$0xff] }
 0x3f2   : > { %10065 = vst.msk [vmem:[%s16630_s10 + $0x68] sm:$0xff] %vm341_vm0, %v10033_v33  ;;  %v10032_v14 = vadd.f32 %v9921_v40, %v9645_v6  ;;  %v9648_v16 = vadd.f32 %v12978_v56, %v9261_v20  ;;  %v9265_v40 = vadd.f32 %v17295_v13, %v8878_v23  ;;  %v9264_v41 = vadd.f32 %v17298_v28, %v8877_v45  ;;  %v17307_v56 = vld [vmem:[#allocation12_spill] sm:$0xff]  ;;  %v17320_v28 = vld [vmem:[#allocation9_spill] sm:$0xff] }
 0x3f3   : > { %v9544_v5 = vpop.f32.mrf.mxu1  ;;  %v13037_v36 = vpop.f32.mrf.mxu0 }
 0x3f4   : > { %10064 = vst.msk [vmem:[%s16630_s10 + $0x60] sm:$0xff] %vm341_vm0, %v10032_v14  ;;  %v10035_v43 = vadd.f32 %v13028_v15, %v9648_v16  ;;  %v9647_v2 = vadd.f32 %v9544_v5, %v9260_v9 }
 0x3f5   : > { %v12981_v39 = vpop.f32.mrf.mxu1  ;;  %v9961_v34 = vpop.f32.mrf.mxu0 }
 0x3f6   : > { %10067 = vst.msk [vmem:[%s16630_s10 + $0x78] sm:$0xff] %vm341_vm0, %v10035_v43  ;;  %v10034_v37 = vadd.f32 %v9931_v60, %v9647_v2  ;;  %v9650_v61 = vadd.f32 %v12981_v39, %v9263_v62  ;;  %v8879_v60 = vadd.f32 %v17300_v35, %v17299_v53  ;;  %v17313_v39 = vld [vmem:[#allocation14_spill] sm:$0xff] }
 0x3f7   : > { %v9554_v42 = vpop.f32.mrf.mxu1  ;;  %v13040_v3 = vpop.f32.mrf.mxu0 }
 0x3f8   : > { %10066 = vst.msk [vmem:[%s16630_s10 + $0x70] sm:$0xff] %vm341_vm0, %v10034_v37  ;;  %v10037_v22 = vadd.f32 %v13031_v29, %v9650_v61  ;;  %v9649_v32 = vadd.f32 %v9554_v42, %v9262_v38  ;;  %v17303_v29 = vld [vmem:[#allocation22_spill] sm:$0xff]  ;;  %v9266_v1 = vadd.f32 %v17304_v30, %v8879_v60  ;;  %v17314_v38 = vld [vmem:[#allocation40_spill] sm:$0xff]  ;;  %v17316_v42 = vld [vmem:[#allocation17_spill] sm:$0xff] }
 0x3f9   : > { %v12984_v15 = vpop.f32.mrf.mxu1  ;;  %v9971_v31 = vpop.f32.mrf.mxu0  ;;  %v8882_v10 = vadd.f32 %v17303_v29, %v17302_v11  ;;  %v17327_v30 = vld [vmem:[#allocation47_spill] sm:$0xff] }
 0x3fa   : > { %10069 = vst.msk [vmem:[%s16630_s10 + $0x88] sm:$0xff] %vm341_vm0, %v10037_v22  ;;  %v10036_v19 = vadd.f32 %v9941_v58, %v9649_v32  ;;  %v9652_v47 = vadd.f32 %v12984_v15, %v9265_v40  ;;  %v17306_v58 = vld [vmem:[#allocation44_spill] sm:$0xff]  ;;  %v17319_v32 = vld [vmem:[#allocation18_spill] sm:$0xff] }
 0x3fb   : > { %v9564_v57 = vpop.f32.mrf.mxu1  ;;  %v13043_v48 = vpop.f32.mrf.mxu0  ;;  %v8881_v20 = vadd.f32 %v17306_v58, %v17305_v24  ;;  %v9269_v9 = vadd.f32 %v17307_v56, %v8882_v10  ;;  %v17317_v40 = vld [vmem:[#allocation8_spill] sm:$0xff]  ;;  %v17330_v56 = vld [vmem:[#allocation51_spill] sm:$0xff] }
 0x3fc   : > { %10068 = vst.msk [vmem:[%s16630_s10 + $0x80] sm:$0xff] %vm341_vm0, %v10036_v19  ;;  %v10039_v27 = vadd.f32 %v13034_v50, %v9652_v47  ;;  %v9651_v4 = vadd.f32 %v9564_v57, %v9264_v41  ;;  %v8884_v50 = vadd.f32 %v17309_v0, %v17308_v55  ;;  %v17321_v41 = vld [vmem:[#allocation26_spill] sm:$0xff]  ;;  %v17322_v47 = vld [vmem:[#allocation19_spill] sm:$0xff] }
 0x3fd   : > { %v12987_v54 = vpop.f32.mrf.mxu1  ;;  %v9981_v46 = vpop.f32.mrf.mxu0  ;;  %v9268_v62 = vadd.f32 %v17310_v63, %v8881_v20 }
 0x3fe   : > { %10071 = vst.msk [vmem:[%s16630_s10 + $0x98] sm:$0xff] %vm341_vm0, %v10039_v27  ;;  %v10038_v21 = vadd.f32 %v9951_v12, %v9651_v4  ;;  %v9654_v33 = vadd.f32 %v12987_v54, %v9267_v49  ;;  %v8883_v12 = vadd.f32 %v17312_v52, %v17311_v26  ;;  %v9271_v18 = vadd.f32 %v17313_v39, %v8884_v50  ;;  %v17324_v49 = vld [vmem:[#allocation50_spill] sm:$0xff]  ;;  %v17326_v54 = vld [vmem:[#allocation31_spill] sm:$0xff] }
 0x3ff   : > { %v9574_v6 = vpop.f32.mrf.mxu1  ;;  %v13046_v5 = vpop.f32.mrf.mxu0  ;;  %v17325_v27 = vld [vmem:[#allocation42_spill] sm:$0xff]  ;;  %v17331_v50 = vld [vmem:[#allocation43_spill] sm:$0xff] }
 0x400   : > { %10070 = vst.msk [vmem:[%s16630_s10 + $0x90] sm:$0xff] %vm341_vm0, %v10038_v21  ;;  %v10041_v44 = vadd.f32 %v13037_v36, %v9654_v33  ;;  %v9653_v14 = vadd.f32 %v9574_v6, %v9266_v1  ;;  %v8886_v36 = vadd.f32 %v17315_v25, %v17314_v38  ;;  %v9270_v13 = vadd.f32 %v17316_v42, %v8883_v12  ;;  %v17328_v21 = vld [vmem:[#allocation20_spill] sm:$0xff] }
 0x401   : > { %v12990_v16 = vpop.f32.mrf.mxu1  ;;  %v9991_v61 = vpop.f32.mrf.mxu0  ;;  %v17329_v6 = vld [vmem:[#allocation32_spill] sm:$0xff] }
 0x402   : > { %10073 = vst.msk [vmem:[%s16630_s10 + $0xa8] sm:$0xff] %vm341_vm0, %v10041_v44  ;;  %v10040_v23 = vadd.f32 %v9961_v34, %v9653_v14  ;;  %v9656_v43 = vadd.f32 %v12990_v16, %v9269_v9  ;;  %v8885_v34 = vadd.f32 %v17318_v59, %v17317_v40  ;;  %v9273_v15 = vadd.f32 %v17319_v32, %v8886_v36 }
 0x403   : > { %v9584_v2 = vpop.f32.mrf.mxu1  ;;  %v13049_v19 = vpop.f32.mrf.mxu0 }
 0x404   : > { %10072 = vst.msk [vmem:[%s16630_s10 + $0xa0] sm:$0xff] %vm341_vm0, %v10040_v23  ;;  %v10043_v7 = vadd.f32 %v13040_v3, %v9656_v43  ;;  %v9655_v45 = vadd.f32 %v9584_v2, %v9268_v62  ;;  %v8888_v3 = vadd.f32 %v17321_v41, %v17320_v28  ;;  %v9272_v57 = vadd.f32 %v17322_v47, %v8885_v34  ;;  %v17332_v62 = vld [vmem:[#allocation45_spill] sm:$0xff] }
 0x405   : > { %v12993_v37 = vpop.f32.mrf.mxu1  ;;  %v10001_v20 = vpop.f32.mrf.mxu0 }
 0x406   : > { %10075 = vst.msk [vmem:[%s16630_s10 + $0xb8] sm:$0xff] %vm341_vm0, %v10043_v7  ;;  %v10042_v8 = vadd.f32 %v9971_v31, %v9655_v45  ;;  %v9658_v51 = vadd.f32 %v12993_v37, %v9271_v18  ;;  %v8887_v31 = vadd.f32 %v17324_v49, %v17323_v17  ;;  %v9275_v4 = vadd.f32 %v17325_v27, %v8888_v3 }
 0x407   : > { %v9594_v22 = vpop.f32.mrf.mxu1  ;;  %v13052_v63 = vpop.f32.mrf.mxu0 }
 0x408   : > { %10074 = vst.msk [vmem:[%s16630_s10 + $0xb0] sm:$0xff] %vm341_vm0, %v10042_v8  ;;  %v10045_v53 = vadd.f32 %v13043_v48, %v9658_v51  ;;  %v9657_v35 = vadd.f32 %v9594_v22, %v9270_v13  ;;  %v8890_v48 = vadd.f32 %v17327_v30, %v17326_v54  ;;  %v9274_v33 = vadd.f32 %v17328_v21, %v8887_v31 }
 0x409   : > { %v12996_v60 = vpop.f32.mrf.mxu1  ;;  %v10011_v39 = vpop.f32.mrf.mxu0 }
 0x40a   : > { %10077 = vst.msk [vmem:[%s16630_s10 + $0xc8] sm:$0xff] %vm341_vm0, %v10045_v53  ;;  %v10044_v11 = vadd.f32 %v9981_v46, %v9657_v35  ;;  %v9660_v29 = vadd.f32 %v12996_v60, %v9273_v15  ;;  %v8889_v46 = vadd.f32 %v17330_v56, %v17329_v6  ;;  %v9277_v44 = vadd.f32 %v17331_v50, %v8890_v48 }
 0x40b   : > { %v9604_v10 = vpop.f32.mrf.mxu1 }
 0x40c   : > { %10076 = vst.msk [vmem:[%s16630_s10 + $0xc0] sm:$0xff] %vm341_vm0, %v10044_v11  ;;  %v10047_v1 = vadd.f32 %v13046_v5, %v9660_v29  ;;  %v9659_v24 = vadd.f32 %v9604_v10, %v9272_v57  ;;  %v9276_v26 = vadd.f32 %v17332_v62, %v8889_v46 }
 0x40d   : > { %v12999_v58 = vpop.f32.mrf.mxu1 }
 0x40e   : > { %10079 = vst.msk [vmem:[%s16630_s10 + $0xd8] sm:$0xff] %vm341_vm0, %v10047_v1  ;;  %v10046_v9 = vadd.f32 %v9991_v61, %v9659_v24  ;;  %v9662_v55 = vadd.f32 %v12999_v58, %v9275_v4 }
 0x40f   : > { %v9614_v0 = vpop.f32.mrf.mxu1 }
 0x410   : > { %10078 = vst.msk [vmem:[%s16630_s10 + $0xd0] sm:$0xff] %vm341_vm0, %v10046_v9  ;;  %v10049_v14 = vadd.f32 %v13049_v19, %v9662_v55  ;;  %v9661_v16 = vadd.f32 %v9614_v0, %v9274_v33 }
 0x411   : > { %v13002_v5 = vpop.f32.mrf.mxu1 }
 0x412   : > { %10081 = vst.msk [vmem:[%s16630_s10 + $0xe8] sm:$0xff] %vm341_vm0, %v10049_v14  ;;  %v10048_v52 = vadd.f32 %v10001_v20, %v9661_v16  ;;  %v9664_v12 = vadd.f32 %v13002_v5, %v9277_v44 }
 0x413   : > { %v9624_v23 = vpop.f32.mrf.mxu1 }
 0x414   : > { %10080 = vst.msk [vmem:[%s16630_s10 + $0xe0] sm:$0xff] %vm341_vm0, %v10048_v52  ;;  %v10051_v43 = vadd.f32 %v13052_v63, %v9664_v12  ;;  %v9663_v2 = vadd.f32 %v9624_v23, %v9276_v26 }
 0x416   : > { %10083 = vst.msk [vmem:[%s16630_s10 + $0xf8] sm:$0xff] %vm341_vm0, %v10051_v43  ;;  %v10050_v18 = vadd.f32 %v10011_v39, %v9663_v2 }
 0x418   : > { %10082 = vst.msk [vmem:[%s16630_s10 + $0xf0] sm:$0xff] %vm341_vm0, %v10050_v18 }
 0x419 PF: > { %s14_s15 = sadd.s32 1, %s13072_s15  }
 0x41a   : > { %p11_p4 = scmp.ge.s32.totalorder %s14_s15, 4  }
 0x41c   :  { %13 = sbr.rel (!%p11_p4) target bundleno = 1 (0x1), region = 95 }

</bundles_post_ra>
